<compile_context>
chip_gen: v5e
topology: v5e:2x2
jax: 0.10.0
libtpu: 0.0.40
codegen_flags: <defaults>
</compile_context>

<pallas_src>
import functools

import jax
import jax.numpy as jnp
import numpy as np
from jax.experimental import pallas as pl
from jax.experimental.pallas import tpu as pltpu


def _vmem_limit_bytes():
    """Per-generation scoped VMEM limit (v7x only has 64 MiB physical VMEM)."""
    try:
        cap = int(pltpu.get_tpu_info().vmem_capacity_bytes)
        return max(16 * 1024 * 1024, min(cap // 2, 64 * 1024 * 1024))
    except Exception:  # pragma: no cover - conservative fallback
        return 32 * 1024 * 1024


_VMEM_LIMIT = _vmem_limit_bytes()


def _cparams(semantics):
    return pltpu.CompilerParams(dimension_semantics=semantics,
                                vmem_limit_bytes=_VMEM_LIMIT)


def _interior_mask(hp, wp):
    """(1, hp*wp) f32 mask: 1 on the valid interior, 0 on the zero halo."""
    m = np.zeros((hp, wp), np.float32)
    m[1:-1, 1:-1] = 1.0
    return jnp.asarray(m.reshape(1, hp * wp))


def _finalize_stats(stats, count):
    """Combine per-(n, d) (sum, sum of squares) into per-channel mean / biased
    variance (the statistics F.batch_norm(training=True) normalises with)."""
    s = jnp.sum(stats[..., 0], axis=(0, 1))
    ss = jnp.sum(stats[..., 1], axis=(0, 1))
    mean = s / count
    var = jnp.maximum(ss / count - mean * mean, 0.0)
    return mean, var


# ----------------------------- Pallas kernels -------------------------------

def _conv_kernel(*refs, num_res, emit_stats, cout, wp, hwp):
    """One (n, d) output plane of a 3x3x3 'same' conv in the padded-lane layout.

    refs: x_dm1, x_d, x_dp1 (1,1,Cin,HWp) bf16 | w (3,Cout,9Cin) bf16
          | mask (1,HWp) f32 | res_i (1,1,Cout,HWp) bf16
          -> out (1,1,Cout,HWp) bf16 [, stats (1,1,Cout,2) f32]
    RevBlock / skip couplings ride along as `res` inputs initialising the
    accumulator; BN batch statistics of the finished plane are emitted while
    the tile is still in VMEM.
    """
    x_refs = refs[0:3]
    w_ref = refs[3]
    mask_ref = refs[4]
    res_refs = refs[5:5 + num_res]
    out_ref = refs[5 + num_res]
    stats_ref = refs[6 + num_res] if emit_stats else None

    di = pl.program_id(1)
    d_last = pl.num_programs(1) - 1

    if num_res:
        acc = res_refs[0][0, 0].astype(jnp.float32)
        for r in res_refs[1:]:
            acc = acc + r[0, 0].astype(jnp.float32)
    else:
        acc = jnp.zeros((cout, hwp), jnp.float32)

    # Depth zero padding: the clamped neighbour plane is zeroed at the edges.
    depth_ok = (di > 0, None, di < d_last)
    for kd in range(3):
        x = x_refs[kd][0, 0].astype(jnp.float32)              # (Cin, HWp)
        if depth_ok[kd] is not None:
            x = jnp.where(depth_ok[kd], x, jnp.zeros_like(x))
        taps = []
        for kh in range(3):
            for kw in range(3):
                # tap[p] must read x[p + s] (cross-correlation); wraparound only
                # pollutes the halo, which is masked below.
                s = (kh - 1) * wp + (kw - 1)
                taps.append(x if s == 0 else pltpu.roll(x, (-s) % hwp, axis=1))
        cols = jnp.concatenate(taps, axis=0).astype(jnp.bfloat16)  # (9Cin, HWp)
        acc = acc + jnp.dot(w_ref[kd], cols, preferred_element_type=jnp.float32)

    acc = acc * mask_ref[...]                                  # re-zero the halo
    out_ref[...] = acc.astype(out_ref.dtype)[None, None]

    if emit_stats:
        s = jnp.sum(acc, axis=1, keepdims=True)                # (Cout, 1)
        ss = jnp.sum(acc * acc, axis=1, keepdims=True)
        stats_ref[...] = jnp.concatenate([s, ss], axis=1)[None, None]


def _bn_act_kernel(*refs, nparts, slope):
    """Per-part y = leaky(x*A + B) * interior_mask (BN-apply + activation +
    channel regrouping, all via BlockSpecs - no in-kernel concat/split).

    refs: x_0..x_{p-1} (1,1,q,HWp) bf16 | a_0,b_0,...,a_{p-1},b_{p-1} (1,q,1) f32
          | mask (1,HWp) f32 -> out_0..out_{p-1} (1,1,q,HWp)
    """
    xs = refs[:nparts]
    ab = refs[nparts:3 * nparts]
    mask_ref = refs[3 * nparts]
    outs = refs[3 * nparts + 1:]
    m = mask_ref[...]                                          # (1, HWp)
    for j in range(nparts):
        x = xs[j][0, 0].astype(jnp.float32)                    # (q, HWp)
        a = ab[2 * j][0]                                       # (q, 1)
        b = ab[2 * j + 1][0]
        y = x * a + b
        y = jnp.where(y >= 0, y, slope * y) * m
        outs[j][...] = y.astype(outs[j].dtype)[None, None]


def _add_stats_kernel(a_ref, b_ref, out_ref, stats_ref):
    """Outer RevBlock coupling add with fused per-channel (sum, sumsq) stats.
    Both inputs keep a zero halo, so the halo contributes nothing to the sums."""
    y = a_ref[0, 0].astype(jnp.float32) + b_ref[0, 0].astype(jnp.float32)
    out_ref[...] = y.astype(out_ref.dtype)[None, None]
    s = jnp.sum(y, axis=1, keepdims=True)
    ss = jnp.sum(y * y, axis=1, keepdims=True)
    stats_ref[...] = jnp.concatenate([s, ss], axis=1)[None, None]


# ------------------------------ Op wrappers ---------------------------------

def conv3d_same(x, w3, mask, *, wp, residuals=(), emit_stats=False):
    """3x3x3, stride 1, 'same', no bias, in the padded-lane layout.

    x: (N, D, Cin, HWp) bf16; w3: (3, Cout, 9*Cin) bf16; mask: (1, HWp) f32.
    residuals: (N, D, Cout, HWp) bf16 tensors fused into the output.
    Returns out (N, D, Cout, HWp) bf16 [, mean, biased var of out].
    """
    n, dd, cin, hwp = x.shape
    cout = w3.shape[1]

    in_specs = [
        pl.BlockSpec((1, 1, cin, hwp),
                     lambda ni, di: (ni, jnp.maximum(di - 1, 0), 0, 0)),
        pl.BlockSpec((1, 1, cin, hwp), lambda ni, di: (ni, di, 0, 0)),
        pl.BlockSpec((1, 1, cin, hwp),
                     lambda ni, di: (ni, jnp.minimum(di + 1, dd - 1), 0, 0)),
        pl.BlockSpec((3, cout, w3.shape[2]), lambda ni, di: (0, 0, 0)),
        pl.BlockSpec((1, hwp), lambda ni, di: (0, 0)),
    ]
    args = [x, x, x, w3, mask]
    for r in residuals:
        in_specs.append(pl.BlockSpec((1, 1, cout, hwp),
                                     lambda ni, di: (ni, di, 0, 0)))
        args.append(r)

    out_shape = [jax.ShapeDtypeStruct((n, dd, cout, hwp), jnp.bfloat16)]
    out_specs = [pl.BlockSpec((1, 1, cout, hwp), lambda ni, di: (ni, di, 0, 0))]
    if emit_stats:
        out_shape.append(jax.ShapeDtypeStruct((n, dd, cout, 2), jnp.float32))
        out_specs.append(pl.BlockSpec((1, 1, cout, 2),
                                      lambda ni, di: (ni, di, 0, 0)))

    outs = pl.pallas_call(
        functools.partial(_conv_kernel, num_res=len(residuals),
                          emit_stats=emit_stats, cout=cout, wp=wp, hwp=hwp),
        grid=(n, dd),
        in_specs=in_specs,
        out_specs=out_specs,
        out_shape=out_shape,
        compiler_params=_cparams(("parallel", "parallel")),
    )(*args)

    if emit_stats:
        hp = hwp // wp
        mean, var = _finalize_stats(outs[1], n * dd * (hp - 2) * (wp - 2))
        return outs[0], mean, var
    return outs[0]


def bn_act_apply(parts, mean, var, gamma, beta, mask, *, ieps, eps, slope,
                 out_dtype=jnp.bfloat16):
    """IBatchNorm3d.i_forward (scale=|gamma|+ieps, precomputed batch stats)
    fused with LeakyReLU, in the padded-lane layout.

    parts: list of (array (N,D,*,HWp) bf16, channel_block_index) - the logical
    channel concatenation of the selected blocks matches gamma/beta/mean/var.
    Returns one (N, D, q, HWp) array per part (q = Ctot / nparts).
    """
    n, dd, _, hwp = parts[0][0].shape
    nparts = len(parts)
    ctot = int(gamma.shape[0])
    q = ctot // nparts

    scale = (jnp.abs(gamma) + ieps) * jax.lax.rsqrt(var + eps)
    a_full = scale.astype(jnp.float32)
    b_full = (beta - mean * scale).astype(jnp.float32)

    in_specs, args = [], []
    for arr, blk in parts:
        in_specs.append(pl.BlockSpec((1, 1, q, hwp),
                                     lambda ni, di, _b=blk: (ni, di, _b, 0)))
        args.append(arr)
    for j in range(nparts):
        a_j = a_full[j * q:(j + 1) * q].reshape(1, q, 1)
        b_j = b_full[j * q:(j + 1) * q].reshape(1, q, 1)
        in_specs += [pl.BlockSpec((1, q, 1), lambda ni, di: (0, 0, 0))] * 2
        args += [a_j, b_j]
    in_specs.append(pl.BlockSpec((1, hwp), lambda ni, di: (0, 0)))
    args.append(mask)

    out_specs = [pl.BlockSpec((1, 1, q, hwp),
                              lambda ni, di: (ni, di, 0, 0))] * nparts
    out_shape = [jax.ShapeDtypeStruct((n, dd, q, hwp), out_dtype)] * nparts

    outs = pl.pallas_call(
        functools.partial(_bn_act_kernel, nparts=nparts, slope=slope),
        grid=(n, dd),
        in_specs=in_specs,
        out_specs=out_specs,
        out_shape=out_shape,
        compiler_params=_cparams(("parallel", "parallel")),
    )(*args)
    return list(outs)


def add_with_stats(x, skip, *, valid_per_plane):
    """y = x + skip (outer RevBlock coupling) plus per-channel batch stats."""
    n, dd, c, hwp = x.shape
    out, stats = pl.pallas_call(
        _add_stats_kernel,
        grid=(n, dd),
        in_specs=[pl.BlockSpec((1, 1, c, hwp), lambda ni, di: (ni, di, 0, 0))] * 2,
        out_specs=[pl.BlockSpec((1, 1, c, hwp), lambda ni, di: (ni, di, 0, 0)),
                   pl.BlockSpec((1, 1, c, 2), lambda ni, di: (ni, di, 0, 0))],
        out_shape=[jax.ShapeDtypeStruct((n, dd, c, hwp), jnp.bfloat16),
                   jax.ShapeDtypeStruct((n, dd, c, 2), jnp.float32)],
        compiler_params=_cparams(("parallel", "parallel")),
    )(x, skip)
    mean, var = _finalize_stats(stats, n * dd * valid_per_plane)
    return out, mean, var


# --------------------------- Module composition -----------------------------

def residual_conv_mod(xa, xb, outer_skip, p, mask, wp, *, ieps, eps, slope):
    """ResidualConvMod(c) on the channel halves (xa, xb) of its input, with the
    second-half outer ISkip add (`outer_skip`) fused into the last conv.
    Returns (d1, y_second = outer_skip + d2, mean/var of y_second)."""
    # IConv3d #1 == RevBlock(F1, G1): c1 = xa + F1(xb); c2 = xb + G1(c1)
    c1, m_c1, v_c1 = conv3d_same(xb, p["w_f1"], mask, wp=wp,
                                 residuals=(xa,), emit_stats=True)
    c2, m_c2, v_c2 = conv3d_same(c1, p["w_g1"], mask, wp=wp,
                                 residuals=(xb,), emit_stats=True)
    # IBN(c) + LeakyReLU over cat(c1, c2); stats were fused into the convs.
    mean = jnp.concatenate([m_c1, m_c2])
    var = jnp.concatenate([v_c1, v_c2])
    u1, u2 = bn_act_apply([(c1, 0), (c2, 0)], mean, var, p["bn_w"], p["bn_b"],
                          mask, ieps=ieps, eps=eps, slope=slope)
    # IConv3d #2 == RevBlock(F2, G2): d1 = u1 + F2(u2); d2 = u2 + G2(d1);
    # the outer ISkip add for the second half rides along as an extra residual.
    d1 = conv3d_same(u2, p["w_f2"], mask, wp=wp, residuals=(u1,))
    y2nd, m_y, v_y = conv3d_same(d1, p["w_g2"], mask, wp=wp,
                                 residuals=(u2, outer_skip), emit_stats=True)
    return d1, y2nd, m_y, v_y


def iconvmod_forward(x_ncdhw, params, *, ieps=0.1, eps=1e-5, slope=0.01):
    """IConvMod forward.  x: (N, Cin, D, H, W) f32 -> (N, Cout, D, H, W) f32."""
    n, cin, d, h, w = x_ncdhw.shape
    hp, wp = h + 2, w + 2
    hwp = hp * wp
    cout = params["bn0_w"].shape[0]

    # One-time layout change at the module boundary: NCDHW f32 ->
    # persistent (N, D, C, (H+2)*(W+2)) bf16 layout with a zero spatial halo.
    x = jnp.transpose(x_ncdhw, (0, 2, 1, 3, 4))
    x = jnp.pad(x, ((0, 0), (0, 0), (0, 0), (1, 1), (1, 1)))
    x = x.reshape(n, d, cin, hwp).astype(jnp.bfloat16)

    mask = _interior_mask(hp, wp)

    # Head conv (+ fused BN stats) -> IBN + LeakyReLU, emitting the four
    # channel quarters the RevBlock plumbing consumes (no split/concat passes).
    t, m0, v0 = conv3d_same(x, params["w_head"], mask, wp=wp, emit_stats=True)
    h1a, h1b, h2a, h2b = bn_act_apply(
        [(t, 0), (t, 1), (t, 2), (t, 3)], m0, v0,
        params["bn0_w"], params["bn0_b"], mask,
        ieps=ieps, eps=eps, slope=slope)

    # ISkip(skip_invert=True) == RevBlock(RCM_a, RCM_b) over halves h1, h2:
    #   y1 = h1 + RCM_a(h2);  y2 = h2 + RCM_b(y1)
    d1_a, y1b, m_y1b, v_y1b = residual_conv_mod(
        h2a, h2b, h1b, params["rcm_a"], mask, wp,
        ieps=ieps, eps=eps, slope=slope)
    y1a, m_y1a, v_y1a = add_with_stats(d1_a, h1a, valid_per_plane=h * w)
    d1_b, y2b, m_y2b, v_y2b = residual_conv_mod(
        y1a, y1b, h2b, params["rcm_b"], mask, wp,
        ieps=ieps, eps=eps, slope=slope)
    y2a, m_y2a, v_y2a = add_with_stats(d1_b, h2a, valid_per_plane=h * w)

    # Final IBN + LeakyReLU over cat(y1, y2); f32 module output.
    mean1 = jnp.concatenate([m_y1a, m_y1b, m_y2a, m_y2b])
    var1 = jnp.concatenate([v_y1a, v_y1b, v_y2a, v_y2b])
    outs = bn_act_apply([(y1a, 0), (y1b, 0), (y2a, 0), (y2b, 0)], mean1, var1,
                        params["bn1_w"], params["bn1_b"], mask,
                        ieps=ieps, eps=eps, slope=slope, out_dtype=jnp.float32)

    out = jnp.concatenate(outs, axis=2)                    # (N, D, Cout, HWp)
    out = out.reshape(n, d, cout, hp, wp)[:, :, :, 1:h + 1, 1:w + 1]
    return jnp.transpose(out, (0, 2, 1, 3, 4))


# ------------------------------- Init / main --------------------------------

def _prep_conv_w(wt):
    """PyTorch Conv3d weight (Cout, Cin, 3, 3, 3) f32 -> (3, Cout, 9*Cin) bf16,
    9*Cin rows ordered (kh, kw, cin) to match the in-kernel tap order."""
    cout, cin = wt.shape[0], wt.shape[1]
    return jnp.transpose(wt, (2, 0, 3, 4, 1)).reshape(
        3, cout, 9 * cin).astype(jnp.bfloat16)


def _conv_w(key, cin, cout):
    return _prep_conv_w(0.1 * jax.random.normal(key, (cout, cin, 3, 3, 3),
                                                jnp.float32))


def _rcm_params(key, ch):
    k = jax.random.split(key, 6)
    half = ch // 2
    return dict(
        w_f1=_conv_w(k[0], half, half), w_g1=_conv_w(k[1], half, half),
        w_f2=_conv_w(k[2], half, half), w_g2=_conv_w(k[3], half, half),
        bn_w=1.0 + 0.1 * jax.random.normal(k[4], (ch,), jnp.float32),
        bn_b=0.1 * jax.random.normal(k[5], (ch,), jnp.float32),
    )


def init_params(key, cin, cout):
    # Nested RevBlocks need quarter-channel splits; the channel-blocked bf16
    # BlockSpecs want the quarter to be a multiple of the bf16 sublane tile.
    assert cout % 4 == 0 and (cout // 4) % 16 == 0
    k = jax.random.split(key, 7)
    return dict(
        w_head=_conv_w(k[0], cin, cout),
        bn0_w=1.0 + 0.1 * jax.random.normal(k[1], (cout,), jnp.float32),
        bn0_b=0.1 * jax.random.normal(k[2], (cout,), jnp.float32),
        rcm_a=_rcm_params(k[3], cout // 2),
        rcm_b=_rcm_params(k[4], cout // 2),
        bn1_w=1.0 + 0.1 * jax.random.normal(k[5], (cout,), jnp.float32),
        bn1_b=0.1 * jax.random.normal(k[6], (cout,), jnp.float32),
    )


if __name__ == "__main__":
    key = jax.random.PRNGKey(0)
    k_x, k_p = jax.random.split(key)

    # Spatial 14 -> padded 16x16 = 256 lanes (128-lane dense); Cout=64 -> q=16.
    N, Cin, Cout, D, H, W = 2, 4, 64, 4, 14, 14
    x = jax.random.normal(k_x, (N, Cin, D, H, W), jnp.float32)   # PyTorch NCDHW
    params = init_params(k_p, Cin, Cout)

    fwd = jax.jit(iconvmod_forward)
    out = fwd(x, params)
    jax.block_until_ready(out)

    assert out.shape == (N, Cout, D, H, W)
    assert bool(jnp.all(jnp.isfinite(out)))
    print("KERNEL_OK")
</pallas_src>

<mosaic_0001>
module attributes {stable_mosaic.version = 11 : i64} {
  func.func @_conv_kernel(%arg0: i32, %arg1: i32, %arg2: memref<1x1x4x256xbf16, #tpu.memory_space<vmem>>, %arg3: memref<1x1x4x256xbf16, #tpu.memory_space<vmem>>, %arg4: memref<1x1x4x256xbf16, #tpu.memory_space<vmem>>, %arg5: memref<3x64x36xbf16, #tpu.memory_space<vmem>>, %arg6: memref<1x256xf32, #tpu.memory_space<vmem>>, %arg7: memref<1x1x64x256xbf16, #tpu.memory_space<vmem>>, %arg8: memref<1x1x64x2xf32, #tpu.memory_space<vmem>>) attributes {dimension_semantics = [#tpu.dimension_semantics<parallel>, #tpu.dimension_semantics<parallel>], iteration_bounds = array<i64: 2, 4>, scalar_prefetch = 0 : i64, scratch_operands = 0 : i64, tpu.core_type = #tpu.core_type<tc>, window_params = [{transform_indices = @transform_0, window_bounds = array<i64: 1, 1, 4, 256>}, {transform_indices = @transform_1, window_bounds = array<i64: 1, 1, 4, 256>}, {transform_indices = @transform_2, window_bounds = array<i64: 1, 1, 4, 256>}, {pipeline_mode = #tpu.pipeline_mode<synchronous>, transform_indices = @transform_3, window_bounds = array<i64: 3, 64, 36>}, {pipeline_mode = #tpu.pipeline_mode<synchronous>, transform_indices = @transform_4, window_bounds = array<i64: 1, 256>}, {transform_indices = @transform_5, window_bounds = array<i64: 1, 1, 64, 256>}, {transform_indices = @transform_6, window_bounds = array<i64: 1, 1, 64, 2>}]} {
    %cst = arith.constant 0.000000e+00 : f32
    %0 = vector.broadcast %cst : f32 to vector<64x256xf32>
    %c0_i32 = arith.constant 0 : i32
    %1 = arith.cmpi sgt, %arg1, %c0_i32 : i32
    %c3_i32 = arith.constant 3 : i32
    %2 = arith.cmpi slt, %arg1, %c3_i32 : i32
    %c0 = arith.constant 0 : index
    %c0_0 = arith.constant 0 : index
    %c0_1 = arith.constant 0 : index
    %c0_2 = arith.constant 0 : index
    %3 = vector.load %arg2[%c0, %c0_0, %c0_1, %c0_2] : memref<1x1x4x256xbf16, #tpu.memory_space<vmem>>, vector<1x1x4x256xbf16>
    %4 = vector.shape_cast %3 : vector<1x1x4x256xbf16> to vector<4x256xbf16>
    %5 = arith.extf %4 : vector<4x256xbf16> to vector<4x256xf32>
    %cst_3 = arith.constant 0.000000e+00 : f32
    %6 = vector.broadcast %cst_3 : f32 to vector<4x256xf32>
    %7 = arith.select %1, %5, %6 : vector<4x256xf32>
    %c17_i32 = arith.constant 17 : i32
    %8 = tpu.dynamic_rotate %7 by %c17_i32 dim 1 : vector<4x256xf32>, i32 -> vector<4x256xf32>
    %c16_i32 = arith.constant 16 : i32
    %9 = tpu.dynamic_rotate %7 by %c16_i32 dim 1 : vector<4x256xf32>, i32 -> vector<4x256xf32>
    %c15_i32 = arith.constant 15 : i32
    %10 = tpu.dynamic_rotate %7 by %c15_i32 dim 1 : vector<4x256xf32>, i32 -> vector<4x256xf32>
    %c1_i32 = arith.constant 1 : i32
    %11 = tpu.dynamic_rotate %7 by %c1_i32 dim 1 : vector<4x256xf32>, i32 -> vector<4x256xf32>
    %c255_i32 = arith.constant 255 : i32
    %12 = tpu.dynamic_rotate %7 by %c255_i32 dim 1 : vector<4x256xf32>, i32 -> vector<4x256xf32>
    %c241_i32 = arith.constant 241 : i32
    %13 = tpu.dynamic_rotate %7 by %c241_i32 dim 1 : vector<4x256xf32>, i32 -> vector<4x256xf32>
    %c240_i32 = arith.constant 240 : i32
    %14 = tpu.dynamic_rotate %7 by %c240_i32 dim 1 : vector<4x256xf32>, i32 -> vector<4x256xf32>
    %c239_i32 = arith.constant 239 : i32
    %15 = tpu.dynamic_rotate %7 by %c239_i32 dim 1 : vector<4x256xf32>, i32 -> vector<4x256xf32>
    %16 = tpu.concatenate %8, %9, %10, %11, %7, %12, %13, %14, %15 in 0 : vector<4x256xf32>, vector<4x256xf32>, vector<4x256xf32>, vector<4x256xf32>, vector<4x256xf32>, vector<4x256xf32>, vector<4x256xf32>, vector<4x256xf32>, vector<4x256xf32> -> vector<36x256xf32>
    %17 = arith.truncf %16 : vector<36x256xf32> to vector<36x256xbf16>
    %c0_4 = arith.constant 0 : index
    %c0_5 = arith.constant 0 : index
    %c0_6 = arith.constant 0 : index
    %18 = vector.load %arg5[%c0_4, %c0_5, %c0_6] : memref<3x64x36xbf16, #tpu.memory_space<vmem>>, vector<1x64x36xbf16>
    %19 = vector.shape_cast %18 : vector<1x64x36xbf16> to vector<64x36xbf16>
    %cst_7 = arith.constant dense<0.000000e+00> : vector<64x256xf32>
    %20 = tpu.matmul %19, %17, %cst_7 {dimension_numbers = #tpu.dot_dimension_numbers<[1], [0], [0], [1], [0, 0, 1, 1], [], []>} : vector<64x36xbf16>, vector<36x256xbf16>, vector<64x256xf32> -> vector<64x256xf32>
    %21 = arith.addf %0, %20 : vector<64x256xf32>
    %c0_8 = arith.constant 0 : index
    %c0_9 = arith.constant 0 : index
    %c0_10 = arith.constant 0 : index
    %c0_11 = arith.constant 0 : index
    %22 = vector.load %arg3[%c0_8, %c0_9, %c0_10, %c0_11] : memref<1x1x4x256xbf16, #tpu.memory_space<vmem>>, vector<1x1x4x256xbf16>
    %23 = vector.shape_cast %22 : vector<1x1x4x256xbf16> to vector<4x256xbf16>
    %24 = arith.extf %23 : vector<4x256xbf16> to vector<4x256xf32>
    %c17_i32_12 = arith.constant 17 : i32
    %25 = tpu.dynamic_rotate %24 by %c17_i32_12 dim 1 : vector<4x256xf32>, i32 -> vector<4x256xf32>
    %c16_i32_13 = arith.constant 16 : i32
    %26 = tpu.dynamic_rotate %24 by %c16_i32_13 dim 1 : vector<4x256xf32>, i32 -> vector<4x256xf32>
    %c15_i32_14 = arith.constant 15 : i32
    %27 = tpu.dynamic_rotate %24 by %c15_i32_14 dim 1 : vector<4x256xf32>, i32 -> vector<4x256xf32>
    %c1_i32_15 = arith.constant 1 : i32
    %28 = tpu.dynamic_rotate %24 by %c1_i32_15 dim 1 : vector<4x256xf32>, i32 -> vector<4x256xf32>
    %c255_i32_16 = arith.constant 255 : i32
    %29 = tpu.dynamic_rotate %24 by %c255_i32_16 dim 1 : vector<4x256xf32>, i32 -> vector<4x256xf32>
    %c241_i32_17 = arith.constant 241 : i32
    %30 = tpu.dynamic_rotate %24 by %c241_i32_17 dim 1 : vector<4x256xf32>, i32 -> vector<4x256xf32>
    %c240_i32_18 = arith.constant 240 : i32
    %31 = tpu.dynamic_rotate %24 by %c240_i32_18 dim 1 : vector<4x256xf32>, i32 -> vector<4x256xf32>
    %c239_i32_19 = arith.constant 239 : i32
    %32 = tpu.dynamic_rotate %24 by %c239_i32_19 dim 1 : vector<4x256xf32>, i32 -> vector<4x256xf32>
    %33 = tpu.concatenate %25, %26, %27, %28, %24, %29, %30, %31, %32 in 0 : vector<4x256xf32>, vector<4x256xf32>, vector<4x256xf32>, vector<4x256xf32>, vector<4x256xf32>, vector<4x256xf32>, vector<4x256xf32>, vector<4x256xf32>, vector<4x256xf32> -> vector<36x256xf32>
    %34 = arith.truncf %33 : vector<36x256xf32> to vector<36x256xbf16>
    %c1 = arith.constant 1 : index
    %c0_20 = arith.constant 0 : index
    %c0_21 = arith.constant 0 : index
    %35 = vector.load %arg5[%c1, %c0_20, %c0_21] : memref<3x64x36xbf16, #tpu.memory_space<vmem>>, vector<1x64x36xbf16>
    %36 = vector.shape_cast %35 : vector<1x64x36xbf16> to vector<64x36xbf16>
    %cst_22 = arith.constant dense<0.000000e+00> : vector<64x256xf32>
    %37 = tpu.matmul %36, %34, %cst_22 {dimension_numbers = #tpu.dot_dimension_numbers<[1], [0], [0], [1], [0, 0, 1, 1], [], []>} : vector<64x36xbf16>, vector<36x256xbf16>, vector<64x256xf32> -> vector<64x256xf32>
    %38 = arith.addf %21, %37 : vector<64x256xf32>
    %c0_23 = arith.constant 0 : index
    %c0_24 = arith.constant 0 : index
    %c0_25 = arith.constant 0 : index
    %c0_26 = arith.constant 0 : index
    %39 = vector.load %arg4[%c0_23, %c0_24, %c0_25, %c0_26] : memref<1x1x4x256xbf16, #tpu.memory_space<vmem>>, vector<1x1x4x256xbf16>
    %40 = vector.shape_cast %39 : vector<1x1x4x256xbf16> to vector<4x256xbf16>
    %41 = arith.extf %40 : vector<4x256xbf16> to vector<4x256xf32>
    %cst_27 = arith.constant 0.000000e+00 : f32
    %42 = vector.broadcast %cst_27 : f32 to vector<4x256xf32>
    %43 = arith.select %2, %41, %42 : vector<4x256xf32>
    %c17_i32_28 = arith.constant 17 : i32
    %44 = tpu.dynamic_rotate %43 by %c17_i32_28 dim 1 : vector<4x256xf32>, i32 -> vector<4x256xf32>
    %c16_i32_29 = arith.constant 16 : i32
    %45 = tpu.dynamic_rotate %43 by %c16_i32_29 dim 1 : vector<4x256xf32>, i32 -> vector<4x256xf32>
    %c15_i32_30 = arith.constant 15 : i32
    %46 = tpu.dynamic_rotate %43 by %c15_i32_30 dim 1 : vector<4x256xf32>, i32 -> vector<4x256xf32>
    %c1_i32_31 = arith.constant 1 : i32
    %47 = tpu.dynamic_rotate %43 by %c1_i32_31 dim 1 : vector<4x256xf32>, i32 -> vector<4x256xf32>
    %c255_i32_32 = arith.constant 255 : i32
    %48 = tpu.dynamic_rotate %43 by %c255_i32_32 dim 1 : vector<4x256xf32>, i32 -> vector<4x256xf32>
    %c241_i32_33 = arith.constant 241 : i32
    %49 = tpu.dynamic_rotate %43 by %c241_i32_33 dim 1 : vector<4x256xf32>, i32 -> vector<4x256xf32>
    %c240_i32_34 = arith.constant 240 : i32
    %50 = tpu.dynamic_rotate %43 by %c240_i32_34 dim 1 : vector<4x256xf32>, i32 -> vector<4x256xf32>
    %c239_i32_35 = arith.constant 239 : i32
    %51 = tpu.dynamic_rotate %43 by %c239_i32_35 dim 1 : vector<4x256xf32>, i32 -> vector<4x256xf32>
    %52 = tpu.concatenate %44, %45, %46, %47, %43, %48, %49, %50, %51 in 0 : vector<4x256xf32>, vector<4x256xf32>, vector<4x256xf32>, vector<4x256xf32>, vector<4x256xf32>, vector<4x256xf32>, vector<4x256xf32>, vector<4x256xf32>, vector<4x256xf32> -> vector<36x256xf32>
    %53 = arith.truncf %52 : vector<36x256xf32> to vector<36x256xbf16>
    %c2 = arith.constant 2 : index
    %c0_36 = arith.constant 0 : index
    %c0_37 = arith.constant 0 : index
    %54 = vector.load %arg5[%c2, %c0_36, %c0_37] : memref<3x64x36xbf16, #tpu.memory_space<vmem>>, vector<1x64x36xbf16>
    %55 = vector.shape_cast %54 : vector<1x64x36xbf16> to vector<64x36xbf16>
    %cst_38 = arith.constant dense<0.000000e+00> : vector<64x256xf32>
    %56 = tpu.matmul %55, %53, %cst_38 {dimension_numbers = #tpu.dot_dimension_numbers<[1], [0], [0], [1], [0, 0, 1, 1], [], []>} : vector<64x36xbf16>, vector<36x256xbf16>, vector<64x256xf32> -> vector<64x256xf32>
    %57 = arith.addf %38, %56 : vector<64x256xf32>
    %c0_39 = arith.constant 0 : index
    %c0_40 = arith.constant 0 : index
    %58 = vector.load %arg6[%c0_39, %c0_40] : memref<1x256xf32, #tpu.memory_space<vmem>>, vector<1x256xf32>
    %59 = vector.broadcast %58 : vector<1x256xf32> to vector<64x256xf32>
    %60 = arith.mulf %57, %59 : vector<64x256xf32>
    %61 = arith.truncf %60 : vector<64x256xf32> to vector<64x256xbf16>
    %62 = vector.shape_cast %61 : vector<64x256xbf16> to vector<1x1x64x256xbf16>
    %c0_41 = arith.constant 0 : index
    %c0_42 = arith.constant 0 : index
    %c0_43 = arith.constant 0 : index
    %c0_44 = arith.constant 0 : index
    %63 = vector.load %arg7[%c0_41, %c0_42, %c0_43, %c0_44] : memref<1x1x64x256xbf16, #tpu.memory_space<vmem>>, vector<1x1x64x256xbf16>
    tpu.vector_store %arg7[%c0_41, %c0_42, %c0_43, %c0_44], %62 {strides = array<i32>} : memref<1x1x64x256xbf16, #tpu.memory_space<vmem>>, vector<1x1x64x256xbf16>,
    %cst_45 = arith.constant dense<0.000000e+00> : vector<64xf32>
    %64 = vector.multi_reduction <add>, %60, %cst_45 [1] : vector<64x256xf32> to vector<64xf32>
    %65 = vector.shape_cast %64 : vector<64xf32> to vector<64x1xf32>
    %66 = arith.mulf %60, %60 : vector<64x256xf32>
    %cst_46 = arith.constant dense<0.000000e+00> : vector<64xf32>
    %67 = vector.multi_reduction <add>, %66, %cst_46 [1] : vector<64x256xf32> to vector<64xf32>
    %68 = vector.shape_cast %67 : vector<64xf32> to vector<64x1xf32>
    %69 = tpu.concatenate %65, %68 in 1 : vector<64x1xf32>, vector<64x1xf32> -> vector<64x2xf32>
    %70 = vector.shape_cast %69 : vector<64x2xf32> to vector<1x1x64x2xf32>
    %c0_47 = arith.constant 0 : index
    %c0_48 = arith.constant 0 : index
    %c0_49 = arith.constant 0 : index
    %c0_50 = arith.constant 0 : index
    %71 = vector.load %arg8[%c0_47, %c0_48, %c0_49, %c0_50] : memref<1x1x64x2xf32, #tpu.memory_space<vmem>>, vector<1x1x64x2xf32>
    tpu.vector_store %arg8[%c0_47, %c0_48, %c0_49, %c0_50], %70 {strides = array<i32>} : memref<1x1x64x2xf32, #tpu.memory_space<vmem>>, vector<1x1x64x2xf32>,
    return
  }
  func.func @transform_0(%arg0: i32, %arg1: i32) -> (i32, i32, i32, i32) {
    %c1_i32 = arith.constant 1 : i32
    %0 = arith.subi %arg1, %c1_i32 : i32
    %c0_i32 = arith.constant 0 : i32
    %1 = arith.maxsi %0, %c0_i32 : i32
    %c0_i32_0 = arith.constant 0 : i32
    %c0_i32_1 = arith.constant 0 : i32
    %c0_i32_2 = arith.constant 0 : i32
    return %arg0, %1, %c0_i32_0, %c0_i32_1 : i32, i32, i32, i32
  }
  func.func @transform_1(%arg0: i32, %arg1: i32) -> (i32, i32, i32, i32) {
    %c0_i32 = arith.constant 0 : i32
    %c0_i32_0 = arith.constant 0 : i32
    %c0_i32_1 = arith.constant 0 : i32
    return %arg0, %arg1, %c0_i32, %c0_i32_0 : i32, i32, i32, i32
  }
  func.func @transform_2(%arg0: i32, %arg1: i32) -> (i32, i32, i32, i32) {
    %c1_i32 = arith.constant 1 : i32
    %0 = arith.addi %arg1, %c1_i32 : i32
    %c3_i32 = arith.constant 3 : i32
    %1 = arith.minsi %0, %c3_i32 : i32
    %c0_i32 = arith.constant 0 : i32
    %c0_i32_0 = arith.constant 0 : i32
    %c0_i32_1 = arith.constant 0 : i32
    return %arg0, %1, %c0_i32, %c0_i32_0 : i32, i32, i32, i32
  }
  func.func @transform_3(%arg0: i32, %arg1: i32) -> (i32, i32, i32) {
    %c0_i32 = arith.constant 0 : i32
    %c0_i32_0 = arith.constant 0 : i32
    %c0_i32_1 = arith.constant 0 : i32
    %c0_i32_2 = arith.constant 0 : i32
    return %c0_i32, %c0_i32_0, %c0_i32_1 : i32, i32, i32
  }
  func.func @transform_4(%arg0: i32, %arg1: i32) -> (i32, i32) {
    %c0_i32 = arith.constant 0 : i32
    %c0_i32_0 = arith.constant 0 : i32
    %c0_i32_1 = arith.constant 0 : i32
    return %c0_i32, %c0_i32_0 : i32, i32
  }
  func.func @transform_5(%arg0: i32, %arg1: i32) -> (i32, i32, i32, i32) {
    %c0_i32 = arith.constant 0 : i32
    %c0_i32_0 = arith.constant 0 : i32
    %c0_i32_1 = arith.constant 0 : i32
    return %arg0, %arg1, %c0_i32, %c0_i32_0 : i32, i32, i32, i32
  }
  func.func @transform_6(%arg0: i32, %arg1: i32) -> (i32, i32, i32, i32) {
    %c0_i32 = arith.constant 0 : i32
    %c0_i32_0 = arith.constant 0 : i32
    %c0_i32_1 = arith.constant 0 : i32
    return %arg0, %arg1, %c0_i32, %c0_i32_0 : i32, i32, i32, i32
  }
}

module attributes {stable_mosaic.version = 11 : i64} {
  func.func @_bn_act_kernel(%arg0: i32, %arg1: i32, %arg2: memref<1x1x16x256xbf16, #tpu.memory_space<vmem>>, %arg3: memref<1x1x16x256xbf16, #tpu.memory_space<vmem>>, %arg4: memref<1x1x16x256xbf16, #tpu.memory_space<vmem>>, %arg5: memref<1x1x16x256xbf16, #tpu.memory_space<vmem>>, %arg6: memref<1x16x1xf32, #tpu.memory_space<vmem>>, %arg7: memref<1x16x1xf32, #tpu.memory_space<vmem>>, %arg8: memref<1x16x1xf32, #tpu.memory_space<vmem>>, %arg9: memref<1x16x1xf32, #tpu.memory_space<vmem>>, %arg10: memref<1x16x1xf32, #tpu.memory_space<vmem>>, %arg11: memref<1x16x1xf32, #tpu.memory_space<vmem>>, %arg12: memref<1x16x1xf32, #tpu.memory_space<vmem>>, %arg13: memref<1x16x1xf32, #tpu.memory_space<vmem>>, %arg14: memref<1x256xf32, #tpu.memory_space<vmem>>, %arg15: memref<1x1x16x256xbf16, #tpu.memory_space<vmem>>, %arg16: memref<1x1x16x256xbf16, #tpu.memory_space<vmem>>, %arg17: memref<1x1x16x256xbf16, #tpu.memory_space<vmem>>, %arg18: memref<1x1x16x256xbf16, #tpu.memory_space<vmem>>) attributes {dimension_semantics = [#tpu.dimension_semantics<parallel>, #tpu.dimension_semantics<parallel>], iteration_bounds = array<i64: 2, 4>, scalar_prefetch = 0 : i64, scratch_operands = 0 : i64, tpu.core_type = #tpu.core_type<tc>, window_params = [{transform_indices = @transform_0, window_bounds = array<i64: 1, 1, 16, 256>}, {transform_indices = @transform_1, window_bounds = array<i64: 1, 1, 16, 256>}, {transform_indices = @transform_2, window_bounds = array<i64: 1, 1, 16, 256>}, {transform_indices = @transform_3, window_bounds = array<i64: 1, 1, 16, 256>}, {pipeline_mode = #tpu.pipeline_mode<synchronous>, transform_indices = @transform_4, window_bounds = array<i64: 1, 16, 1>}, {pipeline_mode = #tpu.pipeline_mode<synchronous>, transform_indices = @transform_5, window_bounds = array<i64: 1, 16, 1>}, {pipeline_mode = #tpu.pipeline_mode<synchronous>, transform_indices = @transform_6, window_bounds = array<i64: 1, 16, 1>}, {pipeline_mode = #tpu.pipeline_mode<synchronous>, transform_indices = @transform_7, window_bounds = array<i64: 1, 16, 1>}, {pipeline_mode = #tpu.pipeline_mode<synchronous>, transform_indices = @transform_8, window_bounds = array<i64: 1, 16, 1>}, {pipeline_mode = #tpu.pipeline_mode<synchronous>, transform_indices = @transform_9, window_bounds = array<i64: 1, 16, 1>}, {pipeline_mode = #tpu.pipeline_mode<synchronous>, transform_indices = @transform_10, window_bounds = array<i64: 1, 16, 1>}, {pipeline_mode = #tpu.pipeline_mode<synchronous>, transform_indices = @transform_11, window_bounds = array<i64: 1, 16, 1>}, {pipeline_mode = #tpu.pipeline_mode<synchronous>, transform_indices = @transform_12, window_bounds = array<i64: 1, 256>}, {transform_indices = @transform_13, window_bounds = array<i64: 1, 1, 16, 256>}, {transform_indices = @transform_14, window_bounds = array<i64: 1, 1, 16, 256>}, {transform_indices = @transform_15, window_bounds = array<i64: 1, 1, 16, 256>}, {transform_indices = @transform_16, window_bounds = array<i64: 1, 1, 16, 256>}]} {
    %c0 = arith.constant 0 : index
    %c0_0 = arith.constant 0 : index
    %0 = vector.load %arg14[%c0, %c0_0] : memref<1x256xf32, #tpu.memory_space<vmem>>, vector<1x256xf32>
    %c0_1 = arith.constant 0 : index
    %c0_2 = arith.constant 0 : index
    %c0_3 = arith.constant 0 : index
    %c0_4 = arith.constant 0 : index
    %1 = vector.load %arg2[%c0_1, %c0_2, %c0_3, %c0_4] : memref<1x1x16x256xbf16, #tpu.memory_space<vmem>>, vector<1x1x16x256xbf16>
    %2 = vector.shape_cast %1 : vector<1x1x16x256xbf16> to vector<16x256xbf16>
    %3 = arith.extf %2 : vector<16x256xbf16> to vector<16x256xf32>
    %c0_5 = arith.constant 0 : index
    %c0_6 = arith.constant 0 : index
    %c0_7 = arith.constant 0 : index
    %4 = vector.load %arg6[%c0_5, %c0_6, %c0_7] : memref<1x16x1xf32, #tpu.memory_space<vmem>>, vector<1x16x1xf32>
    %5 = vector.shape_cast %4 : vector<1x16x1xf32> to vector<16x1xf32>
    %c0_8 = arith.constant 0 : index
    %c0_9 = arith.constant 0 : index
    %c0_10 = arith.constant 0 : index
    %6 = vector.load %arg7[%c0_8, %c0_9, %c0_10] : memref<1x16x1xf32, #tpu.memory_space<vmem>>, vector<1x16x1xf32>
    %7 = vector.shape_cast %6 : vector<1x16x1xf32> to vector<16x1xf32>
    %8 = vector.broadcast %5 : vector<16x1xf32> to vector<16x256xf32>
    %9 = arith.mulf %3, %8 : vector<16x256xf32>
    %10 = vector.broadcast %7 : vector<16x1xf32> to vector<16x256xf32>
    %11 = arith.addf %9, %10 : vector<16x256xf32>
    %cst = arith.constant 0.000000e+00 : f32
    %12 = vector.broadcast %cst : f32 to vector<16x256xf32>
    %13 = arith.cmpf oge, %11, %12 : vector<16x256xf32>
    %cst_11 = arith.constant 0.00999999977 : f32
    %14 = vector.broadcast %cst_11 : f32 to vector<16x256xf32>
    %15 = arith.mulf %14, %11 : vector<16x256xf32>
    %16 = arith.select %13, %11, %15 : vector<16x256xi1>, vector<16x256xf32>
    %17 = vector.broadcast %0 : vector<1x256xf32> to vector<16x256xf32>
    %18 = arith.mulf %16, %17 : vector<16x256xf32>
    %19 = arith.truncf %18 : vector<16x256xf32> to vector<16x256xbf16>
    %20 = vector.shape_cast %19 : vector<16x256xbf16> to vector<1x1x16x256xbf16>
    %c0_12 = arith.constant 0 : index
    %c0_13 = arith.constant 0 : index
    %c0_14 = arith.constant 0 : index
    %c0_15 = arith.constant 0 : index
    %21 = vector.load %arg15[%c0_12, %c0_13, %c0_14, %c0_15] : memref<1x1x16x256xbf16, #tpu.memory_space<vmem>>, vector<1x1x16x256xbf16>
    tpu.vector_store %arg15[%c0_12, %c0_13, %c0_14, %c0_15], %20 {strides = array<i32>} : memref<1x1x16x256xbf16, #tpu.memory_space<vmem>>, vector<1x1x16x256xbf16>,
    %c0_16 = arith.constant 0 : index
    %c0_17 = arith.constant 0 : index
    %c0_18 = arith.constant 0 : index
    %c0_19 = arith.constant 0 : index
    %22 = vector.load %arg3[%c0_16, %c0_17, %c0_18, %c0_19] : memref<1x1x16x256xbf16, #tpu.memory_space<vmem>>, vector<1x1x16x256xbf16>
    %23 = vector.shape_cast %22 : vector<1x1x16x256xbf16> to vector<16x256xbf16>
    %24 = arith.extf %23 : vector<16x256xbf16> to vector<16x256xf32>
    %c0_20 = arith.constant 0 : index
    %c0_21 = arith.constant 0 : index
    %c0_22 = arith.constant 0 : index
    %25 = vector.load %arg8[%c0_20, %c0_21, %c0_22] : memref<1x16x1xf32, #tpu.memory_space<vmem>>, vector<1x16x1xf32>
    %26 = vector.shape_cast %25 : vector<1x16x1xf32> to vector<16x1xf32>
    %c0_23 = arith.constant 0 : index
    %c0_24 = arith.constant 0 : index
    %c0_25 = arith.constant 0 : index
    %27 = vector.load %arg9[%c0_23, %c0_24, %c0_25] : memref<1x16x1xf32, #tpu.memory_space<vmem>>, vector<1x16x1xf32>
    %28 = vector.shape_cast %27 : vector<1x16x1xf32> to vector<16x1xf32>
    %29 = vector.broadcast %26 : vector<16x1xf32> to vector<16x256xf32>
    %30 = arith.mulf %24, %29 : vector<16x256xf32>
    %31 = vector.broadcast %28 : vector<16x1xf32> to vector<16x256xf32>
    %32 = arith.addf %30, %31 : vector<16x256xf32>
    %cst_26 = arith.constant 0.000000e+00 : f32
    %33 = vector.broadcast %cst_26 : f32 to vector<16x256xf32>
    %34 = arith.cmpf oge, %32, %33 : vector<16x256xf32>
    %cst_27 = arith.constant 0.00999999977 : f32
    %35 = vector.broadcast %cst_27 : f32 to vector<16x256xf32>
    %36 = arith.mulf %35, %32 : vector<16x256xf32>
    %37 = arith.select %34, %32, %36 : vector<16x256xi1>, vector<16x256xf32>
    %38 = vector.broadcast %0 : vector<1x256xf32> to vector<16x256xf32>
    %39 = arith.mulf %37, %38 : vector<16x256xf32>
    %40 = arith.truncf %39 : vector<16x256xf32> to vector<16x256xbf16>
    %41 = vector.shape_cast %40 : vector<16x256xbf16> to vector<1x1x16x256xbf16>
    %c0_28 = arith.constant 0 : index
    %c0_29 = arith.constant 0 : index
    %c0_30 = arith.constant 0 : index
    %c0_31 = arith.constant 0 : index
    %42 = vector.load %arg16[%c0_28, %c0_29, %c0_30, %c0_31] : memref<1x1x16x256xbf16, #tpu.memory_space<vmem>>, vector<1x1x16x256xbf16>
    tpu.vector_store %arg16[%c0_28, %c0_29, %c0_30, %c0_31], %41 {strides = array<i32>} : memref<1x1x16x256xbf16, #tpu.memory_space<vmem>>, vector<1x1x16x256xbf16>,
    %c0_32 = arith.constant 0 : index
    %c0_33 = arith.constant 0 : index
    %c0_34 = arith.constant 0 : index
    %c0_35 = arith.constant 0 : index
    %43 = vector.load %arg4[%c0_32, %c0_33, %c0_34, %c0_35] : memref<1x1x16x256xbf16, #tpu.memory_space<vmem>>, vector<1x1x16x256xbf16>
    %44 = vector.shape_cast %43 : vector<1x1x16x256xbf16> to vector<16x256xbf16>
    %45 = arith.extf %44 : vector<16x256xbf16> to vector<16x256xf32>
    %c0_36 = arith.constant 0 : index
    %c0_37 = arith.constant 0 : index
    %c0_38 = arith.constant 0 : index
    %46 = vector.load %arg10[%c0_36, %c0_37, %c0_38] : memref<1x16x1xf32, #tpu.memory_space<vmem>>, vector<1x16x1xf32>
    %47 = vector.shape_cast %46 : vector<1x16x1xf32> to vector<16x1xf32>
    %c0_39 = arith.constant 0 : index
    %c0_40 = arith.constant 0 : index
    %c0_41 = arith.constant 0 : index
    %48 = vector.load %arg11[%c0_39, %c0_40, %c0_41] : memref<1x16x1xf32, #tpu.memory_space<vmem>>, vector<1x16x1xf32>
    %49 = vector.shape_cast %48 : vector<1x16x1xf32> to vector<16x1xf32>
    %50 = vector.broadcast %47 : vector<16x1xf32> to vector<16x256xf32>
    %51 = arith.mulf %45, %50 : vector<16x256xf32>
    %52 = vector.broadcast %49 : vector<16x1xf32> to vector<16x256xf32>
    %53 = arith.addf %51, %52 : vector<16x256xf32>
    %cst_42 = arith.constant 0.000000e+00 : f32
    %54 = vector.broadcast %cst_42 : f32 to vector<16x256xf32>
    %55 = arith.cmpf oge, %53, %54 : vector<16x256xf32>
    %cst_43 = arith.constant 0.00999999977 : f32
    %56 = vector.broadcast %cst_43 : f32 to vector<16x256xf32>
    %57 = arith.mulf %56, %53 : vector<16x256xf32>
    %58 = arith.select %55, %53, %57 : vector<16x256xi1>, vector<16x256xf32>
    %59 = vector.broadcast %0 : vector<1x256xf32> to vector<16x256xf32>
    %60 = arith.mulf %58, %59 : vector<16x256xf32>
    %61 = arith.truncf %60 : vector<16x256xf32> to vector<16x256xbf16>
    %62 = vector.shape_cast %61 : vector<16x256xbf16> to vector<1x1x16x256xbf16>
    %c0_44 = arith.constant 0 : index
    %c0_45 = arith.constant 0 : index
    %c0_46 = arith.constant 0 : index
    %c0_47 = arith.constant 0 : index
    %63 = vector.load %arg17[%c0_44, %c0_45, %c0_46, %c0_47] : memref<1x1x16x256xbf16, #tpu.memory_space<vmem>>, vector<1x1x16x256xbf16>
    tpu.vector_store %arg17[%c0_44, %c0_45, %c0_46, %c0_47], %62 {strides = array<i32>} : memref<1x1x16x256xbf16, #tpu.memory_space<vmem>>, vector<1x1x16x256xbf16>,
    %c0_48 = arith.constant 0 : index
    %c0_49 = arith.constant 0 : index
    %c0_50 = arith.constant 0 : index
    %c0_51 = arith.constant 0 : index
    %64 = vector.load %arg5[%c0_48, %c0_49, %c0_50, %c0_51] : memref<1x1x16x256xbf16, #tpu.memory_space<vmem>>, vector<1x1x16x256xbf16>
    %65 = vector.shape_cast %64 : vector<1x1x16x256xbf16> to vector<16x256xbf16>
    %66 = arith.extf %65 : vector<16x256xbf16> to vector<16x256xf32>
    %c0_52 = arith.constant 0 : index
    %c0_53 = arith.constant 0 : index
    %c0_54 = arith.constant 0 : index
    %67 = vector.load %arg12[%c0_52, %c0_53, %c0_54] : memref<1x16x1xf32, #tpu.memory_space<vmem>>, vector<1x16x1xf32>
    %68 = vector.shape_cast %67 : vector<1x16x1xf32> to vector<16x1xf32>
    %c0_55 = arith.constant 0 : index
    %c0_56 = arith.constant 0 : index
    %c0_57 = arith.constant 0 : index
    %69 = vector.load %arg13[%c0_55, %c0_56, %c0_57] : memref<1x16x1xf32, #tpu.memory_space<vmem>>, vector<1x16x1xf32>
    %70 = vector.shape_cast %69 : vector<1x16x1xf32> to vector<16x1xf32>
    %71 = vector.broadcast %68 : vector<16x1xf32> to vector<16x256xf32>
    %72 = arith.mulf %66, %71 : vector<16x256xf32>
    %73 = vector.broadcast %70 : vector<16x1xf32> to vector<16x256xf32>
    %74 = arith.addf %72, %73 : vector<16x256xf32>
    %cst_58 = arith.constant 0.000000e+00 : f32
    %75 = vector.broadcast %cst_58 : f32 to vector<16x256xf32>
    %76 = arith.cmpf oge, %74, %75 : vector<16x256xf32>
    %cst_59 = arith.constant 0.00999999977 : f32
    %77 = vector.broadcast %cst_59 : f32 to vector<16x256xf32>
    %78 = arith.mulf %77, %74 : vector<16x256xf32>
    %79 = arith.select %76, %74, %78 : vector<16x256xi1>, vector<16x256xf32>
    %80 = vector.broadcast %0 : vector<1x256xf32> to vector<16x256xf32>
    %81 = arith.mulf %79, %80 : vector<16x256xf32>
    %82 = arith.truncf %81 : vector<16x256xf32> to vector<16x256xbf16>
    %83 = vector.shape_cast %82 : vector<16x256xbf16> to vector<1x1x16x256xbf16>
    %c0_60 = arith.constant 0 : index
    %c0_61 = arith.constant 0 : index
    %c0_62 = arith.constant 0 : index
    %c0_63 = arith.constant 0 : index
    %84 = vector.load %arg18[%c0_60, %c0_61, %c0_62, %c0_63] : memref<1x1x16x256xbf16, #tpu.memory_space<vmem>>, vector<1x1x16x256xbf16>
    tpu.vector_store %arg18[%c0_60, %c0_61, %c0_62, %c0_63], %83 {strides = array<i32>} : memref<1x1x16x256xbf16, #tpu.memory_space<vmem>>, vector<1x1x16x256xbf16>,
    return
  }
  func.func @transform_0(%arg0: i32, %arg1: i32) -> (i32, i32, i32, i32) {
    %c0_i32 = arith.constant 0 : i32
    %c0_i32_0 = arith.constant 0 : i32
    %c0_i32_1 = arith.constant 0 : i32
    return %arg0, %arg1, %c0_i32, %c0_i32_0 : i32, i32, i32, i32
  }
  func.func @transform_1(%arg0: i32, %arg1: i32) -> (i32, i32, i32, i32) {
    %c1_i32 = arith.constant 1 : i32
    %c0_i32 = arith.constant 0 : i32
    %c0_i32_0 = arith.constant 0 : i32
    return %arg0, %arg1, %c1_i32, %c0_i32 : i32, i32, i32, i32
  }
  func.func @transform_2(%arg0: i32, %arg1: i32) -> (i32, i32, i32, i32) {
    %c2_i32 = arith.constant 2 : i32
    %c0_i32 = arith.constant 0 : i32
    %c0_i32_0 = arith.constant 0 : i32
    return %arg0, %arg1, %c2_i32, %c0_i32 : i32, i32, i32, i32
  }
  func.func @transform_3(%arg0: i32, %arg1: i32) -> (i32, i32, i32, i32) {
    %c3_i32 = arith.constant 3 : i32
    %c0_i32 = arith.constant 0 : i32
    %c0_i32_0 = arith.constant 0 : i32
    return %arg0, %arg1, %c3_i32, %c0_i32 : i32, i32, i32, i32
  }
  func.func @transform_4(%arg0: i32, %arg1: i32) -> (i32, i32, i32) {
    %c0_i32 = arith.constant 0 : i32
    %c0_i32_0 = arith.constant 0 : i32
    %c0_i32_1 = arith.constant 0 : i32
    %c0_i32_2 = arith.constant 0 : i32
    return %c0_i32, %c0_i32_0, %c0_i32_1 : i32, i32, i32
  }
  func.func @transform_5(%arg0: i32, %arg1: i32) -> (i32, i32, i32) {
    %c0_i32 = arith.constant 0 : i32
    %c0_i32_0 = arith.constant 0 : i32
    %c0_i32_1 = arith.constant 0 : i32
    %c0_i32_2 = arith.constant 0 : i32
    return %c0_i32, %c0_i32_0, %c0_i32_1 : i32, i32, i32
  }
  func.func @transform_6(%arg0: i32, %arg1: i32) -> (i32, i32, i32) {
    %c0_i32 = arith.constant 0 : i32
    %c0_i32_0 = arith.constant 0 : i32
    %c0_i32_1 = arith.constant 0 : i32
    %c0_i32_2 = arith.constant 0 : i32
    return %c0_i32, %c0_i32_0, %c0_i32_1 : i32, i32, i32
  }
  func.func @transform_7(%arg0: i32, %arg1: i32) -> (i32, i32, i32) {
    %c0_i32 = arith.constant 0 : i32
    %c0_i32_0 = arith.constant 0 : i32
    %c0_i32_1 = arith.constant 0 : i32
    %c0_i32_2 = arith.constant 0 : i32
    return %c0_i32, %c0_i32_0, %c0_i32_1 : i32, i32, i32
  }
  func.func @transform_8(%arg0: i32, %arg1: i32) -> (i32, i32, i32) {
    %c0_i32 = arith.constant 0 : i32
    %c0_i32_0 = arith.constant 0 : i32
    %c0_i32_1 = arith.constant 0 : i32
    %c0_i32_2 = arith.constant 0 : i32
    return %c0_i32, %c0_i32_0, %c0_i32_1 : i32, i32, i32
  }
  func.func @transform_9(%arg0: i32, %arg1: i32) -> (i32, i32, i32) {
    %c0_i32 = arith.constant 0 : i32
    %c0_i32_0 = arith.constant 0 : i32
    %c0_i32_1 = arith.constant 0 : i32
    %c0_i32_2 = arith.constant 0 : i32
    return %c0_i32, %c0_i32_0, %c0_i32_1 : i32, i32, i32
  }
  func.func @transform_10(%arg0: i32, %arg1: i32) -> (i32, i32, i32) {
    %c0_i32 = arith.constant 0 : i32
    %c0_i32_0 = arith.constant 0 : i32
    %c0_i32_1 = arith.constant 0 : i32
    %c0_i32_2 = arith.constant 0 : i32
    return %c0_i32, %c0_i32_0, %c0_i32_1 : i32, i32, i32
  }
  func.func @transform_11(%arg0: i32, %arg1: i32) -> (i32, i32, i32) {
    %c0_i32 = arith.constant 0 : i32
    %c0_i32_0 = arith.constant 0 : i32
    %c0_i32_1 = arith.constant 0 : i32
    %c0_i32_2 = arith.constant 0 : i32
    return %c0_i32, %c0_i32_0, %c0_i32_1 : i32, i32, i32
  }
  func.func @transform_12(%arg0: i32, %arg1: i32) -> (i32, i32) {
    %c0_i32 = arith.constant 0 : i32
    %c0_i32_0 = arith.constant 0 : i32
    %c0_i32_1 = arith.constant 0 : i32
    return %c0_i32, %c0_i32_0 : i32, i32
  }
  func.func @transform_13(%arg0: i32, %arg1: i32) -> (i32, i32, i32, i32) {
    %c0_i32 = arith.constant 0 : i32
    %c0_i32_0 = arith.constant 0 : i32
    %c0_i32_1 = arith.constant 0 : i32
    return %arg0, %arg1, %c0_i32, %c0_i32_0 : i32, i32, i32, i32
  }
  func.func @transform_14(%arg0: i32, %arg1: i32) -> (i32, i32, i32, i32) {
    %c0_i32 = arith.constant 0 : i32
    %c0_i32_0 = arith.constant 0 : i32
    %c0_i32_1 = arith.constant 0 : i32
    return %arg0, %arg1, %c0_i32, %c0_i32_0 : i32, i32, i32, i32
  }
  func.func @transform_15(%arg0: i32, %arg1: i32) -> (i32, i32, i32, i32) {
    %c0_i32 = arith.constant 0 : i32
    %c0_i32_0 = arith.constant 0 : i32
    %c0_i32_1 = arith.constant 0 : i32
    return %arg0, %arg1, %c0_i32, %c0_i32_0 : i32, i32, i32, i32
  }
  func.func @transform_16(%arg0: i32, %arg1: i32) -> (i32, i32, i32, i32) {
    %c0_i32 = arith.constant 0 : i32
    %c0_i32_0 = arith.constant 0 : i32
    %c0_i32_1 = arith.constant 0 : i32
    return %arg0, %arg1, %c0_i32, %c0_i32_0 : i32, i32, i32, i32
  }
}

module attributes {stable_mosaic.version = 11 : i64} {
  func.func @_conv_kernel(%arg0: i32, %arg1: i32, %arg2: memref<1x1x16x256xbf16, #tpu.memory_space<vmem>>, %arg3: memref<1x1x16x256xbf16, #tpu.memory_space<vmem>>, %arg4: memref<1x1x16x256xbf16, #tpu.memory_space<vmem>>, %arg5: memref<3x16x144xbf16, #tpu.memory_space<vmem>>, %arg6: memref<1x256xf32, #tpu.memory_space<vmem>>, %arg7: memref<1x1x16x256xbf16, #tpu.memory_space<vmem>>, %arg8: memref<1x1x16x256xbf16, #tpu.memory_space<vmem>>, %arg9: memref<1x1x16x2xf32, #tpu.memory_space<vmem>>) attributes {dimension_semantics = [#tpu.dimension_semantics<parallel>, #tpu.dimension_semantics<parallel>], iteration_bounds = array<i64: 2, 4>, scalar_prefetch = 0 : i64, scratch_operands = 0 : i64, tpu.core_type = #tpu.core_type<tc>, window_params = [{transform_indices = @transform_0, window_bounds = array<i64: 1, 1, 16, 256>}, {transform_indices = @transform_1, window_bounds = array<i64: 1, 1, 16, 256>}, {transform_indices = @transform_2, window_bounds = array<i64: 1, 1, 16, 256>}, {pipeline_mode = #tpu.pipeline_mode<synchronous>, transform_indices = @transform_3, window_bounds = array<i64: 3, 16, 144>}, {pipeline_mode = #tpu.pipeline_mode<synchronous>, transform_indices = @transform_4, window_bounds = array<i64: 1, 256>}, {transform_indices = @transform_5, window_bounds = array<i64: 1, 1, 16, 256>}, {transform_indices = @transform_6, window_bounds = array<i64: 1, 1, 16, 256>}, {transform_indices = @transform_7, window_bounds = array<i64: 1, 1, 16, 2>}]} {
    %c0 = arith.constant 0 : index
    %c0_0 = arith.constant 0 : index
    %c0_1 = arith.constant 0 : index
    %c0_2 = arith.constant 0 : index
    %0 = vector.load %arg7[%c0, %c0_0, %c0_1, %c0_2] : memref<1x1x16x256xbf16, #tpu.memory_space<vmem>>, vector<1x1x16x256xbf16>
    %1 = vector.shape_cast %0 : vector<1x1x16x256xbf16> to vector<16x256xbf16>
    %2 = arith.extf %1 : vector<16x256xbf16> to vector<16x256xf32>
    %c0_i32 = arith.constant 0 : i32
    %3 = arith.cmpi sgt, %arg1, %c0_i32 : i32
    %c3_i32 = arith.constant 3 : i32
    %4 = arith.cmpi slt, %arg1, %c3_i32 : i32
    %c0_3 = arith.constant 0 : index
    %c0_4 = arith.constant 0 : index
    %c0_5 = arith.constant 0 : index
    %c0_6 = arith.constant 0 : index
    %5 = vector.load %arg2[%c0_3, %c0_4, %c0_5, %c0_6] : memref<1x1x16x256xbf16, #tpu.memory_space<vmem>>, vector<1x1x16x256xbf16>
    %6 = vector.shape_cast %5 : vector<1x1x16x256xbf16> to vector<16x256xbf16>
    %7 = arith.extf %6 : vector<16x256xbf16> to vector<16x256xf32>
    %cst = arith.constant 0.000000e+00 : f32
    %8 = vector.broadcast %cst : f32 to vector<16x256xf32>
    %9 = arith.select %3, %7, %8 : vector<16x256xf32>
    %c17_i32 = arith.constant 17 : i32
    %10 = tpu.dynamic_rotate %9 by %c17_i32 dim 1 : vector<16x256xf32>, i32 -> vector<16x256xf32>
    %c16_i32 = arith.constant 16 : i32
    %11 = tpu.dynamic_rotate %9 by %c16_i32 dim 1 : vector<16x256xf32>, i32 -> vector<16x256xf32>
    %c15_i32 = arith.constant 15 : i32
    %12 = tpu.dynamic_rotate %9 by %c15_i32 dim 1 : vector<16x256xf32>, i32 -> vector<16x256xf32>
    %c1_i32 = arith.constant 1 : i32
    %13 = tpu.dynamic_rotate %9 by %c1_i32 dim 1 : vector<16x256xf32>, i32 -> vector<16x256xf32>
    %c255_i32 = arith.constant 255 : i32
    %14 = tpu.dynamic_rotate %9 by %c255_i32 dim 1 : vector<16x256xf32>, i32 -> vector<16x256xf32>
    %c241_i32 = arith.constant 241 : i32
    %15 = tpu.dynamic_rotate %9 by %c241_i32 dim 1 : vector<16x256xf32>, i32 -> vector<16x256xf32>
    %c240_i32 = arith.constant 240 : i32
    %16 = tpu.dynamic_rotate %9 by %c240_i32 dim 1 : vector<16x256xf32>, i32 -> vector<16x256xf32>
    %c239_i32 = arith.constant 239 : i32
    %17 = tpu.dynamic_rotate %9 by %c239_i32 dim 1 : vector<16x256xf32>, i32 -> vector<16x256xf32>
    %18 = tpu.concatenate %10, %11, %12, %13, %9, %14, %15, %16, %17 in 0 : vector<16x256xf32>, vector<16x256xf32>, vector<16x256xf32>, vector<16x256xf32>, vector<16x256xf32>, vector<16x256xf32>, vector<16x256xf32>, vector<16x256xf32>, vector<16x256xf32> -> vector<144x256xf32>
    %19 = arith.truncf %18 : vector<144x256xf32> to vector<144x256xbf16>
    %c0_7 = arith.constant 0 : index
    %c0_8 = arith.constant 0 : index
    %c0_9 = arith.constant 0 : index
    %20 = vector.load %arg5[%c0_7, %c0_8, %c0_9] : memref<3x16x144xbf16, #tpu.memory_space<vmem>>, vector<1x16x144xbf16>
    %21 = vector.shape_cast %20 : vector<1x16x144xbf16> to vector<16x144xbf16>
    %cst_10 = arith.constant dense<0.000000e+00> : vector<16x256xf32>
    %22 = tpu.matmul %21, %19, %cst_10 {dimension_numbers = #tpu.dot_dimension_numbers<[1], [0], [0], [1], [0, 0, 1, 1], [], []>} : vector<16x144xbf16>, vector<144x256xbf16>, vector<16x256xf32> -> vector<16x256xf32>
    %23 = arith.addf %2, %22 : vector<16x256xf32>
    %c0_11 = arith.constant 0 : index
    %c0_12 = arith.constant 0 : index
    %c0_13 = arith.constant 0 : index
    %c0_14 = arith.constant 0 : index
    %24 = vector.load %arg3[%c0_11, %c0_12, %c0_13, %c0_14] : memref<1x1x16x256xbf16, #tpu.memory_space<vmem>>, vector<1x1x16x256xbf16>
    %25 = vector.shape_cast %24 : vector<1x1x16x256xbf16> to vector<16x256xbf16>
    %26 = arith.extf %25 : vector<16x256xbf16> to vector<16x256xf32>
    %c17_i32_15 = arith.constant 17 : i32
    %27 = tpu.dynamic_rotate %26 by %c17_i32_15 dim 1 : vector<16x256xf32>, i32 -> vector<16x256xf32>
    %c16_i32_16 = arith.constant 16 : i32
    %28 = tpu.dynamic_rotate %26 by %c16_i32_16 dim 1 : vector<16x256xf32>, i32 -> vector<16x256xf32>
    %c15_i32_17 = arith.constant 15 : i32
    %29 = tpu.dynamic_rotate %26 by %c15_i32_17 dim 1 : vector<16x256xf32>, i32 -> vector<16x256xf32>
    %c1_i32_18 = arith.constant 1 : i32
    %30 = tpu.dynamic_rotate %26 by %c1_i32_18 dim 1 : vector<16x256xf32>, i32 -> vector<16x256xf32>
    %c255_i32_19 = arith.constant 255 : i32
    %31 = tpu.dynamic_rotate %26 by %c255_i32_19 dim 1 : vector<16x256xf32>, i32 -> vector<16x256xf32>
    %c241_i32_20 = arith.constant 241 : i32
    %32 = tpu.dynamic_rotate %26 by %c241_i32_20 dim 1 : vector<16x256xf32>, i32 -> vector<16x256xf32>
    %c240_i32_21 = arith.constant 240 : i32
    %33 = tpu.dynamic_rotate %26 by %c240_i32_21 dim 1 : vector<16x256xf32>, i32 -> vector<16x256xf32>
    %c239_i32_22 = arith.constant 239 : i32
    %34 = tpu.dynamic_rotate %26 by %c239_i32_22 dim 1 : vector<16x256xf32>, i32 -> vector<16x256xf32>
    %35 = tpu.concatenate %27, %28, %29, %30, %26, %31, %32, %33, %34 in 0 : vector<16x256xf32>, vector<16x256xf32>, vector<16x256xf32>, vector<16x256xf32>, vector<16x256xf32>, vector<16x256xf32>, vector<16x256xf32>, vector<16x256xf32>, vector<16x256xf32> -> vector<144x256xf32>
    %36 = arith.truncf %35 : vector<144x256xf32> to vector<144x256xbf16>
    %c1 = arith.constant 1 : index
    %c0_23 = arith.constant 0 : index
    %c0_24 = arith.constant 0 : index
    %37 = vector.load %arg5[%c1, %c0_23, %c0_24] : memref<3x16x144xbf16, #tpu.memory_space<vmem>>, vector<1x16x144xbf16>
    %38 = vector.shape_cast %37 : vector<1x16x144xbf16> to vector<16x144xbf16>
    %cst_25 = arith.constant dense<0.000000e+00> : vector<16x256xf32>
    %39 = tpu.matmul %38, %36, %cst_25 {dimension_numbers = #tpu.dot_dimension_numbers<[1], [0], [0], [1], [0, 0, 1, 1], [], []>} : vector<16x144xbf16>, vector<144x256xbf16>, vector<16x256xf32> -> vector<16x256xf32>
    %40 = arith.addf %23, %39 : vector<16x256xf32>
    %c0_26 = arith.constant 0 : index
    %c0_27 = arith.constant 0 : index
    %c0_28 = arith.constant 0 : index
    %c0_29 = arith.constant 0 : index
    %41 = vector.load %arg4[%c0_26, %c0_27, %c0_28, %c0_29] : memref<1x1x16x256xbf16, #tpu.memory_space<vmem>>, vector<1x1x16x256xbf16>
    %42 = vector.shape_cast %41 : vector<1x1x16x256xbf16> to vector<16x256xbf16>
    %43 = arith.extf %42 : vector<16x256xbf16> to vector<16x256xf32>
    %cst_30 = arith.constant 0.000000e+00 : f32
    %44 = vector.broadcast %cst_30 : f32 to vector<16x256xf32>
    %45 = arith.select %4, %43, %44 : vector<16x256xf32>
    %c17_i32_31 = arith.constant 17 : i32
    %46 = tpu.dynamic_rotate %45 by %c17_i32_31 dim 1 : vector<16x256xf32>, i32 -> vector<16x256xf32>
    %c16_i32_32 = arith.constant 16 : i32
    %47 = tpu.dynamic_rotate %45 by %c16_i32_32 dim 1 : vector<16x256xf32>, i32 -> vector<16x256xf32>
    %c15_i32_33 = arith.constant 15 : i32
    %48 = tpu.dynamic_rotate %45 by %c15_i32_33 dim 1 : vector<16x256xf32>, i32 -> vector<16x256xf32>
    %c1_i32_34 = arith.constant 1 : i32
    %49 = tpu.dynamic_rotate %45 by %c1_i32_34 dim 1 : vector<16x256xf32>, i32 -> vector<16x256xf32>
    %c255_i32_35 = arith.constant 255 : i32
    %50 = tpu.dynamic_rotate %45 by %c255_i32_35 dim 1 : vector<16x256xf32>, i32 -> vector<16x256xf32>
    %c241_i32_36 = arith.constant 241 : i32
    %51 = tpu.dynamic_rotate %45 by %c241_i32_36 dim 1 : vector<16x256xf32>, i32 -> vector<16x256xf32>
    %c240_i32_37 = arith.constant 240 : i32
    %52 = tpu.dynamic_rotate %45 by %c240_i32_37 dim 1 : vector<16x256xf32>, i32 -> vector<16x256xf32>
    %c239_i32_38 = arith.constant 239 : i32
    %53 = tpu.dynamic_rotate %45 by %c239_i32_38 dim 1 : vector<16x256xf32>, i32 -> vector<16x256xf32>
    %54 = tpu.concatenate %46, %47, %48, %49, %45, %50, %51, %52, %53 in 0 : vector<16x256xf32>, vector<16x256xf32>, vector<16x256xf32>, vector<16x256xf32>, vector<16x256xf32>, vector<16x256xf32>, vector<16x256xf32>, vector<16x256xf32>, vector<16x256xf32> -> vector<144x256xf32>
    %55 = arith.truncf %54 : vector<144x256xf32> to vector<144x256xbf16>
    %c2 = arith.constant 2 : index
    %c0_39 = arith.constant 0 : index
    %c0_40 = arith.constant 0 : index
    %56 = vector.load %arg5[%c2, %c0_39, %c0_40] : memref<3x16x144xbf16, #tpu.memory_space<vmem>>, vector<1x16x144xbf16>
    %57 = vector.shape_cast %56 : vector<1x16x144xbf16> to vector<16x144xbf16>
    %cst_41 = arith.constant dense<0.000000e+00> : vector<16x256xf32>
    %58 = tpu.matmul %57, %55, %cst_41 {dimension_numbers = #tpu.dot_dimension_numbers<[1], [0], [0], [1], [0, 0, 1, 1], [], []>} : vector<16x144xbf16>, vector<144x256xbf16>, vector<16x256xf32> -> vector<16x256xf32>
    %59 = arith.addf %40, %58 : vector<16x256xf32>
    %c0_42 = arith.constant 0 : index
    %c0_43 = arith.constant 0 : index
    %60 = vector.load %arg6[%c0_42, %c0_43] : memref<1x256xf32, #tpu.memory_space<vmem>>, vector<1x256xf32>
    %61 = vector.broadcast %60 : vector<1x256xf32> to vector<16x256xf32>
    %62 = arith.mulf %59, %61 : vector<16x256xf32>
    %63 = arith.truncf %62 : vector<16x256xf32> to vector<16x256xbf16>
    %64 = vector.shape_cast %63 : vector<16x256xbf16> to vector<1x1x16x256xbf16>
    %c0_44 = arith.constant 0 : index
    %c0_45 = arith.constant 0 : index
    %c0_46 = arith.constant 0 : index
    %c0_47 = arith.constant 0 : index
    %65 = vector.load %arg8[%c0_44, %c0_45, %c0_46, %c0_47] : memref<1x1x16x256xbf16, #tpu.memory_space<vmem>>, vector<1x1x16x256xbf16>
    tpu.vector_store %arg8[%c0_44, %c0_45, %c0_46, %c0_47], %64 {strides = array<i32>} : memref<1x1x16x256xbf16, #tpu.memory_space<vmem>>, vector<1x1x16x256xbf16>,
    %cst_48 = arith.constant dense<0.000000e+00> : vector<16xf32>
    %66 = vector.multi_reduction <add>, %62, %cst_48 [1] : vector<16x256xf32> to vector<16xf32>
    %67 = vector.shape_cast %66 : vector<16xf32> to vector<16x1xf32>
    %68 = arith.mulf %62, %62 : vector<16x256xf32>
    %cst_49 = arith.constant dense<0.000000e+00> : vector<16xf32>
    %69 = vector.multi_reduction <add>, %68, %cst_49 [1] : vector<16x256xf32> to vector<16xf32>
    %70 = vector.shape_cast %69 : vector<16xf32> to vector<16x1xf32>
    %71 = tpu.concatenate %67, %70 in 1 : vector<16x1xf32>, vector<16x1xf32> -> vector<16x2xf32>
    %72 = vector.shape_cast %71 : vector<16x2xf32> to vector<1x1x16x2xf32>
    %c0_50 = arith.constant 0 : index
    %c0_51 = arith.constant 0 : index
    %c0_52 = arith.constant 0 : index
    %c0_53 = arith.constant 0 : index
    %73 = vector.load %arg9[%c0_50, %c0_51, %c0_52, %c0_53] : memref<1x1x16x2xf32, #tpu.memory_space<vmem>>, vector<1x1x16x2xf32>
    tpu.vector_store %arg9[%c0_50, %c0_51, %c0_52, %c0_53], %72 {strides = array<i32>} : memref<1x1x16x2xf32, #tpu.memory_space<vmem>>, vector<1x1x16x2xf32>,
    return
  }
  func.func @transform_0(%arg0: i32, %arg1: i32) -> (i32, i32, i32, i32) {
    %c1_i32 = arith.constant 1 : i32
    %0 = arith.subi %arg1, %c1_i32 : i32
    %c0_i32 = arith.constant 0 : i32
    %1 = arith.maxsi %0, %c0_i32 : i32
    %c0_i32_0 = arith.constant 0 : i32
    %c0_i32_1 = arith.constant 0 : i32
    %c0_i32_2 = arith.constant 0 : i32
    return %arg0, %1, %c0_i32_0, %c0_i32_1 : i32, i32, i32, i32
  }
  func.func @transform_1(%arg0: i32, %arg1: i32) -> (i32, i32, i32, i32) {
    %c0_i32 = arith.constant 0 : i32
    %c0_i32_0 = arith.constant 0 : i32
    %c0_i32_1 = arith.constant 0 : i32
    return %arg0, %arg1, %c0_i32, %c0_i32_0 : i32, i32, i32, i32
  }
  func.func @transform_2(%arg0: i32, %arg1: i32) -> (i32, i32, i32, i32) {
    %c1_i32 = arith.constant 1 : i32
    %0 = arith.addi %arg1, %c1_i32 : i32
    %c3_i32 = arith.constant 3 : i32
    %1 = arith.minsi %0, %c3_i32 : i32
    %c0_i32 = arith.constant 0 : i32
    %c0_i32_0 = arith.constant 0 : i32
    %c0_i32_1 = arith.constant 0 : i32
    return %arg0, %1, %c0_i32, %c0_i32_0 : i32, i32, i32, i32
  }
  func.func @transform_3(%arg0: i32, %arg1: i32) -> (i32, i32, i32) {
    %c0_i32 = arith.constant 0 : i32
    %c0_i32_0 = arith.constant 0 : i32
    %c0_i32_1 = arith.constant 0 : i32
    %c0_i32_2 = arith.constant 0 : i32
    return %c0_i32, %c0_i32_0, %c0_i32_1 : i32, i32, i32
  }
  func.func @transform_4(%arg0: i32, %arg1: i32) -> (i32, i32) {
    %c0_i32 = arith.constant 0 : i32
    %c0_i32_0 = arith.constant 0 : i32
    %c0_i32_1 = arith.constant 0 : i32
    return %c0_i32, %c0_i32_0 : i32, i32
  }
  func.func @transform_5(%arg0: i32, %arg1: i32) -> (i32, i32, i32, i32) {
    %c0_i32 = arith.constant 0 : i32
    %c0_i32_0 = arith.constant 0 : i32
    %c0_i32_1 = arith.constant 0 : i32
    return %arg0, %arg1, %c0_i32, %c0_i32_0 : i32, i32, i32, i32
  }
  func.func @transform_6(%arg0: i32, %arg1: i32) -> (i32, i32, i32, i32) {
    %c0_i32 = arith.constant 0 : i32
    %c0_i32_0 = arith.constant 0 : i32
    %c0_i32_1 = arith.constant 0 : i32
    return %arg0, %arg1, %c0_i32, %c0_i32_0 : i32, i32, i32, i32
  }
  func.func @transform_7(%arg0: i32, %arg1: i32) -> (i32, i32, i32, i32) {
    %c0_i32 = arith.constant 0 : i32
    %c0_i32_0 = arith.constant 0 : i32
    %c0_i32_1 = arith.constant 0 : i32
    return %arg0, %arg1, %c0_i32, %c0_i32_0 : i32, i32, i32, i32
  }
}

module attributes {stable_mosaic.version = 11 : i64} {
  func.func @_bn_act_kernel(%arg0: i32, %arg1: i32, %arg2: memref<1x1x16x256xbf16, #tpu.memory_space<vmem>>, %arg3: memref<1x1x16x256xbf16, #tpu.memory_space<vmem>>, %arg4: memref<1x16x1xf32, #tpu.memory_space<vmem>>, %arg5: memref<1x16x1xf32, #tpu.memory_space<vmem>>, %arg6: memref<1x16x1xf32, #tpu.memory_space<vmem>>, %arg7: memref<1x16x1xf32, #tpu.memory_space<vmem>>, %arg8: memref<1x256xf32, #tpu.memory_space<vmem>>, %arg9: memref<1x1x16x256xbf16, #tpu.memory_space<vmem>>, %arg10: memref<1x1x16x256xbf16, #tpu.memory_space<vmem>>) attributes {dimension_semantics = [#tpu.dimension_semantics<parallel>, #tpu.dimension_semantics<parallel>], iteration_bounds = array<i64: 2, 4>, scalar_prefetch = 0 : i64, scratch_operands = 0 : i64, tpu.core_type = #tpu.core_type<tc>, window_params = [{transform_indices = @transform_0, window_bounds = array<i64: 1, 1, 16, 256>}, {transform_indices = @transform_1, window_bounds = array<i64: 1, 1, 16, 256>}, {pipeline_mode = #tpu.pipeline_mode<synchronous>, transform_indices = @transform_2, window_bounds = array<i64: 1, 16, 1>}, {pipeline_mode = #tpu.pipeline_mode<synchronous>, transform_indices = @transform_3, window_bounds = array<i64: 1, 16, 1>}, {pipeline_mode = #tpu.pipeline_mode<synchronous>, transform_indices = @transform_4, window_bounds = array<i64: 1, 16, 1>}, {pipeline_mode = #tpu.pipeline_mode<synchronous>, transform_indices = @transform_5, window_bounds = array<i64: 1, 16, 1>}, {pipeline_mode = #tpu.pipeline_mode<synchronous>, transform_indices = @transform_6, window_bounds = array<i64: 1, 256>}, {transform_indices = @transform_7, window_bounds = array<i64: 1, 1, 16, 256>}, {transform_indices = @transform_8, window_bounds = array<i64: 1, 1, 16, 256>}]} {
    %c0 = arith.constant 0 : index
    %c0_0 = arith.constant 0 : index
    %0 = vector.load %arg8[%c0, %c0_0] : memref<1x256xf32, #tpu.memory_space<vmem>>, vector<1x256xf32>
    %c0_1 = arith.constant 0 : index
    %c0_2 = arith.constant 0 : index
    %c0_3 = arith.constant 0 : index
    %c0_4 = arith.constant 0 : index
    %1 = vector.load %arg2[%c0_1, %c0_2, %c0_3, %c0_4] : memref<1x1x16x256xbf16, #tpu.memory_space<vmem>>, vector<1x1x16x256xbf16>
    %2 = vector.shape_cast %1 : vector<1x1x16x256xbf16> to vector<16x256xbf16>
    %3 = arith.extf %2 : vector<16x256xbf16> to vector<16x256xf32>
    %c0_5 = arith.constant 0 : index
    %c0_6 = arith.constant 0 : index
    %c0_7 = arith.constant 0 : index
    %4 = vector.load %arg4[%c0_5, %c0_6, %c0_7] : memref<1x16x1xf32, #tpu.memory_space<vmem>>, vector<1x16x1xf32>
    %5 = vector.shape_cast %4 : vector<1x16x1xf32> to vector<16x1xf32>
    %c0_8 = arith.constant 0 : index
    %c0_9 = arith.constant 0 : index
    %c0_10 = arith.constant 0 : index
    %6 = vector.load %arg5[%c0_8, %c0_9, %c0_10] : memref<1x16x1xf32, #tpu.memory_space<vmem>>, vector<1x16x1xf32>
    %7 = vector.shape_cast %6 : vector<1x16x1xf32> to vector<16x1xf32>
    %8 = vector.broadcast %5 : vector<16x1xf32> to vector<16x256xf32>
    %9 = arith.mulf %3, %8 : vector<16x256xf32>
    %10 = vector.broadcast %7 : vector<16x1xf32> to vector<16x256xf32>
    %11 = arith.addf %9, %10 : vector<16x256xf32>
    %cst = arith.constant 0.000000e+00 : f32
    %12 = vector.broadcast %cst : f32 to vector<16x256xf32>
    %13 = arith.cmpf oge, %11, %12 : vector<16x256xf32>
    %cst_11 = arith.constant 0.00999999977 : f32
    %14 = vector.broadcast %cst_11 : f32 to vector<16x256xf32>
    %15 = arith.mulf %14, %11 : vector<16x256xf32>
    %16 = arith.select %13, %11, %15 : vector<16x256xi1>, vector<16x256xf32>
    %17 = vector.broadcast %0 : vector<1x256xf32> to vector<16x256xf32>
    %18 = arith.mulf %16, %17 : vector<16x256xf32>
    %19 = arith.truncf %18 : vector<16x256xf32> to vector<16x256xbf16>
    %20 = vector.shape_cast %19 : vector<16x256xbf16> to vector<1x1x16x256xbf16>
    %c0_12 = arith.constant 0 : index
    %c0_13 = arith.constant 0 : index
    %c0_14 = arith.constant 0 : index
    %c0_15 = arith.constant 0 : index
    %21 = vector.load %arg9[%c0_12, %c0_13, %c0_14, %c0_15] : memref<1x1x16x256xbf16, #tpu.memory_space<vmem>>, vector<1x1x16x256xbf16>
    tpu.vector_store %arg9[%c0_12, %c0_13, %c0_14, %c0_15], %20 {strides = array<i32>} : memref<1x1x16x256xbf16, #tpu.memory_space<vmem>>, vector<1x1x16x256xbf16>,
    %c0_16 = arith.constant 0 : index
    %c0_17 = arith.constant 0 : index
    %c0_18 = arith.constant 0 : index
    %c0_19 = arith.constant 0 : index
    %22 = vector.load %arg3[%c0_16, %c0_17, %c0_18, %c0_19] : memref<1x1x16x256xbf16, #tpu.memory_space<vmem>>, vector<1x1x16x256xbf16>
    %23 = vector.shape_cast %22 : vector<1x1x16x256xbf16> to vector<16x256xbf16>
    %24 = arith.extf %23 : vector<16x256xbf16> to vector<16x256xf32>
    %c0_20 = arith.constant 0 : index
    %c0_21 = arith.constant 0 : index
    %c0_22 = arith.constant 0 : index
    %25 = vector.load %arg6[%c0_20, %c0_21, %c0_22] : memref<1x16x1xf32, #tpu.memory_space<vmem>>, vector<1x16x1xf32>
    %26 = vector.shape_cast %25 : vector<1x16x1xf32> to vector<16x1xf32>
    %c0_23 = arith.constant 0 : index
    %c0_24 = arith.constant 0 : index
    %c0_25 = arith.constant 0 : index
    %27 = vector.load %arg7[%c0_23, %c0_24, %c0_25] : memref<1x16x1xf32, #tpu.memory_space<vmem>>, vector<1x16x1xf32>
    %28 = vector.shape_cast %27 : vector<1x16x1xf32> to vector<16x1xf32>
    %29 = vector.broadcast %26 : vector<16x1xf32> to vector<16x256xf32>
    %30 = arith.mulf %24, %29 : vector<16x256xf32>
    %31 = vector.broadcast %28 : vector<16x1xf32> to vector<16x256xf32>
    %32 = arith.addf %30, %31 : vector<16x256xf32>
    %cst_26 = arith.constant 0.000000e+00 : f32
    %33 = vector.broadcast %cst_26 : f32 to vector<16x256xf32>
    %34 = arith.cmpf oge, %32, %33 : vector<16x256xf32>
    %cst_27 = arith.constant 0.00999999977 : f32
    %35 = vector.broadcast %cst_27 : f32 to vector<16x256xf32>
    %36 = arith.mulf %35, %32 : vector<16x256xf32>
    %37 = arith.select %34, %32, %36 : vector<16x256xi1>, vector<16x256xf32>
    %38 = vector.broadcast %0 : vector<1x256xf32> to vector<16x256xf32>
    %39 = arith.mulf %37, %38 : vector<16x256xf32>
    %40 = arith.truncf %39 : vector<16x256xf32> to vector<16x256xbf16>
    %41 = vector.shape_cast %40 : vector<16x256xbf16> to vector<1x1x16x256xbf16>
    %c0_28 = arith.constant 0 : index
    %c0_29 = arith.constant 0 : index
    %c0_30 = arith.constant 0 : index
    %c0_31 = arith.constant 0 : index
    %42 = vector.load %arg10[%c0_28, %c0_29, %c0_30, %c0_31] : memref<1x1x16x256xbf16, #tpu.memory_space<vmem>>, vector<1x1x16x256xbf16>
    tpu.vector_store %arg10[%c0_28, %c0_29, %c0_30, %c0_31], %41 {strides = array<i32>} : memref<1x1x16x256xbf16, #tpu.memory_space<vmem>>, vector<1x1x16x256xbf16>,
    return
  }
  func.func @transform_0(%arg0: i32, %arg1: i32) -> (i32, i32, i32, i32) {
    %c0_i32 = arith.constant 0 : i32
    %c0_i32_0 = arith.constant 0 : i32
    %c0_i32_1 = arith.constant 0 : i32
    return %arg0, %arg1, %c0_i32, %c0_i32_0 : i32, i32, i32, i32
  }
  func.func @transform_1(%arg0: i32, %arg1: i32) -> (i32, i32, i32, i32) {
    %c0_i32 = arith.constant 0 : i32
    %c0_i32_0 = arith.constant 0 : i32
    %c0_i32_1 = arith.constant 0 : i32
    return %arg0, %arg1, %c0_i32, %c0_i32_0 : i32, i32, i32, i32
  }
  func.func @transform_2(%arg0: i32, %arg1: i32) -> (i32, i32, i32) {
    %c0_i32 = arith.constant 0 : i32
    %c0_i32_0 = arith.constant 0 : i32
    %c0_i32_1 = arith.constant 0 : i32
    %c0_i32_2 = arith.constant 0 : i32
    return %c0_i32, %c0_i32_0, %c0_i32_1 : i32, i32, i32
  }
  func.func @transform_3(%arg0: i32, %arg1: i32) -> (i32, i32, i32) {
    %c0_i32 = arith.constant 0 : i32
    %c0_i32_0 = arith.constant 0 : i32
    %c0_i32_1 = arith.constant 0 : i32
    %c0_i32_2 = arith.constant 0 : i32
    return %c0_i32, %c0_i32_0, %c0_i32_1 : i32, i32, i32
  }
  func.func @transform_4(%arg0: i32, %arg1: i32) -> (i32, i32, i32) {
    %c0_i32 = arith.constant 0 : i32
    %c0_i32_0 = arith.constant 0 : i32
    %c0_i32_1 = arith.constant 0 : i32
    %c0_i32_2 = arith.constant 0 : i32
    return %c0_i32, %c0_i32_0, %c0_i32_1 : i32, i32, i32
  }
  func.func @transform_5(%arg0: i32, %arg1: i32) -> (i32, i32, i32) {
    %c0_i32 = arith.constant 0 : i32
    %c0_i32_0 = arith.constant 0 : i32
    %c0_i32_1 = arith.constant 0 : i32
    %c0_i32_2 = arith.constant 0 : i32
    return %c0_i32, %c0_i32_0, %c0_i32_1 : i32, i32, i32
  }
  func.func @transform_6(%arg0: i32, %arg1: i32) -> (i32, i32) {
    %c0_i32 = arith.constant 0 : i32
    %c0_i32_0 = arith.constant 0 : i32
    %c0_i32_1 = arith.constant 0 : i32
    return %c0_i32, %c0_i32_0 : i32, i32
  }
  func.func @transform_7(%arg0: i32, %arg1: i32) -> (i32, i32, i32, i32) {
    %c0_i32 = arith.constant 0 : i32
    %c0_i32_0 = arith.constant 0 : i32
    %c0_i32_1 = arith.constant 0 : i32
    return %arg0, %arg1, %c0_i32, %c0_i32_0 : i32, i32, i32, i32
  }
  func.func @transform_8(%arg0: i32, %arg1: i32) -> (i32, i32, i32, i32) {
    %c0_i32 = arith.constant 0 : i32
    %c0_i32_0 = arith.constant 0 : i32
    %c0_i32_1 = arith.constant 0 : i32
    return %arg0, %arg1, %c0_i32, %c0_i32_0 : i32, i32, i32, i32
  }
}

module attributes {stable_mosaic.version = 11 : i64} {
  func.func @_conv_kernel(%arg0: i32, %arg1: i32, %arg2: memref<1x1x16x256xbf16, #tpu.memory_space<vmem>>, %arg3: memref<1x1x16x256xbf16, #tpu.memory_space<vmem>>, %arg4: memref<1x1x16x256xbf16, #tpu.memory_space<vmem>>, %arg5: memref<3x16x144xbf16, #tpu.memory_space<vmem>>, %arg6: memref<1x256xf32, #tpu.memory_space<vmem>>, %arg7: memref<1x1x16x256xbf16, #tpu.memory_space<vmem>>, %arg8: memref<1x1x16x256xbf16, #tpu.memory_space<vmem>>) attributes {dimension_semantics = [#tpu.dimension_semantics<parallel>, #tpu.dimension_semantics<parallel>], iteration_bounds = array<i64: 2, 4>, scalar_prefetch = 0 : i64, scratch_operands = 0 : i64, tpu.core_type = #tpu.core_type<tc>, window_params = [{transform_indices = @transform_0, window_bounds = array<i64: 1, 1, 16, 256>}, {transform_indices = @transform_1, window_bounds = array<i64: 1, 1, 16, 256>}, {transform_indices = @transform_2, window_bounds = array<i64: 1, 1, 16, 256>}, {pipeline_mode = #tpu.pipeline_mode<synchronous>, transform_indices = @transform_3, window_bounds = array<i64: 3, 16, 144>}, {pipeline_mode = #tpu.pipeline_mode<synchronous>, transform_indices = @transform_4, window_bounds = array<i64: 1, 256>}, {transform_indices = @transform_5, window_bounds = array<i64: 1, 1, 16, 256>}, {transform_indices = @transform_6, window_bounds = array<i64: 1, 1, 16, 256>}]} {
    %c0 = arith.constant 0 : index
    %c0_0 = arith.constant 0 : index
    %c0_1 = arith.constant 0 : index
    %c0_2 = arith.constant 0 : index
    %0 = vector.load %arg7[%c0, %c0_0, %c0_1, %c0_2] : memref<1x1x16x256xbf16, #tpu.memory_space<vmem>>, vector<1x1x16x256xbf16>
    %1 = vector.shape_cast %0 : vector<1x1x16x256xbf16> to vector<16x256xbf16>
    %2 = arith.extf %1 : vector<16x256xbf16> to vector<16x256xf32>
    %c0_i32 = arith.constant 0 : i32
    %3 = arith.cmpi sgt, %arg1, %c0_i32 : i32
    %c3_i32 = arith.constant 3 : i32
    %4 = arith.cmpi slt, %arg1, %c3_i32 : i32
    %c0_3 = arith.constant 0 : index
    %c0_4 = arith.constant 0 : index
    %c0_5 = arith.constant 0 : index
    %c0_6 = arith.constant 0 : index
    %5 = vector.load %arg2[%c0_3, %c0_4, %c0_5, %c0_6] : memref<1x1x16x256xbf16, #tpu.memory_space<vmem>>, vector<1x1x16x256xbf16>
    %6 = vector.shape_cast %5 : vector<1x1x16x256xbf16> to vector<16x256xbf16>
    %7 = arith.extf %6 : vector<16x256xbf16> to vector<16x256xf32>
    %cst = arith.constant 0.000000e+00 : f32
    %8 = vector.broadcast %cst : f32 to vector<16x256xf32>
    %9 = arith.select %3, %7, %8 : vector<16x256xf32>
    %c17_i32 = arith.constant 17 : i32
    %10 = tpu.dynamic_rotate %9 by %c17_i32 dim 1 : vector<16x256xf32>, i32 -> vector<16x256xf32>
    %c16_i32 = arith.constant 16 : i32
    %11 = tpu.dynamic_rotate %9 by %c16_i32 dim 1 : vector<16x256xf32>, i32 -> vector<16x256xf32>
    %c15_i32 = arith.constant 15 : i32
    %12 = tpu.dynamic_rotate %9 by %c15_i32 dim 1 : vector<16x256xf32>, i32 -> vector<16x256xf32>
    %c1_i32 = arith.constant 1 : i32
    %13 = tpu.dynamic_rotate %9 by %c1_i32 dim 1 : vector<16x256xf32>, i32 -> vector<16x256xf32>
    %c255_i32 = arith.constant 255 : i32
    %14 = tpu.dynamic_rotate %9 by %c255_i32 dim 1 : vector<16x256xf32>, i32 -> vector<16x256xf32>
    %c241_i32 = arith.constant 241 : i32
    %15 = tpu.dynamic_rotate %9 by %c241_i32 dim 1 : vector<16x256xf32>, i32 -> vector<16x256xf32>
    %c240_i32 = arith.constant 240 : i32
    %16 = tpu.dynamic_rotate %9 by %c240_i32 dim 1 : vector<16x256xf32>, i32 -> vector<16x256xf32>
    %c239_i32 = arith.constant 239 : i32
    %17 = tpu.dynamic_rotate %9 by %c239_i32 dim 1 : vector<16x256xf32>, i32 -> vector<16x256xf32>
    %18 = tpu.concatenate %10, %11, %12, %13, %9, %14, %15, %16, %17 in 0 : vector<16x256xf32>, vector<16x256xf32>, vector<16x256xf32>, vector<16x256xf32>, vector<16x256xf32>, vector<16x256xf32>, vector<16x256xf32>, vector<16x256xf32>, vector<16x256xf32> -> vector<144x256xf32>
    %19 = arith.truncf %18 : vector<144x256xf32> to vector<144x256xbf16>
    %c0_7 = arith.constant 0 : index
    %c0_8 = arith.constant 0 : index
    %c0_9 = arith.constant 0 : index
    %20 = vector.load %arg5[%c0_7, %c0_8, %c0_9] : memref<3x16x144xbf16, #tpu.memory_space<vmem>>, vector<1x16x144xbf16>
    %21 = vector.shape_cast %20 : vector<1x16x144xbf16> to vector<16x144xbf16>
    %cst_10 = arith.constant dense<0.000000e+00> : vector<16x256xf32>
    %22 = tpu.matmul %21, %19, %cst_10 {dimension_numbers = #tpu.dot_dimension_numbers<[1], [0], [0], [1], [0, 0, 1, 1], [], []>} : vector<16x144xbf16>, vector<144x256xbf16>, vector<16x256xf32> -> vector<16x256xf32>
    %23 = arith.addf %2, %22 : vector<16x256xf32>
    %c0_11 = arith.constant 0 : index
    %c0_12 = arith.constant 0 : index
    %c0_13 = arith.constant 0 : index
    %c0_14 = arith.constant 0 : index
    %24 = vector.load %arg3[%c0_11, %c0_12, %c0_13, %c0_14] : memref<1x1x16x256xbf16, #tpu.memory_space<vmem>>, vector<1x1x16x256xbf16>
    %25 = vector.shape_cast %24 : vector<1x1x16x256xbf16> to vector<16x256xbf16>
    %26 = arith.extf %25 : vector<16x256xbf16> to vector<16x256xf32>
    %c17_i32_15 = arith.constant 17 : i32
    %27 = tpu.dynamic_rotate %26 by %c17_i32_15 dim 1 : vector<16x256xf32>, i32 -> vector<16x256xf32>
    %c16_i32_16 = arith.constant 16 : i32
    %28 = tpu.dynamic_rotate %26 by %c16_i32_16 dim 1 : vector<16x256xf32>, i32 -> vector<16x256xf32>
    %c15_i32_17 = arith.constant 15 : i32
    %29 = tpu.dynamic_rotate %26 by %c15_i32_17 dim 1 : vector<16x256xf32>, i32 -> vector<16x256xf32>
    %c1_i32_18 = arith.constant 1 : i32
    %30 = tpu.dynamic_rotate %26 by %c1_i32_18 dim 1 : vector<16x256xf32>, i32 -> vector<16x256xf32>
    %c255_i32_19 = arith.constant 255 : i32
    %31 = tpu.dynamic_rotate %26 by %c255_i32_19 dim 1 : vector<16x256xf32>, i32 -> vector<16x256xf32>
    %c241_i32_20 = arith.constant 241 : i32
    %32 = tpu.dynamic_rotate %26 by %c241_i32_20 dim 1 : vector<16x256xf32>, i32 -> vector<16x256xf32>
    %c240_i32_21 = arith.constant 240 : i32
    %33 = tpu.dynamic_rotate %26 by %c240_i32_21 dim 1 : vector<16x256xf32>, i32 -> vector<16x256xf32>
    %c239_i32_22 = arith.constant 239 : i32
    %34 = tpu.dynamic_rotate %26 by %c239_i32_22 dim 1 : vector<16x256xf32>, i32 -> vector<16x256xf32>
    %35 = tpu.concatenate %27, %28, %29, %30, %26, %31, %32, %33, %34 in 0 : vector<16x256xf32>, vector<16x256xf32>, vector<16x256xf32>, vector<16x256xf32>, vector<16x256xf32>, vector<16x256xf32>, vector<16x256xf32>, vector<16x256xf32>, vector<16x256xf32> -> vector<144x256xf32>
    %36 = arith.truncf %35 : vector<144x256xf32> to vector<144x256xbf16>
    %c1 = arith.constant 1 : index
    %c0_23 = arith.constant 0 : index
    %c0_24 = arith.constant 0 : index
    %37 = vector.load %arg5[%c1, %c0_23, %c0_24] : memref<3x16x144xbf16, #tpu.memory_space<vmem>>, vector<1x16x144xbf16>
    %38 = vector.shape_cast %37 : vector<1x16x144xbf16> to vector<16x144xbf16>
    %cst_25 = arith.constant dense<0.000000e+00> : vector<16x256xf32>
    %39 = tpu.matmul %38, %36, %cst_25 {dimension_numbers = #tpu.dot_dimension_numbers<[1], [0], [0], [1], [0, 0, 1, 1], [], []>} : vector<16x144xbf16>, vector<144x256xbf16>, vector<16x256xf32> -> vector<16x256xf32>
    %40 = arith.addf %23, %39 : vector<16x256xf32>
    %c0_26 = arith.constant 0 : index
    %c0_27 = arith.constant 0 : index
    %c0_28 = arith.constant 0 : index
    %c0_29 = arith.constant 0 : index
    %41 = vector.load %arg4[%c0_26, %c0_27, %c0_28, %c0_29] : memref<1x1x16x256xbf16, #tpu.memory_space<vmem>>, vector<1x1x16x256xbf16>
    %42 = vector.shape_cast %41 : vector<1x1x16x256xbf16> to vector<16x256xbf16>
    %43 = arith.extf %42 : vector<16x256xbf16> to vector<16x256xf32>
    %cst_30 = arith.constant 0.000000e+00 : f32
    %44 = vector.broadcast %cst_30 : f32 to vector<16x256xf32>
    %45 = arith.select %4, %43, %44 : vector<16x256xf32>
    %c17_i32_31 = arith.constant 17 : i32
    %46 = tpu.dynamic_rotate %45 by %c17_i32_31 dim 1 : vector<16x256xf32>, i32 -> vector<16x256xf32>
    %c16_i32_32 = arith.constant 16 : i32
    %47 = tpu.dynamic_rotate %45 by %c16_i32_32 dim 1 : vector<16x256xf32>, i32 -> vector<16x256xf32>
    %c15_i32_33 = arith.constant 15 : i32
    %48 = tpu.dynamic_rotate %45 by %c15_i32_33 dim 1 : vector<16x256xf32>, i32 -> vector<16x256xf32>
    %c1_i32_34 = arith.constant 1 : i32
    %49 = tpu.dynamic_rotate %45 by %c1_i32_34 dim 1 : vector<16x256xf32>, i32 -> vector<16x256xf32>
    %c255_i32_35 = arith.constant 255 : i32
    %50 = tpu.dynamic_rotate %45 by %c255_i32_35 dim 1 : vector<16x256xf32>, i32 -> vector<16x256xf32>
    %c241_i32_36 = arith.constant 241 : i32
    %51 = tpu.dynamic_rotate %45 by %c241_i32_36 dim 1 : vector<16x256xf32>, i32 -> vector<16x256xf32>
    %c240_i32_37 = arith.constant 240 : i32
    %52 = tpu.dynamic_rotate %45 by %c240_i32_37 dim 1 : vector<16x256xf32>, i32 -> vector<16x256xf32>
    %c239_i32_38 = arith.constant 239 : i32
    %53 = tpu.dynamic_rotate %45 by %c239_i32_38 dim 1 : vector<16x256xf32>, i32 -> vector<16x256xf32>
    %54 = tpu.concatenate %46, %47, %48, %49, %45, %50, %51, %52, %53 in 0 : vector<16x256xf32>, vector<16x256xf32>, vector<16x256xf32>, vector<16x256xf32>, vector<16x256xf32>, vector<16x256xf32>, vector<16x256xf32>, vector<16x256xf32>, vector<16x256xf32> -> vector<144x256xf32>
    %55 = arith.truncf %54 : vector<144x256xf32> to vector<144x256xbf16>
    %c2 = arith.constant 2 : index
    %c0_39 = arith.constant 0 : index
    %c0_40 = arith.constant 0 : index
    %56 = vector.load %arg5[%c2, %c0_39, %c0_40] : memref<3x16x144xbf16, #tpu.memory_space<vmem>>, vector<1x16x144xbf16>
    %57 = vector.shape_cast %56 : vector<1x16x144xbf16> to vector<16x144xbf16>
    %cst_41 = arith.constant dense<0.000000e+00> : vector<16x256xf32>
    %58 = tpu.matmul %57, %55, %cst_41 {dimension_numbers = #tpu.dot_dimension_numbers<[1], [0], [0], [1], [0, 0, 1, 1], [], []>} : vector<16x144xbf16>, vector<144x256xbf16>, vector<16x256xf32> -> vector<16x256xf32>
    %59 = arith.addf %40, %58 : vector<16x256xf32>
    %c0_42 = arith.constant 0 : index
    %c0_43 = arith.constant 0 : index
    %60 = vector.load %arg6[%c0_42, %c0_43] : memref<1x256xf32, #tpu.memory_space<vmem>>, vector<1x256xf32>
    %61 = vector.broadcast %60 : vector<1x256xf32> to vector<16x256xf32>
    %62 = arith.mulf %59, %61 : vector<16x256xf32>
    %63 = arith.truncf %62 : vector<16x256xf32> to vector<16x256xbf16>
    %64 = vector.shape_cast %63 : vector<16x256xbf16> to vector<1x1x16x256xbf16>
    %c0_44 = arith.constant 0 : index
    %c0_45 = arith.constant 0 : index
    %c0_46 = arith.constant 0 : index
    %c0_47 = arith.constant 0 : index
    %65 = vector.load %arg8[%c0_44, %c0_45, %c0_46, %c0_47] : memref<1x1x16x256xbf16, #tpu.memory_space<vmem>>, vector<1x1x16x256xbf16>
    tpu.vector_store %arg8[%c0_44, %c0_45, %c0_46, %c0_47], %64 {strides = array<i32>} : memref<1x1x16x256xbf16, #tpu.memory_space<vmem>>, vector<1x1x16x256xbf16>,
    return
  }
  func.func @transform_0(%arg0: i32, %arg1: i32) -> (i32, i32, i32, i32) {
    %c1_i32 = arith.constant 1 : i32
    %0 = arith.subi %arg1, %c1_i32 : i32
    %c0_i32 = arith.constant 0 : i32
    %1 = arith.maxsi %0, %c0_i32 : i32
    %c0_i32_0 = arith.constant 0 : i32
    %c0_i32_1 = arith.constant 0 : i32
    %c0_i32_2 = arith.constant 0 : i32
    return %arg0, %1, %c0_i32_0, %c0_i32_1 : i32, i32, i32, i32
  }
  func.func @transform_1(%arg0: i32, %arg1: i32) -> (i32, i32, i32, i32) {
    %c0_i32 = arith.constant 0 : i32
    %c0_i32_0 = arith.constant 0 : i32
    %c0_i32_1 = arith.constant 0 : i32
    return %arg0, %arg1, %c0_i32, %c0_i32_0 : i32, i32, i32, i32
  }
  func.func @transform_2(%arg0: i32, %arg1: i32) -> (i32, i32, i32, i32) {
    %c1_i32 = arith.constant 1 : i32
    %0 = arith.addi %arg1, %c1_i32 : i32
    %c3_i32 = arith.constant 3 : i32
    %1 = arith.minsi %0, %c3_i32 : i32
    %c0_i32 = arith.constant 0 : i32
    %c0_i32_0 = arith.constant 0 : i32
    %c0_i32_1 = arith.constant 0 : i32
    return %arg0, %1, %c0_i32, %c0_i32_0 : i32, i32, i32, i32
  }
  func.func @transform_3(%arg0: i32, %arg1: i32) -> (i32, i32, i32) {
    %c0_i32 = arith.constant 0 : i32
    %c0_i32_0 = arith.constant 0 : i32
    %c0_i32_1 = arith.constant 0 : i32
    %c0_i32_2 = arith.constant 0 : i32
    return %c0_i32, %c0_i32_0, %c0_i32_1 : i32, i32, i32
  }
  func.func @transform_4(%arg0: i32, %arg1: i32) -> (i32, i32) {
    %c0_i32 = arith.constant 0 : i32
    %c0_i32_0 = arith.constant 0 : i32
    %c0_i32_1 = arith.constant 0 : i32
    return %c0_i32, %c0_i32_0 : i32, i32
  }
  func.func @transform_5(%arg0: i32, %arg1: i32) -> (i32, i32, i32, i32) {
    %c0_i32 = arith.constant 0 : i32
    %c0_i32_0 = arith.constant 0 : i32
    %c0_i32_1 = arith.constant 0 : i32
    return %arg0, %arg1, %c0_i32, %c0_i32_0 : i32, i32, i32, i32
  }
  func.func @transform_6(%arg0: i32, %arg1: i32) -> (i32, i32, i32, i32) {
    %c0_i32 = arith.constant 0 : i32
    %c0_i32_0 = arith.constant 0 : i32
    %c0_i32_1 = arith.constant 0 : i32
    return %arg0, %arg1, %c0_i32, %c0_i32_0 : i32, i32, i32, i32
  }
}

module attributes {stable_mosaic.version = 11 : i64} {
  func.func @_conv_kernel(%arg0: i32, %arg1: i32, %arg2: memref<1x1x16x256xbf16, #tpu.memory_space<vmem>>, %arg3: memref<1x1x16x256xbf16, #tpu.memory_space<vmem>>, %arg4: memref<1x1x16x256xbf16, #tpu.memory_space<vmem>>, %arg5: memref<3x16x144xbf16, #tpu.memory_space<vmem>>, %arg6: memref<1x256xf32, #tpu.memory_space<vmem>>, %arg7: memref<1x1x16x256xbf16, #tpu.memory_space<vmem>>, %arg8: memref<1x1x16x256xbf16, #tpu.memory_space<vmem>>, %arg9: memref<1x1x16x256xbf16, #tpu.memory_space<vmem>>, %arg10: memref<1x1x16x2xf32, #tpu.memory_space<vmem>>) attributes {dimension_semantics = [#tpu.dimension_semantics<parallel>, #tpu.dimension_semantics<parallel>], iteration_bounds = array<i64: 2, 4>, scalar_prefetch = 0 : i64, scratch_operands = 0 : i64, tpu.core_type = #tpu.core_type<tc>, window_params = [{transform_indices = @transform_0, window_bounds = array<i64: 1, 1, 16, 256>}, {transform_indices = @transform_1, window_bounds = array<i64: 1, 1, 16, 256>}, {transform_indices = @transform_2, window_bounds = array<i64: 1, 1, 16, 256>}, {pipeline_mode = #tpu.pipeline_mode<synchronous>, transform_indices = @transform_3, window_bounds = array<i64: 3, 16, 144>}, {pipeline_mode = #tpu.pipeline_mode<synchronous>, transform_indices = @transform_4, window_bounds = array<i64: 1, 256>}, {transform_indices = @transform_5, window_bounds = array<i64: 1, 1, 16, 256>}, {transform_indices = @transform_6, window_bounds = array<i64: 1, 1, 16, 256>}, {transform_indices = @transform_7, window_bounds = array<i64: 1, 1, 16, 256>}, {transform_indices = @transform_8, window_bounds = array<i64: 1, 1, 16, 2>}]} {
    %c0 = arith.constant 0 : index
    %c0_0 = arith.constant 0 : index
    %c0_1 = arith.constant 0 : index
    %c0_2 = arith.constant 0 : index
    %0 = vector.load %arg7[%c0, %c0_0, %c0_1, %c0_2] : memref<1x1x16x256xbf16, #tpu.memory_space<vmem>>, vector<1x1x16x256xbf16>
    %1 = vector.shape_cast %0 : vector<1x1x16x256xbf16> to vector<16x256xbf16>
    %2 = arith.extf %1 : vector<16x256xbf16> to vector<16x256xf32>
    %c0_3 = arith.constant 0 : index
    %c0_4 = arith.constant 0 : index
    %c0_5 = arith.constant 0 : index
    %c0_6 = arith.constant 0 : index
    %3 = vector.load %arg8[%c0_3, %c0_4, %c0_5, %c0_6] : memref<1x1x16x256xbf16, #tpu.memory_space<vmem>>, vector<1x1x16x256xbf16>
    %4 = vector.shape_cast %3 : vector<1x1x16x256xbf16> to vector<16x256xbf16>
    %5 = arith.extf %4 : vector<16x256xbf16> to vector<16x256xf32>
    %6 = arith.addf %2, %5 : vector<16x256xf32>
    %c0_i32 = arith.constant 0 : i32
    %7 = arith.cmpi sgt, %arg1, %c0_i32 : i32
    %c3_i32 = arith.constant 3 : i32
    %8 = arith.cmpi slt, %arg1, %c3_i32 : i32
    %c0_7 = arith.constant 0 : index
    %c0_8 = arith.constant 0 : index
    %c0_9 = arith.constant 0 : index
    %c0_10 = arith.constant 0 : index
    %9 = vector.load %arg2[%c0_7, %c0_8, %c0_9, %c0_10] : memref<1x1x16x256xbf16, #tpu.memory_space<vmem>>, vector<1x1x16x256xbf16>
    %10 = vector.shape_cast %9 : vector<1x1x16x256xbf16> to vector<16x256xbf16>
    %11 = arith.extf %10 : vector<16x256xbf16> to vector<16x256xf32>
    %cst = arith.constant 0.000000e+00 : f32
    %12 = vector.broadcast %cst : f32 to vector<16x256xf32>
    %13 = arith.select %7, %11, %12 : vector<16x256xf32>
    %c17_i32 = arith.constant 17 : i32
    %14 = tpu.dynamic_rotate %13 by %c17_i32 dim 1 : vector<16x256xf32>, i32 -> vector<16x256xf32>
    %c16_i32 = arith.constant 16 : i32
    %15 = tpu.dynamic_rotate %13 by %c16_i32 dim 1 : vector<16x256xf32>, i32 -> vector<16x256xf32>
    %c15_i32 = arith.constant 15 : i32
    %16 = tpu.dynamic_rotate %13 by %c15_i32 dim 1 : vector<16x256xf32>, i32 -> vector<16x256xf32>
    %c1_i32 = arith.constant 1 : i32
    %17 = tpu.dynamic_rotate %13 by %c1_i32 dim 1 : vector<16x256xf32>, i32 -> vector<16x256xf32>
    %c255_i32 = arith.constant 255 : i32
    %18 = tpu.dynamic_rotate %13 by %c255_i32 dim 1 : vector<16x256xf32>, i32 -> vector<16x256xf32>
    %c241_i32 = arith.constant 241 : i32
    %19 = tpu.dynamic_rotate %13 by %c241_i32 dim 1 : vector<16x256xf32>, i32 -> vector<16x256xf32>
    %c240_i32 = arith.constant 240 : i32
    %20 = tpu.dynamic_rotate %13 by %c240_i32 dim 1 : vector<16x256xf32>, i32 -> vector<16x256xf32>
    %c239_i32 = arith.constant 239 : i32
    %21 = tpu.dynamic_rotate %13 by %c239_i32 dim 1 : vector<16x256xf32>, i32 -> vector<16x256xf32>
    %22 = tpu.concatenate %14, %15, %16, %17, %13, %18, %19, %20, %21 in 0 : vector<16x256xf32>, vector<16x256xf32>, vector<16x256xf32>, vector<16x256xf32>, vector<16x256xf32>, vector<16x256xf32>, vector<16x256xf32>, vector<16x256xf32>, vector<16x256xf32> -> vector<144x256xf32>
    %23 = arith.truncf %22 : vector<144x256xf32> to vector<144x256xbf16>
    %c0_11 = arith.constant 0 : index
    %c0_12 = arith.constant 0 : index
    %c0_13 = arith.constant 0 : index
    %24 = vector.load %arg5[%c0_11, %c0_12, %c0_13] : memref<3x16x144xbf16, #tpu.memory_space<vmem>>, vector<1x16x144xbf16>
    %25 = vector.shape_cast %24 : vector<1x16x144xbf16> to vector<16x144xbf16>
    %cst_14 = arith.constant dense<0.000000e+00> : vector<16x256xf32>
    %26 = tpu.matmul %25, %23, %cst_14 {dimension_numbers = #tpu.dot_dimension_numbers<[1], [0], [0], [1], [0, 0, 1, 1], [], []>} : vector<16x144xbf16>, vector<144x256xbf16>, vector<16x256xf32> -> vector<16x256xf32>
    %27 = arith.addf %6, %26 : vector<16x256xf32>
    %c0_15 = arith.constant 0 : index
    %c0_16 = arith.constant 0 : index
    %c0_17 = arith.constant 0 : index
    %c0_18 = arith.constant 0 : index
    %28 = vector.load %arg3[%c0_15, %c0_16, %c0_17, %c0_18] : memref<1x1x16x256xbf16, #tpu.memory_space<vmem>>, vector<1x1x16x256xbf16>
    %29 = vector.shape_cast %28 : vector<1x1x16x256xbf16> to vector<16x256xbf16>
    %30 = arith.extf %29 : vector<16x256xbf16> to vector<16x256xf32>
    %c17_i32_19 = arith.constant 17 : i32
    %31 = tpu.dynamic_rotate %30 by %c17_i32_19 dim 1 : vector<16x256xf32>, i32 -> vector<16x256xf32>
    %c16_i32_20 = arith.constant 16 : i32
    %32 = tpu.dynamic_rotate %30 by %c16_i32_20 dim 1 : vector<16x256xf32>, i32 -> vector<16x256xf32>
    %c15_i32_21 = arith.constant 15 : i32
    %33 = tpu.dynamic_rotate %30 by %c15_i32_21 dim 1 : vector<16x256xf32>, i32 -> vector<16x256xf32>
    %c1_i32_22 = arith.constant 1 : i32
    %34 = tpu.dynamic_rotate %30 by %c1_i32_22 dim 1 : vector<16x256xf32>, i32 -> vector<16x256xf32>
    %c255_i32_23 = arith.constant 255 : i32
    %35 = tpu.dynamic_rotate %30 by %c255_i32_23 dim 1 : vector<16x256xf32>, i32 -> vector<16x256xf32>
    %c241_i32_24 = arith.constant 241 : i32
    %36 = tpu.dynamic_rotate %30 by %c241_i32_24 dim 1 : vector<16x256xf32>, i32 -> vector<16x256xf32>
    %c240_i32_25 = arith.constant 240 : i32
    %37 = tpu.dynamic_rotate %30 by %c240_i32_25 dim 1 : vector<16x256xf32>, i32 -> vector<16x256xf32>
    %c239_i32_26 = arith.constant 239 : i32
    %38 = tpu.dynamic_rotate %30 by %c239_i32_26 dim 1 : vector<16x256xf32>, i32 -> vector<16x256xf32>
    %39 = tpu.concatenate %31, %32, %33, %34, %30, %35, %36, %37, %38 in 0 : vector<16x256xf32>, vector<16x256xf32>, vector<16x256xf32>, vector<16x256xf32>, vector<16x256xf32>, vector<16x256xf32>, vector<16x256xf32>, vector<16x256xf32>, vector<16x256xf32> -> vector<144x256xf32>
    %40 = arith.truncf %39 : vector<144x256xf32> to vector<144x256xbf16>
    %c1 = arith.constant 1 : index
    %c0_27 = arith.constant 0 : index
    %c0_28 = arith.constant 0 : index
    %41 = vector.load %arg5[%c1, %c0_27, %c0_28] : memref<3x16x144xbf16, #tpu.memory_space<vmem>>, vector<1x16x144xbf16>
    %42 = vector.shape_cast %41 : vector<1x16x144xbf16> to vector<16x144xbf16>
    %cst_29 = arith.constant dense<0.000000e+00> : vector<16x256xf32>
    %43 = tpu.matmul %42, %40, %cst_29 {dimension_numbers = #tpu.dot_dimension_numbers<[1], [0], [0], [1], [0, 0, 1, 1], [], []>} : vector<16x144xbf16>, vector<144x256xbf16>, vector<16x256xf32> -> vector<16x256xf32>
    %44 = arith.addf %27, %43 : vector<16x256xf32>
    %c0_30 = arith.constant 0 : index
    %c0_31 = arith.constant 0 : index
    %c0_32 = arith.constant 0 : index
    %c0_33 = arith.constant 0 : index
    %45 = vector.load %arg4[%c0_30, %c0_31, %c0_32, %c0_33] : memref<1x1x16x256xbf16, #tpu.memory_space<vmem>>, vector<1x1x16x256xbf16>
    %46 = vector.shape_cast %45 : vector<1x1x16x256xbf16> to vector<16x256xbf16>
    %47 = arith.extf %46 : vector<16x256xbf16> to vector<16x256xf32>
    %cst_34 = arith.constant 0.000000e+00 : f32
    %48 = vector.broadcast %cst_34 : f32 to vector<16x256xf32>
    %49 = arith.select %8, %47, %48 : vector<16x256xf32>
    %c17_i32_35 = arith.constant 17 : i32
    %50 = tpu.dynamic_rotate %49 by %c17_i32_35 dim 1 : vector<16x256xf32>, i32 -> vector<16x256xf32>
    %c16_i32_36 = arith.constant 16 : i32
    %51 = tpu.dynamic_rotate %49 by %c16_i32_36 dim 1 : vector<16x256xf32>, i32 -> vector<16x256xf32>
    %c15_i32_37 = arith.constant 15 : i32
    %52 = tpu.dynamic_rotate %49 by %c15_i32_37 dim 1 : vector<16x256xf32>, i32 -> vector<16x256xf32>
    %c1_i32_38 = arith.constant 1 : i32
    %53 = tpu.dynamic_rotate %49 by %c1_i32_38 dim 1 : vector<16x256xf32>, i32 -> vector<16x256xf32>
    %c255_i32_39 = arith.constant 255 : i32
    %54 = tpu.dynamic_rotate %49 by %c255_i32_39 dim 1 : vector<16x256xf32>, i32 -> vector<16x256xf32>
    %c241_i32_40 = arith.constant 241 : i32
    %55 = tpu.dynamic_rotate %49 by %c241_i32_40 dim 1 : vector<16x256xf32>, i32 -> vector<16x256xf32>
    %c240_i32_41 = arith.constant 240 : i32
    %56 = tpu.dynamic_rotate %49 by %c240_i32_41 dim 1 : vector<16x256xf32>, i32 -> vector<16x256xf32>
    %c239_i32_42 = arith.constant 239 : i32
    %57 = tpu.dynamic_rotate %49 by %c239_i32_42 dim 1 : vector<16x256xf32>, i32 -> vector<16x256xf32>
    %58 = tpu.concatenate %50, %51, %52, %53, %49, %54, %55, %56, %57 in 0 : vector<16x256xf32>, vector<16x256xf32>, vector<16x256xf32>, vector<16x256xf32>, vector<16x256xf32>, vector<16x256xf32>, vector<16x256xf32>, vector<16x256xf32>, vector<16x256xf32> -> vector<144x256xf32>
    %59 = arith.truncf %58 : vector<144x256xf32> to vector<144x256xbf16>
    %c2 = arith.constant 2 : index
    %c0_43 = arith.constant 0 : index
    %c0_44 = arith.constant 0 : index
    %60 = vector.load %arg5[%c2, %c0_43, %c0_44] : memref<3x16x144xbf16, #tpu.memory_space<vmem>>, vector<1x16x144xbf16>
    %61 = vector.shape_cast %60 : vector<1x16x144xbf16> to vector<16x144xbf16>
    %cst_45 = arith.constant dense<0.000000e+00> : vector<16x256xf32>
    %62 = tpu.matmul %61, %59, %cst_45 {dimension_numbers = #tpu.dot_dimension_numbers<[1], [0], [0], [1], [0, 0, 1, 1], [], []>} : vector<16x144xbf16>, vector<144x256xbf16>, vector<16x256xf32> -> vector<16x256xf32>
    %63 = arith.addf %44, %62 : vector<16x256xf32>
    %c0_46 = arith.constant 0 : index
    %c0_47 = arith.constant 0 : index
    %64 = vector.load %arg6[%c0_46, %c0_47] : memref<1x256xf32, #tpu.memory_space<vmem>>, vector<1x256xf32>
    %65 = vector.broadcast %64 : vector<1x256xf32> to vector<16x256xf32>
    %66 = arith.mulf %63, %65 : vector<16x256xf32>
    %67 = arith.truncf %66 : vector<16x256xf32> to vector<16x256xbf16>
    %68 = vector.shape_cast %67 : vector<16x256xbf16> to vector<1x1x16x256xbf16>
    %c0_48 = arith.constant 0 : index
    %c0_49 = arith.constant 0 : index
    %c0_50 = arith.constant 0 : index
    %c0_51 = arith.constant 0 : index
    %69 = vector.load %arg9[%c0_48, %c0_49, %c0_50, %c0_51] : memref<1x1x16x256xbf16, #tpu.memory_space<vmem>>, vector<1x1x16x256xbf16>
    tpu.vector_store %arg9[%c0_48, %c0_49, %c0_50, %c0_51], %68 {strides = array<i32>} : memref<1x1x16x256xbf16, #tpu.memory_space<vmem>>, vector<1x1x16x256xbf16>,
    %cst_52 = arith.constant dense<0.000000e+00> : vector<16xf32>
    %70 = vector.multi_reduction <add>, %66, %cst_52 [1] : vector<16x256xf32> to vector<16xf32>
    %71 = vector.shape_cast %70 : vector<16xf32> to vector<16x1xf32>
    %72 = arith.mulf %66, %66 : vector<16x256xf32>
    %cst_53 = arith.constant dense<0.000000e+00> : vector<16xf32>
    %73 = vector.multi_reduction <add>, %72, %cst_53 [1] : vector<16x256xf32> to vector<16xf32>
    %74 = vector.shape_cast %73 : vector<16xf32> to vector<16x1xf32>
    %75 = tpu.concatenate %71, %74 in 1 : vector<16x1xf32>, vector<16x1xf32> -> vector<16x2xf32>
    %76 = vector.shape_cast %75 : vector<16x2xf32> to vector<1x1x16x2xf32>
    %c0_54 = arith.constant 0 : index
    %c0_55 = arith.constant 0 : index
    %c0_56 = arith.constant 0 : index
    %c0_57 = arith.constant 0 : index
    %77 = vector.load %arg10[%c0_54, %c0_55, %c0_56, %c0_57] : memref<1x1x16x2xf32, #tpu.memory_space<vmem>>, vector<1x1x16x2xf32>
    tpu.vector_store %arg10[%c0_54, %c0_55, %c0_56, %c0_57], %76 {strides = array<i32>} : memref<1x1x16x2xf32, #tpu.memory_space<vmem>>, vector<1x1x16x2xf32>,
    return
  }
  func.func @transform_0(%arg0: i32, %arg1: i32) -> (i32, i32, i32, i32) {
    %c1_i32 = arith.constant 1 : i32
    %0 = arith.subi %arg1, %c1_i32 : i32
    %c0_i32 = arith.constant 0 : i32
    %1 = arith.maxsi %0, %c0_i32 : i32
    %c0_i32_0 = arith.constant 0 : i32
    %c0_i32_1 = arith.constant 0 : i32
    %c0_i32_2 = arith.constant 0 : i32
    return %arg0, %1, %c0_i32_0, %c0_i32_1 : i32, i32, i32, i32
  }
  func.func @transform_1(%arg0: i32, %arg1: i32) -> (i32, i32, i32, i32) {
    %c0_i32 = arith.constant 0 : i32
    %c0_i32_0 = arith.constant 0 : i32
    %c0_i32_1 = arith.constant 0 : i32
    return %arg0, %arg1, %c0_i32, %c0_i32_0 : i32, i32, i32, i32
  }
  func.func @transform_2(%arg0: i32, %arg1: i32) -> (i32, i32, i32, i32) {
    %c1_i32 = arith.constant 1 : i32
    %0 = arith.addi %arg1, %c1_i32 : i32
    %c3_i32 = arith.constant 3 : i32
    %1 = arith.minsi %0, %c3_i32 : i32
    %c0_i32 = arith.constant 0 : i32
    %c0_i32_0 = arith.constant 0 : i32
    %c0_i32_1 = arith.constant 0 : i32
    return %arg0, %1, %c0_i32, %c0_i32_0 : i32, i32, i32, i32
  }
  func.func @transform_3(%arg0: i32, %arg1: i32) -> (i32, i32, i32) {
    %c0_i32 = arith.constant 0 : i32
    %c0_i32_0 = arith.constant 0 : i32
    %c0_i32_1 = arith.constant 0 : i32
    %c0_i32_2 = arith.constant 0 : i32
    return %c0_i32, %c0_i32_0, %c0_i32_1 : i32, i32, i32
  }
  func.func @transform_4(%arg0: i32, %arg1: i32) -> (i32, i32) {
    %c0_i32 = arith.constant 0 : i32
    %c0_i32_0 = arith.constant 0 : i32
    %c0_i32_1 = arith.constant 0 : i32
    return %c0_i32, %c0_i32_0 : i32, i32
  }
  func.func @transform_5(%arg0: i32, %arg1: i32) -> (i32, i32, i32, i32) {
    %c0_i32 = arith.constant 0 : i32
    %c0_i32_0 = arith.constant 0 : i32
    %c0_i32_1 = arith.constant 0 : i32
    return %arg0, %arg1, %c0_i32, %c0_i32_0 : i32, i32, i32, i32
  }
  func.func @transform_6(%arg0: i32, %arg1: i32) -> (i32, i32, i32, i32) {
    %c0_i32 = arith.constant 0 : i32
    %c0_i32_0 = arith.constant 0 : i32
    %c0_i32_1 = arith.constant 0 : i32
    return %arg0, %arg1, %c0_i32, %c0_i32_0 : i32, i32, i32, i32
  }
  func.func @transform_7(%arg0: i32, %arg1: i32) -> (i32, i32, i32, i32) {
    %c0_i32 = arith.constant 0 : i32
    %c0_i32_0 = arith.constant 0 : i32
    %c0_i32_1 = arith.constant 0 : i32
    return %arg0, %arg1, %c0_i32, %c0_i32_0 : i32, i32, i32, i32
  }
  func.func @transform_8(%arg0: i32, %arg1: i32) -> (i32, i32, i32, i32) {
    %c0_i32 = arith.constant 0 : i32
    %c0_i32_0 = arith.constant 0 : i32
    %c0_i32_1 = arith.constant 0 : i32
    return %arg0, %arg1, %c0_i32, %c0_i32_0 : i32, i32, i32, i32
  }
}

module attributes {stable_mosaic.version = 11 : i64} {
  func.func @_add_stats_kernel(%arg0: i32, %arg1: i32, %arg2: memref<1x1x16x256xbf16, #tpu.memory_space<vmem>>, %arg3: memref<1x1x16x256xbf16, #tpu.memory_space<vmem>>, %arg4: memref<1x1x16x256xbf16, #tpu.memory_space<vmem>>, %arg5: memref<1x1x16x2xf32, #tpu.memory_space<vmem>>) attributes {dimension_semantics = [#tpu.dimension_semantics<parallel>, #tpu.dimension_semantics<parallel>], iteration_bounds = array<i64: 2, 4>, scalar_prefetch = 0 : i64, scratch_operands = 0 : i64, tpu.core_type = #tpu.core_type<tc>, window_params = [{transform_indices = @transform_0, window_bounds = array<i64: 1, 1, 16, 256>}, {transform_indices = @transform_1, window_bounds = array<i64: 1, 1, 16, 256>}, {transform_indices = @transform_2, window_bounds = array<i64: 1, 1, 16, 256>}, {transform_indices = @transform_3, window_bounds = array<i64: 1, 1, 16, 2>}]} {
    %c0 = arith.constant 0 : index
    %c0_0 = arith.constant 0 : index
    %c0_1 = arith.constant 0 : index
    %c0_2 = arith.constant 0 : index
    %0 = vector.load %arg2[%c0, %c0_0, %c0_1, %c0_2] : memref<1x1x16x256xbf16, #tpu.memory_space<vmem>>, vector<1x1x16x256xbf16>
    %1 = vector.shape_cast %0 : vector<1x1x16x256xbf16> to vector<16x256xbf16>
    %2 = arith.extf %1 : vector<16x256xbf16> to vector<16x256xf32>
    %c0_3 = arith.constant 0 : index
    %c0_4 = arith.constant 0 : index
    %c0_5 = arith.constant 0 : index
    %c0_6 = arith.constant 0 : index
    %3 = vector.load %arg3[%c0_3, %c0_4, %c0_5, %c0_6] : memref<1x1x16x256xbf16, #tpu.memory_space<vmem>>, vector<1x1x16x256xbf16>
    %4 = vector.shape_cast %3 : vector<1x1x16x256xbf16> to vector<16x256xbf16>
    %5 = arith.extf %4 : vector<16x256xbf16> to vector<16x256xf32>
    %6 = arith.addf %2, %5 : vector<16x256xf32>
    %7 = arith.truncf %6 : vector<16x256xf32> to vector<16x256xbf16>
    %8 = vector.shape_cast %7 : vector<16x256xbf16> to vector<1x1x16x256xbf16>
    %c0_7 = arith.constant 0 : index
    %c0_8 = arith.constant 0 : index
    %c0_9 = arith.constant 0 : index
    %c0_10 = arith.constant 0 : index
    %9 = vector.load %arg4[%c0_7, %c0_8, %c0_9, %c0_10] : memref<1x1x16x256xbf16, #tpu.memory_space<vmem>>, vector<1x1x16x256xbf16>
    tpu.vector_store %arg4[%c0_7, %c0_8, %c0_9, %c0_10], %8 {strides = array<i32>} : memref<1x1x16x256xbf16, #tpu.memory_space<vmem>>, vector<1x1x16x256xbf16>,
    %cst = arith.constant dense<0.000000e+00> : vector<16xf32>
    %10 = vector.multi_reduction <add>, %6, %cst [1] : vector<16x256xf32> to vector<16xf32>
    %11 = vector.shape_cast %10 : vector<16xf32> to vector<16x1xf32>
    %12 = arith.mulf %6, %6 : vector<16x256xf32>
    %cst_11 = arith.constant dense<0.000000e+00> : vector<16xf32>
    %13 = vector.multi_reduction <add>, %12, %cst_11 [1] : vector<16x256xf32> to vector<16xf32>
    %14 = vector.shape_cast %13 : vector<16xf32> to vector<16x1xf32>
    %15 = tpu.concatenate %11, %14 in 1 : vector<16x1xf32>, vector<16x1xf32> -> vector<16x2xf32>
    %16 = vector.shape_cast %15 : vector<16x2xf32> to vector<1x1x16x2xf32>
    %c0_12 = arith.constant 0 : index
    %c0_13 = arith.constant 0 : index
    %c0_14 = arith.constant 0 : index
    %c0_15 = arith.constant 0 : index
    %17 = vector.load %arg5[%c0_12, %c0_13, %c0_14, %c0_15] : memref<1x1x16x2xf32, #tpu.memory_space<vmem>>, vector<1x1x16x2xf32>
    tpu.vector_store %arg5[%c0_12, %c0_13, %c0_14, %c0_15], %16 {strides = array<i32>} : memref<1x1x16x2xf32, #tpu.memory_space<vmem>>, vector<1x1x16x2xf32>,
    return
  }
  func.func @transform_0(%arg0: i32, %arg1: i32) -> (i32, i32, i32, i32) {
    %c0_i32 = arith.constant 0 : i32
    %c0_i32_0 = arith.constant 0 : i32
    %c0_i32_1 = arith.constant 0 : i32
    return %arg0, %arg1, %c0_i32, %c0_i32_0 : i32, i32, i32, i32
  }
  func.func @transform_1(%arg0: i32, %arg1: i32) -> (i32, i32, i32, i32) {
    %c0_i32 = arith.constant 0 : i32
    %c0_i32_0 = arith.constant 0 : i32
    %c0_i32_1 = arith.constant 0 : i32
    return %arg0, %arg1, %c0_i32, %c0_i32_0 : i32, i32, i32, i32
  }
  func.func @transform_2(%arg0: i32, %arg1: i32) -> (i32, i32, i32, i32) {
    %c0_i32 = arith.constant 0 : i32
    %c0_i32_0 = arith.constant 0 : i32
    %c0_i32_1 = arith.constant 0 : i32
    return %arg0, %arg1, %c0_i32, %c0_i32_0 : i32, i32, i32, i32
  }
  func.func @transform_3(%arg0: i32, %arg1: i32) -> (i32, i32, i32, i32) {
    %c0_i32 = arith.constant 0 : i32
    %c0_i32_0 = arith.constant 0 : i32
    %c0_i32_1 = arith.constant 0 : i32
    return %arg0, %arg1, %c0_i32, %c0_i32_0 : i32, i32, i32, i32
  }
}

module attributes {stable_mosaic.version = 11 : i64} {
  func.func @_bn_act_kernel(%arg0: i32, %arg1: i32, %arg2: memref<1x1x16x256xbf16, #tpu.memory_space<vmem>>, %arg3: memref<1x1x16x256xbf16, #tpu.memory_space<vmem>>, %arg4: memref<1x1x16x256xbf16, #tpu.memory_space<vmem>>, %arg5: memref<1x1x16x256xbf16, #tpu.memory_space<vmem>>, %arg6: memref<1x16x1xf32, #tpu.memory_space<vmem>>, %arg7: memref<1x16x1xf32, #tpu.memory_space<vmem>>, %arg8: memref<1x16x1xf32, #tpu.memory_space<vmem>>, %arg9: memref<1x16x1xf32, #tpu.memory_space<vmem>>, %arg10: memref<1x16x1xf32, #tpu.memory_space<vmem>>, %arg11: memref<1x16x1xf32, #tpu.memory_space<vmem>>, %arg12: memref<1x16x1xf32, #tpu.memory_space<vmem>>, %arg13: memref<1x16x1xf32, #tpu.memory_space<vmem>>, %arg14: memref<1x256xf32, #tpu.memory_space<vmem>>, %arg15: memref<1x1x16x256xf32, #tpu.memory_space<vmem>>, %arg16: memref<1x1x16x256xf32, #tpu.memory_space<vmem>>, %arg17: memref<1x1x16x256xf32, #tpu.memory_space<vmem>>, %arg18: memref<1x1x16x256xf32, #tpu.memory_space<vmem>>) attributes {dimension_semantics = [#tpu.dimension_semantics<parallel>, #tpu.dimension_semantics<parallel>], iteration_bounds = array<i64: 2, 4>, scalar_prefetch = 0 : i64, scratch_operands = 0 : i64, tpu.core_type = #tpu.core_type<tc>, window_params = [{transform_indices = @transform_0, window_bounds = array<i64: 1, 1, 16, 256>}, {transform_indices = @transform_1, window_bounds = array<i64: 1, 1, 16, 256>}, {transform_indices = @transform_2, window_bounds = array<i64: 1, 1, 16, 256>}, {transform_indices = @transform_3, window_bounds = array<i64: 1, 1, 16, 256>}, {pipeline_mode = #tpu.pipeline_mode<synchronous>, transform_indices = @transform_4, window_bounds = array<i64: 1, 16, 1>}, {pipeline_mode = #tpu.pipeline_mode<synchronous>, transform_indices = @transform_5, window_bounds = array<i64: 1, 16, 1>}, {pipeline_mode = #tpu.pipeline_mode<synchronous>, transform_indices = @transform_6, window_bounds = array<i64: 1, 16, 1>}, {pipeline_mode = #tpu.pipeline_mode<synchronous>, transform_indices = @transform_7, window_bounds = array<i64: 1, 16, 1>}, {pipeline_mode = #tpu.pipeline_mode<synchronous>, transform_indices = @transform_8, window_bounds = array<i64: 1, 16, 1>}, {pipeline_mode = #tpu.pipeline_mode<synchronous>, transform_indices = @transform_9, window_bounds = array<i64: 1, 16, 1>}, {pipeline_mode = #tpu.pipeline_mode<synchronous>, transform_indices = @transform_10, window_bounds = array<i64: 1, 16, 1>}, {pipeline_mode = #tpu.pipeline_mode<synchronous>, transform_indices = @transform_11, window_bounds = array<i64: 1, 16, 1>}, {pipeline_mode = #tpu.pipeline_mode<synchronous>, transform_indices = @transform_12, window_bounds = array<i64: 1, 256>}, {transform_indices = @transform_13, window_bounds = array<i64: 1, 1, 16, 256>}, {transform_indices = @transform_14, window_bounds = array<i64: 1, 1, 16, 256>}, {transform_indices = @transform_15, window_bounds = array<i64: 1, 1, 16, 256>}, {transform_indices = @transform_16, window_bounds = array<i64: 1, 1, 16, 256>}]} {
    %c0 = arith.constant 0 : index
    %c0_0 = arith.constant 0 : index
    %0 = vector.load %arg14[%c0, %c0_0] : memref<1x256xf32, #tpu.memory_space<vmem>>, vector<1x256xf32>
    %c0_1 = arith.constant 0 : index
    %c0_2 = arith.constant 0 : index
    %c0_3 = arith.constant 0 : index
    %c0_4 = arith.constant 0 : index
    %1 = vector.load %arg2[%c0_1, %c0_2, %c0_3, %c0_4] : memref<1x1x16x256xbf16, #tpu.memory_space<vmem>>, vector<1x1x16x256xbf16>
    %2 = vector.shape_cast %1 : vector<1x1x16x256xbf16> to vector<16x256xbf16>
    %3 = arith.extf %2 : vector<16x256xbf16> to vector<16x256xf32>
    %c0_5 = arith.constant 0 : index
    %c0_6 = arith.constant 0 : index
    %c0_7 = arith.constant 0 : index
    %4 = vector.load %arg6[%c0_5, %c0_6, %c0_7] : memref<1x16x1xf32, #tpu.memory_space<vmem>>, vector<1x16x1xf32>
    %5 = vector.shape_cast %4 : vector<1x16x1xf32> to vector<16x1xf32>
    %c0_8 = arith.constant 0 : index
    %c0_9 = arith.constant 0 : index
    %c0_10 = arith.constant 0 : index
    %6 = vector.load %arg7[%c0_8, %c0_9, %c0_10] : memref<1x16x1xf32, #tpu.memory_space<vmem>>, vector<1x16x1xf32>
    %7 = vector.shape_cast %6 : vector<1x16x1xf32> to vector<16x1xf32>
    %8 = vector.broadcast %5 : vector<16x1xf32> to vector<16x256xf32>
    %9 = arith.mulf %3, %8 : vector<16x256xf32>
    %10 = vector.broadcast %7 : vector<16x1xf32> to vector<16x256xf32>
    %11 = arith.addf %9, %10 : vector<16x256xf32>
    %cst = arith.constant 0.000000e+00 : f32
    %12 = vector.broadcast %cst : f32 to vector<16x256xf32>
    %13 = arith.cmpf oge, %11, %12 : vector<16x256xf32>
    %cst_11 = arith.constant 0.00999999977 : f32
    %14 = vector.broadcast %cst_11 : f32 to vector<16x256xf32>
    %15 = arith.mulf %14, %11 : vector<16x256xf32>
    %16 = arith.select %13, %11, %15 : vector<16x256xi1>, vector<16x256xf32>
    %17 = vector.broadcast %0 : vector<1x256xf32> to vector<16x256xf32>
    %18 = arith.mulf %16, %17 : vector<16x256xf32>
    %19 = vector.shape_cast %18 : vector<16x256xf32> to vector<1x1x16x256xf32>
    %c0_12 = arith.constant 0 : index
    %c0_13 = arith.constant 0 : index
    %c0_14 = arith.constant 0 : index
    %c0_15 = arith.constant 0 : index
    %20 = vector.load %arg15[%c0_12, %c0_13, %c0_14, %c0_15] : memref<1x1x16x256xf32, #tpu.memory_space<vmem>>, vector<1x1x16x256xf32>
    tpu.vector_store %arg15[%c0_12, %c0_13, %c0_14, %c0_15], %19 {strides = array<i32>} : memref<1x1x16x256xf32, #tpu.memory_space<vmem>>, vector<1x1x16x256xf32>,
    %c0_16 = arith.constant 0 : index
    %c0_17 = arith.constant 0 : index
    %c0_18 = arith.constant 0 : index
    %c0_19 = arith.constant 0 : index
    %21 = vector.load %arg3[%c0_16, %c0_17, %c0_18, %c0_19] : memref<1x1x16x256xbf16, #tpu.memory_space<vmem>>, vector<1x1x16x256xbf16>
    %22 = vector.shape_cast %21 : vector<1x1x16x256xbf16> to vector<16x256xbf16>
    %23 = arith.extf %22 : vector<16x256xbf16> to vector<16x256xf32>
    %c0_20 = arith.constant 0 : index
    %c0_21 = arith.constant 0 : index
    %c0_22 = arith.constant 0 : index
    %24 = vector.load %arg8[%c0_20, %c0_21, %c0_22] : memref<1x16x1xf32, #tpu.memory_space<vmem>>, vector<1x16x1xf32>
    %25 = vector.shape_cast %24 : vector<1x16x1xf32> to vector<16x1xf32>
    %c0_23 = arith.constant 0 : index
    %c0_24 = arith.constant 0 : index
    %c0_25 = arith.constant 0 : index
    %26 = vector.load %arg9[%c0_23, %c0_24, %c0_25] : memref<1x16x1xf32, #tpu.memory_space<vmem>>, vector<1x16x1xf32>
    %27 = vector.shape_cast %26 : vector<1x16x1xf32> to vector<16x1xf32>
    %28 = vector.broadcast %25 : vector<16x1xf32> to vector<16x256xf32>
    %29 = arith.mulf %23, %28 : vector<16x256xf32>
    %30 = vector.broadcast %27 : vector<16x1xf32> to vector<16x256xf32>
    %31 = arith.addf %29, %30 : vector<16x256xf32>
    %cst_26 = arith.constant 0.000000e+00 : f32
    %32 = vector.broadcast %cst_26 : f32 to vector<16x256xf32>
    %33 = arith.cmpf oge, %31, %32 : vector<16x256xf32>
    %cst_27 = arith.constant 0.00999999977 : f32
    %34 = vector.broadcast %cst_27 : f32 to vector<16x256xf32>
    %35 = arith.mulf %34, %31 : vector<16x256xf32>
    %36 = arith.select %33, %31, %35 : vector<16x256xi1>, vector<16x256xf32>
    %37 = vector.broadcast %0 : vector<1x256xf32> to vector<16x256xf32>
    %38 = arith.mulf %36, %37 : vector<16x256xf32>
    %39 = vector.shape_cast %38 : vector<16x256xf32> to vector<1x1x16x256xf32>
    %c0_28 = arith.constant 0 : index
    %c0_29 = arith.constant 0 : index
    %c0_30 = arith.constant 0 : index
    %c0_31 = arith.constant 0 : index
    %40 = vector.load %arg16[%c0_28, %c0_29, %c0_30, %c0_31] : memref<1x1x16x256xf32, #tpu.memory_space<vmem>>, vector<1x1x16x256xf32>
    tpu.vector_store %arg16[%c0_28, %c0_29, %c0_30, %c0_31], %39 {strides = array<i32>} : memref<1x1x16x256xf32, #tpu.memory_space<vmem>>, vector<1x1x16x256xf32>,
    %c0_32 = arith.constant 0 : index
    %c0_33 = arith.constant 0 : index
    %c0_34 = arith.constant 0 : index
    %c0_35 = arith.constant 0 : index
    %41 = vector.load %arg4[%c0_32, %c0_33, %c0_34, %c0_35] : memref<1x1x16x256xbf16, #tpu.memory_space<vmem>>, vector<1x1x16x256xbf16>
    %42 = vector.shape_cast %41 : vector<1x1x16x256xbf16> to vector<16x256xbf16>
    %43 = arith.extf %42 : vector<16x256xbf16> to vector<16x256xf32>
    %c0_36 = arith.constant 0 : index
    %c0_37 = arith.constant 0 : index
    %c0_38 = arith.constant 0 : index
    %44 = vector.load %arg10[%c0_36, %c0_37, %c0_38] : memref<1x16x1xf32, #tpu.memory_space<vmem>>, vector<1x16x1xf32>
    %45 = vector.shape_cast %44 : vector<1x16x1xf32> to vector<16x1xf32>
    %c0_39 = arith.constant 0 : index
    %c0_40 = arith.constant 0 : index
    %c0_41 = arith.constant 0 : index
    %46 = vector.load %arg11[%c0_39, %c0_40, %c0_41] : memref<1x16x1xf32, #tpu.memory_space<vmem>>, vector<1x16x1xf32>
    %47 = vector.shape_cast %46 : vector<1x16x1xf32> to vector<16x1xf32>
    %48 = vector.broadcast %45 : vector<16x1xf32> to vector<16x256xf32>
    %49 = arith.mulf %43, %48 : vector<16x256xf32>
    %50 = vector.broadcast %47 : vector<16x1xf32> to vector<16x256xf32>
    %51 = arith.addf %49, %50 : vector<16x256xf32>
    %cst_42 = arith.constant 0.000000e+00 : f32
    %52 = vector.broadcast %cst_42 : f32 to vector<16x256xf32>
    %53 = arith.cmpf oge, %51, %52 : vector<16x256xf32>
    %cst_43 = arith.constant 0.00999999977 : f32
    %54 = vector.broadcast %cst_43 : f32 to vector<16x256xf32>
    %55 = arith.mulf %54, %51 : vector<16x256xf32>
    %56 = arith.select %53, %51, %55 : vector<16x256xi1>, vector<16x256xf32>
    %57 = vector.broadcast %0 : vector<1x256xf32> to vector<16x256xf32>
    %58 = arith.mulf %56, %57 : vector<16x256xf32>
    %59 = vector.shape_cast %58 : vector<16x256xf32> to vector<1x1x16x256xf32>
    %c0_44 = arith.constant 0 : index
    %c0_45 = arith.constant 0 : index
    %c0_46 = arith.constant 0 : index
    %c0_47 = arith.constant 0 : index
    %60 = vector.load %arg17[%c0_44, %c0_45, %c0_46, %c0_47] : memref<1x1x16x256xf32, #tpu.memory_space<vmem>>, vector<1x1x16x256xf32>
    tpu.vector_store %arg17[%c0_44, %c0_45, %c0_46, %c0_47], %59 {strides = array<i32>} : memref<1x1x16x256xf32, #tpu.memory_space<vmem>>, vector<1x1x16x256xf32>,
    %c0_48 = arith.constant 0 : index
    %c0_49 = arith.constant 0 : index
    %c0_50 = arith.constant 0 : index
    %c0_51 = arith.constant 0 : index
    %61 = vector.load %arg5[%c0_48, %c0_49, %c0_50, %c0_51] : memref<1x1x16x256xbf16, #tpu.memory_space<vmem>>, vector<1x1x16x256xbf16>
    %62 = vector.shape_cast %61 : vector<1x1x16x256xbf16> to vector<16x256xbf16>
    %63 = arith.extf %62 : vector<16x256xbf16> to vector<16x256xf32>
    %c0_52 = arith.constant 0 : index
    %c0_53 = arith.constant 0 : index
    %c0_54 = arith.constant 0 : index
    %64 = vector.load %arg12[%c0_52, %c0_53, %c0_54] : memref<1x16x1xf32, #tpu.memory_space<vmem>>, vector<1x16x1xf32>
    %65 = vector.shape_cast %64 : vector<1x16x1xf32> to vector<16x1xf32>
    %c0_55 = arith.constant 0 : index
    %c0_56 = arith.constant 0 : index
    %c0_57 = arith.constant 0 : index
    %66 = vector.load %arg13[%c0_55, %c0_56, %c0_57] : memref<1x16x1xf32, #tpu.memory_space<vmem>>, vector<1x16x1xf32>
    %67 = vector.shape_cast %66 : vector<1x16x1xf32> to vector<16x1xf32>
    %68 = vector.broadcast %65 : vector<16x1xf32> to vector<16x256xf32>
    %69 = arith.mulf %63, %68 : vector<16x256xf32>
    %70 = vector.broadcast %67 : vector<16x1xf32> to vector<16x256xf32>
    %71 = arith.addf %69, %70 : vector<16x256xf32>
    %cst_58 = arith.constant 0.000000e+00 : f32
    %72 = vector.broadcast %cst_58 : f32 to vector<16x256xf32>
    %73 = arith.cmpf oge, %71, %72 : vector<16x256xf32>
    %cst_59 = arith.constant 0.00999999977 : f32
    %74 = vector.broadcast %cst_59 : f32 to vector<16x256xf32>
    %75 = arith.mulf %74, %71 : vector<16x256xf32>
    %76 = arith.select %73, %71, %75 : vector<16x256xi1>, vector<16x256xf32>
    %77 = vector.broadcast %0 : vector<1x256xf32> to vector<16x256xf32>
    %78 = arith.mulf %76, %77 : vector<16x256xf32>
    %79 = vector.shape_cast %78 : vector<16x256xf32> to vector<1x1x16x256xf32>
    %c0_60 = arith.constant 0 : index
    %c0_61 = arith.constant 0 : index
    %c0_62 = arith.constant 0 : index
    %c0_63 = arith.constant 0 : index
    %80 = vector.load %arg18[%c0_60, %c0_61, %c0_62, %c0_63] : memref<1x1x16x256xf32, #tpu.memory_space<vmem>>, vector<1x1x16x256xf32>
    tpu.vector_store %arg18[%c0_60, %c0_61, %c0_62, %c0_63], %79 {strides = array<i32>} : memref<1x1x16x256xf32, #tpu.memory_space<vmem>>, vector<1x1x16x256xf32>,
    return
  }
  func.func @transform_0(%arg0: i32, %arg1: i32) -> (i32, i32, i32, i32) {
    %c0_i32 = arith.constant 0 : i32
    %c0_i32_0 = arith.constant 0 : i32
    %c0_i32_1 = arith.constant 0 : i32
    return %arg0, %arg1, %c0_i32, %c0_i32_0 : i32, i32, i32, i32
  }
  func.func @transform_1(%arg0: i32, %arg1: i32) -> (i32, i32, i32, i32) {
    %c0_i32 = arith.constant 0 : i32
    %c0_i32_0 = arith.constant 0 : i32
    %c0_i32_1 = arith.constant 0 : i32
    return %arg0, %arg1, %c0_i32, %c0_i32_0 : i32, i32, i32, i32
  }
  func.func @transform_2(%arg0: i32, %arg1: i32) -> (i32, i32, i32, i32) {
    %c0_i32 = arith.constant 0 : i32
    %c0_i32_0 = arith.constant 0 : i32
    %c0_i32_1 = arith.constant 0 : i32
    return %arg0, %arg1, %c0_i32, %c0_i32_0 : i32, i32, i32, i32
  }
  func.func @transform_3(%arg0: i32, %arg1: i32) -> (i32, i32, i32, i32) {
    %c0_i32 = arith.constant 0 : i32
    %c0_i32_0 = arith.constant 0 : i32
    %c0_i32_1 = arith.constant 0 : i32
    return %arg0, %arg1, %c0_i32, %c0_i32_0 : i32, i32, i32, i32
  }
  func.func @transform_4(%arg0: i32, %arg1: i32) -> (i32, i32, i32) {
    %c0_i32 = arith.constant 0 : i32
    %c0_i32_0 = arith.constant 0 : i32
    %c0_i32_1 = arith.constant 0 : i32
    %c0_i32_2 = arith.constant 0 : i32
    return %c0_i32, %c0_i32_0, %c0_i32_1 : i32, i32, i32
  }
  func.func @transform_5(%arg0: i32, %arg1: i32) -> (i32, i32, i32) {
    %c0_i32 = arith.constant 0 : i32
    %c0_i32_0 = arith.constant 0 : i32
    %c0_i32_1 = arith.constant 0 : i32
    %c0_i32_2 = arith.constant 0 : i32
    return %c0_i32, %c0_i32_0, %c0_i32_1 : i32, i32, i32
  }
  func.func @transform_6(%arg0: i32, %arg1: i32) -> (i32, i32, i32) {
    %c0_i32 = arith.constant 0 : i32
    %c0_i32_0 = arith.constant 0 : i32
    %c0_i32_1 = arith.constant 0 : i32
    %c0_i32_2 = arith.constant 0 : i32
    return %c0_i32, %c0_i32_0, %c0_i32_1 : i32, i32, i32
  }
  func.func @transform_7(%arg0: i32, %arg1: i32) -> (i32, i32, i32) {
    %c0_i32 = arith.constant 0 : i32
    %c0_i32_0 = arith.constant 0 : i32
    %c0_i32_1 = arith.constant 0 : i32
    %c0_i32_2 = arith.constant 0 : i32
    return %c0_i32, %c0_i32_0, %c0_i32_1 : i32, i32, i32
  }
  func.func @transform_8(%arg0: i32, %arg1: i32) -> (i32, i32, i32) {
    %c0_i32 = arith.constant 0 : i32
    %c0_i32_0 = arith.constant 0 : i32
    %c0_i32_1 = arith.constant 0 : i32
    %c0_i32_2 = arith.constant 0 : i32
    return %c0_i32, %c0_i32_0, %c0_i32_1 : i32, i32, i32
  }
  func.func @transform_9(%arg0: i32, %arg1: i32) -> (i32, i32, i32) {
    %c0_i32 = arith.constant 0 : i32
    %c0_i32_0 = arith.constant 0 : i32
    %c0_i32_1 = arith.constant 0 : i32
    %c0_i32_2 = arith.constant 0 : i32
    return %c0_i32, %c0_i32_0, %c0_i32_1 : i32, i32, i32
  }
  func.func @transform_10(%arg0: i32, %arg1: i32) -> (i32, i32, i32) {
    %c0_i32 = arith.constant 0 : i32
    %c0_i32_0 = arith.constant 0 : i32
    %c0_i32_1 = arith.constant 0 : i32
    %c0_i32_2 = arith.constant 0 : i32
    return %c0_i32, %c0_i32_0, %c0_i32_1 : i32, i32, i32
  }
  func.func @transform_11(%arg0: i32, %arg1: i32) -> (i32, i32, i32) {
    %c0_i32 = arith.constant 0 : i32
    %c0_i32_0 = arith.constant 0 : i32
    %c0_i32_1 = arith.constant 0 : i32
    %c0_i32_2 = arith.constant 0 : i32
    return %c0_i32, %c0_i32_0, %c0_i32_1 : i32, i32, i32
  }
  func.func @transform_12(%arg0: i32, %arg1: i32) -> (i32, i32) {
    %c0_i32 = arith.constant 0 : i32
    %c0_i32_0 = arith.constant 0 : i32
    %c0_i32_1 = arith.constant 0 : i32
    return %c0_i32, %c0_i32_0 : i32, i32
  }
  func.func @transform_13(%arg0: i32, %arg1: i32) -> (i32, i32, i32, i32) {
    %c0_i32 = arith.constant 0 : i32
    %c0_i32_0 = arith.constant 0 : i32
    %c0_i32_1 = arith.constant 0 : i32
    return %arg0, %arg1, %c0_i32, %c0_i32_0 : i32, i32, i32, i32
  }
  func.func @transform_14(%arg0: i32, %arg1: i32) -> (i32, i32, i32, i32) {
    %c0_i32 = arith.constant 0 : i32
    %c0_i32_0 = arith.constant 0 : i32
    %c0_i32_1 = arith.constant 0 : i32
    return %arg0, %arg1, %c0_i32, %c0_i32_0 : i32, i32, i32, i32
  }
  func.func @transform_15(%arg0: i32, %arg1: i32) -> (i32, i32, i32, i32) {
    %c0_i32 = arith.constant 0 : i32
    %c0_i32_0 = arith.constant 0 : i32
    %c0_i32_1 = arith.constant 0 : i32
    return %arg0, %arg1, %c0_i32, %c0_i32_0 : i32, i32, i32, i32
  }
  func.func @transform_16(%arg0: i32, %arg1: i32) -> (i32, i32, i32, i32) {
    %c0_i32 = arith.constant 0 : i32
    %c0_i32_0 = arith.constant 0 : i32
    %c0_i32_1 = arith.constant 0 : i32
    return %arg0, %arg1, %c0_i32, %c0_i32_0 : i32, i32, i32, i32
  }
}

</mosaic_0001>

<bundles_post_ra>
// kernel: iconvmod_forward.16
= control target key start
LH: loop header
LB: loop body
LE: loop exit
PB: predicated region body
PF: predicated region fallthrough
CT: control target
= control target key end

     0   :  { %s1507_s21 = smov 0   ;;  %s1509_s22 = smov 0   ;;  %s1687_s0 = inlined_call_operand.vmem [shape: bf16[2,4,64,256], index: 0, kind: input, shape index: {}, may-alias: {0,1,2,3}]   ;;  %s1688_s1 = inlined_call_operand.vmem [shape: bf16[2,4,64,256], index: 1, kind: input, shape index: {}, may-alias: {0,1,2,3}]   ;;  %s1689_s2 = inlined_call_operand.vmem [shape: bf16[2,4,64,256], index: 2, kind: input, shape index: {}, may-alias: {0,1,2,3}]   ;;  %s1690_s3 = inlined_call_operand.vmem [shape: bf16[2,4,64,256], index: 3, kind: input, shape index: {}, may-alias: {0,1,2,3}]   ;;  %s1691_s4 = inlined_call_operand.vmem [shape: f32[1,16,1], index: 4, kind: input, shape index: {}]   ;;  %s1692_s5 = inlined_call_operand.vmem [shape: f32[1,16,1], index: 5, kind: input, shape index: {}]   ;;  %s1693_s6 = inlined_call_operand.vmem [shape: f32[1,16,1], index: 6, kind: input, shape index: {}]   ;;  %s1694_s7 = inlined_call_operand.vmem [shape: f32[1,16,1], index: 7, kind: input, shape index: {}]   ;;  %s1695_s8 = inlined_call_operand.vmem [shape: f32[1,16,1], index: 8, kind: input, shape index: {}]   ;;  %s1696_s9 = inlined_call_operand.vmem [shape: f32[1,16,1], index: 9, kind: input, shape index: {}]   ;;  %s1697_s10 = inlined_call_operand.vmem [shape: f32[1,16,1], index: 10, kind: input, shape index: {}]   ;;  %s1698_s11 = inlined_call_operand.vmem [shape: f32[1,16,1], index: 11, kind: input, shape index: {}]   ;;  %s1699_s12 = inlined_call_operand.vmem [shape: f32[1,256], index: 12, kind: input, shape index: {}]   ;;  %s1700_s13 = inlined_call_operand.vmem [shape: bf16[2,4,16,256], index: 13, kind: output, shape index: {0}]   ;;  %s1701_s14 = inlined_call_operand.vmem [shape: bf16[2,4,16,256], index: 14, kind: output, shape index: {1}]   ;;  %s1702_s15 = inlined_call_operand.vmem [shape: bf16[2,4,16,256], index: 15, kind: output, shape index: {2}]   ;;  %s1703_s16 = inlined_call_operand.vmem [shape: bf16[2,4,16,256], index: 16, kind: output, shape index: {3}]  }
   0x1   :  { %1704 = sst [smem:[#allocation4_spill]] %s1687_s0  ;;  %s1511_s23 = smov 0  }
   0x2   :  { %1705 = sst [smem:[#allocation5_spill]] %s1691_s4  ;;  %s1513_s24 = smov 0  }
   0x3   :  { %1706 = sst [smem:[#allocation6_spill]] %s1692_s5  ;;  %s1515_s25 = smov 0  }
   0x4 LB: > { %s36_s26 = sadd.s32 1, %s1411_s23  ;;  %s39_s27 = sadd.s32 1, %s1415_s24  ;;  %s1419_s25 = sphi %s1515_s25, %s27_s25   ;;  %s1415_s24 = sphi %s1513_s24, %s1717_s24   ;;  %s1411_s23 = sphi %s1511_s23, %s1716_s23   ;;  %s1407_s22 = sphi %s1509_s22, %s1715_s22   ;;  %s1403_s21 = sphi %s1507_s21, %s1714_s21  }
   0x5   : > { %p37_p0 = scmp.ge.s32.totalorder %s36_s26, 4  ;;  %p1304_p1 = scmp.ge.s32.totalorder %s1419_s25, 1 }
   0x6   : > { %p546_p2 = scmp.lt.s32.totalorder %s1419_s25, 9 }
   0x7   : > { %s1719_s26 = smov (%p37_p0, %s36_s26), 0  ;;  %s1721_s27 = smov (!%p37_p0, %s39_s27), %s1415_s24 }
   0x8   : > { %1707 = sst [smem:[#allocation2_spill]] %s1719_s26  ;;  %p547_p3 = pnand %p1304_p1, %p546_p2 }
   0x9   : > { %p41_p4 = scmp.ge.s32.totalorder %s1721_s27, 2  ;;  %s1709_s5 = sld [smem:[#allocation6_spill]] (!%p547_p3) }
   0xa   : > { %550 = sbr.rel (%p547_p3) target bundleno = 183 (0xb7), region = 72  ;;  %s1710_s4 = sld [smem:[#allocation5_spill]] (!%p547_p3) }
   0xb   : > { %s1723_s27 = smov (%p41_p4, %s1721_s27), 0  ;;  %p661_p5 = scmp.lt.s32.totalorder (!%p547_p3), %s1407_s22, 1 }
   0xc   : > { %1708 = sst [smem:[#allocation3_spill]] %s1723_s27  ;;  %p663_p6 = scmp.lt.s32.totalorder (!%p547_p3), %s1403_s21, 3 }
   0xd   : > { %s1711_s28 = sld [smem:[#allocation4_spill]] (!%p547_p3) }
   0xf   : > { %v806_v0 = vld [vmem:[%s1693_s6] sm:$0xff]  ;;  %v1421_v3 = vmov 0   ;;  %v807_v4 = vld [vmem:[%s1693_s6 + $0x8] sm:$0xff]  ;;  %s1725_s22 = smov (!%p661_p5, %s1407_s22), 1  ;;  %s1727_s21 = smov (!%p663_p6, %s1403_s21), 3 }
  0x10   : > { %v745_v1 = vld [vmem:[%s1709_s5] sm:$0xff]  ;;  %1380 = vset.pattern.permute.xlu2 %v1421_v3  ;;  %1379 = vset.pattern.permute.xlu1 %v1421_v3  ;;  %v746_v5 = vld [vmem:[%s1709_s5 + $0x8] sm:$0xff]  ;;  %s1305_s26 = sshll.u32 %s1727_s21, 4  ;;  %s1306_s27 = sshll.u32 %s1725_s22, 6 }
  0x11   : > { %v743_v2 = vld [vmem:[%s1710_s4] sm:$0xff]  ;;  %1378 = vset.pattern.permute.xlu0 %v1421_v3  ;;  %812 = vperm.xlu2 %1380, %v806_v0   ;;  %v744_v6 = vld [vmem:[%s1710_s4 + $0x8] sm:$0xff]  ;;  %s667_s17 = sadd.s32 %s1306_s27, %s1305_s26  ;;  %s1317_s30 = sshll.u32 %s1727_s21, 2 }
  0x12   : > { %763 = vperm.xlu1 %1379, %v745_v1   ;;  %749 = vperm.xlu0 %1378, %v743_v2   ;;  %v864_v7 = vld [vmem:[%s1695_s8] sm:$0xff]  ;;  %v809_v8 = vld [vmem:[%s1694_s7 + $0x8] sm:$0xff]  ;;  %s1593_s18 = sshll.u32 %s667_s17, 2  ;;  %s1318_s0 = sshll.u32 %s1725_s22, 4 }
  0x13   : > { %v808_v9 = vld [vmem:[%s1694_s7] sm:$0xff]  ;;  %v923_v10 = vld [vmem:[%s1697_s10 + $0x8] sm:$0xff]  ;;  %s669_s29 = scalar_lea.vmem %s1711_s28, %s1593_s18  ;;  %s706_s26 = sadd.s32 %s1318_s0, %s1317_s30 }
  0x14   : > { %v922_v11 = vld [vmem:[%s1697_s10] sm:$0xff]  ;;  %v865_v12 = vld [vmem:[%s1695_s8 + $0x8] sm:$0xff]  ;;  %s1150_s19 = scalar_lea.vmem %s1688_s1, %s1593_s18  ;;  %s1612_s4 = sshll.u32 %s706_s26, 2 }
  0x15   : > { %v924_v13 = vld [vmem:[%s1698_s11] sm:$0xff]  ;;  %v867_v14 = vld [vmem:[%s1696_s9 + $0x8] sm:$0xff]  ;;  %v1329_v37 = vld [vmem:[%s1150_s19 + $0x10] sm:$0xff]  ;;  %s1620_s22 = scalar_lea.vmem %s1700_s13, %s1612_s4  ;;  %s1156_s26 = scalar_lea.vmem %s1689_s2, %s1593_s18 }
  0x16   : > { %v866_v15 = vld [vmem:[%s1696_s9] sm:$0xff]  ;;  %v925_v16 = vld [vmem:[%s1698_s11 + $0x8] sm:$0xff]  ;;  %v1330_v40 = vld [vmem:[%s1150_s19 + $0x18] sm:$0xff]  ;;  %v802_v47 = vunpack.c.l.bf16 %v1329_v37  ;;  %v803_v48 = vunpack.c.h.bf16 %v1329_v37  ;;  %s717_s19 = scalar_lea.vmem %s1701_s14, %s1612_s4  ;;  %s1656_s21 = scalar_lea.vmem %s1703_s16, %s1612_s4 }
  0x17   : > { %v737_v18 = vld [vmem:[%s669_s29] sm:$0xff]  ;;  %v738_v27 = vld [vmem:[%s669_s29 + $0x8] sm:$0xff]  ;;  %v804_v50 = vunpack.c.l.bf16 %v1330_v40  ;;  %v805_v51 = vunpack.c.h.bf16 %v1330_v40  ;;  %s1629_s29 = scalar_lea.vmem %s1690_s3, %s1593_s18  ;;  %s726_s28 = scalar_lea.vmem %s1702_s15, %s1612_s4 }
  0x18   : > { %v739_v20 = vunpack.c.l.bf16 %v737_v18  ;;  %v740_v21 = vunpack.c.h.bf16 %v737_v18  ;;  %v736_v24 = vld [vmem:[%s1699_s12] sm:$0x3]  ;;  %v741_v32 = vunpack.c.l.bf16 %v738_v27  ;;  %v742_v33 = vunpack.c.h.bf16 %v738_v27  ;;  %v1332_v27 = vld [vmem:[%s1156_s26 + $0x28] sm:$0xff] }
  0x19   : > { %817 = vperm.xlu2 %1380, %v807_v4   ;;  %v1606_v30 = vperm.slane %v736_v24, 0  ;;  %v1608_v31 = vperm.slane %v736_v24, 1  ;;  %v863_v40 = vunpack.c.h.bf16 %v1332_v27 }
  0x1a   : > { %768 = vperm.xlu1 %1379, %v746_v5   ;;  %754 = vperm.xlu0 %1378, %v744_v6  }
  0x21   : > { %870 = vperm.xlu2 %1380, %v864_v7   ;;  %v1333_v7 = vld [vmem:[%s1629_s29 + $0x30] sm:$0xff] }
  0x22   : > { %831 = vperm.xlu1 %1379, %v809_v8   ;;  %826 = vperm.xlu0 %1378, %v808_v9  }
  0x29   : > { %933 = vperm.xlu2 %1380, %v923_v10  }
  0x2a   : > { %928 = vperm.xlu1 %1379, %v922_v11   ;;  %875 = vperm.xlu0 %1378, %v865_v12   ;;  %v918_v12 = vunpack.c.l.bf16 %v1333_v7 }
  0x31   : > { %942 = vperm.xlu2 %1380, %v924_v13  }
  0x32   : > { %889 = vperm.xlu1 %1379, %v867_v14   ;;  %884 = vperm.xlu0 %1378, %v866_v15  }
  0x3a   : > { %947 = vperm.xlu0 %1378, %v925_v16   ;;  %v919_v16 = vunpack.c.h.bf16 %v1333_v7 }
  0x6b   : > { %v813_v17 = vpop.permute.xlu2 %812 }
  0x6c   : > { %v820_v56 = vmul.f32 %v813_v17, %v802_v47  ;;  %v821_v57 = vmul.f32 %v813_v17, %v803_v48 }
  0x73   : > { %v818_v19 = vpop.permute.xlu2 %817 }
  0x74   : > { %v822_v58 = vmul.f32 %v818_v19, %v804_v50  ;;  %v823_v59 = vmul.f32 %v818_v19, %v805_v51 }
  0x7b   : > { %v1610_v34 = vpop.permute.xlu2 %870 }
  0x83   : > { %v1623_v60 = vpop.permute.xlu2 %933 }
  0x84   : > { %v764_v22 = vpop.permute.xlu1 %763  ;;  %v750_v23 = vpop.permute.xlu0 %749 }
  0x85   : > { %v757_v25 = vmul.f32 %v750_v23, %v739_v20  ;;  %v758_v26 = vmul.f32 %v750_v23, %v740_v21  ;;  %v1331_v20 = vld [vmem:[%s1156_s26 + $0x20] sm:$0xff] }
  0x87   : > { %v771_v28 = vadd.f32 %v764_v22, %v757_v25  ;;  %v772_v29 = vadd.f32 %v764_v22, %v758_v26 }
  0x89   : > { %vm775_vm0 = vcmp.ge.f32.partialorder %v771_v28, 0.0  ;;  %vm776_vm1 = vcmp.ge.f32.partialorder %v772_v29, 0.0  ;;  %v779_v35 = vmul.f32 0.01, %v771_v28  ;;  %v780_v36 = vmul.f32 0.01, %v772_v29 }
  0x8b   : > { %v783_v38 = vsel %vm775_vm0, %v771_v28, %v779_v35  ;;  %v784_v39 = vsel %vm776_vm1, %v772_v29, %v780_v36  ;;  %v943_v35 = vpop.permute.xlu2 %942 }
  0x8c   : > { %v792_v41 = vmul.f32 %v1606_v30, %v783_v38  ;;  %v793_v42 = vmul.f32 %v1608_v31, %v784_v39  ;;  %v769_v43 = vpop.permute.xlu1 %768  ;;  %v755_v44 = vpop.permute.xlu0 %754  ;;  %v862_v39 = vunpack.c.l.bf16 %v1332_v27 }
  0x8d   : > { %v759_v45 = vmul.f32 %v755_v44, %v741_v32  ;;  %v760_v46 = vmul.f32 %v755_v44, %v742_v33  ;;  %v860_v32 = vunpack.c.l.bf16 %v1331_v20  ;;  %v861_v33 = vunpack.c.h.bf16 %v1331_v20 }
  0x8e   : > { %v796_v49 = vpack.c.bf16 %v793_v42, %v792_v41 }
  0x8f   : > { %v773_v52 = vadd.f32 %v769_v43, %v759_v45  ;;  %v774_v53 = vadd.f32 %v769_v43, %v760_v46  ;;  %v878_v43 = vmul.f32 %v1610_v34, %v860_v32  ;;  %v879_v44 = vmul.f32 %v1610_v34, %v861_v33  ;;  %v1334_v45 = vld [vmem:[%s1629_s29 + $0x38] sm:$0xff] }
  0x90   : > { %798 = vst [vmem:[%s1620_s22] sm:$0xff] %v796_v49  ;;  %v920_v34 = vunpack.c.l.bf16 %v1334_v45 }
  0x91   : > { %vm777_vm2 = vcmp.ge.f32.partialorder %v773_v52, 0.0  ;;  %vm778_vm3 = vcmp.ge.f32.partialorder %v774_v53, 0.0  ;;  %v781_v54 = vmul.f32 0.01, %v773_v52  ;;  %v782_v55 = vmul.f32 0.01, %v774_v53 }
  0x92   : > { %v938_v7 = vmul.f32 %v1623_v60, %v920_v34 }
  0x93   : > { %v785_v61 = vsel %vm777_vm2, %v773_v52, %v781_v54  ;;  %v786_v62 = vsel %vm778_vm3, %v774_v53, %v782_v55 }
  0x94   : > { %v794_v63 = vmul.f32 %v1606_v30, %v785_v61  ;;  %v795_v0 = vmul.f32 %v1608_v31, %v786_v62  ;;  %v832_v1 = vpop.permute.xlu1 %831  ;;  %v827_v2 = vpop.permute.xlu0 %826 }
  0x95   : > { %v836_v3 = vadd.f32 %v832_v1, %v822_v58  ;;  %v837_v4 = vadd.f32 %v832_v1, %v823_v59  ;;  %v834_v5 = vadd.f32 %v827_v2, %v820_v56  ;;  %v835_v6 = vadd.f32 %v827_v2, %v821_v57 }
  0x96   : > { %v797_v8 = vpack.c.bf16 %v795_v0, %v794_v63  ;;  %v921_v58 = vunpack.c.h.bf16 %v1334_v45 }
  0x97   : > { %vm840_vm4 = vcmp.ge.f32.partialorder %v836_v3, 0.0  ;;  %vm841_vm5 = vcmp.ge.f32.partialorder %v837_v4, 0.0  ;;  %v844_v9 = vmul.f32 0.01, %v836_v3  ;;  %v845_v10 = vmul.f32 0.01, %v837_v4 }
  0x98   : > { %799 = vst [vmem:[%s1620_s22 + $0x8] sm:$0xff] %v797_v8  ;;  %vm838_vm6 = vcmp.ge.f32.partialorder %v834_v5, 0.0  ;;  %vm839_vm7 = vcmp.ge.f32.partialorder %v835_v6, 0.0  ;;  %v842_v11 = vmul.f32 0.01, %v834_v5  ;;  %v939_v8 = vmul.f32 %v1623_v60, %v921_v58 }
  0x99   : > { %v848_v13 = vsel %vm840_vm4, %v836_v3, %v844_v9  ;;  %v849_v14 = vsel %vm841_vm5, %v837_v4, %v845_v10  ;;  %v843_v15 = vmul.f32 0.01, %v835_v6 }
  0x9a   : > { %v852_v17 = vmul.f32 %v848_v13, %v1606_v30  ;;  %v853_v18 = vmul.f32 %v849_v14, %v1608_v31  ;;  %v846_v19 = vsel %vm838_vm6, %v834_v5, %v842_v11 }
  0x9b   : > { %v847_v21 = vsel %vm839_vm7, %v835_v6, %v843_v15  ;;  %v850_v22 = vmul.f32 %v846_v19, %v1606_v30 }
  0x9c   : > { %v855_v23 = vpack.c.bf16 %v853_v18, %v852_v17  ;;  %v851_v24 = vmul.f32 %v847_v21, %v1608_v31  ;;  %v929_v25 = vpop.permute.xlu1 %928  ;;  %v876_v26 = vpop.permute.xlu0 %875 }
  0x9d   : > { %v936_v28 = vmul.f32 %v929_v25, %v918_v12  ;;  %v937_v29 = vmul.f32 %v929_v25, %v919_v16  ;;  %v880_v48 = vmul.f32 %v876_v26, %v862_v39  ;;  %v881_v49 = vmul.f32 %v876_v26, %v863_v40 }
  0x9e   : > { %857 = vst [vmem:[%s717_s19 + $0x8] sm:$0xff] %v855_v23  ;;  %v854_v36 = vpack.c.bf16 %v851_v24, %v850_v22 }
  0x9f   : > { %v950_v37 = vadd.f32 %v943_v35, %v936_v28  ;;  %v951_v38 = vadd.f32 %v943_v35, %v937_v29 }
  0xa0   : > { %856 = vst [vmem:[%s717_s19] sm:$0xff] %v854_v36 }
  0xa1   : > { %vm954_vm8 = vcmp.ge.f32.partialorder %v950_v37, 0.0  ;;  %vm955_vm9 = vcmp.ge.f32.partialorder %v951_v38, 0.0  ;;  %v958_v41 = vmul.f32 0.01, %v950_v37  ;;  %v959_v42 = vmul.f32 0.01, %v951_v38 }
  0xa3   : > { %v962_v46 = vsel %vm954_vm8, %v950_v37, %v958_v41  ;;  %v963_v47 = vsel %vm955_vm9, %v951_v38, %v959_v42 }
  0xa4   : > { %v966_v50 = vmul.f32 %v962_v46, %v1606_v30  ;;  %v967_v51 = vmul.f32 %v963_v47, %v1608_v31  ;;  %v890_v52 = vpop.permute.xlu1 %889  ;;  %v885_v53 = vpop.permute.xlu0 %884 }
  0xa5   : > { %v894_v54 = vadd.f32 %v890_v52, %v880_v48  ;;  %v895_v55 = vadd.f32 %v890_v52, %v881_v49  ;;  %v892_v56 = vadd.f32 %v885_v53, %v878_v43  ;;  %v893_v57 = vadd.f32 %v885_v53, %v879_v44 }
  0xa6   : > { %v970_v59 = vpack.c.bf16 %v967_v51, %v966_v50 }
  0xa7   : > { %vm898_vm10 = vcmp.ge.f32.partialorder %v894_v54, 0.0  ;;  %vm899_vm11 = vcmp.ge.f32.partialorder %v895_v55, 0.0  ;;  %v902_v61 = vmul.f32 0.01, %v894_v54  ;;  %v903_v62 = vmul.f32 0.01, %v895_v55 }
  0xa8   : > { %vm896_vm12 = vcmp.ge.f32.partialorder %v892_v56, 0.0  ;;  %vm897_vm13 = vcmp.ge.f32.partialorder %v893_v57, 0.0  ;;  %v900_v63 = vmul.f32 0.01, %v892_v56  ;;  %v901_v0 = vmul.f32 0.01, %v893_v57  ;;  %972 = vst [vmem:[%s1656_s21] sm:$0xff] %v970_v59 }
  0xa9   : > { %v906_v1 = vsel %vm898_vm10, %v894_v54, %v902_v61  ;;  %v907_v2 = vsel %vm899_vm11, %v895_v55, %v903_v62 }
  0xaa   : > { %v910_v3 = vmul.f32 %v906_v1, %v1606_v30  ;;  %v911_v4 = vmul.f32 %v907_v2, %v1608_v31  ;;  %v904_v5 = vsel %vm896_vm12, %v892_v56, %v900_v63  ;;  %v905_v6 = vsel %vm897_vm13, %v893_v57, %v901_v0 }
  0xab   : > { %v908_v9 = vmul.f32 %v904_v5, %v1606_v30  ;;  %v909_v10 = vmul.f32 %v905_v6, %v1608_v31 }
  0xac   : > { %v913_v11 = vpack.c.bf16 %v911_v4, %v910_v3  ;;  %v948_v12 = vpop.permute.xlu0 %947 }
  0xad   : > { %v912_v13 = vpack.c.bf16 %v909_v10, %v908_v9  ;;  %v952_v14 = vadd.f32 %v948_v12, %v938_v7  ;;  %v953_v15 = vadd.f32 %v948_v12, %v939_v8 }
  0xae   : > { %915 = vst [vmem:[%s726_s28 + $0x8] sm:$0xff] %v913_v11 }
  0xaf   : > { %914 = vst [vmem:[%s726_s28] sm:$0xff] %v912_v13  ;;  %vm956_vm14 = vcmp.ge.f32.partialorder %v952_v14, 0.0  ;;  %vm957_vm15 = vcmp.ge.f32.partialorder %v953_v15, 0.0  ;;  %v960_v16 = vmul.f32 0.01, %v952_v14  ;;  %v961_v60 = vmul.f32 0.01, %v953_v15 }
  0xb1   : > { %v964_v17 = vsel %vm956_vm14, %v952_v14, %v960_v16  ;;  %v965_v18 = vsel %vm957_vm15, %v953_v15, %v961_v60 }
  0xb2   : > { %v968_v19 = vmul.f32 %v964_v17, %v1606_v30  ;;  %v969_v20 = vmul.f32 %v965_v18, %v1608_v31 }
  0xb4   : > { %v971_v21 = vpack.c.bf16 %v969_v20, %v968_v19 }
  0xb6   : > { %973 = vst [vmem:[%s1656_s21 + $0x8] sm:$0xff] %v971_v21 }
  0xb7 PF: > { %s27_s25 = sadd.s32 1, %s1419_s25   ;;  %s1712_s4 = sld [smem:[#allocation2_spill]] }
  0xb8   : > { %p24_p7 = scmp.ge.s32.totalorder %s27_s25, 10   ;;  %s1713_s29 = sld [smem:[#allocation3_spill]] }
  0xb9   : > { %s1714_s21 = smov %s1411_s23  ;;  %s1715_s22 = smov %s1415_s24 }
  0xba   :  { %26 = sbr.rel (!%p24_p7) target bundleno = 4 (0x4), region = 147 }
  0xbd   : > { %s1716_s23 = smov %s1712_s4 }
  0xbe   : > { %s1717_s24 = smov %s1713_s29 }

// kernel: iconvmod_forward.15
= control target key start
LH: loop header
LB: loop body
LE: loop exit
PB: predicated region body
PF: predicated region fallthrough
CT: control target
= control target key end

     0   :  { %s1879_s21 = smov 0   ;;  %s1881_s22 = smov 0   ;;  %s2342_s0 = inlined_call_operand.vmem [shape: bf16[2,4,4,256], index: 0, kind: input, shape index: {}, may-alias: {0,1,2}]   ;;  %s2343_s1 = inlined_call_operand.vmem [shape: bf16[2,4,4,256], index: 1, kind: input, shape index: {}, may-alias: {0,1,2}]   ;;  %s2344_s2 = inlined_call_operand.vmem [shape: bf16[2,4,4,256], index: 2, kind: input, shape index: {}, may-alias: {0,1,2}]   ;;  %s2345_s3 = inlined_call_operand.vmem [shape: bf16[3,64,36], index: 3, kind: input, shape index: {}]   ;;  %s2346_s4 = inlined_call_operand.vmem [shape: f32[1,256], index: 4, kind: input, shape index: {}]   ;;  %s2347_s5 = inlined_call_operand.vmem [shape: bf16[2,4,64,256], index: 5, kind: output, shape index: {0}]   ;;  %s2348_s6 = inlined_call_operand.vmem [shape: f32[2,4,64,2], index: 6, kind: output, shape index: {1}]  }
   0x1   :  { %s1883_s23 = smov 0   ;;  %s1885_s24 = smov 0  }
   0x2   :  { %s1887_s25 = smov 0  }
   0x3 LB: > { %s26_s26 = sadd.s32 1, %s1826_s23  ;;  %s29_s27 = sadd.s32 1, %s1830_s24  ;;  %s1834_s25 = sphi %s1887_s25, %s17_s25   ;;  %s1830_s24 = sphi %s1885_s24, %s2352_s24   ;;  %s1826_s23 = sphi %s1883_s23, %s2351_s23   ;;  %s1822_s22 = sphi %s1881_s22, %s2350_s22   ;;  %s1818_s21 = sphi %s1879_s21, %s2349_s21  }
   0x4   : > { %p27_p0 = scmp.ge.s32.totalorder %s26_s26, 4  ;;  %p1493_p1 = scmp.ge.s32.totalorder %s1834_s25, 1 }
   0x5   : > { %p293_p2 = scmp.lt.s32.totalorder %s1834_s25, 9 }
   0x6   : > { %s2354_s26 = smov (%p27_p0, %s26_s26), 0  ;;  %s2356_s27 = smov (!%p27_p0, %s29_s27), %s1830_s24 }
   0x7   : > { %p294_p3 = pnand %p1493_p1, %p293_p2  ;;  %p31_p4 = scmp.ge.s32.totalorder %s2356_s27, 2 }
   0x8   : > { %s1494_s28 = sadd.s32 (!%p294_p3), 4294967295, %s1818_s21  ;;  %p367_p5 = scmp.lt.s32.totalorder (!%p294_p3), %s1822_s22, 1 }
   0x9   : > { %s2358_s27 = smov (%p31_p4, %s2356_s27), 0  ;;  %297 = sbr.rel (%p294_p3) target bundleno = 681 (0x2a9), region = 40 }
   0xa   : > { %p365_p6 = scmp.gt.s32.totalorder (!%p294_p3), %s1494_s28, 0  ;;  %p1495_p7 = scmp.lt.s32.totalorder (!%p294_p3), %s1494_s28, 3 }
   0xb   : > { %p422_p8 = scmp.gt.s32.totalorder (!%p294_p3), %s1818_s21, 0  ;;  %p381_p9 = scmp.lt.s32.totalorder (!%p294_p3), %s1818_s21, 3 }
   0xc   : > { %s388_s15 = sadd.s32 (!%p294_p3), 1, %s1818_s21  ;;  %s1843_s18 = smov (!%p294_p3), 17  }
   0xd   : > { %p389_p10 = scmp.lt.s32.totalorder (!%p294_p3), %s388_s15, 3 }
   0xe   : > { %s2360_s22 = smov (!%p367_p5, %s1822_s22), 1  ;;  %s2362_s28 = smov (!%p365_p6, %s1494_s28), 0  ;;  %vm757_vm8 = vcmask 1041408   ;;  %vm558_vm9 = vcmask 1043456   ;;  %vm744_vm12 = vcmask 293888   ;;  %vm1279_vm13 = vcmask 7168  }
   0xf   : > { %s1915_s29 = sshll.u32 %s2360_s22, 3  ;;  %s2364_s28 = smov (!%p1495_p7, %s2362_s28), 3  ;;  %vm1288_vm14 = vcmask 15360  }
  0x10   : > { %s1500_s30 = sshll.u32 %s2364_s28, 1  ;;  %s2366_s15 = smov (!%p389_p10, %s388_s15), 3 }
  0x11   : > { %s373_s7 = sadd.s32 %s1915_s29, %s1500_s30  ;;  %s2368_s15 = smov (!%p389_p10, %s2366_s15), 3 }
  0x12   : > { %s1502_s8 = sshll.u32 %s373_s7, 1  ;;  %s1509_s28 = sshll.u32 %s2368_s15, 1 }
  0x13   : > { %s375_s11 = scalar_lea.vmem %s2342_s0, %s1502_s8  ;;  %s397_s30 = sadd.s32 %s1509_s28, %s1915_s29 }
  0x14   : > { %v424_v0 = vld [vmem:[%s375_s11] sm:$0xf]  ;;  %s426_s12 = scalar_select %p422_p8, 1, 0 }
  0x15   : > { %v425_v1 = vunpack.c.l.bf16 %v424_v0  ;;  %s1950_s13 = scalar_select %p381_p9, %s1818_s21, 3 }
  0x16   : > { %v427_v2 = vstv %s426_s12  ;;  %s1511_s7 = sshll.u32 %s397_s30, 1  ;;  %s1836_s21 = smov 127  }
  0x17   : > { %vm428_vm0 = vcmp.eq.s32.totalorder %v427_v2, 1  ;;  %s1503_s14 = sshll.u32 %s1950_s13, 1  ;;  %s399_s11 = scalar_lea.vmem %s2344_s2, %s1511_s7 }
  0x18   : > { %v429_v3 = vsel %vm428_vm0, %v425_v1, 0.0  ;;  %s385_s16 = sadd.s32 %s1503_s14, %s1915_s29  ;;  %v918_v27 = vld [vmem:[%s399_s11] sm:$0xf]  ;;  %s1837_s29 = smov 113  }
  0x19   : > { %431 = vst [vmem:[#allocation1] ss:$2 sm:$0xff] %v429_v3  ;;  %s1505_s17 = sshll.u32 %s385_s16, 1  ;;  %v919_v28 = vunpack.c.l.bf16 %v918_v27  ;;  %s1838_s12 = smov 16  }
  0x1a   : > { %s387_s20 = scalar_lea.vmem %s2343_s1, %s1505_s17  ;;  %s1839_s14 = smov 112  }
  0x1b   : > { %v581_v20 = vld [vmem:[%s387_s20] sm:$0xf]  ;;  %s920_s8 = scalar_select %p381_p9, 1, 0 }
  0x1c   : > { %v582_v21 = vunpack.c.l.bf16 %v581_v20  ;;  %s1840_s15 = smov 1   ;;  %s1841_s16 = smov 111  }
  0x1d   : > { %v921_v26 = vstv %s920_s8  ;;  %s1842_s17 = smov 15   ;;  %s1512_s10 = sshll.u32 %s1950_s13, 4 }
  0x1e   : > { %vm922_vm1 = vcmp.eq.s32.totalorder %v921_v26, 1  ;;  %v440_v26 = vlaneseq  ;;  %s1513_s11 = sshll.u32 %s2360_s22, 6  ;;  %s1516_s19 = sshll.u32 %s2360_s22, 5 }
  0x1f   : > { %v1976_v29 = vsel %vm922_vm1, %v919_v28, 0.0 }
  0x20   : > { %v1922_v4 = vld.sshfl [vmem:[#allocation1] sm:$0xff pattern:$0x75316420]  ;;  %v1924_v5 = vld.sshfl [vmem:[#allocation1 + $0x8] sm:$0xff pattern:$0x75316420] }
  0x21   : > { %445 = vst [vmem:[#allocation1] ss:$2 sm:$0xff] %v429_v3  ;;  %v2031_v27 = vand.u32 127, %v440_v26 }
  0x23   : > { %vm490_vm2 = vcmp.lt.s32.totalorder %v2031_v27, 127  ;;  %vm514_vm3 = vcmp.lt.s32.totalorder %v2031_v27, 112  ;;  %vm454_vm4 = vcmp.lt.s32.totalorder %v2031_v27, 16  ;;  %vm502_vm5 = vcmp.lt.s32.totalorder %v2031_v27, 113 }
  0x24   : > { %vm478_vm6 = vcmp.lt.s32.totalorder %v2031_v27, 1  ;;  %vm526_vm7 = vcmp.lt.s32.totalorder %v2031_v27, 111  ;;  %vm466_vm10 = vcmp.lt.s32.totalorder %v2031_v27, 15  ;;  %vm442_vm11 = vcmp.lt.s32.totalorder %v2031_v27, 17  ;;  %v1613_v27 = vld [vmem:[%s2345_s3 + $0x18] sm:$0xff] }
  0x28   : > { %v1926_v6 = vld.sshfl [vmem:[#allocation1] sm:$0xff pattern:$0x75316420]  ;;  %v1928_v7 = vld.sshfl [vmem:[#allocation1 + $0x8] sm:$0xff pattern:$0x75316420] }
  0x29   : > { %457 = vst [vmem:[#allocation1] ss:$2 sm:$0xff] %v429_v3  ;;  %v1736_v60 = vpack.i.bf16 %v1928_v7, %v1926_v6 }
  0x30   : > { %v1930_v8 = vld.sshfl [vmem:[#allocation1] sm:$0xff pattern:$0x75316420]  ;;  %v1932_v9 = vld.sshfl [vmem:[#allocation1 + $0x8] sm:$0xff pattern:$0x75316420] }
  0x31   : > { %469 = vst [vmem:[#allocation1] ss:$2 sm:$0xff] %v429_v3  ;;  %v1751_v0 = vpack.i.bf16 %v1932_v9, %v1930_v8 }
  0x38   : > { %v1934_v10 = vld.sshfl [vmem:[#allocation1] sm:$0xff pattern:$0x75316420]  ;;  %v1936_v11 = vld.sshfl [vmem:[#allocation1 + $0x8] sm:$0xff pattern:$0x75316420] }
  0x39   : > { %481 = vst [vmem:[#allocation1] ss:$2 sm:$0xff] %v429_v3  ;;  %v1741_v56 = vpack.i.bf16 %v1936_v11, %v1934_v10 }
  0x40   : > { %v1938_v12 = vld.sshfl [vmem:[#allocation1] sm:$0xff pattern:$0x75316420]  ;;  %v1940_v13 = vld.sshfl [vmem:[#allocation1 + $0x8] sm:$0xff pattern:$0x75316420] }
  0x41   : > { %493 = vst [vmem:[#allocation1] ss:$2 sm:$0xff] %v429_v3  ;;  %v1721_v55 = vpack.i.bf16 %v1940_v13, %v1938_v12 }
  0x48   : > { %v1943_v14 = vld.sshfl [vmem:[#allocation1] sm:$0xff pattern:$0x75316420]  ;;  %v1945_v15 = vld.sshfl [vmem:[#allocation1 + $0x8] sm:$0xff pattern:$0x75316420] }
  0x49   : > { %505 = vst [vmem:[#allocation1] ss:$2 sm:$0xff] %v429_v3  ;;  %v1731_v63 = vpack.i.bf16 %v1945_v15, %v1943_v14 }
  0x50   : > { %v1954_v16 = vld.sshfl [vmem:[#allocation1] sm:$0xff pattern:$0x75316420]  ;;  %v1956_v17 = vld.sshfl [vmem:[#allocation1 + $0x8] sm:$0xff pattern:$0x75316420] }
  0x51   : > { %517 = vst [vmem:[#allocation1] ss:$2 sm:$0xff] %v429_v3  ;;  %v1726_v52 = vpack.i.bf16 %v1956_v17, %v1954_v16 }
  0x58   : > { %v1962_v18 = vld.sshfl [vmem:[#allocation1] sm:$0xff pattern:$0x75316420]  ;;  %v1964_v19 = vld.sshfl [vmem:[#allocation1 + $0x8] sm:$0xff pattern:$0x75316420] }
  0x59   : > { %541 = vst [vmem:[#allocation1] ss:$2 sm:$0xff] %v429_v3  ;;  %v1716_v59 = vpack.i.bf16 %v1964_v19, %v1962_v18  ;;  %v1746_v3 = vpack.i.bf16 %v1924_v5, %v1922_v4 }
  0x60   : > { %v1967_v22 = vld.sshfl [vmem:[#allocation1] sm:$0xff pattern:$0x75316420]  ;;  %v1969_v23 = vld.sshfl [vmem:[#allocation1 + $0x8] sm:$0xff pattern:$0x75316420] }
  0x61   : > { %584 = vst [vmem:[#allocation1] ss:$2 sm:$0xff] %v582_v21 }
  0x68   : > { %v585_v24 = vld.sshfl [vmem:[#allocation1] sm:$0xff pattern:$0x75316420]  ;;  %v586_v25 = vld.sshfl [vmem:[#allocation1 + $0x8] sm:$0xff pattern:$0x75316420] }
  0x69   : > { %595 = vst [vmem:[#allocation1] ss:$2 sm:$0xff] %v582_v21  ;;  %v1706_v51 = vpack.i.bf16 %v586_v25, %v585_v24 }
  0x70   : > { %v596_v30 = vld.sshfl [vmem:[#allocation1] sm:$0xff pattern:$0x75316420]  ;;  %v597_v31 = vld.sshfl [vmem:[#allocation1 + $0x8] sm:$0xff pattern:$0x75316420] }
  0x71   : > { %606 = vst [vmem:[#allocation1] ss:$2 sm:$0xff] %v582_v21  ;;  %v1676_v42 = vpack.i.bf16 %v597_v31, %v596_v30 }
  0x73   : > { %1677 = vrot.lane.b32.xlu2 %v1676_v42, %s1838_s12 }
  0x78   : > { %v607_v32 = vld.sshfl [vmem:[#allocation1] sm:$0xff pattern:$0x75316420]  ;;  %v608_v33 = vld.sshfl [vmem:[#allocation1 + $0x8] sm:$0xff pattern:$0x75316420] }
  0x79   : > { %617 = vst [vmem:[#allocation1] ss:$2 sm:$0xff] %v582_v21  ;;  %v1711_v46 = vpack.i.bf16 %v608_v33, %v607_v32 }
  0x80   : > { %v618_v34 = vld.sshfl [vmem:[#allocation1] sm:$0xff pattern:$0x75316420]  ;;  %v619_v35 = vld.sshfl [vmem:[#allocation1 + $0x8] sm:$0xff pattern:$0x75316420] }
  0x81   : > { %628 = vst [vmem:[#allocation1] ss:$2 sm:$0xff] %v582_v21  ;;  %v1681_v47 = vpack.i.bf16 %v619_v35, %v618_v34 }
  0x83   : > { %1682 = vrot.lane.b32.xlu2 %v1681_v47, %s1840_s15 }
  0x88   : > { %v629_v36 = vld.sshfl [vmem:[#allocation1] sm:$0xff pattern:$0x75316420]  ;;  %v630_v37 = vld.sshfl [vmem:[#allocation1 + $0x8] sm:$0xff pattern:$0x75316420] }
  0x89   : > { %v1686_v38 = vpack.i.bf16 %v630_v37, %v629_v36  ;;  %639 = vst [vmem:[#allocation1] ss:$2 sm:$0xff] %v582_v21 }
  0x8b   : > { %1687 = vrot.lane.b32.xlu0 %v1686_v38, %s1836_s21  ;;  %1717 = vrot.lane.b32.xlu2 %v1716_v59, %s1841_s16 }
  0x90   : > { %v640_v39 = vld.sshfl [vmem:[#allocation1] sm:$0xff pattern:$0x75316420]  ;;  %v641_v40 = vld.sshfl [vmem:[#allocation1 + $0x8] sm:$0xff pattern:$0x75316420] }
  0x91   : > { %v1691_v41 = vpack.i.bf16 %v641_v40, %v640_v39  ;;  %650 = vst [vmem:[#allocation1] ss:$2 sm:$0xff] %v582_v21 }
  0x93   : > { %1692 = vrot.lane.b32.xlu1 %v1691_v41, %s1837_s29  ;;  %1732 = vrot.lane.b32.xlu2 %v1731_v63, %s1837_s29 }
  0x98   : > { %v651_v43 = vld.sshfl [vmem:[#allocation1] sm:$0xff pattern:$0x75316420]  ;;  %v652_v44 = vld.sshfl [vmem:[#allocation1 + $0x8] sm:$0xff pattern:$0x75316420] }
  0x99   : > { %v1696_v45 = vpack.i.bf16 %v652_v44, %v651_v43  ;;  %661 = vst [vmem:[#allocation1] ss:$2 sm:$0xff] %v582_v21 }
  0x9b   : > { %1697 = vrot.lane.b32.xlu1 %v1696_v45, %s1839_s14  ;;  %1747 = vrot.lane.b32.xlu2 %v1746_v3, %s1843_s18 }
  0xa0   : > { %v662_v48 = vld.sshfl [vmem:[#allocation1] sm:$0xff pattern:$0x75316420]  ;;  %v663_v49 = vld.sshfl [vmem:[#allocation1 + $0x8] sm:$0xff pattern:$0x75316420] }
  0xa1   : > { %v1701_v50 = vpack.i.bf16 %v663_v49, %v662_v48  ;;  %684 = vst [vmem:[#allocation1] ss:$2 sm:$0xff] %v582_v21 }
  0xa3   : > { %1702 = vrot.lane.b32.xlu0 %v1701_v50, %s1841_s16  ;;  %1712 = vrot.lane.b32.xlu1 %v1711_v46, %s1842_s17 }
  0xa8   : > { %v1987_v53 = vld.sshfl [vmem:[#allocation1] sm:$0xff pattern:$0x75316420]  ;;  %v1989_v54 = vld.sshfl [vmem:[#allocation1 + $0x8] sm:$0xff pattern:$0x75316420] }
  0xa9   : > { %925 = vst [vmem:[#allocation1] ss:$2 sm:$0xff] %v1976_v29 }
  0xab   : > { %1707 = vrot.lane.b32.xlu0 %v1706_v51, %s1843_s18  ;;  %1727 = vrot.lane.b32.xlu1 %v1726_v52, %s1839_s14 }
  0xb0   : > { %v926_v57 = vld.sshfl [vmem:[#allocation1] sm:$0xff pattern:$0x75316420]  ;;  %v927_v58 = vld.sshfl [vmem:[#allocation1 + $0x8] sm:$0xff pattern:$0x75316420] }
  0xb1   : > { %936 = vst [vmem:[#allocation1] ss:$2 sm:$0xff] %v1976_v29  ;;  %v1786_v11 = vpack.i.bf16 %v927_v58, %v926_v57 }
  0xb3   : > { %1722 = vrot.lane.b32.xlu0 %v1721_v55, %s1836_s21  ;;  %1742 = vrot.lane.b32.xlu1 %v1741_v56, %s1840_s15 }
  0xb8   : > { %v937_v61 = vld.sshfl [vmem:[#allocation1] sm:$0xff pattern:$0x75316420]  ;;  %v938_v62 = vld.sshfl [vmem:[#allocation1 + $0x8] sm:$0xff pattern:$0x75316420] }
  0xb9   : > { %947 = vst [vmem:[#allocation1] ss:$2 sm:$0xff] %v1976_v29  ;;  %v1756_v10 = vpack.i.bf16 %v938_v62, %v937_v61 }
  0xbb   : > { %1737 = vrot.lane.b32.xlu0 %v1736_v60, %s1838_s12  ;;  %1757 = vrot.lane.b32.xlu2 %v1756_v10, %s1838_s12  ;;  %s409_s12 = sadd.s32 %s1513_s11, %s1512_s10 }
  0xc0   : > { %v948_v1 = vld.sshfl [vmem:[#allocation1] sm:$0xff pattern:$0x75316420]  ;;  %v949_v2 = vld.sshfl [vmem:[#allocation1 + $0x8] sm:$0xff pattern:$0x75316420] }
  0xc1   : > { %958 = vst [vmem:[#allocation1] ss:$2 sm:$0xff] %v1976_v29  ;;  %v1791_v14 = vpack.i.bf16 %v949_v2, %v948_v1 }
  0xc3   : > { %1752 = vrot.lane.b32.xlu0 %v1751_v0, %s1842_s17 }
  0xc8   : > { %v959_v6 = vld.sshfl [vmem:[#allocation1] sm:$0xff pattern:$0x75316420]  ;;  %v960_v7 = vld.sshfl [vmem:[#allocation1 + $0x8] sm:$0xff pattern:$0x75316420] }
  0xc9   : > { %969 = vst [vmem:[#allocation1] ss:$2 sm:$0xff] %v1976_v29  ;;  %v1776_v18 = vpack.i.bf16 %v960_v7, %v959_v6 }
  0xcd   : > { %v1678_v24 = vpop.permute.xlu2 %1677 }
  0xce   : > { %v1680_v35 = vunpack.i.h.bf16 %v1678_v24  ;;  %v1679_v36 = vunpack.i.l.bf16 %v1678_v24 }
  0xd0   : > { %v970_v8 = vld.sshfl [vmem:[#allocation1] sm:$0xff pattern:$0x75316420]  ;;  %v971_v9 = vld.sshfl [vmem:[#allocation1 + $0x8] sm:$0xff pattern:$0x75316420]  ;;  %v2048_v46 = vsel %vm454_vm4, %v1680_v35, %v1679_v36 }
  0xd1   : > { %980 = vst [vmem:[#allocation1] ss:$2 sm:$0xff] %v1976_v29  ;;  %v1761_v12 = vpack.i.bf16 %v971_v9, %v970_v8 }
  0xd3   : > { %1762 = vrot.lane.b32.xlu2 %v1761_v12, %s1836_s21 }
  0xd8   : > { %v981_v4 = vld.sshfl [vmem:[#allocation1] sm:$0xff pattern:$0x75316420]  ;;  %v982_v5 = vld.sshfl [vmem:[#allocation1 + $0x8] sm:$0xff pattern:$0x75316420] }
  0xd9   : > { %v1766_v13 = vpack.i.bf16 %v982_v5, %v981_v4  ;;  %991 = vst [vmem:[#allocation1] ss:$2 sm:$0xff] %v1976_v29 }
  0xdb   : > { %1767 = vrot.lane.b32.xlu1 %v1766_v13, %s1837_s29  ;;  %1792 = vrot.lane.b32.xlu2 %v1791_v14, %s1842_s17 }
  0xdd   : > { %v1683_v32 = vpop.permute.xlu2 %1682 }
  0xde   : > { %v1685_v41 = vunpack.i.h.bf16 %v1683_v32  ;;  %v1684_v42 = vunpack.i.l.bf16 %v1683_v32 }
  0xe0   : > { %v992_v15 = vld.sshfl [vmem:[#allocation1] sm:$0xff pattern:$0x75316420]  ;;  %v993_v16 = vld.sshfl [vmem:[#allocation1 + $0x8] sm:$0xff pattern:$0x75316420]  ;;  %v626_v55 = vsel %vm478_vm6, %v1684_v42, %v1685_v41  ;;  %v627_v62 = vsel %vm478_vm6, %v1685_v41, %v1684_v42 }
  0xe1   : > { %v1771_v17 = vpack.i.bf16 %v993_v16, %v992_v15  ;;  %1002 = vst [vmem:[#allocation1] ss:$2 sm:$0xff] %v1976_v29  ;;  %v680_v9 = vrot.slane %v627_v62, 4  ;;  %v681_v5 = vrot.slane %v626_v55, 4 }
  0xe3   : > { %1772 = vrot.lane.b32.xlu0 %v1771_v17, %s1839_s14  ;;  %s1514_s14 = sshll.u32 %s409_s12, 2 }
  0xe4   : > { %s2264_s17 = scalar_lea.vmem %s2347_s5, %s1514_s14 }
  0xe5   : > { %v1718_v49 = vpop.permute.xlu2 %1717 }
  0xe6   : > { %v1720_v60 = vunpack.i.h.bf16 %v1718_v49  ;;  %v1719_v61 = vunpack.i.l.bf16 %v1718_v49 }
  0xe8   : > { %v1003_v19 = vld.sshfl [vmem:[#allocation1] sm:$0xff pattern:$0x75316420]  ;;  %v1004_v20 = vld.sshfl [vmem:[#allocation1 + $0x8] sm:$0xff pattern:$0x75316420]  ;;  %v527_v12 = vsel %vm526_vm7, %v1719_v61, %v1720_v60  ;;  %v528_v4 = vsel %vm526_vm7, %v1720_v60, %v1719_v61 }
  0xe9   : > { %v1781_v21 = vpack.i.bf16 %v1004_v20, %v1003_v19  ;;  %1025 = vst [vmem:[#allocation1] ss:$2 sm:$0xff] %v1976_v29  ;;  %v571_v24 = vpack.c.bf16 %v527_v12, %v527_v12 }
  0xeb   : > { %1782 = vrot.lane.b32.xlu1 %v1781_v21, %s1841_s16  ;;  %1777 = vrot.lane.b32.xlu0 %v1776_v18, %s1840_s15 }
  0xf3   : > { %1787 = vrot.lane.b32.xlu1 %v1786_v11, %s1843_s18  ;;  %s1515_s18 = sshll.u32 %s1950_s13, 3 }
  0xf4   : > { %s418_s20 = sadd.s32 %s1516_s19, %s1515_s18 }
  0xf5   : > { %s1517_s28 = sshll.u32 %s418_s20, 3 }
  0xf6   : > { %s2301_s8 = scalar_lea.vmem %s2348_s6, %s1517_s28 }
  0xfd   : > { %v1688_v28 = vpop.permute.xlu0 %1687 }
  0xfe   : > { %v1690_v30 = vunpack.i.h.bf16 %v1688_v28  ;;  %v1689_v31 = vunpack.i.l.bf16 %v1688_v28 }
 0x100   : > { %v637_v37 = vsel %vm490_vm2, %v1689_v31, %v1690_v30  ;;  %v638_v43 = vsel %vm490_vm2, %v1690_v30, %v1689_v31 }
 0x101   : > { %v691_v45 = vrot.slane %v637_v37, 4  ;;  %v692_v50 = vrot.slane %v638_v43, 4 }
 0x103   : > { %v705_v63 = vsel %vm558_vm9, %v1987_v53, %v691_v45  ;;  %v706_v11 = vsel %vm558_vm9, %v1989_v54, %v692_v50  ;;  %v604_v53 = vsel %vm454_vm4, %v1679_v36, %v1680_v35  ;;  %v674_v54 = vrot.slane %v2048_v46, 4  ;;  %v1616_v46 = vld [vmem:[%s2345_s3 + $0x30] sm:$0xff]  ;;  %v1614_v50 = vld [vmem:[%s2345_s3 + $0x20] sm:$0xff] }
 0x104   : > { %v675_v19 = vrot.slane %v604_v53, 4 }
 0x105   : > { %v1693_v25 = vpop.permute.xlu1 %1692 }
 0x106   : > { %v1695_v38 = vunpack.i.h.bf16 %v1693_v25  ;;  %v1694_v39 = vunpack.i.l.bf16 %v1693_v25  ;;  %v572_v25 = vpack.c.bf16 %v528_v4, %v528_v4 }
 0x108   : > { %v648_v48 = vsel %vm502_vm5, %v1694_v39, %v1695_v38  ;;  %v649_v57 = vsel %vm502_vm5, %v1695_v38, %v1694_v39  ;;  %v858_v41 = vsel %vm757_vm8, %v572_v25, 0 }
 0x10d   : > { %v1698_v29 = vpop.permute.xlu1 %1697 }
 0x10e   : > { %v1700_v33 = vunpack.i.h.bf16 %v1698_v29  ;;  %v1699_v34 = vunpack.i.l.bf16 %v1698_v29 }
 0x110   : > { %v659_v40 = vsel %vm514_vm3, %v1699_v34, %v1700_v33  ;;  %v660_v44 = vsel %vm514_vm3, %v1700_v33, %v1699_v34  ;;  %v1733_v33 = vpop.permute.xlu2 %1732 }
 0x111   : > { %v697_v47 = vrot.slane %v659_v40, 4  ;;  %v698_v51 = vrot.slane %v660_v44, 4  ;;  %v1735_v36 = vunpack.i.h.bf16 %v1733_v33  ;;  %v1734_v37 = vunpack.i.l.bf16 %v1733_v33 }
 0x112   : > { %v855_v40 = vsel %vm757_vm8, %v571_v24, 0 }
 0x113   : > { %v707_v0 = vsel %vm558_vm9, %v648_v48, %v697_v47  ;;  %v708_v8 = vsel %vm558_vm9, %v649_v57, %v698_v51  ;;  %v503_v55 = vsel %vm502_vm5, %v1734_v37, %v1735_v36 }
 0x114   : > { %v711_v15 = vpack.c.bf16 %v707_v0, %v705_v63  ;;  %v712_v16 = vpack.c.bf16 %v708_v8, %v706_v11 }
 0x115   : > { %v1703_v52 = vpop.permute.xlu0 %1702  ;;  %v1713_v56 = vpop.permute.xlu1 %1712 }
 0x116   : > { %v1705_v58 = vunpack.i.h.bf16 %v1703_v52  ;;  %v1704_v59 = vunpack.i.l.bf16 %v1703_v52  ;;  %v1715_v3 = vunpack.i.h.bf16 %v1713_v56  ;;  %v1714_v6 = vunpack.i.l.bf16 %v1713_v56 }
 0x117   : > { %v504_v56 = vsel %vm502_vm5, %v1735_v36, %v1734_v37 }
 0x118   : > { %v670_v1 = vsel %vm526_vm7, %v1704_v59, %v1705_v58  ;;  %v671_v2 = vsel %vm526_vm7, %v1705_v58, %v1704_v59  ;;  %v616_v17 = vsel %vm466_vm10, %v1715_v3, %v1714_v6  ;;  %v615_v18 = vsel %vm466_vm10, %v1714_v6, %v1715_v3 }
 0x119   : > { %v713_v7 = vpack.c.bf16 %v670_v1, %v670_v1  ;;  %v714_v10 = vpack.c.bf16 %v671_v2, %v671_v2  ;;  %v703_v32 = vsel %vm558_vm9, %v616_v17, %v680_v9  ;;  %v704_v29 = vsel %vm558_vm9, %v615_v18, %v681_v5 }
 0x11b   : > { %v759_v13 = vsel %vm757_vm8, %v713_v7, 0  ;;  %v762_v14 = vsel %vm757_vm8, %v714_v10, 0  ;;  %v1748_v7 = vpop.permute.xlu2 %1747 }
 0x11c   : > { %1622 = vmatpush.bf16.msra.mxu2 %v759_v13  ;;  %1625 = vmatpush.bf16.msra.mxu3 %v762_v14  ;;  %v1749_v4 = vunpack.i.l.bf16 %v1748_v7 }
 0x11d   : > { %v1708_v20 = vpop.permute.xlu0 %1707  ;;  %769 = vmatpush.bf16.msra.mxu0 %v759_v13  ;;  %798 = vmatpush.bf16.msra.mxu1 %v762_v14  ;;  %v1728_v21 = vpop.permute.xlu1 %1727 }
 0x11e   : > { %v1710_v26 = vunpack.i.h.bf16 %v1708_v20  ;;  %v1709_v28 = vunpack.i.l.bf16 %v1708_v20  ;;  %v1730_v30 = vunpack.i.h.bf16 %v1728_v21  ;;  %v1729_v31 = vunpack.i.l.bf16 %v1728_v21  ;;  %v1615_v20 = vld [vmem:[%s2345_s3 + $0x28] sm:$0xff] }
 0x120   : > { %1623 = vmatpush.bf16.msra.mxu2 %v711_v15  ;;  %1626 = vmatpush.bf16.msra.mxu3 %v712_v16  ;;  %v594_v34 = vsel %vm442_vm11, %v1710_v26, %v1709_v28  ;;  %v593_v35 = vsel %vm442_vm11, %v1709_v28, %v1710_v26  ;;  %v515_v44 = vsel %vm514_vm3, %v1729_v31, %v1730_v30 }
 0x121   : > { %v701_v38 = vsel %vm558_vm9, %v594_v34, %v674_v54  ;;  %v702_v39 = vsel %vm558_vm9, %v593_v35, %v675_v19  ;;  %770 = vmatpush.bf16.msra.mxu0 %v711_v15  ;;  %799 = vmatpush.bf16.msra.mxu1 %v712_v16  ;;  %v516_v45 = vsel %vm514_vm3, %v1730_v30, %v1729_v31  ;;  %v554_v48 = vrot.slane %v515_v44, 4  ;;  %v1617_v15 = vld [vmem:[%s2345_s3 + $0x38] sm:$0xff]  ;;  %v1610_v34 = vld [vmem:[%s2345_s3] sm:$0xff] }
 0x122   : > { %v709_v42 = vpack.c.bf16 %v703_v32, %v701_v38  ;;  %v710_v43 = vpack.c.bf16 %v704_v29, %v702_v39  ;;  %v555_v49 = vrot.slane %v516_v45, 4  ;;  %v1611_v38 = vld [vmem:[%s2345_s3 + $0x8] sm:$0xff] }
 0x123   : > { %v565_v61 = vsel %vm558_vm9, %v503_v55, %v554_v48  ;;  %v1758_v35 = vpop.permute.xlu2 %1757 }
 0x124   : > { %1624 = vmatpush.bf16.msra.mxu2 %v709_v42  ;;  %1627 = vmatpush.bf16.msra.mxu3 %v710_v43  ;;  %v566_v62 = vsel %vm558_vm9, %v504_v56, %v555_v49  ;;  %v1760_v48 = vunpack.i.h.bf16 %v1758_v35  ;;  %v1759_v49 = vunpack.i.l.bf16 %v1758_v35 }
 0x125   : > { %v1723_v47 = vpop.permute.xlu0 %1722  ;;  %771 = vmatpush.bf16.msra.mxu0 %v709_v42  ;;  %800 = vmatpush.bf16.msra.mxu1 %v710_v43  ;;  %v1743_v63 = vpop.permute.xlu1 %1742 }
 0x126   : > { %v1725_v51 = vunpack.i.h.bf16 %v1723_v47  ;;  %v1724_v52 = vunpack.i.l.bf16 %v1723_v47  ;;  %v1745_v8 = vunpack.i.h.bf16 %v1743_v63  ;;  %v1744_v53 = vunpack.i.l.bf16 %v1743_v63 }
 0x127   : > { %1544 = vmatmul.msk.bf16.vlgmr.msra.gmra.mxu2 %vm744_vm12, %v1616_v46  ;;  %1548 = vmatmul.msk.bf16.vlgmr.msra.gmra.mxu3 %vm744_vm12, %v1616_v46 }
 0x128   : > { %865 = vmatpush.bf16.msrb.mxu2 %v855_v40  ;;  %894 = vmatpush.bf16.msrb.mxu3 %v858_v41  ;;  %v491_v57 = vsel %vm490_vm2, %v1724_v52, %v1725_v51  ;;  %v492_v58 = vsel %vm490_vm2, %v1725_v51, %v1724_v52  ;;  %v480_v5 = vsel %vm478_vm6, %v1745_v8, %v1744_v53 }
 0x129   : > { %v548_v59 = vrot.slane %v491_v57, 4  ;;  %v549_v60 = vrot.slane %v492_v58, 4  ;;  %1542 = vmatmul.msk.bf16.vlgmr.msra.gmra.mxu0 %vm744_vm12, %v1614_v50  ;;  %1546 = vmatmul.msk.bf16.vlgmr.msra.gmra.mxu1 %vm744_vm12, %v1614_v50  ;;  %v537_v17 = vrot.slane %v480_v5, 4 }
 0x12b   : > { %v563_v0 = vsel %vm558_vm9, %v1967_v22, %v548_v59  ;;  %v564_v1 = vsel %vm558_vm9, %v1969_v23, %v549_v60  ;;  %v1750_v22 = vunpack.i.h.bf16 %v1748_v7  ;;  %v479_v23 = vsel %vm478_vm6, %v1744_v53, %v1745_v8  ;;  %v1027_v7 = vld.sshfl [vmem:[#allocation1 + $0x8] sm:$0xff pattern:$0x75316420] }
 0x12c   : > { %v569_v2 = vpack.c.bf16 %v565_v61, %v563_v0  ;;  %v570_v3 = vpack.c.bf16 %v566_v62, %v564_v1  ;;  %v538_v18 = vrot.slane %v479_v23, 4  ;;  %v945_v1 = vsel %vm454_vm4, %v1759_v49, %v1760_v48 }
 0x12d   : > { %v1738_v6 = vpop.permute.xlu0 %1737  ;;  %v444_v54 = vsel %vm442_vm11, %v1750_v22, %v1749_v4  ;;  %v443_v16 = vsel %vm442_vm11, %v1749_v4, %v1750_v22  ;;  %v1763_v36 = vpop.permute.xlu2 %1762 }
 0x12e   : > { %v1740_v10 = vunpack.i.h.bf16 %v1738_v6  ;;  %v1739_v11 = vunpack.i.l.bf16 %v1738_v6  ;;  %866 = vmatpush.bf16.msrb.mxu2 %v569_v2  ;;  %895 = vmatpush.bf16.msrb.mxu3 %v570_v3  ;;  %v1765_v39 = vunpack.i.h.bf16 %v1763_v36  ;;  %v1764_v40 = vunpack.i.l.bf16 %v1763_v36  ;;  %v1026_v6 = vld.sshfl [vmem:[#allocation1] sm:$0xff pattern:$0x75316420] }
 0x130   : > { %v455_v9 = vsel %vm454_vm4, %v1739_v11, %v1740_v10  ;;  %v456_v12 = vsel %vm454_vm4, %v1740_v10, %v1739_v11  ;;  %v978_v44 = vsel %vm490_vm2, %v1764_v40, %v1765_v39  ;;  %v979_v45 = vsel %vm490_vm2, %v1765_v39, %v1764_v40  ;;  %v1618_v40 = vld [vmem:[%s2345_s3 + $0x40] sm:$0xff] }
 0x131   : > { %v531_v13 = vrot.slane %v456_v12, 4  ;;  %v532_v14 = vrot.slane %v455_v9, 4  ;;  %v1032_v50 = vrot.slane %v978_v44, 4  ;;  %v1033_v51 = vrot.slane %v979_v45, 4 }
 0x133   : > { %v559_v25 = vsel %vm558_vm9, %v444_v54, %v531_v13  ;;  %v560_v26 = vsel %vm558_vm9, %v443_v16, %v532_v14  ;;  %v1046_v23 = vsel %vm558_vm9, %v1026_v6, %v1032_v50  ;;  %v1047_v13 = vsel %vm558_vm9, %v1027_v7, %v1033_v51 }
 0x135   : > { %v1753_v19 = vpop.permute.xlu0 %1752  ;;  %v1793_v52 = vpop.permute.xlu2 %1792 }
 0x136   : > { %v1755_v21 = vunpack.i.h.bf16 %v1753_v19  ;;  %v1754_v24 = vunpack.i.l.bf16 %v1753_v19  ;;  %v1795_v2 = vunpack.i.h.bf16 %v1793_v52  ;;  %v1794_v3 = vunpack.i.l.bf16 %v1793_v52 }
 0x137   : > { %1545 = vmatmul.msk.bf16.gmra.mxu2 %vm744_vm12, %v1617_v15  ;;  %1549 = vmatmul.msk.bf16.gmra.mxu3 %vm744_vm12, %v1617_v15  ;;  %v946_v19 = vsel %vm454_vm4, %v1760_v48, %v1759_v49 }
 0x138   : > { %v468_v28 = vsel %vm466_vm10, %v1755_v21, %v1754_v24  ;;  %v467_v30 = vsel %vm466_vm10, %v1754_v24, %v1755_v21  ;;  %v956_v21 = vsel %vm466_vm10, %v1794_v3, %v1795_v2 }
 0x139   : > { %v561_v31 = vsel %vm558_vm9, %v468_v28, %v537_v17  ;;  %v562_v32 = vsel %vm558_vm9, %v467_v30, %v538_v18  ;;  %1543 = vmatmul.msk.bf16.gmra.mxu0 %vm744_vm12, %v1615_v20  ;;  %1547 = vmatmul.msk.bf16.gmra.mxu1 %vm744_vm12, %v1615_v20  ;;  %v1612_v18 = vld [vmem:[%s2345_s3 + $0x10] sm:$0xff]  ;;  %v957_v20 = vsel %vm466_vm10, %v1795_v2, %v1794_v3  ;;  %v1177_v2 = vld [vmem:[%s2346_s4] sm:$0x3] }
 0x13a   : > { %v567_v29 = vpack.c.bf16 %v561_v31, %v559_v25  ;;  %v568_v33 = vpack.c.bf16 %v562_v32, %v560_v26  ;;  %v1015_v31 = vrot.slane %v946_v19, 4  ;;  %v1016_v32 = vrot.slane %v945_v1, 4 }
 0x13b   : > { %v2255_v7 = vperm.slane %v1177_v2, 0 }
 0x13c   : > { %867 = vmatpush.bf16.msrb.mxu2 %v567_v29  ;;  %896 = vmatpush.bf16.msrb.mxu3 %v568_v33 }
 0x147   : > { %1566 = vmatmul.msk.bf16.vlgmr.msrb.gmra.mxu2 %vm744_vm12, %v1610_v34  ;;  %1570 = vmatmul.msk.bf16.vlgmr.msrb.gmra.mxu3 %vm744_vm12, %v1610_v34 }
 0x14d   : > { %v1768_v37 = vpop.permute.xlu1 %1767 }
 0x14e   : > { %v1770_v55 = vunpack.i.h.bf16 %v1768_v37  ;;  %v1769_v56 = vunpack.i.l.bf16 %v1768_v37 }
 0x150   : > { %v989_v22 = vsel %vm502_vm5, %v1769_v56, %v1770_v55  ;;  %v990_v4 = vsel %vm502_vm5, %v1770_v55, %v1769_v56 }
 0x155   : > { %v1773_v41 = vpop.permute.xlu0 %1772 }
 0x156   : > { %v1775_v42 = vunpack.i.h.bf16 %v1773_v41  ;;  %v1774_v43 = vunpack.i.l.bf16 %v1773_v41  ;;  %v1619_v41 = vld [vmem:[%s2345_s3 + $0x48] sm:$0xff] }
 0x157   : > { %1567 = vmatmul.msk.bf16.gmra.mxu2 %vm744_vm12, %v1611_v38  ;;  %1571 = vmatmul.msk.bf16.gmra.mxu3 %vm744_vm12, %v1611_v38 }
 0x158   : > { %v1000_v46 = vsel %vm514_vm3, %v1774_v43, %v1775_v42  ;;  %v1001_v47 = vsel %vm514_vm3, %v1775_v42, %v1774_v43  ;;  %v1620_v42 = vld [vmem:[%s2345_s3 + $0x50] sm:$0xff]  ;;  %v1621_v43 = vld [vmem:[%s2345_s3 + $0x58] sm:$0xff] }
 0x159   : > { %v1038_v57 = vrot.slane %v1000_v46, 4  ;;  %v1039_v58 = vrot.slane %v1001_v47, 4 }
 0x15b   : > { %v1048_v5 = vsel %vm558_vm9, %v989_v22, %v1038_v57  ;;  %v1049_v14 = vsel %vm558_vm9, %v990_v4, %v1039_v58 }
 0x15c   : > { %v1052_v28 = vpack.c.bf16 %v1048_v5, %v1046_v23  ;;  %v1053_v30 = vpack.c.bf16 %v1049_v14, %v1047_v13 }
 0x15d   : > { %v1783_v59 = vpop.permute.xlu1 %1782  ;;  %v1778_v60 = vpop.permute.xlu0 %1777 }
 0x15e   : > { %v1785_v61 = vunpack.i.h.bf16 %v1783_v59  ;;  %v1784_v62 = vunpack.i.l.bf16 %v1783_v59  ;;  %v1780_v63 = vunpack.i.h.bf16 %v1778_v60  ;;  %v1779_v0 = vunpack.i.l.bf16 %v1778_v60 }
 0x160   : > { %v967_v10 = vsel %vm478_vm6, %v1779_v0, %v1780_v63  ;;  %v968_v11 = vsel %vm478_vm6, %v1780_v63, %v1779_v0  ;;  %v1011_v8 = vsel %vm526_vm7, %v1784_v62, %v1785_v61  ;;  %v1012_v53 = vsel %vm526_vm7, %v1785_v61, %v1784_v62 }
 0x161   : > { %v1054_v9 = vpack.c.bf16 %v1011_v8, %v1011_v8  ;;  %v1055_v12 = vpack.c.bf16 %v1012_v53, %v1012_v53  ;;  %v1021_v15 = vrot.slane %v968_v11, 4  ;;  %v1022_v54 = vrot.slane %v967_v10, 4 }
 0x162   : > { %v2257_v10 = vperm.slane %v1177_v2, 1 }
 0x163   : > { %v1098_v16 = vsel %vm757_vm8, %v1054_v9, 0  ;;  %v1101_v17 = vsel %vm757_vm8, %v1055_v12, 0  ;;  %v1044_v29 = vsel %vm558_vm9, %v957_v20, %v1021_v15  ;;  %v1045_v33 = vsel %vm558_vm9, %v956_v21, %v1022_v54 }
 0x164   : > { %1108 = vmatpush.bf16.msrb.mxu0 %v1098_v16  ;;  %1137 = vmatpush.bf16.msrb.mxu1 %v1101_v17 }
 0x165   : > { %v1788_v24 = vpop.permute.xlu1 %1787 }
 0x166   : > { %v1790_v25 = vunpack.i.h.bf16 %v1788_v24  ;;  %v1789_v26 = vunpack.i.l.bf16 %v1788_v24 }
 0x167   : > { %1568 = vmatmul.msk.bf16.gmra.mxu2 %vm744_vm12, %v1612_v18  ;;  %1572 = vmatmul.msk.bf16.gmra.mxu3 %vm744_vm12, %v1612_v18 }
 0x168   : > { %1109 = vmatpush.bf16.msrb.mxu0 %v1052_v28  ;;  %1138 = vmatpush.bf16.msrb.mxu1 %v1053_v30  ;;  %v935_v34 = vsel %vm442_vm11, %v1790_v25, %v1789_v26  ;;  %v934_v35 = vsel %vm442_vm11, %v1789_v26, %v1790_v25 }
 0x169   : > { %v1042_v36 = vsel %vm558_vm9, %v935_v34, %v1015_v31  ;;  %v1043_v37 = vsel %vm558_vm9, %v934_v35, %v1016_v32 }
 0x16a   : > { %v1050_v38 = vpack.c.bf16 %v1044_v29, %v1042_v36  ;;  %v1051_v39 = vpack.c.bf16 %v1045_v33, %v1043_v37 }
 0x16c   : > { %1110 = vmatpush.bf16.msrb.mxu0 %v1050_v38  ;;  %1139 = vmatpush.bf16.msrb.mxu1 %v1051_v39 }
 0x16f   : > { %1598 = vmatmul.msk.bf16.vlgmr.msrb.gmra.mxu0 %vm744_vm12, %v1618_v40  ;;  %1602 = vmatmul.msk.bf16.vlgmr.msrb.gmra.mxu1 %vm744_vm12, %v1618_v40 }
 0x177   : > { %1569 = vmatmul.msk.bf16.gmra.mxu2 %vm744_vm12, %v1613_v27  ;;  %1573 = vmatmul.msk.bf16.gmra.mxu3 %vm744_vm12, %v1613_v27 }
 0x17f   : > { %1599 = vmatmul.msk.bf16.gmra.mxu0 %vm744_vm12, %v1619_v41  ;;  %1603 = vmatmul.msk.bf16.gmra.mxu1 %vm744_vm12, %v1619_v41 }
 0x18f   : > { %1600 = vmatmul.msk.bf16.gmra.mxu0 %vm744_vm12, %v1620_v42  ;;  %1604 = vmatmul.msk.bf16.gmra.mxu1 %vm744_vm12, %v1620_v42 }
 0x19f   : > { %1601 = vmatmul.msk.bf16.gmra.mxu0 %vm744_vm12, %v1621_v43  ;;  %1605 = vmatmul.msk.bf16.gmra.mxu1 %vm744_vm12, %v1621_v43 }
 0x1a6   : > { %v773_v50 = vpop.f32.mrf.mxu0  ;;  %v802_v51 = vpop.f32.mrf.mxu1 }
 0x1aa   : > { %v2234_v44 = vpop.f32.mrf.mxu2  ;;  %v2236_v45 = vpop.f32.mrf.mxu3 }
 0x1ae   : > { %v775_v56 = vpop.f32.mrf.mxu0  ;;  %v804_v57 = vpop.f32.mrf.mxu1 }
 0x1b2   : > { %v2238_v46 = vpop.f32.mrf.mxu2  ;;  %v2240_v47 = vpop.f32.mrf.mxu3 }
 0x1b6   : > { %v778_v60 = vpop.f32.mrf.mxu0  ;;  %v807_v61 = vpop.f32.mrf.mxu1 }
 0x1ba   : > { %v2242_v48 = vpop.f32.mrf.mxu2  ;;  %v2244_v49 = vpop.f32.mrf.mxu3 }
 0x1be   : > { %v780_v0 = vpop.f32.mrf.mxu0  ;;  %v809_v1 = vpop.f32.mrf.mxu1 }
 0x1c2   : > { %v2246_v52 = vpop.f32.mrf.mxu2  ;;  %v2248_v55 = vpop.f32.mrf.mxu3 }
 0x1ca   : > { %v869_v58 = vpop.f32.mrf.mxu2  ;;  %v898_v59 = vpop.f32.mrf.mxu3 }
 0x1cb   : > { %v870_v3 = vadd.f32 %v869_v58, %v773_v50  ;;  %v899_v6 = vadd.f32 %v898_v59, %v802_v51 }
 0x1d2   : > { %v871_v62 = vpop.f32.mrf.mxu2  ;;  %v900_v63 = vpop.f32.mrf.mxu3 }
 0x1d3   : > { %v872_v54 = vadd.f32 %v871_v62, %v775_v56  ;;  %v901_v16 = vadd.f32 %v900_v63, %v804_v57 }
 0x1da   : > { %v874_v53 = vpop.f32.mrf.mxu2  ;;  %v903_v9 = vpop.f32.mrf.mxu3 }
 0x1db   : > { %v875_v29 = vadd.f32 %v874_v53, %v778_v60  ;;  %v904_v33 = vadd.f32 %v903_v9, %v807_v61 }
 0x1e2   : > { %v876_v24 = vpop.f32.mrf.mxu2  ;;  %v905_v25 = vpop.f32.mrf.mxu3 }
 0x1e3   : > { %v877_v56 = vadd.f32 %v876_v24, %v780_v0  ;;  %v906_v57 = vadd.f32 %v905_v25, %v809_v1 }
 0x1ea   : > { %v879_v41 = vpop.f32.mrf.mxu2  ;;  %v908_v42 = vpop.f32.mrf.mxu3 }
 0x1eb   : > { %v880_v0 = vadd.f32 %v879_v41, %v2234_v44  ;;  %v909_v1 = vadd.f32 %v908_v42, %v2236_v45 }
 0x1ec   : > { %v1112_v11 = vpop.f32.mrf.mxu0  ;;  %v1141_v8 = vpop.f32.mrf.mxu1 }
 0x1ed   : > { %v1161_v12 = vadd.f32 %v1112_v11, %v870_v3  ;;  %v1162_v22 = vadd.f32 %v1141_v8, %v899_v6 }
 0x1ef   : > { %v1183_v4 = vmul.f32 %v2255_v7, %v1161_v12  ;;  %v1184_v23 = vmul.f32 %v2257_v10, %v1162_v22 }
 0x1f1   : > { %v1199_v5 = vpack.c.bf16 %v1184_v23, %v1183_v4  ;;  %v1215_v13 = vadd.f32 %v1184_v23, %v1183_v4  ;;  %v1239_v14 = vmul.f32 %v1183_v4, %v1183_v4  ;;  %v1240_v15 = vmul.f32 %v1184_v23, %v1184_v23 }
 0x1f2   : > { %v881_v53 = vpop.f32.mrf.mxu2  ;;  %v910_v9 = vpop.f32.mrf.mxu3 }
 0x1f3   : > { %1207 = vst [vmem:[%s2264_s17] sm:$0xff] %v1199_v5  ;;  %1216 = vadd.xlane.f32.xlu0 %v1215_v13  ;;  %v1255_v17 = vadd.f32 %v1240_v15, %v1239_v14 }
 0x1f4   : > { %v1114_v18 = vpop.f32.mrf.mxu0  ;;  %v1143_v19 = vpop.f32.mrf.mxu1 }
 0x1f5   : > { %v1163_v20 = vadd.f32 %v1114_v18, %v872_v54  ;;  %v1164_v21 = vadd.f32 %v1143_v19, %v901_v16  ;;  %1256 = vadd.xlane.f32.xlu1 %v1255_v17  ;;  %v882_v17 = vadd.f32 %v881_v53, %v2238_v46  ;;  %v911_v18 = vadd.f32 %v910_v9, %v2240_v47 }
 0x1f7   : > { %v1185_v26 = vmul.f32 %v2255_v7, %v1163_v20  ;;  %v1186_v28 = vmul.f32 %v2257_v10, %v1164_v21 }
 0x1f9   : > { %v1200_v30 = vpack.c.bf16 %v1186_v28, %v1185_v26  ;;  %v1241_v31 = vmul.f32 %v1185_v26, %v1185_v26  ;;  %v1242_v32 = vmul.f32 %v1186_v28, %v1186_v28  ;;  %v1218_v35 = vadd.f32 %v1186_v28, %v1185_v26 }
 0x1fa   : > { %v884_v26 = vpop.f32.mrf.mxu2  ;;  %v913_v28 = vpop.f32.mrf.mxu3 }
 0x1fb   : > { %1208 = vst [vmem:[%s2264_s17 + $0x8] sm:$0xff] %v1200_v30  ;;  %v1258_v34 = vadd.f32 %v1242_v32, %v1241_v31  ;;  %v885_v47 = vadd.f32 %v884_v26, %v2242_v48 }
 0x1fc   : > { %v1117_v36 = vpop.f32.mrf.mxu0  ;;  %v1146_v37 = vpop.f32.mrf.mxu1 }
 0x1fd   : > { %v1165_v38 = vadd.f32 %v1117_v36, %v875_v29  ;;  %v1166_v39 = vadd.f32 %v1146_v37, %v904_v33  ;;  %1259 = vadd.xlane.f32.xlu2 %v1258_v34  ;;  %1219 = vadd.xlane.f32.xlu1 %v1218_v35  ;;  %v914_v34 = vadd.f32 %v913_v28, %v2244_v49 }
 0x1ff   : > { %v1187_v40 = vmul.f32 %v2255_v7, %v1165_v38  ;;  %v1188_v27 = vmul.f32 %v2257_v10, %v1166_v39 }
 0x201   : > { %v1201_v43 = vpack.c.bf16 %v1188_v27, %v1187_v40  ;;  %v1243_v50 = vmul.f32 %v1187_v40, %v1187_v40  ;;  %v1244_v51 = vmul.f32 %v1188_v27, %v1188_v27  ;;  %v1221_v59 = vadd.f32 %v1188_v27, %v1187_v40 }
 0x202   : > { %v886_v41 = vpop.f32.mrf.mxu2  ;;  %v915_v42 = vpop.f32.mrf.mxu3 }
 0x203   : > { %1209 = vst [vmem:[%s2264_s17 + $0x10] sm:$0xff] %v1201_v43  ;;  %v1261_v58 = vadd.f32 %v1244_v51, %v1243_v50  ;;  %v887_v49 = vadd.f32 %v886_v41, %v2246_v52 }
 0x204   : > { %v1119_v60 = vpop.f32.mrf.mxu0  ;;  %v1148_v61 = vpop.f32.mrf.mxu1 }
 0x205   : > { %v1167_v62 = vadd.f32 %v1119_v60, %v877_v56  ;;  %v1168_v63 = vadd.f32 %v1148_v61, %v906_v57  ;;  %1262 = vadd.xlane.f32.xlu0 %v1261_v58  ;;  %1222 = vadd.xlane.f32.xlu2 %v1221_v59  ;;  %v916_v56 = vadd.f32 %v915_v42, %v2248_v55 }
 0x207   : > { %v1189_v2 = vmul.f32 %v2255_v7, %v1167_v62  ;;  %v1190_v3 = vmul.f32 %v2257_v10, %v1168_v63 }
 0x209   : > { %v1202_v6 = vpack.c.bf16 %v1190_v3, %v1189_v2  ;;  %v1245_v11 = vmul.f32 %v1189_v2, %v1189_v2  ;;  %v1246_v8 = vmul.f32 %v1190_v3, %v1190_v3  ;;  %v1224_v22 = vadd.f32 %v1190_v3, %v1189_v2 }
 0x20b   : > { %1210 = vst [vmem:[%s2264_s17 + $0x18] sm:$0xff] %v1202_v6  ;;  %v1264_v12 = vadd.f32 %v1246_v8, %v1245_v11 }
 0x20c   : > { %v1122_v4 = vpop.f32.mrf.mxu0  ;;  %v1151_v23 = vpop.f32.mrf.mxu1 }
 0x20d   : > { %v1169_v5 = vadd.f32 %v1122_v4, %v880_v0  ;;  %v1170_v13 = vadd.f32 %v1151_v23, %v909_v1  ;;  %1265 = vadd.xlane.f32.xlu1 %v1264_v12  ;;  %1225 = vadd.xlane.f32.xlu2 %v1224_v22 }
 0x20f   : > { %v1191_v14 = vmul.f32 %v2255_v7, %v1169_v5  ;;  %v1192_v15 = vmul.f32 %v2257_v10, %v1170_v13 }
 0x211   : > { %v1203_v54 = vpack.c.bf16 %v1192_v15, %v1191_v14  ;;  %v1227_v44 = vadd.f32 %v1192_v15, %v1191_v14  ;;  %v1247_v16 = vmul.f32 %v1191_v14, %v1191_v14  ;;  %v1248_v45 = vmul.f32 %v1192_v15, %v1192_v15 }
 0x213   : > { %1211 = vst [vmem:[%s2264_s17 + $0x20] sm:$0xff] %v1203_v54  ;;  %1228 = vadd.xlane.f32.xlu0 %v1227_v44  ;;  %v1267_v19 = vadd.f32 %v1248_v45, %v1247_v16 }
 0x214   : > { %v1124_v20 = vpop.f32.mrf.mxu0  ;;  %v1153_v21 = vpop.f32.mrf.mxu1 }
 0x215   : > { %v1171_v24 = vadd.f32 %v1124_v20, %v882_v17  ;;  %v1172_v25 = vadd.f32 %v1153_v21, %v911_v18  ;;  %1268 = vadd.xlane.f32.xlu2 %v1267_v19 }
 0x217   : > { %v1193_v30 = vmul.f32 %v2255_v7, %v1171_v24  ;;  %v1194_v31 = vmul.f32 %v2257_v10, %v1172_v25 }
 0x219   : > { %v1204_v32 = vpack.c.bf16 %v1194_v31, %v1193_v30  ;;  %v1230_v29 = vadd.f32 %v1194_v31, %v1193_v30  ;;  %v1249_v46 = vmul.f32 %v1193_v30, %v1193_v30  ;;  %v1250_v33 = vmul.f32 %v1194_v31, %v1194_v31 }
 0x21b   : > { %1212 = vst [vmem:[%s2264_s17 + $0x28] sm:$0xff] %v1204_v32  ;;  %1231 = vadd.xlane.f32.xlu1 %v1230_v29  ;;  %v1270_v35 = vadd.f32 %v1250_v33, %v1249_v46 }
 0x21c   : > { %v1127_v36 = vpop.f32.mrf.mxu0  ;;  %v1156_v37 = vpop.f32.mrf.mxu1 }
 0x21d   : > { %v1173_v38 = vadd.f32 %v1127_v36, %v885_v47  ;;  %v1174_v39 = vadd.f32 %v1156_v37, %v914_v34 }
 0x21f   : > { %v1195_v40 = vmul.f32 %v2255_v7, %v1173_v38  ;;  %v1196_v27 = vmul.f32 %v2257_v10, %v1174_v39 }
 0x221   : > { %v1205_v43 = vpack.c.bf16 %v1196_v27, %v1195_v40  ;;  %v1233_v50 = vadd.f32 %v1196_v27, %v1195_v40  ;;  %v1251_v51 = vmul.f32 %v1195_v40, %v1195_v40  ;;  %v1252_v48 = vmul.f32 %v1196_v27, %v1196_v27 }
 0x223   : > { %1213 = vst [vmem:[%s2264_s17 + $0x30] sm:$0xff] %v1205_v43  ;;  %1234 = vadd.xlane.f32.xlu2 %v1233_v50  ;;  %v1273_v57 = vadd.f32 %v1252_v48, %v1251_v51 }
 0x224   : > { %v1129_v58 = vpop.f32.mrf.mxu0  ;;  %v1158_v59 = vpop.f32.mrf.mxu1 }
 0x225   : > { %v1175_v60 = vadd.f32 %v1129_v58, %v887_v49  ;;  %v1176_v61 = vadd.f32 %v1158_v59, %v916_v56  ;;  %1274 = vadd.xlane.f32.xlu1 %v1273_v57 }
 0x227   : > { %v1197_v62 = vmul.f32 %v2255_v7, %v1175_v60  ;;  %v1198_v63 = vmul.f32 %v2257_v10, %v1176_v61 }
 0x229   : > { %v1206_v2 = vpack.c.bf16 %v1198_v63, %v1197_v62  ;;  %v1236_v3 = vadd.f32 %v1198_v63, %v1197_v62  ;;  %v1253_v52 = vmul.f32 %v1197_v62, %v1197_v62  ;;  %v1254_v6 = vmul.f32 %v1198_v63, %v1198_v63 }
 0x22b   : > { %1214 = vst [vmem:[%s2264_s17 + $0x38] sm:$0xff] %v1206_v2  ;;  %1237 = vadd.xlane.f32.xlu0 %v1236_v3  ;;  %v1276_v55 = vadd.f32 %v1254_v6, %v1253_v52 }
 0x22d   : > { %1277 = vadd.xlane.f32.xlu2 %v1276_v55 }
 0x233   : > { %1271 = vadd.xlane.f32.xlu0 %v1270_v35 }
 0x266   : > { %v1217_v7 = vpop.xlane.xlu0 %1216 }
 0x268   : > { %v1257_v10 = vpop.xlane.xlu1 %1256 }
 0x269   : > { %v1280_v11 = vsel %vm1279_vm13, %v1217_v7, %v1257_v10 }
 0x26a   : > { %1289 = vst.msk [vmem:[%s2301_s8] sm:$0xff] %vm1288_vm14, %v1280_v11 }
 0x270   : > { %v1260_v8 = vpop.xlane.xlu2 %1259  ;;  %v1220_v0 = vpop.xlane.xlu1 %1219 }
 0x271   : > { %v1281_v1 = vsel %vm1279_vm13, %v1220_v0, %v1260_v8 }
 0x272   : > { %1290 = vst.msk [vmem:[%s2301_s8 + $0x8] sm:$0xff] %vm1288_vm14, %v1281_v1 }
 0x278   : > { %v1263_v53 = vpop.xlane.xlu0 %1262  ;;  %v1223_v9 = vpop.xlane.xlu2 %1222 }
 0x279   : > { %v1282_v12 = vsel %vm1279_vm13, %v1223_v9, %v1263_v53 }
 0x27a   : > { %1291 = vst.msk [vmem:[%s2301_s8 + $0x10] sm:$0xff] %vm1288_vm14, %v1282_v12 }
 0x280   : > { %v1266_v22 = vpop.xlane.xlu1 %1265  ;;  %v1226_v4 = vpop.xlane.xlu2 %1225 }
 0x281   : > { %v1283_v23 = vsel %vm1279_vm13, %v1226_v4, %v1266_v22 }
 0x282   : > { %1292 = vst.msk [vmem:[%s2301_s8 + $0x18] sm:$0xff] %vm1288_vm14, %v1283_v23 }
 0x286   : > { %v1229_v5 = vpop.xlane.xlu0 %1228 }
 0x288   : > { %v1269_v13 = vpop.xlane.xlu2 %1268 }
 0x289   : > { %v1284_v14 = vsel %vm1279_vm13, %v1229_v5, %v1269_v13 }
 0x28a   : > { %1293 = vst.msk [vmem:[%s2301_s8 + $0x20] sm:$0xff] %vm1288_vm14, %v1284_v14 }
 0x28e   : > { %v1232_v15 = vpop.xlane.xlu1 %1231 }
 0x296   : > { %v1235_v54 = vpop.xlane.xlu2 %1234 }
 0x298   : > { %v1275_v44 = vpop.xlane.xlu1 %1274 }
 0x299   : > { %v1286_v16 = vsel %vm1279_vm13, %v1235_v54, %v1275_v44 }
 0x29a   : > { %1295 = vst.msk [vmem:[%s2301_s8 + $0x30] sm:$0xff] %vm1288_vm14, %v1286_v16 }
 0x29e   : > { %v1238_v45 = vpop.xlane.xlu0 %1237 }
 0x2a0   : > { %v1278_v17 = vpop.xlane.xlu2 %1277 }
 0x2a1   : > { %v1287_v18 = vsel %vm1279_vm13, %v1238_v45, %v1278_v17 }
 0x2a2   : > { %1296 = vst.msk [vmem:[%s2301_s8 + $0x38] sm:$0xff] %vm1288_vm14, %v1287_v18 }
 0x2a6   : > { %v1272_v19 = vpop.xlane.xlu0 %1271 }
 0x2a7   : > { %v1285_v20 = vsel %vm1279_vm13, %v1232_v15, %v1272_v19 }
 0x2a8   : > { %1294 = vst.msk [vmem:[%s2301_s8 + $0x28] sm:$0xff] %vm1288_vm14, %v1285_v20 }
 0x2a9 PF: > { %s17_s25 = sadd.s32 1, %s1834_s25   ;;  %s2349_s21 = smov %s1826_s23 }
 0x2aa   : > { %p14_p11 = scmp.ge.s32.totalorder %s17_s25, 10   ;;  %s2350_s22 = smov %s1830_s24 }
 0x2ab   : > { %s2351_s23 = smov %s2354_s26  ;;  %s2352_s24 = smov %s2358_s27 }
 0x2ac   :  { %16 = sbr.rel (!%p14_p11) target bundleno = 3 (0x3), region = 90 }

// kernel: iconvmod_forward.17
= control target key start
LH: loop header
LB: loop body
LE: loop exit
PB: predicated region body
PF: predicated region fallthrough
CT: control target
= control target key end

     0   :  { %s1813_s24 = smov 0   ;;  %s1815_s25 = smov 0   ;;  %s2541_s0 = inlined_call_operand.vmem [shape: bf16[2,4,16,256], index: 0, kind: input, shape index: {}, may-alias: {0,1,2}]   ;;  %s2542_s1 = inlined_call_operand.vmem [shape: bf16[2,4,16,256], index: 1, kind: input, shape index: {}, may-alias: {0,1,2}]   ;;  %s2543_s2 = inlined_call_operand.vmem [shape: bf16[2,4,16,256], index: 2, kind: input, shape index: {}, may-alias: {0,1,2}]   ;;  %s2544_s3 = inlined_call_operand.vmem [shape: bf16[3,16,144], index: 3, kind: input, shape index: {}]   ;;  %s2545_s4 = inlined_call_operand.vmem [shape: f32[1,256], index: 4, kind: input, shape index: {}]   ;;  %s2546_s5 = inlined_call_operand.vmem [shape: bf16[2,4,16,256], index: 5, kind: input, shape index: {}]   ;;  %s2547_s6 = inlined_call_operand.vmem [shape: bf16[2,4,16,256], index: 6, kind: output, shape index: {0}]   ;;  %s2548_s7 = inlined_call_operand.vmem [shape: f32[2,4,16,2], index: 7, kind: output, shape index: {1}]  }
   0x1   :  { %s1817_s26 = smov 0   ;;  %s1819_s27 = smov 0  }
   0x2   :  { %s1821_s28 = smov 0  }
   0x3 LB: > { %s27_s29 = sadd.s32 1, %s1755_s26  ;;  %s30_s30 = sadd.s32 1, %s1759_s27  ;;  %s1763_s28 = sphi %s1821_s28, %s18_s28   ;;  %s1759_s27 = sphi %s1819_s27, %s2571_s27   ;;  %s1755_s26 = sphi %s1817_s26, %s2570_s26   ;;  %s1751_s25 = sphi %s1815_s25, %s2569_s25   ;;  %s1747_s24 = sphi %s1813_s24, %s2568_s24  }
   0x4   : > { %p28_p0 = scmp.ge.s32.totalorder %s27_s29, 4  ;;  %p1353_p1 = scmp.ge.s32.totalorder %s1763_s28, 1 }
   0x5   : > { %p334_p2 = scmp.lt.s32.totalorder %s1763_s28, 9 }
   0x6   : > { %s2573_s29 = smov (%p28_p0, %s27_s29), 0  ;;  %s2575_s30 = smov (!%p28_p0, %s30_s30), %s1759_s27 }
   0x7   : > { %p335_p3 = pnand %p1353_p1, %p334_p2  ;;  %p32_p4 = scmp.ge.s32.totalorder %s2575_s30, 2 }
   0x8   : > { %s1354_s8 = sadd.s32 (!%p335_p3), 4294967295, %s1747_s24  ;;  %p419_p5 = scmp.lt.s32.totalorder (!%p335_p3), %s1751_s25, 1 }
   0x9   : > { %s2577_s30 = smov (%p32_p4, %s2575_s30), 0  ;;  %338 = sbr.rel (%p335_p3) target bundleno = 549 (0x225), region = 44 }
   0xa   : > { %p417_p6 = scmp.gt.s32.totalorder (!%p335_p3), %s1354_s8, 0  ;;  %p1355_p7 = scmp.lt.s32.totalorder (!%p335_p3), %s1354_s8, 3 }
   0xb   : > { %p433_p8 = scmp.lt.s32.totalorder (!%p335_p3), %s1747_s24, 3  ;;  %p489_p9 = scmp.gt.s32.totalorder (!%p335_p3), %s1747_s24, 0 }
   0xc   : > { %s440_s16 = sadd.s32 (!%p335_p3), 1, %s1747_s24  ;;  %s1771_s17 = smov (!%p335_p3), 1  }
   0xd   : > { %p441_p10 = scmp.lt.s32.totalorder (!%p335_p3), %s440_s16, 3 }
   0xe   : > { %s2579_s25 = smov (!%p419_p5, %s1751_s25), 1  ;;  %s2581_s8 = smov (!%p417_p6, %s1354_s8), 0  ;;  %v512_v45 = vlaneseq  ;;  %vm639_vm8 = vcmask 130048   ;;  %vm1130_vm13 = vcmask 7168   ;;  %vm1133_vm14 = vcmask 15360  }
   0xf   : > { %s1849_s9 = sshll.u32 %s2579_s25, 4  ;;  %s2583_s8 = smov (!%p1355_p7, %s2581_s8), 3 }
  0x10   : > { %s1855_s10 = scalar_select %p433_p8, %s1747_s24, 3  ;;  %v2024_v46 = vand.u32 127, %v512_v45 }
  0x11   : > { %s1360_s11 = sshll.u32 %s2583_s8, 2  ;;  %s2551_s8 = smov 112  }
  0x12   : > { %s425_s12 = sadd.s32 %s1849_s9, %s1360_s11  ;;  %s1363_s13 = sshll.u32 %s1855_s10, 2  ;;  %vm527_vm2 = vcmp.lt.s32.totalorder %v2024_v46, 16  ;;  %vm514_vm3 = vcmp.lt.s32.totalorder %v2024_v46, 17  ;;  %vm592_vm4 = vcmp.lt.s32.totalorder %v2024_v46, 112  ;;  %vm605_vm5 = vcmp.lt.s32.totalorder %v2024_v46, 111 }
  0x13   : > { %s1362_s14 = sshll.u32 %s425_s12, 2  ;;  %s437_s15 = sadd.s32 %s1363_s13, %s1849_s9  ;;  %vm579_vm6 = vcmp.lt.s32.totalorder %v2024_v46, 113  ;;  %vm566_vm7 = vcmp.lt.s32.totalorder %v2024_v46, 127  ;;  %vm553_vm9 = vcmp.lt.s32.totalorder %v2024_v46, 1  ;;  %vm540_vm11 = vcmp.lt.s32.totalorder %v2024_v46, 15 }
  0x14   : > { %s427_s18 = scalar_lea.vmem %s2541_s0, %s1362_s14  ;;  %s1864_s19 = sshll.u32 %s437_s15, 2 }
  0x15   : > { %s439_s22 = scalar_lea.vmem %s2542_s1, %s1864_s19  ;;  %v1870_v0 = vld [vmem:[%s427_s18] sm:$0xff]  ;;  %v1872_v1 = vld [vmem:[%s427_s18 + $0x8] sm:$0xff]  ;;  %s1766_s11 = smov 16  }
  0x16   : > { %v493_v2 = vunpack.c.l.bf16 %v1870_v0  ;;  %v495_v3 = vunpack.c.l.bf16 %v1872_v1  ;;  %s497_s23 = scalar_select %p489_p9, 1, 0  ;;  %v703_v4 = vld [vmem:[%s439_s22] sm:$0xff]  ;;  %v704_v5 = vld [vmem:[%s439_s22 + $0x8] sm:$0xff]  ;;  %v494_v11 = vunpack.c.h.bf16 %v1870_v0  ;;  %v496_v12 = vunpack.c.h.bf16 %v1872_v1 }
  0x17   : > { %v1876_v6 = vunpack.c.l.bf16 %v703_v4  ;;  %v1878_v7 = vunpack.c.l.bf16 %v704_v5  ;;  %v1902_v16 = vunpack.c.h.bf16 %v703_v4  ;;  %v1904_v17 = vunpack.c.h.bf16 %v704_v5  ;;  %s2549_s12 = smov 17   ;;  %s2553_s13 = smov 113  }
  0x18   : > { %v498_v8 = vstv %s497_s23  ;;  %s1769_s14 = smov 111   ;;  %s1770_s15 = smov 127  }
  0x19   : > { %vm1880_vm0 = vcmp.eq.s32.totalorder %v498_v8, 1  ;;  %v1886_v10 = vpack.i.bf16 %v1878_v7, %v1876_v6  ;;  %v1490_v20 = vpack.i.bf16 %v1904_v17, %v1902_v16  ;;  %s2585_s16 = smov (!%p441_p10, %s440_s16), 3  ;;  %s1772_s18 = smov 15   ;;  %v1605_v27 = vpack.i.bf16 %v1902_v16, %v1878_v7 }
  0x1a   : > { %v500_v13 = vsel %vm1880_vm0, %v493_v2, 0.0  ;;  %v502_v14 = vsel %vm1880_vm0, %v495_v3, 0.0  ;;  %v501_v18 = vsel %vm1880_vm0, %v494_v11, 0.0  ;;  %v503_v19 = vsel %vm1880_vm0, %v496_v12, 0.0  ;;  %s2587_s16 = smov (!%p441_p10, %s2585_s16), 3  ;;  %s2562_s24 = smov 112   ;;  %vm1389_vm10 = vmpackc.low %vm1880_vm0, %vm1880_vm0 }
  0x1b   : > { %v1898_v15 = vpack.i.bf16 %v502_v14, %v500_v13  ;;  %1486 = vrot.lane.b32.xlu2 %v1886_v10, %s2551_s8  ;;  %v1510_v21 = vpack.i.bf16 %v1876_v6, %v501_v18  ;;  %v1500_v22 = vpack.i.bf16 %v503_v19, %v501_v18  ;;  %s1369_s20 = sshll.u32 %s2587_s16, 2  ;;  %v1610_v26 = vpack.i.bf16 %v503_v19, %v1904_v17 }
  0x1c   : > { %s449_s21 = sadd.s32 %s1369_s20, %s1849_s9  ;;  %s2563_s9 = smov 17  }
  0x1d   : > { %1506 = vrot.lane.b32.xlu1 %v1898_v15, %s1766_s11  ;;  %1496 = vrot.lane.b32.xlu0 %v1898_v15, %s2549_s12  ;;  %s1371_s22 = sshll.u32 %s449_s21, 2 }
  0x1e   : > { %s904_s23 = scalar_select %p433_p8, 1, 0 }
  0x20   : > { %v905_v25 = vstv %s904_s23  ;;  %s463_s23 = scalar_lea.vmem %s2546_s5, %s1864_s19 }
  0x21   : > { %vm1969_vm1 = vcmp.eq.s32.totalorder %v905_v25, 1 }
  0x22   : > { %vm1419_vm12 = vmpackc.low %vm1969_vm1, %vm1969_vm1 }
  0x23   : > { %1491 = vrot.lane.b32.xlu2 %v1490_v20, %s2551_s8 }
  0x25   : > { %1511 = vrot.lane.b32.xlu1 %v1510_v21, %s1766_s11  ;;  %1501 = vrot.lane.b32.xlu0 %v1500_v22, %s2549_s12  ;;  %s472_s12 = scalar_lea.vmem %s2547_s6, %s1864_s19  ;;  %s1378_s19 = sshll.u32 %s1855_s10, 1 }
  0x2b   : > { %1526 = vrot.lane.b32.xlu2 %v1886_v10, %s2553_s13 }
  0x2d   : > { %1521 = vrot.lane.b32.xlu1 %v1500_v22, %s1769_s14  ;;  %1516 = vrot.lane.b32.xlu0 %v1898_v15, %s1769_s14 }
  0x33   : > { %1541 = vrot.lane.b32.xlu2 %v1490_v20, %s1770_s15 }
  0x35   : > { %1536 = vrot.lane.b32.xlu1 %v1886_v10, %s1770_s15  ;;  %1531 = vrot.lane.b32.xlu0 %v1490_v20, %s2553_s13 }
  0x3b   : > { %1556 = vrot.lane.b32.xlu2 %v1898_v15, %s2553_s13 }
  0x3d   : > { %1551 = vrot.lane.b32.xlu1 %v1500_v22, %s2551_s8  ;;  %1546 = vrot.lane.b32.xlu0 %v1898_v15, %s2551_s8  ;;  %s2564_s8 = smov 113  }
  0x43   : > { %1571 = vrot.lane.b32.xlu2 %v1490_v20, %s1771_s17 }
  0x45   : > { %1566 = vrot.lane.b32.xlu1 %v1886_v10, %s1771_s17  ;;  %1561 = vrot.lane.b32.xlu0 %v1500_v22, %s2553_s13  ;;  %s451_s13 = scalar_lea.vmem %s2543_s2, %s1371_s22 }
  0x46   : > { %v1958_v23 = vld [vmem:[%s451_s13] sm:$0xff]  ;;  %v1960_v24 = vld [vmem:[%s451_s13 + $0x8] sm:$0xff]  ;;  %s1379_s13 = sshll.u32 %s2579_s25, 3 }
  0x47   : > { %v900_v28 = vunpack.c.l.bf16 %v1958_v23  ;;  %v2557_v29 = vunpack.c.l.bf16 %v1960_v24  ;;  %v2556_v30 = vunpack.c.h.bf16 %v1958_v23  ;;  %v2555_v31 = vunpack.c.h.bf16 %v1960_v24 }
  0x49   : > { %v907_v33 = vsel %vm1969_vm1, %v900_v28, 0.0  ;;  %v909_v34 = vsel %vm1969_vm1, %v2557_v29, 0.0  ;;  %v908_v35 = vsel %vm1969_vm1, %v2556_v30, 0.0  ;;  %v910_v36 = vsel %vm1969_vm1, %v2555_v31, 0.0 }
  0x4a   : > { %v1630_v37 = vpack.i.bf16 %v910_v36, %v908_v35  ;;  %v1625_v38 = vpack.i.bf16 %v909_v34, %v907_v33 }
  0x4b   : > { %1586 = vrot.lane.b32.xlu2 %v1886_v10, %s1772_s18 }
  0x4d   : > { %1581 = vrot.lane.b32.xlu1 %v1500_v22, %s1770_s15  ;;  %1576 = vrot.lane.b32.xlu0 %v1898_v15, %s1770_s15 }
  0x53   : > { %1601 = vrot.lane.b32.xlu2 %v1490_v20, %s1769_s14 }
  0x55   : > { %1596 = vrot.lane.b32.xlu1 %v1886_v10, %s1769_s14  ;;  %1591 = vrot.lane.b32.xlu0 %v1490_v20, %s1772_s18 }
  0x5b   : > { %1616 = vrot.lane.b32.xlu2 %v1898_v15, %s1771_s17 }
  0x5d   : > { %1611 = vrot.lane.b32.xlu1 %v1610_v26, %s1766_s11  ;;  %1606 = vrot.lane.b32.xlu0 %v1605_v27, %s1766_s11 }
  0x63   : > { %1631 = vrot.lane.b32.xlu2 %v1630_v37, %s2562_s24 }
  0x65   : > { %1626 = vrot.lane.b32.xlu1 %v1625_v38, %s2562_s24  ;;  %1621 = vrot.lane.b32.xlu0 %v1500_v22, %s1771_s17 }
  0x6b   : > { %1646 = vrot.lane.b32.xlu2 %v1898_v15, %s1772_s18 }
  0x6d   : > { %1641 = vrot.lane.b32.xlu1 %v1490_v20, %s2563_s9  ;;  %1636 = vrot.lane.b32.xlu0 %v1886_v10, %s2563_s9 }
  0x73   : > { %1661 = vrot.lane.b32.xlu2 %v1630_v37, %s2564_s8 }
  0x75   : > { %1656 = vrot.lane.b32.xlu1 %v1625_v38, %s2564_s8  ;;  %1651 = vrot.lane.b32.xlu0 %v1500_v22, %s1772_s18  ;;  %v2004_v39 = vpop.permute.xlu2 %1486 }
  0x76   : > { %v1489_v4 = vunpack.i.h.bf16 %v2004_v39  ;;  %v1488_v5 = vunpack.i.l.bf16 %v2004_v39 }
  0x7b   : > { %1676 = vrot.lane.b32.xlu2 %v1625_v38, %s1771_s17 }
  0x7d   : > { %1671 = vrot.lane.b32.xlu1 %v1630_v37, %s1770_s15  ;;  %1666 = vrot.lane.b32.xlu0 %v1625_v38, %s1770_s15  ;;  %v2009_v40 = vpop.permute.xlu2 %1491 }
  0x7e   : > { %v1494_v8 = vunpack.i.h.bf16 %v2009_v40  ;;  %v1493_v10 = vunpack.i.l.bf16 %v2009_v40  ;;  %v1433_v40 = vld [vmem:[%s2544_s3 + $0x14] sm:$0xf] }
  0x80   : > { %v789_v21 = vsel %vm592_vm4, %v1488_v5, %v1493_v10  ;;  %v790_v22 = vsel %vm592_vm4, %v1489_v4, %v1494_v8 }
  0x81   : > { %v819_v36 = vpack.c.bf16 %v790_v22, %v789_v21 }
  0x83   : > { %1691 = vrot.lane.b32.xlu2 %v1630_v37, %s1769_s14 }
  0x85   : > { %1686 = vrot.lane.b32.xlu1 %v1625_v38, %s1769_s14  ;;  %1681 = vrot.lane.b32.xlu0 %v1630_v37, %s1771_s17  ;;  %v2014_v41 = vpop.permute.xlu2 %1526  ;;  %s479_s14 = sadd.s32 %s1379_s13, %s1378_s19 }
  0x86   : > { %v1529_v45 = vunpack.i.h.bf16 %v2014_v41  ;;  %s1380_s15 = sshll.u32 %s479_s14, 3 }
  0x8b   : > { %1706 = vrot.lane.b32.xlu2 %v1625_v38, %s1766_s11 }
  0x8d   : > { %1696 = vrot.lane.b32.xlu0 %v1625_v38, %s1772_s18  ;;  %1701 = vrot.lane.b32.xlu1 %v1630_v37, %s1772_s18  ;;  %v2021_v44 = vpop.permute.xlu2 %1541  ;;  %s481_s18 = scalar_lea.vmem %s2548_s7, %s1380_s15 }
  0x8f   : > { %v2019_v42 = vpop.permute.xlu1 %1506  ;;  %v1497_v43 = vpop.permute.xlu0 %1496 }
  0x90   : > { %v1508_v47 = vunpack.i.l.bf16 %v2019_v42  ;;  %v1499_v48 = vunpack.i.h.bf16 %v1497_v43  ;;  %v1498_v51 = vunpack.i.l.bf16 %v1497_v43  ;;  %v1543_v43 = vunpack.i.l.bf16 %v2021_v44 }
  0x93   : > { %1721 = vrot.lane.b32.xlu2 %v1630_v37, %s2563_s9 }
  0x95   : > { %1711 = vrot.lane.b32.xlu0 %v1630_v37, %s1766_s11  ;;  %1716 = vrot.lane.b32.xlu1 %v1625_v38, %s2563_s9  ;;  %v2034_v55 = vpop.permute.xlu2 %1556  ;;  %v1544_v38 = vunpack.i.h.bf16 %v2021_v44 }
  0x97   : > { %v2029_v49 = vpop.permute.xlu1 %1511  ;;  %v1502_v50 = vpop.permute.xlu0 %1501 }
  0x98   : > { %v1513_v52 = vunpack.i.l.bf16 %v2029_v49  ;;  %v1504_v53 = vunpack.i.h.bf16 %v1502_v50  ;;  %v1503_v54 = vunpack.i.l.bf16 %v1502_v50 }
  0x9a   : > { %v2038_v56 = vsel %vm527_vm2, %v1513_v52, %v1508_v47  ;;  %v2042_v57 = vsel %vm527_vm2, %v1508_v47, %v1513_v52  ;;  %v2046_v58 = vsel %vm514_vm3, %v1503_v54, %v1498_v51  ;;  %v2050_v59 = vsel %vm514_vm3, %v1504_v53, %v1499_v48 }
  0x9b   : > { %v610_v60 = vpack.c.bf16 %v2050_v59, %v2046_v58  ;;  %v2056_v61 = vsel %vm514_vm3, %v1498_v51, %v1503_v54  ;;  %v2060_v62 = vsel %vm514_vm3, %v1499_v48, %v1504_v53  ;;  %v1528_v47 = vunpack.i.l.bf16 %v2014_v41 }
  0x9c   : > { %v611_v63 = vpack.c.bf16 %v2060_v62, %v2056_v61  ;;  %v1435_v62 = vld [vmem:[%s2544_s3 + $0x24] sm:$0xf] }
  0x9d   : > { %v2090_v37 = vpop.permute.xlu2 %1571 }
  0x9f   : > { %v1522_v13 = vpop.permute.xlu1 %1521  ;;  %v1517_v14 = vpop.permute.xlu0 %1516 }
  0xa0   : > { %v1524_v15 = vunpack.i.h.bf16 %v1522_v13  ;;  %v1523_v18 = vunpack.i.l.bf16 %v1522_v13  ;;  %v1519_v19 = vunpack.i.h.bf16 %v1517_v14  ;;  %v1518_v20 = vunpack.i.l.bf16 %v1517_v14 }
  0xa2   : > { %v606_v25 = vsel %vm605_vm5, %v1518_v20, %v1523_v18  ;;  %v607_v26 = vsel %vm605_vm5, %v1519_v19, %v1524_v15  ;;  %v608_v27 = vsel %vm605_vm5, %v1523_v18, %v1518_v20  ;;  %v609_v33 = vsel %vm605_vm5, %v1524_v15, %v1519_v19  ;;  %v1431_v19 = vld [vmem:[%s2544_s3 + $0x4] sm:$0xf]  ;;  %v1385_v20 = vld [vmem:[%s2544_s3 + $0x8] sm:$0xf0] }
  0xa3   : > { %v626_v34 = vpack.c.bf16 %v607_v26, %v606_v25  ;;  %v627_v35 = vpack.c.bf16 %v609_v33, %v608_v27  ;;  %v1388_v22 = vor.u32 %v1431_v19, %v1385_v20 }
  0xa5   : > { %664 = vmatpush.bf16.msra.mxu1 %v626_v34  ;;  %692 = vmatpush.bf16.msra.mxu3 %v627_v35  ;;  %v2137_v26 = vpop.permute.xlu2 %1586 }
  0xa7   : > { %v2096_v48 = vpop.permute.xlu1 %1536  ;;  %v2098_v50 = vpop.permute.xlu0 %1531 }
  0xa8   : > { %v1539_v51 = vunpack.i.h.bf16 %v2096_v48  ;;  %v1538_v52 = vunpack.i.l.bf16 %v2096_v48  ;;  %v1534_v53 = vunpack.i.h.bf16 %v2098_v50  ;;  %v1533_v54 = vunpack.i.l.bf16 %v2098_v50  ;;  %1396 = vmatmul.msk.bf16.vlgmr.msra.gmra.mxu3 %vm639_vm8, %v1388_v22  ;;  %1392 = vmatmul.msk.bf16.vlgmr.msra.gmra.mxu1 %vm639_vm8, %v1388_v22 }
  0xa9   : > { %838 = vmatpush.bf16.msrb.mxu1 %v819_v36  ;;  %v1559_v22 = vunpack.i.h.bf16 %v2034_v55 }
  0xaa   : > { %v777_v13 = vsel %vm579_vm6, %v1528_v47, %v1533_v54  ;;  %v778_v14 = vsel %vm579_vm6, %v1529_v45, %v1534_v53  ;;  %v765_v15 = vsel %vm566_vm7, %v1538_v52, %v1543_v43  ;;  %v766_v18 = vsel %vm566_vm7, %v1539_v51, %v1544_v38 }
  0xab   : > { %v817_v21 = vpack.c.bf16 %v778_v14, %v777_v13  ;;  %v815_v25 = vpack.c.bf16 %v766_v18, %v765_v15  ;;  %v813_v13 = vpack.c.bf16 %v1878_v7, %v1876_v6  ;;  %v1558_v6 = vunpack.i.l.bf16 %v2034_v55 }
  0xac   : > { %v1574_v7 = vunpack.i.h.bf16 %v2090_v37 }
  0xad   : > { %839 = vmatpush.bf16.msrb.mxu1 %v817_v21 }
  0xaf   : > { %v1552_v27 = vpop.permute.xlu1 %1551  ;;  %v1547_v33 = vpop.permute.xlu0 %1546 }
  0xb0   : > { %v1554_v34 = vunpack.i.h.bf16 %v1552_v27  ;;  %v1553_v35 = vunpack.i.l.bf16 %v1552_v27  ;;  %v1549_v36 = vunpack.i.h.bf16 %v1547_v33  ;;  %v1548_v31 = vunpack.i.l.bf16 %v1547_v33 }
  0xb1   : > { %840 = vmatpush.bf16.msrb.mxu1 %v815_v25  ;;  %v1573_v25 = vunpack.i.l.bf16 %v2090_v37 }
  0xb2   : > { %v593_v14 = vsel %vm592_vm4, %v1548_v31, %v1553_v35  ;;  %v594_v15 = vsel %vm592_vm4, %v1549_v36, %v1554_v34  ;;  %v595_v18 = vsel %vm592_vm4, %v1553_v35, %v1548_v31  ;;  %v596_v19 = vsel %vm592_vm4, %v1554_v34, %v1549_v36 }
  0xb3   : > { %v624_v20 = vpack.c.bf16 %v594_v15, %v593_v14  ;;  %v625_v21 = vpack.c.bf16 %v596_v19, %v595_v18  ;;  %v2159_v14 = vpop.permute.xlu2 %1601 }
  0xb5   : > { %643 = vmatpush.bf16.msra.mxu0 %v624_v20  ;;  %671 = vmatpush.bf16.msra.mxu2 %v625_v21 }
  0xb6   : > { %841 = vmatpush.bf16.msrb.mxu1 %v813_v13 }
  0xb7   : > { %v2154_v27 = vpop.permute.xlu1 %1566  ;;  %v1562_v33 = vpop.permute.xlu0 %1561 }
  0xb8   : > { %v1569_v31 = vunpack.i.h.bf16 %v2154_v27  ;;  %v1568_v34 = vunpack.i.l.bf16 %v2154_v27  ;;  %v1564_v35 = vunpack.i.h.bf16 %v1562_v33  ;;  %v1563_v36 = vunpack.i.l.bf16 %v1562_v33 }
  0xba   : > { %v580_v55 = vsel %vm579_vm6, %v1558_v6, %v1563_v36  ;;  %v581_v13 = vsel %vm579_vm6, %v1559_v22, %v1564_v35  ;;  %v582_v15 = vsel %vm579_vm6, %v1563_v36, %v1558_v6  ;;  %v583_v18 = vsel %vm579_vm6, %v1564_v35, %v1559_v22 }
  0xbb   : > { %v622_v19 = vpack.c.bf16 %v581_v13, %v580_v55  ;;  %v623_v20 = vpack.c.bf16 %v583_v18, %v582_v15  ;;  %v755_v21 = vsel %vm553_vm9, %v1573_v25, %v1568_v34  ;;  %v756_v33 = vsel %vm553_vm9, %v1574_v7, %v1569_v31  ;;  %v2181_v18 = vpop.permute.xlu2 %1616 }
  0xbc   : > { %v811_v6 = vpack.c.bf16 %v756_v33, %v755_v21 }
  0xbd   : > { %644 = vmatpush.bf16.msra.mxu0 %v622_v19  ;;  %672 = vmatpush.bf16.msra.mxu2 %v623_v20 }
  0xbe   : > { %842 = vmatpush.bf16.msrb.mxu1 %v811_v6  ;;  %v1390_v6 = vpack.c.bf16 %v495_v3, %v493_v2 }
  0xbf   : > { %v1582_v22 = vpop.permute.xlu1 %1581  ;;  %v1577_v35 = vpop.permute.xlu0 %1576 }
  0xc0   : > { %v1584_v36 = vunpack.i.h.bf16 %v1582_v22  ;;  %v1583_v55 = vunpack.i.l.bf16 %v1582_v22  ;;  %v1579_v13 = vunpack.i.h.bf16 %v1577_v35  ;;  %v1578_v15 = vunpack.i.l.bf16 %v1577_v35 }
  0xc1   : > { %v1394_v22 = vpack.c.bf16 %v496_v12, %v494_v11  ;;  %v1589_v35 = vunpack.i.h.bf16 %v2137_v26  ;;  %v791_v11 = vsel %vm592_vm4, %v1493_v10, %v1488_v5  ;;  %v792_v12 = vsel %vm592_vm4, %v1494_v8, %v1489_v4  ;;  %v1403_v4 = vld [vmem:[%s2544_s3 + $0x18] sm:$0xf0] }
  0xc2   : > { %v567_v30 = vsel %vm566_vm7, %v1578_v15, %v1583_v55  ;;  %v568_v29 = vsel %vm566_vm7, %v1579_v13, %v1584_v36  ;;  %v569_v21 = vsel %vm566_vm7, %v1583_v55, %v1578_v15  ;;  %v570_v19 = vsel %vm566_vm7, %v1584_v36, %v1579_v13 }
  0xc3   : > { %v620_v20 = vpack.c.bf16 %v568_v29, %v567_v30  ;;  %v621_v33 = vpack.c.bf16 %v570_v19, %v569_v21  ;;  %v1588_v29 = vunpack.i.l.bf16 %v2137_v26  ;;  %v1604_v30 = vunpack.i.h.bf16 %v2159_v14  ;;  %v2239_v39 = vpop.permute.xlu2 %1631 }
  0xc4   : > { %v1603_v36 = vunpack.i.l.bf16 %v2159_v14  ;;  %v820_v19 = vpack.c.bf16 %v792_v12, %v791_v11 }
  0xc5   : > { %645 = vmatpush.bf16.msra.mxu0 %v620_v20  ;;  %673 = vmatpush.bf16.msra.mxu2 %v621_v33  ;;  %v2259_v20 = vor.u32 %v1433_v40, %v1403_v4  ;;  %v779_v33 = vsel %vm579_vm6, %v1533_v54, %v1528_v47 }
  0xc7   : > { %v2206_v55 = vpop.permute.xlu1 %1596  ;;  %v2208_v2 = vpop.permute.xlu0 %1591 }
  0xc8   : > { %v1599_v0 = vunpack.i.h.bf16 %v2206_v55  ;;  %v1598_v1 = vunpack.i.l.bf16 %v2206_v55  ;;  %v1594_v3 = vunpack.i.h.bf16 %v2208_v2  ;;  %v1593_v9 = vunpack.i.l.bf16 %v2208_v2 }
  0xc9   : > { %1391 = vmatpush.bf16.msk.msra.mxu0 %vm1389_vm10, %v1390_v6  ;;  %1395 = vmatpush.bf16.msk.msra.mxu2 %vm1389_vm10, %v1394_v22  ;;  %v780_v6 = vsel %vm579_vm6, %v1534_v53, %v1529_v45  ;;  %v1514_v22 = vunpack.i.h.bf16 %v2029_v49  ;;  %v767_v49 = vsel %vm566_vm7, %v1543_v43, %v1538_v52  ;;  %v814_v52 = vpack.c.bf16 %v1904_v17, %v1902_v16 }
  0xca   : > { %v743_v13 = vsel %vm540_vm11, %v1593_v9, %v1588_v29  ;;  %v744_v5 = vsel %vm540_vm11, %v1594_v3, %v1589_v35  ;;  %v801_v10 = vsel %vm605_vm5, %v1598_v1, %v1603_v36  ;;  %v802_v15 = vsel %vm605_vm5, %v1599_v0, %v1604_v30 }
  0xcb   : > { %v809_v8 = vpack.c.bf16 %v744_v5, %v743_v13  ;;  %v821_v21 = vpack.c.bf16 %v802_v15, %v801_v10  ;;  %v818_v10 = vpack.c.bf16 %v780_v6, %v779_v33  ;;  %v2301_v54 = vpop.permute.xlu2 %1646  ;;  %v1619_v15 = vunpack.i.h.bf16 %v2181_v18 }
  0xcc   : > { %v753_v6 = vsel %vm553_vm9, %v1568_v34, %v1573_v25  ;;  %v754_v16 = vsel %vm553_vm9, %v1569_v31, %v1574_v7  ;;  %v741_v7 = vsel %vm540_vm11, %v1588_v29, %v1593_v9  ;;  %v742_v31 = vsel %vm540_vm11, %v1589_v35, %v1594_v3  ;;  %v1401_v9 = vld [vmem:[%s2544_s3 + $0x10] sm:$0xf] }
  0xcd   : > { %843 = vmatpush.bf16.msrb.mxu1 %v809_v8  ;;  %859 = vmatpush.bf16.msrb.mxu3 %v821_v21  ;;  %v1509_v8 = vunpack.i.h.bf16 %v2019_v42  ;;  %v768_v42 = vsel %vm566_vm7, %v1544_v38, %v1539_v51  ;;  %v1618_v21 = vunpack.i.l.bf16 %v2181_v18  ;;  %v812_v27 = vpack.c.bf16 %v754_v16, %v753_v6 }
  0xce   : > { %v816_v38 = vpack.c.bf16 %v768_v42, %v767_v49  ;;  %v810_v42 = vpack.c.bf16 %v742_v31, %v741_v7 }
  0xcf   : > { %v1612_v11 = vpop.permute.xlu1 %1611  ;;  %v1607_v12 = vpop.permute.xlu0 %1606 }
  0xd0   : > { %v1614_v13 = vunpack.i.h.bf16 %v1612_v11  ;;  %v1613_v5 = vunpack.i.l.bf16 %v1612_v11  ;;  %v1609_v40 = vunpack.i.h.bf16 %v1607_v12  ;;  %v1608_v4 = vunpack.i.l.bf16 %v1607_v12  ;;  %1407 = vmatmul.msk.bf16.vlgmr.msrb.gmra.mxu3 %vm639_vm8, %v2259_v20 }
  0xd1   : > { %866 = vmatpush.bf16.msra.mxu3 %v820_v19 }
  0xd2   : > { %v731_v41 = vsel %vm527_vm2, %v1609_v40, %v1514_v22  ;;  %v732_v45 = vsel %vm527_vm2, %v1613_v5, %v1608_v4  ;;  %v2295_v50 = vsel %vm527_vm2, %v1614_v13, %v1509_v8  ;;  %v2299_v53 = vsel %vm527_vm2, %v1509_v8, %v1614_v13 }
  0xd3   : > { %v807_v47 = vpack.c.bf16 %v732_v45, %v731_v41  ;;  %v612_v43 = vpack.c.bf16 %v2295_v50, %v2038_v56  ;;  %v613_v44 = vpack.c.bf16 %v2299_v53, %v2042_v57  ;;  %v2345_v34 = vpop.permute.xlu2 %1661  ;;  %v729_v26 = vsel %vm527_vm2, %v1514_v22, %v1609_v40 }
  0xd4   : > { %v730_v35 = vsel %vm527_vm2, %v1608_v4, %v1613_v5  ;;  %v804_v22 = vsel %vm605_vm5, %v1604_v30, %v1599_v0  ;;  %v803_v5 = vsel %vm605_vm5, %v1603_v36, %v1598_v1  ;;  %v1649_v30 = vunpack.i.h.bf16 %v2301_v54 }
  0xd5   : > { %867 = vmatpush.bf16.msra.mxu3 %v818_v10  ;;  %844 = vmatpush.bf16.msrb.mxu1 %v807_v47  ;;  %v1434_v47 = vld [vmem:[%s2544_s3 + $0x14] sm:$0xf0]  ;;  %v808_v40 = vpack.c.bf16 %v730_v35, %v729_v26  ;;  %v1648_v0 = vunpack.i.l.bf16 %v2301_v54  ;;  %v822_v36 = vpack.c.bf16 %v804_v22, %v803_v5  ;;  %v1634_v1 = vunpack.i.h.bf16 %v2239_v39 }
  0xd7   : > { %v2307_v48 = vpop.permute.xlu1 %1626  ;;  %v1622_v51 = vpop.permute.xlu0 %1621 }
  0xd8   : > { %v1624_v19 = vunpack.i.h.bf16 %v1622_v51  ;;  %v1623_v33 = vunpack.i.l.bf16 %v1622_v51  ;;  %v1402_v51 = vor.u32 %v1434_v47, %v1401_v9 }
  0xd9   : > { %868 = vmatpush.bf16.msra.mxu3 %v816_v38 }
  0xda   : > { %v556_v17 = vsel %vm553_vm9, %v1623_v33, %v1618_v21  ;;  %v557_v18 = vsel %vm553_vm9, %v1624_v19, %v1619_v15  ;;  %v554_v11 = vsel %vm553_vm9, %v1618_v21, %v1623_v33  ;;  %v555_v12 = vsel %vm553_vm9, %v1619_v15, %v1624_v19 }
  0xdb   : > { %v616_v25 = vpack.c.bf16 %v557_v18, %v556_v17  ;;  %v617_v37 = vpack.c.bf16 %v555_v12, %v554_v11  ;;  %v2379_v14 = vpop.permute.xlu2 %1676  ;;  %v1633_v19 = vunpack.i.l.bf16 %v2239_v39  ;;  %v1629_v18 = vunpack.i.h.bf16 %v2307_v48 }
  0xdc   : > { %v1628_v11 = vunpack.i.l.bf16 %v2307_v48 }
  0xdd   : > { %869 = vmatpush.bf16.msra.mxu3 %v814_v52  ;;  %647 = vmatpush.bf16.msra.mxu0 %v616_v25  ;;  %v1664_v25 = vunpack.i.h.bf16 %v2345_v34 }
  0xde   : > { %675 = vmatpush.bf16.msra.mxu2 %v617_v37  ;;  %v1663_v37 = vunpack.i.l.bf16 %v2345_v34  ;;  %v991_v31 = vsel %vm592_vm4, %v1628_v11, %v1633_v19  ;;  %v1383_v34 = vld [vmem:[%s2544_s3] sm:$0xf] }
  0xdf   : > { %v1642_v13 = vpop.permute.xlu1 %1641  ;;  %v1637_v8 = vpop.permute.xlu0 %1636 }
  0xe0   : > { %v1644_v10 = vunpack.i.h.bf16 %v1642_v13  ;;  %v1643_v41 = vunpack.i.l.bf16 %v1642_v13  ;;  %v1639_v45 = vunpack.i.h.bf16 %v1637_v8  ;;  %v1638_v49 = vunpack.i.l.bf16 %v1637_v8 }
  0xe1   : > { %870 = vmatpush.bf16.msra.mxu3 %v812_v27  ;;  %v992_v13 = vsel %vm592_vm4, %v1629_v18, %v1634_v1 }
  0xe2   : > { %v719_v29 = vsel %vm514_vm3, %v1643_v41, %v1638_v49  ;;  %v720_v2 = vsel %vm514_vm3, %v1644_v10, %v1639_v45  ;;  %v717_v4 = vsel %vm514_vm3, %v1638_v49, %v1643_v41  ;;  %v718_v38 = vsel %vm514_vm3, %v1639_v45, %v1644_v10  ;;  %v1432_v45 = vld [vmem:[%s2544_s3 + $0x4] sm:$0xf0] }
  0xe3   : > { %v805_v3 = vpack.c.bf16 %v720_v2, %v719_v29  ;;  %v806_v33 = vpack.c.bf16 %v718_v38, %v717_v4  ;;  %v993_v10 = vsel %vm592_vm4, %v1633_v19, %v1628_v11  ;;  %v994_v41 = vsel %vm592_vm4, %v1634_v1, %v1629_v18  ;;  %v1692_v49 = vpop.permute.xlu2 %1691 }
  0xe4   : > { %v1022_v29 = vpack.c.bf16 %v994_v41, %v993_v10  ;;  %v1384_v2 = vor.u32 %v1432_v45, %v1383_v34  ;;  %v1693_v9 = vunpack.i.l.bf16 %v1692_v49  ;;  %v1678_v18 = vunpack.i.l.bf16 %v2379_v14 }
  0xe5   : > { %871 = vmatpush.bf16.msra.mxu3 %v810_v42  ;;  %845 = vmatpush.bf16.msrb.mxu1 %v805_v3  ;;  %v1021_v42 = vpack.c.bf16 %v992_v13, %v991_v31 }
  0xe7   : > { %v1657_v52 = vpop.permute.xlu1 %1656  ;;  %v1652_v15 = vpop.permute.xlu0 %1651 }
  0xe8   : > { %v1654_v55 = vunpack.i.h.bf16 %v1652_v15  ;;  %v1653_v21 = vunpack.i.l.bf16 %v1652_v15  ;;  %846 = vmatmul.bf16.vlgmr.msrb.gmra.mxu1 %v1402_v51  ;;  %v1659_v48 = vunpack.i.h.bf16 %v1657_v52  ;;  %v1658_v8 = vunpack.i.l.bf16 %v1657_v52 }
  0xe9   : > { %872 = vmatpush.bf16.msra.mxu3 %v808_v40 }
  0xea   : > { %v543_v6 = vsel %vm540_vm11, %v1653_v21, %v1648_v0  ;;  %v544_v16 = vsel %vm540_vm11, %v1654_v55, %v1649_v30  ;;  %v541_v54 = vsel %vm540_vm11, %v1648_v0, %v1653_v21  ;;  %v542_v17 = vsel %vm540_vm11, %v1649_v30, %v1654_v55 }
  0xeb   : > { %v614_v12 = vpack.c.bf16 %v544_v16, %v543_v6  ;;  %v615_v39 = vpack.c.bf16 %v542_v17, %v541_v54  ;;  %v979_v26 = vsel %vm579_vm6, %v1658_v8, %v1663_v37  ;;  %v980_v35 = vsel %vm579_vm6, %v1659_v48, %v1664_v25  ;;  %v1707_v0 = vpop.permute.xlu2 %1706 }
  0xec   : > { %v981_v3 = vsel %vm579_vm6, %v1663_v37, %v1658_v8  ;;  %v982_v56 = vsel %vm579_vm6, %v1664_v25, %v1659_v48  ;;  %v1019_v4 = vpack.c.bf16 %v980_v35, %v979_v26  ;;  %v2565_v16 = vunpack.c.l.bf16 %v1960_v24 }
  0xed   : > { %873 = vmatpush.bf16.msra.mxu3 %v806_v33  ;;  %648 = vmatpush.bf16.msra.mxu0 %v614_v12  ;;  %v1020_v38 = vpack.c.bf16 %v982_v56, %v981_v3  ;;  %v1679_v17 = vunpack.i.h.bf16 %v2379_v14  ;;  %v1709_v41 = vunpack.i.h.bf16 %v1707_v0 }
  0xee   : > { %676 = vmatpush.bf16.msra.mxu2 %v615_v39  ;;  %v1420_v54 = vpack.c.bf16 %v2565_v16, %v900_v28  ;;  %v2567_v39 = vunpack.c.h.bf16 %v1960_v24 }
  0xef   : > { %v1672_v27 = vpop.permute.xlu1 %1671  ;;  %v1667_v7 = vpop.permute.xlu0 %1666 }
  0xf0   : > { %874 = vmatmul.bf16.vlgmr.msra.gmra.mxu3 %v1402_v51  ;;  %v1674_v50 = vunpack.i.h.bf16 %v1672_v27  ;;  %v1669_v57 = vunpack.i.h.bf16 %v1667_v7  ;;  %v1668_v53 = vunpack.i.l.bf16 %v1667_v7 }
  0xf1   : > { %887 = vmatpush.bf16.msrb.mxu3 %v822_v36  ;;  %649 = vmatpush.bf16.msra.mxu0 %v612_v43  ;;  %v1673_v43 = vunpack.i.l.bf16 %v1672_v27 }
  0xf2   : > { %677 = vmatpush.bf16.msra.mxu2 %v613_v44  ;;  %v1694_v44 = vunpack.i.h.bf16 %v1692_v49  ;;  %v968_v59 = vsel %vm566_vm7, %v1669_v57, %v1674_v50  ;;  %v970_v61 = vsel %vm566_vm7, %v1674_v50, %v1669_v57  ;;  %v1708_v49 = vunpack.i.l.bf16 %v1707_v0 }
  0xf3   : > { %v967_v58 = vsel %vm566_vm7, %v1668_v53, %v1673_v43  ;;  %v1722_v8 = vpop.permute.xlu2 %1721 }
  0xf4   : > { %v1017_v36 = vpack.c.bf16 %v968_v59, %v967_v58  ;;  %v1723_v26 = vunpack.i.l.bf16 %v1722_v8 }
  0xf5   : > { %650 = vmatpush.bf16.msra.mxu0 %v610_v60  ;;  %v969_v60 = vsel %vm566_vm7, %v1673_v43, %v1668_v53 }
  0xf6   : > { %678 = vmatpush.bf16.msra.mxu2 %v611_v63  ;;  %v1415_v63 = vld [vmem:[%s2544_s3 + $0x28] sm:$0xf0]  ;;  %v1018_v6 = vpack.c.bf16 %v970_v61, %v969_v60  ;;  %v1413_v60 = vld [vmem:[%s2544_s3 + $0x20] sm:$0xf]  ;;  %v1436_v61 = vld [vmem:[%s2544_s3 + $0x24] sm:$0xf0] }
  0xf7   : > { %v1687_v47 = vpop.permute.xlu1 %1686  ;;  %v1682_v22 = vpop.permute.xlu0 %1681  ;;  %v2451_v1 = vor.u32 %v1435_v62, %v1415_v63  ;;  %v1414_v63 = vor.u32 %v1436_v61, %v1413_v60 }
  0xf8   : > { %v1689_v40 = vunpack.i.h.bf16 %v1687_v47  ;;  %v1688_v5 = vunpack.i.l.bf16 %v1687_v47  ;;  %651 = vmatmul.bf16.vlgmr.msra.gmra.mxu0 %v1384_v2  ;;  %v1684_v19 = vunpack.i.h.bf16 %v1682_v22  ;;  %v1683_v33 = vunpack.i.l.bf16 %v1682_v22 }
  0xf9   : > { %1068 = vmatpush.bf16.msrb.mxu0 %v1022_v29  ;;  %679 = vmatmul.bf16.vlgmr.msra.gmra.mxu2 %v1384_v2  ;;  %v1724_v2 = vunpack.i.h.bf16 %v1722_v8 }
  0xfa   : > { %1040 = vmatpush.bf16.msrb.mxu2 %v1021_v42  ;;  %v1004_v51 = vsel %vm605_vm5, %v1689_v40, %v1694_v44  ;;  %v1006_v52 = vsel %vm605_vm5, %v1694_v44, %v1689_v40  ;;  %v1003_v15 = vsel %vm605_vm5, %v1688_v5, %v1693_v9  ;;  %v1005_v30 = vsel %vm605_vm5, %v1693_v9, %v1688_v5 }
  0xfb   : > { %v1023_v55 = vpack.c.bf16 %v1004_v51, %v1003_v15  ;;  %v1024_v21 = vpack.c.bf16 %v1006_v52, %v1005_v30  ;;  %v957_v14 = vsel %vm553_vm9, %v1683_v33, %v1678_v18  ;;  %v958_v32 = vsel %vm553_vm9, %v1684_v19, %v1679_v17 }
  0xfc   : > { %v956_v24 = vsel %vm553_vm9, %v1679_v17, %v1684_v19  ;;  %v1013_v31 = vpack.c.bf16 %v958_v32, %v957_v14  ;;  %v1100_v14 = vld [vmem:[%s2545_s4] sm:$0x3] }
  0xfd   : > { %1069 = vmatpush.bf16.msrb.mxu0 %v1020_v38  ;;  %1061 = vmatpush.bf16.msra.mxu1 %v1023_v55 }
  0xfe   : > { %1041 = vmatpush.bf16.msrb.mxu2 %v1019_v4 }
  0xff   : > { %v1697_v11 = vpop.permute.xlu0 %1696  ;;  %v1702_v12 = vpop.permute.xlu1 %1701 }
 0x100   : > { %1408 = vmatmul.msk.bf16.vlgmr.msrb.gmra.mxu3 %vm639_vm8, %v2259_v20  ;;  %v2566_v20 = vunpack.c.h.bf16 %v1958_v23  ;;  %v1699_v37 = vunpack.i.h.bf16 %v1697_v11  ;;  %v1698_v27 = vunpack.i.l.bf16 %v1697_v11  ;;  %v1704_v28 = vunpack.i.h.bf16 %v1702_v12  ;;  %1422 = vmatmul.msk.bf16.vlgmr.msra.gmra.mxu1 %vm639_vm8, %v2451_v1 }
 0x101   : > { %1070 = vmatpush.bf16.msrb.mxu0 %v1018_v6  ;;  %1089 = vmatpush.bf16.msrb.mxu1 %v1024_v21  ;;  %v1703_v7 = vunpack.i.l.bf16 %v1702_v12  ;;  %v955_v23 = vsel %vm553_vm9, %v1678_v18, %v1683_v33  ;;  %v483_v18 = vld [vmem:[%s463_s23] sm:$0xff] }
 0x102   : > { %1042 = vmatpush.bf16.msrb.mxu2 %v1017_v36  ;;  %v1424_v25 = vpack.c.bf16 %v2567_v39, %v2566_v20  ;;  %v946_v48 = vsel %vm540_vm11, %v1704_v28, %v1699_v37  ;;  %v1014_v10 = vpack.c.bf16 %v956_v24, %v955_v23  ;;  %v944_v45 = vsel %vm540_vm11, %v1699_v37, %v1704_v28 }
 0x103   : > { %v945_v13 = vsel %vm540_vm11, %v1703_v7, %v1698_v27  ;;  %v943_v34 = vsel %vm540_vm11, %v1698_v27, %v1703_v7  ;;  %v486_v11 = vunpack.c.h.bf16 %v483_v18  ;;  %v485_v20 = vunpack.c.l.bf16 %v483_v18 }
 0x104   : > { %v1011_v29 = vpack.c.bf16 %v946_v48, %v945_v13  ;;  %v1012_v57 = vpack.c.bf16 %v944_v45, %v943_v34  ;;  %v484_v13 = vld [vmem:[%s463_s23 + $0x8] sm:$0xff] }
 0x105   : > { %1425 = vmatpush.bf16.msk.msrb.mxu0 %vm1419_vm12, %v1424_v25  ;;  %v487_v45 = vunpack.c.l.bf16 %v484_v13 }
 0x106   : > { %1421 = vmatpush.bf16.msk.msrb.mxu2 %vm1419_vm12, %v1420_v54 }
 0x107   : > { %v1712_v42 = vpop.permute.xlu0 %1711  ;;  %v1717_v35 = vpop.permute.xlu1 %1716 }
 0x108   : > { %v1714_v3 = vunpack.i.h.bf16 %v1712_v42  ;;  %v1713_v56 = vunpack.i.l.bf16 %v1712_v42  ;;  %v1719_v50 = vunpack.i.h.bf16 %v1717_v35  ;;  %v1718_v43 = vunpack.i.l.bf16 %v1717_v35 }
 0x109   : > { %1072 = vmatpush.bf16.msrb.mxu0 %v1014_v10  ;;  %v1103_v10 = vperm.slane %v1100_v14, 1  ;;  %v1102_v35 = vperm.slane %v1100_v14, 0 }
 0x10a   : > { %1044 = vmatpush.bf16.msrb.mxu2 %v1013_v31  ;;  %v933_v53 = vsel %vm527_vm2, %v1713_v56, %v1708_v49  ;;  %v934_v44 = vsel %vm527_vm2, %v1714_v3, %v1709_v41  ;;  %v931_v9 = vsel %vm527_vm2, %v1708_v49, %v1713_v56  ;;  %v932_v47 = vsel %vm527_vm2, %v1709_v41, %v1714_v3 }
 0x10b   : > { %v1009_v22 = vpack.c.bf16 %v934_v44, %v933_v53  ;;  %v1010_v40 = vpack.c.bf16 %v932_v47, %v931_v9  ;;  %v921_v5 = vsel %vm514_vm3, %v1723_v26, %v1718_v43  ;;  %v922_v4 = vsel %vm514_vm3, %v1724_v2, %v1719_v50 }
 0x10c   : > { %v919_v38 = vsel %vm514_vm3, %v1718_v43, %v1723_v26  ;;  %v920_v58 = vsel %vm514_vm3, %v1719_v50, %v1724_v2  ;;  %v1007_v59 = vpack.c.bf16 %v922_v4, %v921_v5  ;;  %v488_v41 = vunpack.c.h.bf16 %v484_v13 }
 0x10d   : > { %1073 = vmatpush.bf16.msrb.mxu0 %v1012_v57  ;;  %v1008_v62 = vpack.c.bf16 %v920_v58, %v919_v38 }
 0x10e   : > { %1045 = vmatpush.bf16.msrb.mxu2 %v1011_v29 }
 0x110   : > { %1426 = vmatmul.msk.bf16.vlgmr.msrb.gmra.mxu1 %vm639_vm8, %v2451_v1 }
 0x111   : > { %1074 = vmatpush.bf16.msrb.mxu0 %v1010_v40 }
 0x112   : > { %1046 = vmatpush.bf16.msrb.mxu2 %v1009_v22 }
 0x115   : > { %1075 = vmatpush.bf16.msrb.mxu0 %v1008_v62 }
 0x116   : > { %1047 = vmatpush.bf16.msrb.mxu2 %v1007_v59 }
 0x118   : > { %1076 = vmatmul.bf16.vlgmr.msrb.gmra.mxu0 %v1414_v63 }
 0x119   : > { %1048 = vmatmul.bf16.vlgmr.msrb.gmra.mxu2 %v1414_v63 }
 0x125   : > { %v666_v51 = vpop.f32.mrf.mxu1 }
 0x12b   : > { %v694_v46 = vpop.f32.mrf.mxu3 }
 0x12d   : > { %v668_v15 = vpop.f32.mrf.mxu1 }
 0x133   : > { %v696_v52 = vpop.f32.mrf.mxu3 }
 0x153   : > { %v861_v30 = vpop.f32.mrf.mxu3 }
 0x15b   : > { %v863_v55 = vpop.f32.mrf.mxu3 }
 0x165   : > { %v847_v0 = vpop.f32.mrf.mxu1 }
 0x166   : > { %v862_v32 = vadd.f32 %v861_v30, %v847_v0 }
 0x16d   : > { %v849_v21 = vpop.f32.mrf.mxu1 }
 0x16e   : > { %v864_v22 = vadd.f32 %v863_v55, %v849_v21 }
 0x173   : > { %v875_v36 = vpop.f32.mrf.mxu3 }
 0x175   : > { %v652_v33 = vpop.f32.mrf.mxu0 }
 0x176   : > { %v667_v39 = vadd.f32 %v666_v51, %v652_v33 }
 0x178   : > { %v699_v23 = vadd.f32 %v667_v39, %v485_v20 }
 0x17a   : > { %v894_v49 = vadd.f32 %v862_v32, %v699_v23 }
 0x17b   : > { %v877_v6 = vpop.f32.mrf.mxu3 }
 0x17c   : > { %v680_v16 = vpop.f32.mrf.mxu2 }
 0x17d   : > { %v1063_v19 = vpop.f32.mrf.mxu1  ;;  %v654_v54 = vpop.f32.mrf.mxu0  ;;  %v695_v12 = vadd.f32 %v694_v46, %v680_v16 }
 0x17e   : > { %v669_v29 = vadd.f32 %v668_v15, %v654_v54 }
 0x17f   : > { %v700_v28 = vadd.f32 %v695_v12, %v486_v11 }
 0x180   : > { %v701_v44 = vadd.f32 %v669_v29, %v487_v45 }
 0x182   : > { %v896_v60 = vadd.f32 %v864_v22, %v701_v44 }
 0x183   : > { %v889_v17 = vpop.f32.mrf.mxu3 }
 0x184   : > { %v890_v25 = vadd.f32 %v889_v17, %v875_v36  ;;  %v682_v37 = vpop.f32.mrf.mxu2 }
 0x185   : > { %v1065_v1 = vpop.f32.mrf.mxu1  ;;  %v697_v34 = vadd.f32 %v696_v52, %v682_v37 }
 0x186   : > { %v895_v24 = vadd.f32 %v890_v25, %v700_v28 }
 0x187   : > { %v702_v56 = vadd.f32 %v697_v34, %v488_v41 }
 0x18b   : > { %v891_v48 = vpop.f32.mrf.mxu3 }
 0x18c   : > { %v892_v2 = vadd.f32 %v891_v48, %v877_v6 }
 0x18d   : > { %v1091_v27 = vpop.f32.mrf.mxu1 }
 0x18e   : > { %v897_v9 = vadd.f32 %v892_v2, %v702_v56 }
 0x195   : > { %v1077_v7 = vpop.f32.mrf.mxu0  ;;  %v1093_v57 = vpop.f32.mrf.mxu1 }
 0x196   : > { %v1092_v31 = vadd.f32 %v1091_v27, %v1077_v7 }
 0x198   : > { %v1097_v8 = vadd.f32 %v1092_v31, %v895_v24 }
 0x19a   : > { %v1107_v3 = vmul.f32 %v1103_v10, %v1097_v8 }
 0x19c   : > { %v1049_v42 = vpop.f32.mrf.mxu2  ;;  %v1121_v40 = vmul.f32 %v1107_v3, %v1107_v3 }
 0x19d   : > { %v1064_v26 = vadd.f32 %v1063_v19, %v1049_v42  ;;  %v1079_v43 = vpop.f32.mrf.mxu0 }
 0x19e   : > { %v1094_v53 = vadd.f32 %v1093_v57, %v1079_v43 }
 0x19f   : > { %v1096_v50 = vadd.f32 %v1064_v26, %v894_v49 }
 0x1a0   : > { %v1099_v4 = vadd.f32 %v1094_v53, %v897_v9 }
 0x1a1   : > { %v1106_v47 = vmul.f32 %v1102_v35, %v1096_v50 }
 0x1a2   : > { %v1109_v63 = vmul.f32 %v1103_v10, %v1099_v4 }
 0x1a3   : > { %v1110_v5 = vpack.c.bf16 %v1107_v3, %v1106_v47  ;;  %v1114_v38 = vadd.f32 %v1107_v3, %v1106_v47  ;;  %v1120_v58 = vmul.f32 %v1106_v47, %v1106_v47 }
 0x1a4   : > { %v1051_v59 = vpop.f32.mrf.mxu2  ;;  %v1123_v0 = vmul.f32 %v1109_v63, %v1109_v63 }
 0x1a5   : > { %1112 = vst [vmem:[%s472_s12] sm:$0xff] %v1110_v5  ;;  %v1066_v61 = vadd.f32 %v1065_v1, %v1051_v59  ;;  %1115 = vadd.xlane.f32.xlu0 %v1114_v38  ;;  %v1124_v62 = vadd.f32 %v1121_v40, %v1120_v58 }
 0x1a7   : > { %v1098_v46 = vadd.f32 %v1066_v61, %v896_v60  ;;  %1125 = vadd.xlane.f32.xlu2 %v1124_v62 }
 0x1a9   : > { %v1108_v51 = vmul.f32 %v1102_v35, %v1098_v46 }
 0x1ab   : > { %v1111_v52 = vpack.c.bf16 %v1109_v63, %v1108_v51  ;;  %v1117_v15 = vadd.f32 %v1109_v63, %v1108_v51  ;;  %v1122_v30 = vmul.f32 %v1108_v51, %v1108_v51 }
 0x1ad   : > { %1113 = vst [vmem:[%s472_s12 + $0x8] sm:$0xff] %v1111_v52  ;;  %1118 = vadd.xlane.f32.xlu1 %v1117_v15  ;;  %v1127_v55 = vadd.f32 %v1123_v0, %v1122_v30 }
 0x1af   : > { %1128 = vadd.xlane.f32.xlu2 %v1127_v55 }
 0x218   : > { %v1116_v21 = vpop.xlane.xlu0 %1115 }
 0x21a   : > { %v1126_v36 = vpop.xlane.xlu2 %1125 }
 0x21b   : > { %v1131_v19 = vsel %vm1130_vm13, %v1116_v21, %v1126_v36 }
 0x21c   : > { %1134 = vst.msk [vmem:[%s481_s18] sm:$0xff] %vm1133_vm14, %v1131_v19 }
 0x220   : > { %v1119_v33 = vpop.xlane.xlu1 %1118 }
 0x222   : > { %v1129_v6 = vpop.xlane.xlu2 %1128 }
 0x223   : > { %v1132_v16 = vsel %vm1130_vm13, %v1119_v33, %v1129_v6 }
 0x224   : > { %1135 = vst.msk [vmem:[%s481_s18 + $0x8] sm:$0xff] %vm1133_vm14, %v1132_v16 }
 0x225 PF: > { %s18_s28 = sadd.s32 1, %s1763_s28   ;;  %s2568_s24 = smov %s1755_s26 }
 0x226   : > { %p15_p11 = scmp.ge.s32.totalorder %s18_s28, 10   ;;  %s2569_s25 = smov %s1759_s27 }
 0x227   : > { %s2570_s26 = smov %s2573_s29  ;;  %s2571_s27 = smov %s2577_s30 }
 0x228   :  { %17 = sbr.rel (!%p15_p11) target bundleno = 3 (0x3), region = 97 }

// kernel: iconvmod_forward.19
= control target key start
LH: loop header
LB: loop body
LE: loop exit
PB: predicated region body
PF: predicated region fallthrough
CT: control target
= control target key end

     0   :  { %s839_s27 = smov 0   ;;  %s841_s28 = smov 0   ;;  %s953_s0 = inlined_call_operand.vmem [shape: bf16[2,4,16,256], index: 0, kind: input, shape index: {}]   ;;  %s954_s1 = inlined_call_operand.vmem [shape: bf16[2,4,16,256], index: 1, kind: input, shape index: {}]   ;;  %s955_s2 = inlined_call_operand.vmem [shape: f32[1,16,1], index: 2, kind: input, shape index: {}]   ;;  %s956_s3 = inlined_call_operand.vmem [shape: f32[1,16,1], index: 3, kind: input, shape index: {}]   ;;  %s957_s4 = inlined_call_operand.vmem [shape: f32[1,16,1], index: 4, kind: input, shape index: {}]   ;;  %s958_s5 = inlined_call_operand.vmem [shape: f32[1,16,1], index: 5, kind: input, shape index: {}]   ;;  %s959_s6 = inlined_call_operand.vmem [shape: f32[1,256], index: 6, kind: input, shape index: {}]   ;;  %s960_s7 = inlined_call_operand.vmem [shape: bf16[2,4,16,256], index: 7, kind: output, shape index: {0}]   ;;  %s961_s8 = inlined_call_operand.vmem [shape: bf16[2,4,16,256], index: 8, kind: output, shape index: {1}]  }
   0x1   :  { %s843_s29 = smov 0   ;;  %s845_s30 = smov 0  }
   0x2   :  { %s847_s9 = smov 0  }
   0x3 LB: > { %s28_s10 = sadd.s32 1, %s783_s29  ;;  %s31_s11 = sadd.s32 1, %s787_s30  ;;  %s791_s9 = sphi %s847_s9, %s19_s9   ;;  %s787_s30 = sphi %s845_s30, %s965_s30   ;;  %s783_s29 = sphi %s843_s29, %s964_s29   ;;  %s779_s28 = sphi %s841_s28, %s963_s28   ;;  %s775_s27 = sphi %s839_s27, %s962_s27  }
   0x4   : > { %p29_p0 = scmp.ge.s32.totalorder %s28_s10, 4  ;;  %p694_p1 = scmp.ge.s32.totalorder %s791_s9, 1 }
   0x5   : > { %p303_p2 = scmp.lt.s32.totalorder %s791_s9, 9 }
   0x6   : > { %s967_s10 = smov (%p29_p0, %s28_s10), 0  ;;  %s969_s11 = smov (!%p29_p0, %s31_s11), %s787_s30 }
   0x7   : > { %p304_p3 = pnand %p694_p1, %p303_p2  ;;  %p33_p4 = scmp.ge.s32.totalorder %s969_s11, 2 }
   0x8   : > { %p363_p5 = scmp.lt.s32.totalorder (!%p304_p3), %s779_s28, 1  ;;  %p365_p6 = scmp.lt.s32.totalorder (!%p304_p3), %s775_s27, 3 }
   0x9   : > { %s971_s11 = smov (%p33_p4, %s969_s11), 0  ;;  %307 = sbr.rel (%p304_p3) target bundleno = 159 (0x9f), region = 48 }
   0xe   : > { %v469_v0 = vld [vmem:[%s957_s4] sm:$0xff]  ;;  %v793_v2 = vmov 0   ;;  %v470_v4 = vld [vmem:[%s957_s4 + $0x8] sm:$0xff]  ;;  %s973_s28 = smov (!%p363_p5, %s779_s28), 1  ;;  %s975_s27 = smov (!%p365_p6, %s775_s27), 3 }
   0xf   : > { %v406_v1 = vld [vmem:[%s955_s2] sm:$0xff]  ;;  %751 = vset.pattern.permute.xlu1 %v793_v2  ;;  %750 = vset.pattern.permute.xlu0 %v793_v2  ;;  %v407_v5 = vld [vmem:[%s955_s2 + $0x8] sm:$0xff]  ;;  %s695_s13 = sshll.u32 %s975_s27, 2  ;;  %s696_s14 = sshll.u32 %s973_s28, 4 }
  0x10   : > { %475 = vperm.xlu1 %751, %v469_v0   ;;  %412 = vperm.xlu0 %750, %v406_v1   ;;  %v408_v3 = vld [vmem:[%s956_s3] sm:$0xff]  ;;  %v409_v6 = vld [vmem:[%s956_s3 + $0x8] sm:$0xff]  ;;  %s369_s15 = sadd.s32 %s696_s14, %s695_s13 }
  0x11   : > { %752 = vset.pattern.permute.xlu2 %v793_v2  ;;  %v472_v7 = vld [vmem:[%s958_s5 + $0x8] sm:$0xff]  ;;  %v471_v8 = vld [vmem:[%s958_s5] sm:$0xff]  ;;  %s901_s16 = sshll.u32 %s369_s15, 2 }
  0x12   : > { %426 = vperm.xlu2 %752, %v408_v3   ;;  %s371_s19 = scalar_lea.vmem %s953_s0, %s901_s16  ;;  %v399_v15 = vld [vmem:[%s959_s6] sm:$0x3]  ;;  %s380_s22 = scalar_lea.vmem %s954_s1, %s901_s16 }
  0x13   : > { %v400_v9 = vld [vmem:[%s371_s19] sm:$0xff]  ;;  %v401_v18 = vld [vmem:[%s371_s19 + $0x8] sm:$0xff]  ;;  %v914_v21 = vperm.slane %v399_v15, 0  ;;  %v916_v22 = vperm.slane %v399_v15, 1  ;;  %s924_s25 = scalar_lea.vmem %s960_s7, %s901_s16  ;;  %s398_s13 = scalar_lea.vmem %s961_s8, %s901_s16 }
  0x14   : > { %v402_v10 = vunpack.c.l.bf16 %v400_v9  ;;  %v403_v11 = vunpack.c.h.bf16 %v400_v9  ;;  %v404_v23 = vunpack.c.l.bf16 %v401_v18  ;;  %v405_v24 = vunpack.c.h.bf16 %v401_v18  ;;  %v463_v27 = vld [vmem:[%s380_s22] sm:$0xff]  ;;  %v464_v33 = vld [vmem:[%s380_s22 + $0x8] sm:$0xff] }
  0x15   : > { %v465_v37 = vunpack.c.l.bf16 %v463_v27  ;;  %v466_v38 = vunpack.c.h.bf16 %v463_v27  ;;  %v467_v41 = vunpack.c.l.bf16 %v464_v33  ;;  %v468_v42 = vunpack.c.h.bf16 %v464_v33 }
  0x18   : > { %480 = vperm.xlu1 %751, %v470_v4   ;;  %417 = vperm.xlu0 %750, %v407_v5  }
  0x1a   : > { %431 = vperm.xlu2 %752, %v409_v6  }
  0x20   : > { %494 = vperm.xlu1 %751, %v472_v7   ;;  %489 = vperm.xlu0 %750, %v471_v8  }
  0x6c   : > { %v427_v12 = vpop.permute.xlu2 %426 }
  0x74   : > { %v432_v40 = vpop.permute.xlu2 %431 }
  0x82   : > { %v476_v13 = vpop.permute.xlu1 %475  ;;  %v413_v14 = vpop.permute.xlu0 %412 }
  0x83   : > { %v420_v16 = vmul.f32 %v413_v14, %v402_v10  ;;  %v421_v17 = vmul.f32 %v413_v14, %v403_v11  ;;  %v483_v47 = vmul.f32 %v476_v13, %v465_v37  ;;  %v484_v48 = vmul.f32 %v476_v13, %v466_v38 }
  0x85   : > { %v434_v19 = vadd.f32 %v427_v12, %v420_v16  ;;  %v435_v20 = vadd.f32 %v427_v12, %v421_v17 }
  0x87   : > { %vm438_vm0 = vcmp.ge.f32.partialorder %v434_v19, 0.0  ;;  %vm439_vm1 = vcmp.ge.f32.partialorder %v435_v20, 0.0  ;;  %v442_v25 = vmul.f32 0.01, %v434_v19  ;;  %v443_v26 = vmul.f32 0.01, %v435_v20 }
  0x89   : > { %v446_v28 = vsel %vm438_vm0, %v434_v19, %v442_v25  ;;  %v447_v29 = vsel %vm439_vm1, %v435_v20, %v443_v26 }
  0x8a   : > { %v455_v30 = vmul.f32 %v914_v21, %v446_v28  ;;  %v456_v31 = vmul.f32 %v916_v22, %v447_v29  ;;  %v481_v32 = vpop.permute.xlu1 %480  ;;  %v418_v34 = vpop.permute.xlu0 %417 }
  0x8b   : > { %v422_v35 = vmul.f32 %v418_v34, %v404_v23  ;;  %v423_v36 = vmul.f32 %v418_v34, %v405_v24  ;;  %v485_v49 = vmul.f32 %v481_v32, %v467_v41  ;;  %v486_v50 = vmul.f32 %v481_v32, %v468_v42 }
  0x8c   : > { %v459_v39 = vpack.c.bf16 %v456_v31, %v455_v30 }
  0x8d   : > { %v436_v43 = vadd.f32 %v432_v40, %v422_v35  ;;  %v437_v44 = vadd.f32 %v432_v40, %v423_v36 }
  0x8e   : > { %461 = vst [vmem:[%s924_s25] sm:$0xff] %v459_v39 }
  0x8f   : > { %vm440_vm2 = vcmp.ge.f32.partialorder %v436_v43, 0.0  ;;  %vm441_vm3 = vcmp.ge.f32.partialorder %v437_v44, 0.0  ;;  %v444_v45 = vmul.f32 0.01, %v436_v43  ;;  %v445_v46 = vmul.f32 0.01, %v437_v44 }
  0x91   : > { %v448_v51 = vsel %vm440_vm2, %v436_v43, %v444_v45  ;;  %v449_v52 = vsel %vm441_vm3, %v437_v44, %v445_v46 }
  0x92   : > { %v457_v53 = vmul.f32 %v914_v21, %v448_v51  ;;  %v458_v54 = vmul.f32 %v916_v22, %v449_v52  ;;  %v495_v55 = vpop.permute.xlu1 %494  ;;  %v490_v56 = vpop.permute.xlu0 %489 }
  0x93   : > { %v499_v57 = vadd.f32 %v495_v55, %v485_v49  ;;  %v500_v58 = vadd.f32 %v495_v55, %v486_v50  ;;  %v497_v59 = vadd.f32 %v490_v56, %v483_v47  ;;  %v498_v60 = vadd.f32 %v490_v56, %v484_v48 }
  0x94   : > { %v460_v61 = vpack.c.bf16 %v458_v54, %v457_v53 }
  0x95   : > { %vm503_vm4 = vcmp.ge.f32.partialorder %v499_v57, 0.0  ;;  %vm504_vm5 = vcmp.ge.f32.partialorder %v500_v58, 0.0  ;;  %v507_v62 = vmul.f32 0.01, %v499_v57  ;;  %v508_v63 = vmul.f32 0.01, %v500_v58 }
  0x96   : > { %462 = vst [vmem:[%s924_s25 + $0x8] sm:$0xff] %v460_v61  ;;  %vm501_vm6 = vcmp.ge.f32.partialorder %v497_v59, 0.0  ;;  %vm502_vm7 = vcmp.ge.f32.partialorder %v498_v60, 0.0  ;;  %v505_v0 = vmul.f32 0.01, %v497_v59 }
  0x97   : > { %v511_v1 = vsel %vm503_vm4, %v499_v57, %v507_v62  ;;  %v512_v2 = vsel %vm504_vm5, %v500_v58, %v508_v63  ;;  %v506_v3 = vmul.f32 0.01, %v498_v60 }
  0x98   : > { %v515_v4 = vmul.f32 %v511_v1, %v914_v21  ;;  %v516_v5 = vmul.f32 %v512_v2, %v916_v22  ;;  %v509_v6 = vsel %vm501_vm6, %v497_v59, %v505_v0 }
  0x99   : > { %v510_v7 = vsel %vm502_vm7, %v498_v60, %v506_v3  ;;  %v513_v8 = vmul.f32 %v509_v6, %v914_v21 }
  0x9a   : > { %v518_v9 = vpack.c.bf16 %v516_v5, %v515_v4  ;;  %v514_v10 = vmul.f32 %v510_v7, %v916_v22 }
  0x9c   : > { %520 = vst [vmem:[%s398_s13 + $0x8] sm:$0xff] %v518_v9  ;;  %v517_v11 = vpack.c.bf16 %v514_v10, %v513_v8 }
  0x9e   : > { %519 = vst [vmem:[%s398_s13] sm:$0xff] %v517_v11 }
  0x9f PF: > { %s19_s9 = sadd.s32 1, %s791_s9   ;;  %s962_s27 = smov %s783_s29 }
  0xa0   : > { %p16_p7 = scmp.ge.s32.totalorder %s19_s9, 10   ;;  %s963_s28 = smov %s787_s30 }
  0xa1   : > { %s964_s29 = smov %s967_s10  ;;  %s965_s30 = smov %s971_s11 }
  0xa2   :  { %18 = sbr.rel (!%p16_p7) target bundleno = 3 (0x3), region = 93 }

// kernel: iconvmod_forward.20
= control target key start
LH: loop header
LB: loop body
LE: loop exit
PB: predicated region body
PF: predicated region fallthrough
CT: control target
= control target key end

     0   :  { %s1680_s21 = smov 0   ;;  %s1682_s22 = smov 0   ;;  %s2398_s0 = inlined_call_operand.vmem [shape: bf16[2,4,16,256], index: 0, kind: input, shape index: {}, may-alias: {0,1,2}]   ;;  %s2399_s1 = inlined_call_operand.vmem [shape: bf16[2,4,16,256], index: 1, kind: input, shape index: {}, may-alias: {0,1,2}]   ;;  %s2400_s2 = inlined_call_operand.vmem [shape: bf16[2,4,16,256], index: 2, kind: input, shape index: {}, may-alias: {0,1,2}]   ;;  %s2401_s3 = inlined_call_operand.vmem [shape: bf16[3,16,144], index: 3, kind: input, shape index: {}]   ;;  %s2402_s4 = inlined_call_operand.vmem [shape: f32[1,256], index: 4, kind: input, shape index: {}]   ;;  %s2403_s5 = inlined_call_operand.vmem [shape: bf16[2,4,16,256], index: 5, kind: input, shape index: {}]   ;;  %s2404_s6 = inlined_call_operand.vmem [shape: bf16[2,4,16,256], index: 6, kind: output, shape index: {}]  }
   0x1   :  { %s1684_s23 = smov 0   ;;  %s1686_s24 = smov 0  }
   0x2   :  { %s1688_s25 = smov 0  }
   0x3 LB: > { %s25_s26 = sadd.s32 1, %s1627_s23  ;;  %s28_s27 = sadd.s32 1, %s1631_s24  ;;  %s1635_s25 = sphi %s1688_s25, %s16_s25   ;;  %s1631_s24 = sphi %s1686_s24, %s2448_s24   ;;  %s1627_s23 = sphi %s1684_s23, %s2447_s23   ;;  %s1623_s22 = sphi %s1682_s22, %s2446_s22   ;;  %s1619_s21 = sphi %s1680_s21, %s2445_s21  }
   0x4   : > { %p26_p0 = scmp.ge.s32.totalorder %s25_s26, 4  ;;  %p1228_p1 = scmp.ge.s32.totalorder %s1635_s25, 1 }
   0x5   : > { %p304_p2 = scmp.lt.s32.totalorder %s1635_s25, 9 }
   0x6   : > { %s2450_s26 = smov (%p26_p0, %s25_s26), 0  ;;  %s2452_s27 = smov (!%p26_p0, %s28_s27), %s1631_s24 }
   0x7   : > { %p305_p3 = pnand %p1228_p1, %p304_p2  ;;  %p30_p4 = scmp.ge.s32.totalorder %s2452_s27, 2 }
   0x8   : > { %s1229_s28 = sadd.s32 (!%p305_p3), 4294967295, %s1619_s21  ;;  %p378_p5 = scmp.lt.s32.totalorder (!%p305_p3), %s1623_s22, 1 }
   0x9   : > { %s2454_s27 = smov (%p30_p4, %s2452_s27), 0  ;;  %308 = sbr.rel (%p305_p3) target bundleno = 425 (0x1a9), region = 44 }
   0xa   : > { %p376_p6 = scmp.gt.s32.totalorder (!%p305_p3), %s1229_s28, 0  ;;  %p1230_p7 = scmp.lt.s32.totalorder (!%p305_p3), %s1229_s28, 3 }
   0xb   : > { %p392_p8 = scmp.lt.s32.totalorder (!%p305_p3), %s1619_s21, 3  ;;  %p439_p9 = scmp.gt.s32.totalorder (!%p305_p3), %s1619_s21, 0 }
   0xc   : > { %s1637_s17 = smov (!%p305_p3), 15   ;;  %s1638_s18 = smov (!%p305_p3), 16  }
   0xd   : > { %s1639_s19 = smov (!%p305_p3), 17   ;;  %s1644_s10 = smov (!%p305_p3), 127  }
   0xe   : > { %s2456_s22 = smov (!%p378_p5, %s1623_s22), 1  ;;  %s2458_s28 = smov (!%p376_p6, %s1229_s28), 0  ;;  %v462_v37 = vlaneseq  ;;  %vm589_vm9 = vcmask 130048  }
   0xf   : > { %s1713_s29 = sshll.u32 %s2456_s22, 4  ;;  %s2460_s28 = smov (!%p1230_p7, %s2458_s28), 3 }
  0x10   : > { %s393_s30 = scalar_select %p392_p8, %s1619_s21, 3  ;;  %v1846_v38 = vand.u32 127, %v462_v37 }
  0x11   : > { %s1235_s7 = sshll.u32 %s2460_s28, 2  ;;  %s399_s11 = sadd.s32 1, %s1619_s21 }
  0x12   : > { %s384_s8 = sadd.s32 %s1713_s29, %s1235_s7  ;;  %s1238_s13 = sshll.u32 %s393_s30, 2  ;;  %vm490_vm2 = vcmp.lt.s32.totalorder %v1846_v38, 15  ;;  %vm477_vm3 = vcmp.lt.s32.totalorder %v1846_v38, 16  ;;  %vm464_vm4 = vcmp.lt.s32.totalorder %v1846_v38, 17  ;;  %vm542_vm5 = vcmp.lt.s32.totalorder %v1846_v38, 112 }
  0x13   : > { %s1237_s9 = sshll.u32 %s384_s8, 2  ;;  %s396_s15 = sadd.s32 %s1238_s13, %s1713_s29  ;;  %vm555_vm6 = vcmp.lt.s32.totalorder %v1846_v38, 111  ;;  %vm529_vm7 = vcmp.lt.s32.totalorder %v1846_v38, 113  ;;  %vm516_vm8 = vcmp.lt.s32.totalorder %v1846_v38, 127  ;;  %vm503_vm10 = vcmp.lt.s32.totalorder %v1846_v38, 1 }
  0x14   : > { %s386_s12 = scalar_lea.vmem %s2398_s0, %s1237_s9  ;;  %s1745_s16 = sshll.u32 %s396_s15, 2 }
  0x15   : > { %v1724_v0 = vld [vmem:[%s386_s12] sm:$0xff]  ;;  %v1726_v1 = vld [vmem:[%s386_s12 + $0x8] sm:$0xff]  ;;  %s447_s14 = scalar_select %p439_p9, 1, 0 }
  0x16   : > { %v443_v2 = vunpack.c.l.bf16 %v1724_v0  ;;  %v445_v3 = vunpack.c.l.bf16 %v1726_v1  ;;  %v444_v6 = vunpack.c.h.bf16 %v1724_v0  ;;  %v446_v7 = vunpack.c.h.bf16 %v1726_v1  ;;  %s398_s28 = scalar_lea.vmem %s2399_s1, %s1745_s16  ;;  %s1640_s30 = smov 112  }
  0x17   : > { %v448_v4 = vstv %s447_s14  ;;  %v1762_v14 = vld [vmem:[%s398_s28] sm:$0xff]  ;;  %v1764_v15 = vld [vmem:[%s398_s28 + $0x8] sm:$0xff]  ;;  %s1641_s7 = smov 1   ;;  %s1642_s8 = smov 113  }
  0x18   : > { %vm1731_vm0 = vcmp.eq.s32.totalorder %v448_v4, 1  ;;  %v655_v16 = vunpack.c.l.bf16 %v1762_v14  ;;  %v2410_v17 = vunpack.c.h.bf16 %v1762_v14  ;;  %v657_v18 = vunpack.c.l.bf16 %v1764_v15  ;;  %s1643_s9 = smov 111   ;;  %p400_p10 = scmp.lt.s32.totalorder %s399_s11, 3 }
  0x19   : > { %v450_v8 = vsel %vm1731_vm0, %v443_v2, 0.0  ;;  %v452_v9 = vsel %vm1731_vm0, %v445_v3, 0.0  ;;  %v451_v11 = vsel %vm1731_vm0, %v444_v6, 0.0  ;;  %v453_v12 = vsel %vm1731_vm0, %v446_v7, 0.0  ;;  %s854_s15 = scalar_select %p392_p8, 1, 0  ;;  %vm1261_vm11 = vmpackc.low %vm1731_vm0, %vm1731_vm0 }
  0x1a   : > { %v1377_v10 = vpack.i.bf16 %v452_v9, %v450_v8  ;;  %v1382_v13 = vpack.i.bf16 %v453_v12, %v451_v11  ;;  %v2409_v19 = vunpack.c.h.bf16 %v1764_v15  ;;  %v1392_v21 = vpack.i.bf16 %v657_v18, %v655_v16  ;;  %s2462_s11 = smov (!%p400_p10, %s399_s11), 3 }
  0x1b   : > { %s2464_s11 = smov (!%p400_p10, %s2462_s11), 3  ;;  %v855_v24 = vstv %s854_s15 }
  0x1c   : > { %1378 = vrot.lane.b32.xlu2 %v1377_v10, %s1637_s17  ;;  %1368 = vrot.lane.b32.xlu1 %v1377_v10, %s1638_s18  ;;  %v1397_v20 = vpack.i.bf16 %v2409_v19, %v2410_v17  ;;  %s1244_s12 = sshll.u32 %s2464_s11, 2  ;;  %vm1815_vm1 = vcmp.eq.s32.totalorder %v855_v24, 1 }
  0x1d   : > { %1358 = vrot.lane.b32.xlu0 %v1377_v10, %s1639_s19  ;;  %s408_s13 = sadd.s32 %s1244_s12, %s1713_s29  ;;  %vm1291_vm12 = vmpackc.low %vm1815_vm1, %vm1815_vm1 }
  0x1e   : > { %s1246_s14 = sshll.u32 %s408_s13, 2 }
  0x1f   : > { %s410_s28 = scalar_lea.vmem %s2400_s2, %s1246_s14  ;;  %s431_s14 = scalar_lea.vmem %s2404_s6, %s1745_s16 }
  0x20   : > { %v1809_v22 = vld [vmem:[%s410_s28] sm:$0xff]  ;;  %v1811_v23 = vld [vmem:[%s410_s28 + $0x8] sm:$0xff] }
  0x21   : > { %v2406_v25 = vunpack.c.h.bf16 %v1809_v22  ;;  %v2405_v26 = vunpack.c.h.bf16 %v1811_v23  ;;  %v2408_v28 = vunpack.c.l.bf16 %v1809_v22  ;;  %v2407_v29 = vunpack.c.l.bf16 %v1811_v23 }
  0x23   : > { %v858_v30 = vsel %vm1815_vm1, %v2406_v25, 0.0  ;;  %v860_v31 = vsel %vm1815_vm1, %v2405_v26, 0.0  ;;  %v857_v32 = vsel %vm1815_vm1, %v2408_v28, 0.0  ;;  %v859_v33 = vsel %vm1815_vm1, %v2407_v29, 0.0 }
  0x24   : > { %1383 = vrot.lane.b32.xlu2 %v1382_v13, %s1637_s17  ;;  %1373 = vrot.lane.b32.xlu1 %v1382_v13, %s1638_s18  ;;  %v1512_v34 = vpack.i.bf16 %v860_v31, %v858_v30  ;;  %v1507_v35 = vpack.i.bf16 %v859_v33, %v857_v32 }
  0x25   : > { %1363 = vrot.lane.b32.xlu0 %v1382_v13, %s1639_s19 }
  0x2c   : > { %1398 = vrot.lane.b32.xlu2 %v1397_v20, %s1640_s30  ;;  %1393 = vrot.lane.b32.xlu1 %v1392_v21, %s1640_s30 }
  0x2d   : > { %1388 = vrot.lane.b32.xlu0 %v1377_v10, %s1641_s7 }
  0x34   : > { %1413 = vrot.lane.b32.xlu2 %v1392_v21, %s1642_s8  ;;  %1408 = vrot.lane.b32.xlu1 %v1382_v13, %s1643_s9 }
  0x35   : > { %1403 = vrot.lane.b32.xlu0 %v1377_v10, %s1643_s9 }
  0x3c   : > { %1428 = vrot.lane.b32.xlu2 %v1397_v20, %s1644_s10  ;;  %1423 = vrot.lane.b32.xlu1 %v1392_v21, %s1644_s10 }
  0x3d   : > { %1418 = vrot.lane.b32.xlu0 %v1397_v20, %s1642_s8 }
  0x44   : > { %1443 = vrot.lane.b32.xlu2 %v1377_v10, %s1642_s8  ;;  %1438 = vrot.lane.b32.xlu1 %v1382_v13, %s1640_s30 }
  0x45   : > { %1433 = vrot.lane.b32.xlu0 %v1377_v10, %s1640_s30 }
  0x4c   : > { %1458 = vrot.lane.b32.xlu2 %v1397_v20, %s1641_s7  ;;  %1453 = vrot.lane.b32.xlu1 %v1392_v21, %s1641_s7 }
  0x4d   : > { %1448 = vrot.lane.b32.xlu0 %v1382_v13, %s1642_s8 }
  0x54   : > { %1473 = vrot.lane.b32.xlu2 %v1392_v21, %s1637_s17  ;;  %1468 = vrot.lane.b32.xlu1 %v1382_v13, %s1644_s10 }
  0x55   : > { %1463 = vrot.lane.b32.xlu0 %v1377_v10, %s1644_s10 }
  0x5c   : > { %1488 = vrot.lane.b32.xlu2 %v1397_v20, %s1643_s9  ;;  %1483 = vrot.lane.b32.xlu1 %v1392_v21, %s1643_s9 }
  0x5d   : > { %1478 = vrot.lane.b32.xlu0 %v1397_v20, %s1637_s17 }
  0x64   : > { %1503 = vrot.lane.b32.xlu2 %v1382_v13, %s1641_s7  ;;  %1498 = vrot.lane.b32.xlu1 %v1397_v20, %s1638_s18 }
  0x65   : > { %1493 = vrot.lane.b32.xlu0 %v1392_v21, %s1638_s18 }
  0x6c   : > { %1513 = vrot.lane.b32.xlu1 %v1512_v34, %s1640_s30  ;;  %1518 = vrot.lane.b32.xlu2 %v1392_v21, %s1639_s19 }
  0x6d   : > { %1508 = vrot.lane.b32.xlu0 %v1507_v35, %s1640_s30 }
  0x74   : > { %1528 = vrot.lane.b32.xlu1 %v1507_v35, %s1642_s8  ;;  %1533 = vrot.lane.b32.xlu2 %v1512_v34, %s1642_s8 }
  0x75   : > { %1523 = vrot.lane.b32.xlu0 %v1397_v20, %s1639_s19 }
  0x76   : > { %v1379_v36 = vpop.permute.xlu2 %1378 }
  0x77   : > { %v1381_v39 = vunpack.i.h.bf16 %v1379_v36  ;;  %v1380_v40 = vunpack.i.l.bf16 %v1379_v36 }
  0x7c   : > { %1543 = vrot.lane.b32.xlu1 %v1512_v34, %s1644_s10  ;;  %1548 = vrot.lane.b32.xlu2 %v1507_v35, %s1641_s7 }
  0x7d   : > { %1538 = vrot.lane.b32.xlu0 %v1507_v35, %s1644_s10 }
  0x7e   : > { %v1384_v41 = vpop.permute.xlu2 %1383 }
  0x7f   : > { %v1386_v42 = vunpack.i.h.bf16 %v1384_v41  ;;  %v1385_v43 = vunpack.i.l.bf16 %v1384_v41 }
  0x81   : > { %v1854_v44 = vsel %vm490_vm2, %v1385_v43, %v1380_v40  ;;  %v1858_v45 = vsel %vm490_vm2, %v1386_v42, %v1381_v39  ;;  %v1862_v46 = vsel %vm490_vm2, %v1380_v40, %v1385_v43  ;;  %v1866_v47 = vsel %vm490_vm2, %v1381_v39, %v1386_v42 }
  0x84   : > { %1558 = vrot.lane.b32.xlu1 %v1507_v35, %s1643_s9  ;;  %1563 = vrot.lane.b32.xlu2 %v1512_v34, %s1643_s9  ;;  %s422_s9 = scalar_lea.vmem %s2403_s5, %s1745_s16 }
  0x85   : > { %1553 = vrot.lane.b32.xlu0 %v1512_v34, %s1641_s7 }
  0x86   : > { %v1875_v50 = vpop.permute.xlu2 %1398 }
  0x87   : > { %v1401_v36 = vunpack.i.h.bf16 %v1875_v50  ;;  %v1400_v37 = vunpack.i.l.bf16 %v1875_v50 }
  0x8c   : > { %1573 = vrot.lane.b32.xlu1 %v1512_v34, %s1637_s17  ;;  %1578 = vrot.lane.b32.xlu2 %v1507_v35, %s1638_s18 }
  0x8d   : > { %1568 = vrot.lane.b32.xlu0 %v1507_v35, %s1637_s17 }
  0x8e   : > { %v1880_v51 = vpop.permute.xlu2 %1413  ;;  %v1369_v52 = vpop.permute.xlu1 %1368 }
  0x8f   : > { %v1359_v53 = vpop.permute.xlu0 %1358  ;;  %v1371_v56 = vunpack.i.h.bf16 %v1369_v52  ;;  %v1370_v57 = vunpack.i.l.bf16 %v1369_v52 }
  0x90   : > { %v1361_v61 = vunpack.i.h.bf16 %v1359_v53  ;;  %v1360_v62 = vunpack.i.l.bf16 %v1359_v53 }
  0x94   : > { %1588 = vrot.lane.b32.xlu1 %v1507_v35, %s1639_s19  ;;  %1593 = vrot.lane.b32.xlu2 %v1512_v34, %s1639_s19 }
  0x95   : > { %1583 = vrot.lane.b32.xlu0 %v1512_v34, %s1638_s18 }
  0x96   : > { %v1885_v54 = vpop.permute.xlu2 %1428  ;;  %v1374_v55 = vpop.permute.xlu1 %1373 }
  0x97   : > { %v1376_v58 = vunpack.i.h.bf16 %v1374_v55  ;;  %v1375_v59 = vunpack.i.l.bf16 %v1374_v55  ;;  %v1364_v60 = vpop.permute.xlu0 %1363  ;;  %v2417_v26 = vunpack.i.l.bf16 %v1885_v54 }
  0x98   : > { %v1366_v63 = vunpack.i.h.bf16 %v1364_v60  ;;  %v1365_v4 = vunpack.i.l.bf16 %v1364_v60 }
  0x99   : > { %v1891_v8 = vsel %vm477_vm3, %v1375_v59, %v1370_v57  ;;  %v1895_v9 = vsel %vm477_vm3, %v1376_v58, %v1371_v56  ;;  %v1899_v10 = vsel %vm477_vm3, %v1370_v57, %v1375_v59  ;;  %v1903_v11 = vsel %vm477_vm3, %v1371_v56, %v1376_v58 }
  0x9a   : > { %v1911_v20 = vsel %vm464_vm4, %v1365_v4, %v1360_v62  ;;  %v1915_v21 = vsel %vm464_vm4, %v1366_v63, %v1361_v61  ;;  %v1921_v30 = vsel %vm464_vm4, %v1360_v62, %v1365_v4  ;;  %v1925_v31 = vsel %vm464_vm4, %v1361_v61, %v1366_v63 }
  0x9e   : > { %v1929_v33 = vpop.permute.xlu1 %1393  ;;  %v1933_v35 = vpop.permute.xlu2 %1443 }
  0x9f   : > { %v1931_v34 = vpop.permute.xlu0 %1388  ;;  %v1396_v39 = vunpack.i.h.bf16 %v1929_v33  ;;  %v1395_v40 = vunpack.i.l.bf16 %v1929_v33 }
  0xa1   : > { %v739_v56 = vsel %vm542_vm5, %v1395_v40, %v1400_v37  ;;  %v740_v57 = vsel %vm542_vm5, %v1396_v39, %v1401_v36 }
  0xa6   : > { %v1409_v41 = vpop.permute.xlu1 %1408  ;;  %v1953_v58 = vpop.permute.xlu2 %1458 }
  0xa7   : > { %v1411_v42 = vunpack.i.h.bf16 %v1409_v41  ;;  %v1410_v43 = vunpack.i.l.bf16 %v1409_v41  ;;  %v1404_v52 = vpop.permute.xlu0 %1403  ;;  %v769_v41 = vpack.c.bf16 %v740_v57, %v739_v56 }
  0xa8   : > { %v1406_v53 = vunpack.i.h.bf16 %v1404_v52  ;;  %v1405_v55 = vunpack.i.l.bf16 %v1404_v52  ;;  %v2411_v52 = vunpack.i.h.bf16 %v1885_v54 }
  0xaa   : > { %v556_v59 = vsel %vm555_vm6, %v1405_v55, %v1410_v43  ;;  %v557_v60 = vsel %vm555_vm6, %v1406_v53, %v1411_v42  ;;  %v558_v61 = vsel %vm555_vm6, %v1410_v43, %v1405_v55  ;;  %v559_v62 = vsel %vm555_vm6, %v1411_v42, %v1406_v53 }
  0xab   : > { %v576_v63 = vpack.c.bf16 %v557_v60, %v556_v59  ;;  %v577_v4 = vpack.c.bf16 %v559_v62, %v558_v61  ;;  %v1416_v42 = vunpack.i.h.bf16 %v1880_v51  ;;  %v1415_v53 = vunpack.i.l.bf16 %v1880_v51 }
  0xac   : > { %v2425_v51 = vpack.c.bf16 %v1858_v45, %v1854_v44 }
  0xad   : > { %614 = vmatpush.bf16.msra.mxu1 %v576_v63  ;;  %642 = vmatpush.bf16.msra.mxu3 %v577_v4  ;;  %v1303_v4 = vld [vmem:[%s2401_s3 + $0x4] sm:$0xf] }
  0xae   : > { %v1965_v25 = vpop.permute.xlu1 %1423  ;;  %v2001_v63 = vpop.permute.xlu2 %1473 }
  0xaf   : > { %v2414_v29 = vunpack.i.h.bf16 %v1965_v25  ;;  %v2418_v28 = vunpack.i.l.bf16 %v1965_v25  ;;  %v1969_v43 = vpop.permute.xlu0 %1418  ;;  %v2429_v45 = vunpack.i.h.bf16 %v1965_v25 }
  0xb0   : > { %v2419_v55 = vunpack.i.h.bf16 %v1969_v43  ;;  %v1420_v56 = vunpack.i.l.bf16 %v1969_v43 }
  0xb1   : > { %788 = vmatpush.bf16.msrb.mxu1 %v769_v41  ;;  %v715_v60 = vsel %vm516_vm8, %v2418_v28, %v2417_v26  ;;  %v716_v61 = vsel %vm516_vm8, %v2414_v29, %v2411_v52  ;;  %v1257_v41 = vld [vmem:[%s2401_s3 + $0x8] sm:$0xf0]  ;;  %v763_v52 = vpack.c.bf16 %v657_v18, %v655_v16 }
  0xb2   : > { %v727_v57 = vsel %vm529_vm7, %v1415_v53, %v1420_v56  ;;  %v728_v59 = vsel %vm529_vm7, %v1416_v42, %v2419_v55  ;;  %v765_v32 = vpack.c.bf16 %v716_v61, %v715_v60  ;;  %v1260_v24 = vor.u32 %v1303_v4, %v1257_v41 }
  0xb3   : > { %v767_v62 = vpack.c.bf16 %v728_v59, %v727_v57  ;;  %v2413_v4 = vunpack.i.l.bf16 %v1953_v58  ;;  %v1446_v41 = vunpack.i.h.bf16 %v1933_v35 }
  0xb4   : > { %1268 = vmatmul.msk.bf16.vlgmr.msra.gmra.mxu3 %vm589_vm9, %v1260_v24  ;;  %1264 = vmatmul.msk.bf16.vlgmr.msra.gmra.mxu1 %vm589_vm9, %v1260_v24 }
  0xb5   : > { %789 = vmatpush.bf16.msrb.mxu1 %v767_v62 }
  0xb6   : > { %v1439_v19 = vpop.permute.xlu1 %1438  ;;  %v2025_v16 = vpop.permute.xlu2 %1488 }
  0xb7   : > { %v1441_v17 = vunpack.i.h.bf16 %v1439_v19  ;;  %v1440_v13 = vunpack.i.l.bf16 %v1439_v19  ;;  %v1434_v12 = vpop.permute.xlu0 %1433 }
  0xb8   : > { %v1436_v57 = vunpack.i.h.bf16 %v1434_v12  ;;  %v1435_v59 = vunpack.i.l.bf16 %v1434_v12 }
  0xb9   : > { %790 = vmatpush.bf16.msrb.mxu1 %v765_v32  ;;  %v2416_v32 = vunpack.i.h.bf16 %v1953_v58 }
  0xba   : > { %v543_v60 = vsel %vm542_vm5, %v1435_v59, %v1440_v13  ;;  %v544_v61 = vsel %vm542_vm5, %v1436_v57, %v1441_v17  ;;  %v545_v19 = vsel %vm542_vm5, %v1440_v13, %v1435_v59  ;;  %v546_v24 = vsel %vm542_vm5, %v1441_v17, %v1436_v57 }
  0xbb   : > { %v574_v62 = vpack.c.bf16 %v544_v61, %v543_v60  ;;  %v575_v12 = vpack.c.bf16 %v546_v24, %v545_v19  ;;  %v1445_v57 = vunpack.i.l.bf16 %v1933_v35 }
  0xbd   : > { %593 = vmatpush.bf16.msra.mxu0 %v574_v62  ;;  %621 = vmatpush.bf16.msra.mxu2 %v575_v12 }
  0xbe   : > { %v2027_v18 = vpop.permute.xlu1 %1453  ;;  %791 = vmatpush.bf16.msrb.mxu1 %v763_v52  ;;  %v1504_v28 = vpop.permute.xlu2 %1503 }
  0xbf   : > { %v2415_v13 = vunpack.i.h.bf16 %v2027_v18  ;;  %v2412_v59 = vunpack.i.l.bf16 %v2027_v18  ;;  %v1449_v17 = vpop.permute.xlu0 %1448 }
  0xc0   : > { %v1451_v60 = vunpack.i.h.bf16 %v1449_v17  ;;  %v1450_v61 = vunpack.i.l.bf16 %v1449_v17 }
  0xc1   : > { %v705_v52 = vsel %vm503_vm10, %v2413_v4, %v2412_v59  ;;  %v706_v19 = vsel %vm503_vm10, %v2416_v32, %v2415_v13 }
  0xc2   : > { %v530_v35 = vsel %vm529_vm7, %v1445_v57, %v1450_v61  ;;  %v531_v24 = vsel %vm529_vm7, %v1446_v41, %v1451_v60  ;;  %v532_v62 = vsel %vm529_vm7, %v1450_v61, %v1445_v57  ;;  %v533_v12 = vsel %vm529_vm7, %v1451_v60, %v1446_v41 }
  0xc3   : > { %v572_v17 = vpack.c.bf16 %v531_v24, %v530_v35  ;;  %v573_v59 = vpack.c.bf16 %v533_v12, %v532_v62  ;;  %v761_v4 = vpack.c.bf16 %v706_v19, %v705_v52  ;;  %v1505_v60 = vunpack.i.l.bf16 %v1504_v28 }
  0xc4   : > { %v1391_v52 = vunpack.i.h.bf16 %v1931_v34  ;;  %v1490_v19 = vunpack.i.l.bf16 %v2025_v16  ;;  %v742_v24 = vsel %vm542_vm5, %v1401_v36, %v1396_v39  ;;  %v741_v12 = vsel %vm542_vm5, %v1400_v37, %v1395_v40 }
  0xc5   : > { %594 = vmatpush.bf16.msra.mxu0 %v572_v17  ;;  %622 = vmatpush.bf16.msra.mxu2 %v573_v59 }
  0xc6   : > { %792 = vmatpush.bf16.msrb.mxu1 %v761_v4  ;;  %v1469_v29 = vpop.permute.xlu1 %1468  ;;  %v1506_v4 = vunpack.i.h.bf16 %v1504_v28  ;;  %v1266_v28 = vpack.c.bf16 %v446_v7, %v444_v6  ;;  %v2131_v33 = vpop.permute.xlu2 %1518 }
  0xc7   : > { %v1471_v13 = vunpack.i.h.bf16 %v1469_v29  ;;  %v1470_v32 = vunpack.i.l.bf16 %v1469_v29  ;;  %v1464_v26 = vpop.permute.xlu0 %1463 }
  0xc8   : > { %v1466_v49 = vunpack.i.h.bf16 %v1464_v26  ;;  %v1465_v48 = vunpack.i.l.bf16 %v1464_v26  ;;  %v1390_v26 = vunpack.i.l.bf16 %v1931_v34  ;;  %v1491_v34 = vunpack.i.h.bf16 %v2025_v16 }
  0xc9   : > { %v505_v35 = vsel %vm503_vm10, %v1391_v52, %v1506_v4 }
  0xca   : > { %v517_v55 = vsel %vm516_vm8, %v1465_v48, %v1470_v32  ;;  %v518_v57 = vsel %vm516_vm8, %v1466_v49, %v1471_v13  ;;  %v519_v41 = vsel %vm516_vm8, %v1470_v32, %v1465_v48  ;;  %v520_v59 = vsel %vm516_vm8, %v1471_v13, %v1466_v49 }
  0xcb   : > { %v570_v61 = vpack.c.bf16 %v518_v57, %v517_v55  ;;  %v571_v29 = vpack.c.bf16 %v520_v59, %v519_v41  ;;  %v1262_v48 = vpack.c.bf16 %v445_v3, %v443_v2  ;;  %v1476_v49 = vunpack.i.h.bf16 %v2001_v63  ;;  %v1305_v41 = vld [vmem:[%s2401_s3 + $0x14] sm:$0xf]  ;;  %v1275_v59 = vld [vmem:[%s2401_s3 + $0x18] sm:$0xf0] }
  0xcc   : > { %v1475_v55 = vunpack.i.l.bf16 %v2001_v63  ;;  %v506_v1 = vsel %vm503_vm10, %v1505_v60, %v1390_v26  ;;  %v507_v3 = vsel %vm503_vm10, %v1506_v4, %v1391_v52  ;;  %v504_v5 = vsel %vm503_vm10, %v1390_v26, %v1505_v60 }
  0xcd   : > { %595 = vmatpush.bf16.msra.mxu0 %v570_v61  ;;  %623 = vmatpush.bf16.msra.mxu2 %v571_v29  ;;  %v566_v37 = vpack.c.bf16 %v507_v3, %v506_v1  ;;  %v567_v40 = vpack.c.bf16 %v505_v35, %v504_v5  ;;  %v770_v4 = vpack.c.bf16 %v742_v24, %v741_v12  ;;  %v2424_v29 = vunpack.i.h.bf16 %v1969_v43 }
  0xce   : > { %v2076_v32 = vpop.permute.xlu1 %1483  ;;  %v729_v61 = vsel %vm529_vm7, %v1420_v56, %v1415_v53  ;;  %v2153_v26 = vor.u32 %v1305_v41, %v1275_v59  ;;  %v2426_v43 = vpack.c.bf16 %v1866_v47, %v1862_v46  ;;  %v2427_v35 = vunpack.i.l.bf16 %v1965_v25  ;;  %v1534_v12 = vpop.permute.xlu2 %1533 }
  0xcf   : > { %v1486_v13 = vunpack.i.h.bf16 %v2076_v32  ;;  %v1485_v2 = vunpack.i.l.bf16 %v2076_v32  ;;  %v2083_v0 = vpop.permute.xlu0 %1478  ;;  %v730_v52 = vsel %vm529_vm7, %v2424_v29, %v1416_v42  ;;  %v2428_v24 = vunpack.i.l.bf16 %v1885_v54 }
  0xd0   : > { %v1481_v6 = vunpack.i.h.bf16 %v2083_v0  ;;  %v1480_v7 = vunpack.i.l.bf16 %v2083_v0  ;;  %v768_v42 = vpack.c.bf16 %v730_v52, %v729_v61  ;;  %v2430_v46 = vunpack.i.h.bf16 %v1885_v54  ;;  %v1255_v54 = vld [vmem:[%s2401_s3] sm:$0xf] }
  0xd1   : > { %1263 = vmatpush.bf16.msk.msra.mxu0 %vm1261_vm11, %v1262_v48  ;;  %1267 = vmatpush.bf16.msk.msra.mxu2 %vm1261_vm11, %v1266_v28  ;;  %v751_v62 = vsel %vm555_vm6, %v1485_v2, %v1490_v19  ;;  %v752_v50 = vsel %vm555_vm6, %v1486_v13, %v1491_v34  ;;  %v717_v44 = vsel %vm516_vm8, %v2428_v24, %v2427_v35  ;;  %v2437_v29 = vunpack.i.l.bf16 %v1953_v58 }
  0xd2   : > { %v693_v36 = vsel %vm490_vm2, %v1480_v7, %v1475_v55  ;;  %v694_v39 = vsel %vm490_vm2, %v1481_v6, %v1476_v49  ;;  %v771_v57 = vpack.c.bf16 %v752_v50, %v751_v62  ;;  %v718_v47 = vsel %vm516_vm8, %v2430_v46, %v2429_v45  ;;  %v1304_v50 = vld [vmem:[%s2401_s3 + $0x4] sm:$0xf0] }
  0xd3   : > { %v759_v17 = vpack.c.bf16 %v694_v39, %v693_v36  ;;  %v2431_v36 = vpack.c.bf16 %v1895_v9, %v1891_v8  ;;  %v2432_v39 = vpack.c.bf16 %v1903_v11, %v1899_v10  ;;  %v766_v25 = vpack.c.bf16 %v718_v47, %v717_v44 }
  0xd4   : > { %809 = vmatpush.bf16.msrb.mxu3 %v771_v57  ;;  %v2433_v9 = vunpack.c.h.bf16 %v1762_v14  ;;  %v2434_v10 = vunpack.c.h.bf16 %v1764_v15  ;;  %v1256_v59 = vor.u32 %v1304_v50, %v1255_v54  ;;  %v2436_v61 = vpack.c.bf16 %v1925_v31, %v1921_v30 }
  0xd5   : > { %597 = vmatpush.bf16.msra.mxu0 %v566_v37  ;;  %625 = vmatpush.bf16.msra.mxu2 %v567_v40  ;;  %v2438_v52 = vunpack.i.l.bf16 %v2027_v18  ;;  %v2439_v15 = vunpack.i.h.bf16 %v1953_v58  ;;  %v1535_v35 = vunpack.i.l.bf16 %v1534_v12  ;;  %v1521_v24 = vunpack.i.h.bf16 %v2131_v33 }
  0xd6   : > { %793 = vmatpush.bf16.msrb.mxu1 %v759_v17  ;;  %v2139_v60 = vpop.permute.xlu1 %1498  ;;  %v764_v11 = vpack.c.bf16 %v2434_v10, %v2433_v9  ;;  %v2242_v45 = vpop.permute.xlu2 %1548  ;;  %v1520_v46 = vunpack.i.l.bf16 %v2131_v33 }
  0xd7   : > { %v1501_v48 = vunpack.i.h.bf16 %v2139_v60  ;;  %v1500_v28 = vunpack.i.l.bf16 %v2139_v60  ;;  %v2157_v1 = vpop.permute.xlu0 %1493  ;;  %1279 = vmatmul.msk.bf16.vlgmr.msrb.gmra.mxu3 %vm589_vm9, %v2153_v26  ;;  %v703_v14 = vsel %vm503_vm10, %v2438_v52, %v2437_v29  ;;  %v1306_v60 = vld [vmem:[%s2401_s3 + $0x14] sm:$0xf0] }
  0xd8   : > { %816 = vmatpush.bf16.msra.mxu3 %v770_v4  ;;  %v1496_v3 = vunpack.i.h.bf16 %v2157_v1  ;;  %v1495_v53 = vunpack.i.l.bf16 %v2157_v1  ;;  %v2435_v4 = vpack.c.bf16 %v1915_v21, %v1911_v20  ;;  %v2440_v1 = vunpack.i.h.bf16 %v2027_v18 }
  0xd9   : > { %598 = vmatpush.bf16.msra.mxu0 %v2425_v51  ;;  %626 = vmatpush.bf16.msra.mxu2 %v2426_v43  ;;  %v691_v18 = vsel %vm490_vm2, %v1475_v55, %v1480_v7 }
  0xda   : > { %v681_v56 = vsel %vm477_vm3, %v1500_v28, %v1495_v53  ;;  %v682_v5 = vsel %vm477_vm3, %v1501_v48, %v1496_v3  ;;  %v704_v51 = vsel %vm503_vm10, %v2440_v1, %v2439_v15  ;;  %v2441_v1 = vunpack.c.l.bf16 %v1809_v22 }
  0xdb   : > { %v757_v62 = vpack.c.bf16 %v682_v5, %v681_v56  ;;  %v762_v56 = vpack.c.bf16 %v704_v51, %v703_v14  ;;  %v1536_v5 = vunpack.i.h.bf16 %v1534_v12  ;;  %v2442_v51 = vunpack.c.l.bf16 %v1811_v23 }
  0xdc   : > { %817 = vmatpush.bf16.msra.mxu3 %v768_v42  ;;  %v692_v42 = vsel %vm490_vm2, %v1476_v49, %v1481_v6  ;;  %v679_v49 = vsel %vm477_vm3, %v1495_v53, %v1500_v28  ;;  %v680_v6 = vsel %vm477_vm3, %v1496_v3, %v1501_v48  ;;  %v1273_v28 = vld [vmem:[%s2401_s3 + $0x10] sm:$0xf] }
  0xdd   : > { %599 = vmatpush.bf16.msra.mxu0 %v2431_v36  ;;  %627 = vmatpush.bf16.msra.mxu2 %v2432_v39  ;;  %v760_v63 = vpack.c.bf16 %v692_v42, %v691_v18  ;;  %v1274_v50 = vor.u32 %v1306_v60, %v1273_v28 }
  0xde   : > { %794 = vmatpush.bf16.msrb.mxu1 %v757_v62  ;;  %v1514_v37 = vpop.permute.xlu1 %1513  ;;  %v1564_v32 = vpop.permute.xlu2 %1563 }
  0xdf   : > { %v1516_v40 = vunpack.i.h.bf16 %v1514_v37  ;;  %v1515_v17 = vunpack.i.l.bf16 %v1514_v37  ;;  %v1509_v8 = vpop.permute.xlu0 %1508  ;;  %v758_v37 = vpack.c.bf16 %v680_v6, %v679_v49  ;;  %v1566_v14 = vunpack.i.h.bf16 %v1564_v32 }
  0xe0   : > { %818 = vmatpush.bf16.msra.mxu3 %v766_v25  ;;  %v1511_v57 = vunpack.i.h.bf16 %v1509_v8  ;;  %v1510_v41 = vunpack.i.l.bf16 %v1509_v8  ;;  %v1565_v15 = vunpack.i.l.bf16 %v1564_v32 }
  0xe1   : > { %600 = vmatpush.bf16.msra.mxu0 %v2435_v4  ;;  %628 = vmatpush.bf16.msra.mxu2 %v2436_v61 }
  0xe2   : > { %v941_v20 = vsel %vm542_vm5, %v1510_v41, %v1515_v17  ;;  %v942_v21 = vsel %vm542_vm5, %v1511_v57, %v1516_v40  ;;  %v943_v30 = vsel %vm542_vm5, %v1515_v17, %v1510_v41  ;;  %v944_v31 = vsel %vm542_vm5, %v1516_v40, %v1511_v57 }
  0xe3   : > { %v971_v43 = vpack.c.bf16 %v942_v21, %v941_v20  ;;  %v972_v58 = vpack.c.bf16 %v944_v31, %v943_v30  ;;  %v754_v40 = vsel %vm555_vm6, %v1491_v34, %v1486_v13  ;;  %v753_v17 = vsel %vm555_vm6, %v1490_v19, %v1485_v2 }
  0xe4   : > { %819 = vmatpush.bf16.msra.mxu3 %v764_v11  ;;  %629 = vmatmul.bf16.vlgmr.msra.gmra.mxu2 %v1256_v59  ;;  %v772_v13 = vpack.c.bf16 %v754_v40, %v753_v17  ;;  %v1292_v20 = vpack.c.bf16 %v2442_v51, %v2441_v1  ;;  %v2443_v30 = vunpack.c.h.bf16 %v1809_v22  ;;  %v2444_v31 = vunpack.c.h.bf16 %v1811_v23 }
  0xe5   : > { %601 = vmatmul.bf16.vlgmr.msra.gmra.mxu0 %v1256_v59  ;;  %990 = vmatpush.bf16.msrb.mxu2 %v971_v43 }
  0xe6   : > { %1018 = vmatpush.bf16.msrb.mxu0 %v972_v58  ;;  %v1529_v44 = vpop.permute.xlu1 %1528  ;;  %v1296_v43 = vpack.c.bf16 %v2444_v31, %v2443_v30 }
  0xe7   : > { %v1531_v55 = vunpack.i.h.bf16 %v1529_v44  ;;  %v1530_v0 = vunpack.i.l.bf16 %v1529_v44  ;;  %v1524_v7 = vpop.permute.xlu0 %1523  ;;  %v1579_v44 = vpop.permute.xlu2 %1578 }
  0xe8   : > { %820 = vmatpush.bf16.msra.mxu3 %v762_v56  ;;  %v1526_v47 = vunpack.i.h.bf16 %v1524_v7  ;;  %v1525_v62 = vunpack.i.l.bf16 %v1524_v7  ;;  %v1551_v56 = vunpack.i.h.bf16 %v2242_v45 }
  0xe9   : > { %v929_v12 = vsel %vm529_vm7, %v1530_v0, %v1535_v35  ;;  %v930_v33 = vsel %vm529_vm7, %v1531_v55, %v1536_v5  ;;  %v931_v36 = vsel %vm529_vm7, %v1535_v35, %v1530_v0  ;;  %v932_v39 = vsel %vm529_vm7, %v1536_v5, %v1531_v55  ;;  %v1287_v0 = vld [vmem:[%s2401_s3 + $0x28] sm:$0xf0] }
  0xea   : > { %v669_v48 = vsel %vm464_vm4, %v1525_v62, %v1520_v46  ;;  %v670_v3 = vsel %vm464_vm4, %v1526_v47, %v1521_v24  ;;  %v969_v53 = vpack.c.bf16 %v930_v33, %v929_v12  ;;  %v970_v25 = vpack.c.bf16 %v932_v39, %v931_v36 }
  0xeb   : > { %v755_v54 = vpack.c.bf16 %v670_v3, %v669_v48  ;;  %v667_v9 = vsel %vm464_vm4, %v1520_v46, %v1525_v62  ;;  %v668_v10 = vsel %vm464_vm4, %v1521_v24, %v1526_v47  ;;  %v1550_v5 = vunpack.i.l.bf16 %v2242_v45  ;;  %v1307_v45 = vld [vmem:[%s2401_s3 + $0x24] sm:$0xf] }
  0xec   : > { %821 = vmatpush.bf16.msra.mxu3 %v760_v63  ;;  %991 = vmatpush.bf16.msrb.mxu2 %v969_v53  ;;  %v756_v16 = vpack.c.bf16 %v668_v10, %v667_v9  ;;  %v1290_v36 = vor.u32 %v1307_v45, %v1287_v0  ;;  %v433_v45 = vld [vmem:[%s422_s9] sm:$0xff] }
  0xed   : > { %1019 = vmatpush.bf16.msrb.mxu0 %v970_v25  ;;  %795 = vmatpush.bf16.msrb.mxu1 %v755_v54 }
  0xee   : > { %v1544_v8 = vpop.permute.xlu1 %1543 }
  0xef   : > { %v1546_v11 = vunpack.i.h.bf16 %v1544_v8  ;;  %v1545_v57 = vunpack.i.l.bf16 %v1544_v8  ;;  %v1539_v41 = vpop.permute.xlu0 %1538 }
  0xf0   : > { %822 = vmatpush.bf16.msra.mxu3 %v758_v37  ;;  %v1541_v59 = vunpack.i.h.bf16 %v1539_v41  ;;  %v1540_v34 = vunpack.i.l.bf16 %v1539_v41  ;;  %796 = vmatmul.bf16.vlgmr.msrb.gmra.mxu1 %v1274_v50  ;;  %v1594_v37 = vpop.permute.xlu2 %1593 }
  0xf1   : > { %v1596_v8 = vunpack.i.h.bf16 %v1594_v37  ;;  %v1595_v9 = vunpack.i.l.bf16 %v1594_v37 }
  0xf2   : > { %v917_v19 = vsel %vm516_vm8, %v1540_v34, %v1545_v57  ;;  %v918_v2 = vsel %vm516_vm8, %v1541_v59, %v1546_v11  ;;  %v919_v4 = vsel %vm516_vm8, %v1545_v57, %v1540_v34  ;;  %v920_v61 = vsel %vm516_vm8, %v1546_v11, %v1541_v59 }
  0xf3   : > { %v967_v29 = vpack.c.bf16 %v918_v2, %v917_v19  ;;  %v968_v52 = vpack.c.bf16 %v920_v61, %v919_v4  ;;  %v1581_v59 = vunpack.i.h.bf16 %v1579_v44  ;;  %v1580_v34 = vunpack.i.l.bf16 %v1579_v44 }
  0xf4   : > { %823 = vmatpush.bf16.msra.mxu3 %v756_v16 }
  0xf5   : > { %992 = vmatpush.bf16.msrb.mxu2 %v967_v29  ;;  %1020 = vmatpush.bf16.msrb.mxu0 %v968_v52 }
  0xf6   : > { %v1559_v21 = vpop.permute.xlu1 %1558 }
  0xf7   : > { %824 = vmatmul.bf16.vlgmr.msra.gmra.mxu3 %v1274_v50  ;;  %v1561_v58 = vunpack.i.h.bf16 %v1559_v21  ;;  %v1560_v18 = vunpack.i.l.bf16 %v1559_v21  ;;  %v1554_v42 = vpop.permute.xlu0 %1553  ;;  %v1308_v21 = vld [vmem:[%s2401_s3 + $0x24] sm:$0xf0] }
  0xf8   : > { %837 = vmatpush.bf16.msrb.mxu3 %v772_v13  ;;  %v1556_v35 = vunpack.i.h.bf16 %v1554_v42  ;;  %v1555_v24 = vunpack.i.l.bf16 %v1554_v42 }
  0xf9   : > { %v954_v46 = vsel %vm555_vm6, %v1561_v58, %v1566_v14  ;;  %v956_v55 = vsel %vm555_vm6, %v1566_v14, %v1561_v58  ;;  %v953_v22 = vsel %vm555_vm6, %v1560_v18, %v1565_v15  ;;  %v955_v23 = vsel %vm555_vm6, %v1565_v15, %v1560_v18  ;;  %1293 = vmatpush.bf16.msk.msrb.mxu2 %vm1291_vm12, %v1292_v20  ;;  %v1285_v20 = vld [vmem:[%s2401_s3 + $0x20] sm:$0xf] }
  0xfa   : > { %v973_v7 = vpack.c.bf16 %v954_v46, %v953_v22  ;;  %v974_v63 = vpack.c.bf16 %v956_v55, %v955_v23  ;;  %1297 = vmatpush.bf16.msk.msrb.mxu0 %vm1291_vm12, %v1296_v43  ;;  %v907_v47 = vsel %vm503_vm10, %v1555_v24, %v1550_v5  ;;  %v908_v62 = vsel %vm503_vm10, %v1556_v35, %v1551_v56 }
  0xfb   : > { %v963_v49 = vpack.c.bf16 %v908_v62, %v907_v47  ;;  %v905_v6 = vsel %vm503_vm10, %v1550_v5, %v1555_v24  ;;  %v906_v12 = vsel %vm503_vm10, %v1551_v56, %v1556_v35  ;;  %v1286_v30 = vor.u32 %v1308_v21, %v1285_v20 }
  0xfc   : > { %1011 = vmatpush.bf16.msra.mxu1 %v973_v7  ;;  %v964_v33 = vpack.c.bf16 %v906_v12, %v905_v6  ;;  %v435_v62 = vunpack.c.l.bf16 %v433_v45 }
  0xfd   : > { %994 = vmatpush.bf16.msrb.mxu2 %v963_v49 }
  0xfe   : > { %1022 = vmatpush.bf16.msrb.mxu0 %v964_v33  ;;  %v1574_v27 = vpop.permute.xlu1 %1573 }
  0xff   : > { %v1569_v39 = vpop.permute.xlu0 %1568  ;;  %v1576_v28 = vunpack.i.h.bf16 %v1574_v27  ;;  %v1575_v60 = vunpack.i.l.bf16 %v1574_v27 }
 0x100   : > { %1039 = vmatpush.bf16.msrb.mxu1 %v974_v63  ;;  %v1571_v48 = vunpack.i.h.bf16 %v1569_v39  ;;  %v1570_v3 = vunpack.i.l.bf16 %v1569_v39  ;;  %v436_v63 = vunpack.c.h.bf16 %v433_v45 }
 0x101   : > { %1294 = vmatmul.msk.bf16.vlgmr.msra.gmra.mxu1 %vm589_vm9, %v1290_v36 }
 0x102   : > { %v895_v53 = vsel %vm490_vm2, %v1575_v60, %v1570_v3  ;;  %v896_v25 = vsel %vm490_vm2, %v1576_v28, %v1571_v48  ;;  %v893_v54 = vsel %vm490_vm2, %v1570_v3, %v1575_v60  ;;  %v894_v50 = vsel %vm490_vm2, %v1571_v48, %v1576_v28  ;;  %v1050_v60 = vld [vmem:[%s2402_s4] sm:$0x3]  ;;  %v434_v48 = vld [vmem:[%s422_s9 + $0x8] sm:$0xff] }
 0x103   : > { %v961_v40 = vpack.c.bf16 %v896_v25, %v895_v53  ;;  %v962_v17 = vpack.c.bf16 %v894_v50, %v893_v54  ;;  %v438_v25 = vunpack.c.h.bf16 %v434_v48 }
 0x105   : > { %995 = vmatpush.bf16.msrb.mxu2 %v961_v40  ;;  %1023 = vmatpush.bf16.msrb.mxu0 %v962_v17  ;;  %v1053_v17 = vperm.slane %v1050_v60, 1 }
 0x106   : > { %v1589_v10 = vpop.permute.xlu1 %1588 }
 0x107   : > { %1280 = vmatmul.msk.bf16.vlgmr.msrb.gmra.mxu3 %vm589_vm9, %v2153_v26  ;;  %v1584_v11 = vpop.permute.xlu0 %1583  ;;  %v1591_v57 = vunpack.i.h.bf16 %v1589_v10  ;;  %v1590_v41 = vunpack.i.l.bf16 %v1589_v10 }
 0x108   : > { %v1586_v32 = vunpack.i.h.bf16 %v1584_v11  ;;  %v1585_v13 = vunpack.i.l.bf16 %v1584_v11  ;;  %v437_v11 = vunpack.c.l.bf16 %v434_v48 }
 0x109   : > { %v871_v16 = vsel %vm464_vm4, %v1595_v9, %v1590_v41  ;;  %v872_v19 = vsel %vm464_vm4, %v1596_v8, %v1591_v57  ;;  %v869_v2 = vsel %vm464_vm4, %v1590_v41, %v1595_v9  ;;  %v870_v26 = vsel %vm464_vm4, %v1591_v57, %v1596_v8 }
 0x10a   : > { %v883_v4 = vsel %vm477_vm3, %v1585_v13, %v1580_v34  ;;  %v884_v61 = vsel %vm477_vm3, %v1586_v32, %v1581_v59  ;;  %v881_v29 = vsel %vm477_vm3, %v1580_v34, %v1585_v13  ;;  %v882_v52 = vsel %vm477_vm3, %v1581_v59, %v1586_v32 }
 0x10b   : > { %v959_v14 = vpack.c.bf16 %v884_v61, %v883_v4  ;;  %v960_v15 = vpack.c.bf16 %v882_v52, %v881_v29  ;;  %v957_v1 = vpack.c.bf16 %v872_v19, %v871_v16  ;;  %v958_v51 = vpack.c.bf16 %v870_v26, %v869_v2 }
 0x10c   : > { %v1052_v9 = vperm.slane %v1050_v60, 0 }
 0x10d   : > { %996 = vmatpush.bf16.msrb.mxu2 %v959_v14  ;;  %1024 = vmatpush.bf16.msrb.mxu0 %v960_v15 }
 0x111   : > { %1298 = vmatmul.msk.bf16.vlgmr.msrb.gmra.mxu1 %vm589_vm9, %v1290_v36  ;;  %997 = vmatpush.bf16.msrb.mxu2 %v957_v1 }
 0x112   : > { %1025 = vmatpush.bf16.msrb.mxu0 %v958_v51 }
 0x114   : > { %998 = vmatmul.bf16.vlgmr.msrb.gmra.mxu2 %v1286_v30 }
 0x115   : > { %1026 = vmatmul.bf16.vlgmr.msrb.gmra.mxu0 %v1286_v30 }
 0x131   : > { %v616_v31 = vpop.f32.mrf.mxu1 }
 0x137   : > { %v644_v38 = vpop.f32.mrf.mxu3 }
 0x139   : > { %v618_v58 = vpop.f32.mrf.mxu1 }
 0x13f   : > { %v646_v43 = vpop.f32.mrf.mxu3 }
 0x15a   : > { %v811_v18 = vpop.f32.mrf.mxu3 }
 0x162   : > { %v813_v56 = vpop.f32.mrf.mxu3  ;;  %v602_v44 = vpop.f32.mrf.mxu0 }
 0x163   : > { %v617_v49 = vadd.f32 %v616_v31, %v602_v44 }
 0x165   : > { %v649_v28 = vadd.f32 %v617_v49, %v435_v62 }
 0x167   : > { %v630_v55 = vpop.f32.mrf.mxu2 }
 0x168   : > { %v645_v47 = vadd.f32 %v644_v38, %v630_v55 }
 0x16a   : > { %v604_v23 = vpop.f32.mrf.mxu0  ;;  %v650_v27 = vadd.f32 %v645_v47, %v436_v63 }
 0x16b   : > { %v619_v57 = vadd.f32 %v618_v58, %v604_v23 }
 0x16d   : > { %v797_v42 = vpop.f32.mrf.mxu1  ;;  %v651_v26 = vadd.f32 %v619_v57, %v437_v11 }
 0x16e   : > { %v812_v36 = vadd.f32 %v811_v18, %v797_v42 }
 0x16f   : > { %v632_v7 = vpop.f32.mrf.mxu2 }
 0x170   : > { %v844_v53 = vadd.f32 %v812_v36, %v649_v28  ;;  %v647_v54 = vadd.f32 %v646_v43, %v632_v7 }
 0x172   : > { %v652_v34 = vadd.f32 %v647_v54, %v438_v25 }
 0x175   : > { %v799_v5 = vpop.f32.mrf.mxu1 }
 0x176   : > { %v814_v13 = vadd.f32 %v813_v56, %v799_v5 }
 0x178   : > { %v846_v52 = vadd.f32 %v814_v13, %v651_v26 }
 0x17a   : > { %v825_v35 = vpop.f32.mrf.mxu3 }
 0x17e   : > { %v1013_v24 = vpop.f32.mrf.mxu1 }
 0x182   : > { %v827_v46 = vpop.f32.mrf.mxu3 }
 0x186   : > { %v1015_v22 = vpop.f32.mrf.mxu1 }
 0x18a   : > { %v839_v0 = vpop.f32.mrf.mxu3 }
 0x18b   : > { %v840_v33 = vadd.f32 %v839_v0, %v825_v35 }
 0x18d   : > { %v845_v3 = vadd.f32 %v840_v33, %v650_v27 }
 0x18e   : > { %v1041_v12 = vpop.f32.mrf.mxu1 }
 0x192   : > { %v1027_v6 = vpop.f32.mrf.mxu0  ;;  %v841_v50 = vpop.f32.mrf.mxu3 }
 0x193   : > { %v1042_v39 = vadd.f32 %v1041_v12, %v1027_v6  ;;  %v842_v41 = vadd.f32 %v841_v50, %v827_v46 }
 0x195   : > { %v1047_v40 = vadd.f32 %v1042_v39, %v845_v3  ;;  %v847_v4 = vadd.f32 %v842_v41, %v652_v34 }
 0x196   : > { %v1043_v32 = vpop.f32.mrf.mxu1 }
 0x197   : > { %v999_v37 = vpop.f32.mrf.mxu2  ;;  %v1057_v16 = vmul.f32 %v1053_v17, %v1047_v40 }
 0x198   : > { %v1014_v8 = vadd.f32 %v1013_v24, %v999_v37 }
 0x19a   : > { %v1029_v10 = vpop.f32.mrf.mxu0  ;;  %v1046_v59 = vadd.f32 %v1014_v8, %v844_v53 }
 0x19b   : > { %v1044_v2 = vadd.f32 %v1043_v32, %v1029_v10 }
 0x19c   : > { %v1056_v19 = vmul.f32 %v1052_v9, %v1046_v59 }
 0x19d   : > { %v1049_v14 = vadd.f32 %v1044_v2, %v847_v4 }
 0x19e   : > { %v1060_v61 = vpack.c.bf16 %v1057_v16, %v1056_v19 }
 0x19f   : > { %v1001_v29 = vpop.f32.mrf.mxu2  ;;  %v1059_v51 = vmul.f32 %v1053_v17, %v1049_v14 }
 0x1a0   : > { %1062 = vst [vmem:[%s431_s14] sm:$0xff] %v1060_v61  ;;  %v1016_v15 = vadd.f32 %v1015_v22, %v1001_v29 }
 0x1a2   : > { %v1048_v1 = vadd.f32 %v1016_v15, %v846_v52 }
 0x1a4   : > { %v1058_v20 = vmul.f32 %v1052_v9, %v1048_v1 }
 0x1a6   : > { %v1061_v21 = vpack.c.bf16 %v1059_v51, %v1058_v20 }
 0x1a8   : > { %1063 = vst [vmem:[%s431_s14 + $0x8] sm:$0xff] %v1061_v21 }
 0x1a9 PF: > { %s16_s25 = sadd.s32 1, %s1635_s25   ;;  %s2445_s21 = smov %s1627_s23 }
 0x1aa   : > { %p13_p11 = scmp.ge.s32.totalorder %s16_s25, 10   ;;  %s2446_s22 = smov %s1631_s24 }
 0x1ab   : > { %s2447_s23 = smov %s2450_s26  ;;  %s2448_s24 = smov %s2454_s27 }
 0x1ac   :  { %15 = sbr.rel (!%p13_p11) target bundleno = 3 (0x3), region = 85 }

// kernel: iconvmod_forward.22
= control target key start
LH: loop header
LB: loop body
LE: loop exit
PB: predicated region body
PF: predicated region fallthrough
CT: control target
= control target key end

     0   :  { %s594_s12 = smov 0   ;;  %s596_s13 = smov 0   ;;  %s654_s0 = inlined_call_operand.vmem [shape: bf16[2,4,16,256], index: 0, kind: input, shape index: {}]   ;;  %s655_s1 = inlined_call_operand.vmem [shape: bf16[2,4,16,256], index: 1, kind: input, shape index: {}]   ;;  %s656_s2 = inlined_call_operand.vmem [shape: bf16[2,4,16,256], index: 2, kind: output, shape index: {0}]   ;;  %s657_s3 = inlined_call_operand.vmem [shape: f32[2,4,16,2], index: 3, kind: output, shape index: {1}]  }
   0x1   :  { %s598_s14 = smov 0   ;;  %s600_s15 = smov 0  }
   0x2   :  { %s602_s16 = smov 0  }
   0x3 LB: > { %s23_s17 = sadd.s32 1, %s564_s14  ;;  %s26_s18 = sadd.s32 1, %s568_s15  ;;  %s572_s16 = sphi %s602_s16, %s14_s16   ;;  %s568_s15 = sphi %s600_s15, %s661_s15   ;;  %s564_s14 = sphi %s598_s14, %s660_s14   ;;  %s560_s13 = sphi %s596_s13, %s659_s13   ;;  %s556_s12 = sphi %s594_s12, %s658_s12  }
   0x4   : > { %p24_p0 = scmp.ge.s32.totalorder %s23_s17, 4  ;;  %p479_p1 = scmp.ge.s32.totalorder %s572_s16, 1 }
   0x5   : > { %p178_p2 = scmp.lt.s32.totalorder %s572_s16, 9 }
   0x6   : > { %s663_s17 = smov (%p24_p0, %s23_s17), 0  ;;  %s665_s18 = smov (!%p24_p0, %s26_s18), %s568_s15 }
   0x7   : > { %p179_p3 = pnand %p479_p1, %p178_p2  ;;  %p28_p4 = scmp.ge.s32.totalorder %s665_s18, 2 }
   0x8   : > { %p228_p5 = scmp.lt.s32.totalorder (!%p179_p3), %s560_s13, 1  ;;  %p230_p6 = scmp.lt.s32.totalorder (!%p179_p3), %s556_s12, 3 }
   0x9   : > { %s667_s18 = smov (%p28_p4, %s665_s18), 0  ;;  %182 = sbr.rel (%p179_p3) target bundleno = 156 (0x9c), region = 28 }
   0xe   : > { %s669_s13 = smov (!%p228_p5, %s560_s13), 1  ;;  %s671_s12 = smov (!%p230_p6, %s556_s12), 3  ;;  %vm300_vm0 = vcmask 7168   ;;  %vm303_vm1 = vcmask 15360  }
   0xf   : > { %s481_s19 = sshll.u32 %s669_s13, 4  ;;  %s490_s20 = sshll.u32 %s669_s13, 3 }
  0x10   : > { %s480_s21 = sshll.u32 %s671_s12, 2  ;;  %s489_s22 = sshll.u32 %s671_s12, 1 }
  0x11   : > { %s234_s23 = sadd.s32 %s481_s19, %s480_s21  ;;  %s624_s24 = sadd.s32 %s490_s20, %s489_s22 }
  0x12   : > { %s482_s25 = sshll.u32 %s234_s23, 2  ;;  %s491_s8 = sshll.u32 %s624_s24, 3 }
  0x13   : > { %s236_s28 = scalar_lea.vmem %s654_s0, %s482_s25  ;;  %s245_s4 = scalar_lea.vmem %s655_s1, %s482_s25 }
  0x14   : > { %v264_v0 = vld [vmem:[%s236_s28] sm:$0xff]  ;;  %v265_v2 = vld [vmem:[%s236_s28 + $0x8] sm:$0xff]  ;;  %s254_s7 = scalar_lea.vmem %s656_s2, %s482_s25  ;;  %s263_s11 = scalar_lea.vmem %s657_s3, %s491_s8 }
  0x15   : > { %v270_v1 = vld [vmem:[%s245_s4] sm:$0xff]  ;;  %v266_v3 = vunpack.c.l.bf16 %v264_v0  ;;  %v267_v4 = vunpack.c.h.bf16 %v264_v0  ;;  %v271_v7 = vld [vmem:[%s245_s4 + $0x8] sm:$0xff]  ;;  %v268_v8 = vunpack.c.l.bf16 %v265_v2  ;;  %v269_v9 = vunpack.c.h.bf16 %v265_v2 }
  0x16   : > { %v272_v5 = vunpack.c.l.bf16 %v270_v1  ;;  %v273_v6 = vunpack.c.h.bf16 %v270_v1  ;;  %v274_v10 = vunpack.c.l.bf16 %v271_v7  ;;  %v275_v11 = vunpack.c.h.bf16 %v271_v7 }
  0x18   : > { %v276_v12 = vadd.f32 %v272_v5, %v266_v3  ;;  %v277_v13 = vadd.f32 %v273_v6, %v267_v4  ;;  %v278_v14 = vadd.f32 %v274_v10, %v268_v8  ;;  %v279_v15 = vadd.f32 %v275_v11, %v269_v9 }
  0x1a   : > { %v290_v16 = vmul.f32 %v276_v12, %v276_v12  ;;  %v291_v17 = vmul.f32 %v277_v13, %v277_v13  ;;  %v280_v18 = vpack.c.bf16 %v277_v13, %v276_v12  ;;  %v284_v19 = vadd.f32 %v277_v13, %v276_v12 }
  0x1b   : > { %v281_v20 = vpack.c.bf16 %v279_v15, %v278_v14  ;;  %v292_v22 = vmul.f32 %v278_v14, %v278_v14  ;;  %v293_v23 = vmul.f32 %v279_v15, %v279_v15  ;;  %v287_v24 = vadd.f32 %v279_v15, %v278_v14 }
  0x1c   : > { %v294_v21 = vadd.f32 %v291_v17, %v290_v16  ;;  %282 = vst [vmem:[%s254_s7] sm:$0xff] %v280_v18  ;;  %285 = vadd.xlane.f32.xlu0 %v284_v19 }
  0x1d   : > { %283 = vst [vmem:[%s254_s7 + $0x8] sm:$0xff] %v281_v20  ;;  %v297_v25 = vadd.f32 %v293_v23, %v292_v22 }
  0x1e   : > { %295 = vadd.xlane.f32.xlu1 %v294_v21 }
  0x24   : > { %288 = vadd.xlane.f32.xlu0 %v287_v24 }
  0x26   : > { %298 = vadd.xlane.f32.xlu1 %v297_v25 }
  0x8f   : > { %v286_v26 = vpop.xlane.xlu0 %285 }
  0x91   : > { %v296_v27 = vpop.xlane.xlu1 %295 }
  0x92   : > { %v301_v28 = vsel %vm300_vm0, %v286_v26, %v296_v27 }
  0x93   : > { %304 = vst.msk [vmem:[%s263_s11] sm:$0xff] %vm303_vm1, %v301_v28 }
  0x97   : > { %v289_v29 = vpop.xlane.xlu0 %288 }
  0x99   : > { %v299_v30 = vpop.xlane.xlu1 %298 }
  0x9a   : > { %v302_v31 = vsel %vm300_vm0, %v289_v29, %v299_v30 }
  0x9b   : > { %305 = vst.msk [vmem:[%s263_s11 + $0x8] sm:$0xff] %vm303_vm1, %v302_v31 }
  0x9c PF: > { %s14_s16 = sadd.s32 1, %s572_s16   ;;  %s658_s12 = smov %s564_s14 }
  0x9d   : > { %p11_p7 = scmp.ge.s32.totalorder %s14_s16, 10   ;;  %s659_s13 = smov %s568_s15 }
  0x9e   : > { %s660_s14 = smov %s663_s17  ;;  %s661_s15 = smov %s667_s18 }
  0x9f   :  { %13 = sbr.rel (!%p11_p7) target bundleno = 3 (0x3), region = 73 }

// kernel: iconvmod_forward.21
= control target key start
LH: loop header
LB: loop body
LE: loop exit
PB: predicated region body
PF: predicated region fallthrough
CT: control target
= control target key end

     0   :  { %s1913_s27 = smov 0   ;;  %s1915_s28 = smov 0   ;;  %s2645_s0 = inlined_call_operand.vmem [shape: bf16[2,4,16,256], index: 0, kind: input, shape index: {}, may-alias: {0,1,2}]   ;;  %s2646_s1 = inlined_call_operand.vmem [shape: bf16[2,4,16,256], index: 1, kind: input, shape index: {}, may-alias: {0,1,2}]   ;;  %s2647_s2 = inlined_call_operand.vmem [shape: bf16[2,4,16,256], index: 2, kind: input, shape index: {}, may-alias: {0,1,2}]   ;;  %s2648_s3 = inlined_call_operand.vmem [shape: bf16[3,16,144], index: 3, kind: input, shape index: {}]   ;;  %s2649_s4 = inlined_call_operand.vmem [shape: f32[1,256], index: 4, kind: input, shape index: {}]   ;;  %s2650_s5 = inlined_call_operand.vmem [shape: bf16[2,4,16,256], index: 5, kind: input, shape index: {}]   ;;  %s2651_s6 = inlined_call_operand.vmem [shape: bf16[2,4,16,256], index: 6, kind: input, shape index: {}]   ;;  %s2652_s7 = inlined_call_operand.vmem [shape: bf16[2,4,16,256], index: 7, kind: output, shape index: {0}]   ;;  %s2653_s8 = inlined_call_operand.vmem [shape: f32[2,4,16,2], index: 8, kind: output, shape index: {1}]  }
   0x1   :  { %s1917_s29 = smov 0   ;;  %s1919_s30 = smov 0  }
   0x2   :  { %s1921_s9 = smov 0  }
   0x3 LB: > { %s28_s10 = sadd.s32 1, %s1850_s29  ;;  %s31_s11 = sadd.s32 1, %s1854_s30  ;;  %s1858_s9 = sphi %s1921_s9, %s19_s9   ;;  %s1854_s30 = sphi %s1919_s30, %s2679_s30   ;;  %s1850_s29 = sphi %s1917_s29, %s2678_s29   ;;  %s1846_s28 = sphi %s1915_s28, %s2677_s28   ;;  %s1842_s27 = sphi %s1913_s27, %s2676_s27  }
   0x4   : > { %p29_p0 = scmp.ge.s32.totalorder %s28_s10, 4  ;;  %p1445_p1 = scmp.ge.s32.totalorder %s1858_s9, 1 }
   0x5   : > { %p375_p2 = scmp.lt.s32.totalorder %s1858_s9, 9 }
   0x6   : > { %s2681_s10 = smov (%p29_p0, %s28_s10), 0  ;;  %s2683_s11 = smov (!%p29_p0, %s31_s11), %s1854_s30 }
   0x7   : > { %p376_p3 = pnand %p1445_p1, %p375_p2  ;;  %p33_p4 = scmp.ge.s32.totalorder %s2683_s11, 2 }
   0x8   : > { %s1446_s12 = sadd.s32 (!%p376_p3), 4294967295, %s1842_s27  ;;  %p471_p5 = scmp.lt.s32.totalorder (!%p376_p3), %s1846_s28, 1 }
   0x9   : > { %s2685_s11 = smov (%p33_p4, %s2683_s11), 0  ;;  %379 = sbr.rel (%p376_p3) target bundleno = 549 (0x225), region = 48 }
   0xa   : > { %p469_p6 = scmp.gt.s32.totalorder (!%p376_p3), %s1446_s12, 0  ;;  %p1447_p7 = scmp.lt.s32.totalorder (!%p376_p3), %s1446_s12, 3 }
   0xb   : > { %p485_p8 = scmp.lt.s32.totalorder (!%p376_p3), %s1842_s27, 3  ;;  %p560_p9 = scmp.gt.s32.totalorder (!%p376_p3), %s1842_s27, 0 }
   0xc   : > { %s1865_s20 = smov (!%p376_p3), 127   ;;  %s492_s21 = sadd.s32 (!%p376_p3), 1, %s1842_s27 }
   0xd   : > { %p493_p10 = scmp.lt.s32.totalorder (!%p376_p3), %s492_s21, 3  ;;  %s1867_s24 = smov (!%p376_p3), 15  }
   0xe   : > { %s2687_s28 = smov (!%p471_p5, %s1846_s28), 1  ;;  %s2689_s12 = smov (!%p469_p6, %s1446_s12), 0  ;;  %v583_v45 = vlaneseq  ;;  %vm710_vm8 = vcmask 130048   ;;  %vm1201_vm13 = vcmask 7168   ;;  %vm1204_vm14 = vcmask 15360  }
   0xf   : > { %s1949_s13 = sshll.u32 %s2687_s28, 4  ;;  %s2691_s12 = smov (!%p1447_p7, %s2689_s12), 3 }
  0x10   : > { %s1955_s14 = scalar_select %p485_p8, %s1842_s27, 3  ;;  %v2124_v46 = vand.u32 127, %v583_v45 }
  0x11   : > { %s1452_s15 = sshll.u32 %s2691_s12, 2  ;;  %s2693_s21 = smov (!%p493_p10, %s492_s21), 3 }
  0x12   : > { %s477_s16 = sadd.s32 %s1949_s13, %s1452_s15  ;;  %s1455_s17 = sshll.u32 %s1955_s14, 2  ;;  %vm598_vm2 = vcmp.lt.s32.totalorder %v2124_v46, 16  ;;  %vm585_vm3 = vcmp.lt.s32.totalorder %v2124_v46, 17  ;;  %vm663_vm4 = vcmp.lt.s32.totalorder %v2124_v46, 112  ;;  %vm676_vm5 = vcmp.lt.s32.totalorder %v2124_v46, 111 }
  0x13   : > { %s1454_s18 = sshll.u32 %s477_s16, 2  ;;  %s489_s19 = sadd.s32 %s1455_s17, %s1949_s13  ;;  %vm650_vm6 = vcmp.lt.s32.totalorder %v2124_v46, 113  ;;  %vm637_vm7 = vcmp.lt.s32.totalorder %v2124_v46, 127  ;;  %vm624_vm9 = vcmp.lt.s32.totalorder %v2124_v46, 1  ;;  %vm611_vm11 = vcmp.lt.s32.totalorder %v2124_v46, 15 }
  0x14   : > { %s479_s22 = scalar_lea.vmem %s2645_s0, %s1454_s18  ;;  %s1964_s23 = sshll.u32 %s489_s19, 2 }
  0x15   : > { %s491_s26 = scalar_lea.vmem %s2646_s1, %s1964_s23  ;;  %v1970_v0 = vld [vmem:[%s479_s22] sm:$0xff]  ;;  %v1972_v1 = vld [vmem:[%s479_s22 + $0x8] sm:$0xff]  ;;  %s2656_s15 = smov 112  }
  0x16   : > { %v564_v2 = vunpack.c.l.bf16 %v1970_v0  ;;  %v566_v3 = vunpack.c.l.bf16 %v1972_v1  ;;  %s568_s12 = scalar_select %p560_p9, 1, 0  ;;  %v774_v4 = vld [vmem:[%s491_s26] sm:$0xff]  ;;  %v775_v5 = vld [vmem:[%s491_s26 + $0x8] sm:$0xff]  ;;  %v565_v11 = vunpack.c.h.bf16 %v1970_v0  ;;  %v567_v12 = vunpack.c.h.bf16 %v1972_v1 }
  0x17   : > { %v1976_v6 = vunpack.c.l.bf16 %v774_v4  ;;  %v1978_v7 = vunpack.c.l.bf16 %v775_v5  ;;  %v2002_v16 = vunpack.c.h.bf16 %v774_v4  ;;  %v2004_v17 = vunpack.c.h.bf16 %v775_v5  ;;  %s2658_s16 = smov 16   ;;  %s2654_s17 = smov 17  }
  0x18   : > { %v569_v8 = vstv %s568_s12  ;;  %s2660_s18 = smov 113   ;;  %s1864_s19 = smov 111  }
  0x19   : > { %vm1980_vm0 = vcmp.eq.s32.totalorder %v569_v8, 1  ;;  %v1986_v10 = vpack.i.bf16 %v1978_v7, %v1976_v6  ;;  %v1585_v20 = vpack.i.bf16 %v2004_v17, %v2002_v16  ;;  %s1866_s22 = smov 1   ;;  %s2695_s21 = smov (!%p493_p10, %s2693_s21), 3  ;;  %v1700_v27 = vpack.i.bf16 %v2002_v16, %v1978_v7 }
  0x1a   : > { %v571_v13 = vsel %vm1980_vm0, %v564_v2, 0.0  ;;  %v573_v14 = vsel %vm1980_vm0, %v566_v3, 0.0  ;;  %v572_v18 = vsel %vm1980_vm0, %v565_v11, 0.0  ;;  %v574_v19 = vsel %vm1980_vm0, %v567_v12, 0.0  ;;  %s1461_s25 = sshll.u32 %s2695_s21, 2  ;;  %s2669_s27 = smov 16   ;;  %vm1484_vm10 = vmpackc.low %vm1980_vm0, %vm1980_vm0 }
  0x1b   : > { %v1998_v15 = vpack.i.bf16 %v573_v14, %v571_v13  ;;  %1581 = vrot.lane.b32.xlu2 %v1986_v10, %s2656_s15  ;;  %v1605_v21 = vpack.i.bf16 %v1976_v6, %v572_v18  ;;  %v1595_v22 = vpack.i.bf16 %v574_v19, %v572_v18  ;;  %s501_s26 = sadd.s32 %s1461_s25, %s1949_s13  ;;  %v1705_v26 = vpack.i.bf16 %v574_v19, %v2004_v17  ;;  %s2670_s13 = smov 112  }
  0x1c   : > { %s1463_s12 = sshll.u32 %s501_s26, 2  ;;  %s1474_s25 = sshll.u32 %s2687_s28, 3 }
  0x1d   : > { %1601 = vrot.lane.b32.xlu1 %v1998_v15, %s2658_s16  ;;  %1591 = vrot.lane.b32.xlu0 %v1998_v15, %s2654_s17 }
  0x23   : > { %1586 = vrot.lane.b32.xlu2 %v1585_v20, %s2656_s15 }
  0x25   : > { %1606 = vrot.lane.b32.xlu1 %v1605_v21, %s2658_s16  ;;  %1596 = vrot.lane.b32.xlu0 %v1595_v22, %s2654_s17  ;;  %s975_s17 = scalar_select %p485_p8, 1, 0 }
  0x26   : > { %s2672_s16 = smov 113  }
  0x27   : > { %v976_v25 = vstv %s975_s17 }
  0x28   : > { %vm2069_vm1 = vcmp.eq.s32.totalorder %v976_v25, 1 }
  0x29   : > { %vm1514_vm12 = vmpackc.low %vm2069_vm1, %vm2069_vm1 }
  0x2b   : > { %1621 = vrot.lane.b32.xlu2 %v1986_v10, %s2660_s18 }
  0x2d   : > { %1616 = vrot.lane.b32.xlu1 %v1595_v22, %s1864_s19  ;;  %1611 = vrot.lane.b32.xlu0 %v1998_v15, %s1864_s19 }
  0x33   : > { %1636 = vrot.lane.b32.xlu2 %v1585_v20, %s1865_s20 }
  0x35   : > { %1631 = vrot.lane.b32.xlu1 %v1986_v10, %s1865_s20  ;;  %1626 = vrot.lane.b32.xlu0 %v1585_v20, %s2660_s18 }
  0x3b   : > { %1651 = vrot.lane.b32.xlu2 %v1998_v15, %s2660_s18 }
  0x3d   : > { %1646 = vrot.lane.b32.xlu1 %v1595_v22, %s2656_s15  ;;  %1641 = vrot.lane.b32.xlu0 %v1998_v15, %s2656_s15  ;;  %s2671_s15 = smov 17  }
  0x43   : > { %1666 = vrot.lane.b32.xlu2 %v1585_v20, %s1866_s22 }
  0x45   : > { %1661 = vrot.lane.b32.xlu1 %v1986_v10, %s1866_s22  ;;  %1656 = vrot.lane.b32.xlu0 %v1595_v22, %s2660_s18  ;;  %s503_s18 = scalar_lea.vmem %s2647_s2, %s1463_s12 }
  0x46   : > { %v2058_v23 = vld [vmem:[%s503_s18] sm:$0xff]  ;;  %v2060_v24 = vld [vmem:[%s503_s18 + $0x8] sm:$0xff]  ;;  %s524_s18 = scalar_lea.vmem %s2651_s6, %s1964_s23 }
  0x47   : > { %v971_v28 = vunpack.c.l.bf16 %v2058_v23  ;;  %v2664_v29 = vunpack.c.l.bf16 %v2060_v24  ;;  %v2663_v30 = vunpack.c.h.bf16 %v2058_v23  ;;  %v2662_v31 = vunpack.c.h.bf16 %v2060_v24 }
  0x49   : > { %v978_v33 = vsel %vm2069_vm1, %v971_v28, 0.0  ;;  %v980_v34 = vsel %vm2069_vm1, %v2664_v29, 0.0  ;;  %v979_v35 = vsel %vm2069_vm1, %v2663_v30, 0.0  ;;  %v981_v36 = vsel %vm2069_vm1, %v2662_v31, 0.0 }
  0x4a   : > { %v1725_v37 = vpack.i.bf16 %v981_v36, %v979_v35  ;;  %v1720_v38 = vpack.i.bf16 %v980_v34, %v978_v33 }
  0x4b   : > { %1681 = vrot.lane.b32.xlu2 %v1986_v10, %s1867_s24 }
  0x4d   : > { %1676 = vrot.lane.b32.xlu1 %v1595_v22, %s1865_s20  ;;  %1671 = vrot.lane.b32.xlu0 %v1998_v15, %s1865_s20 }
  0x53   : > { %1696 = vrot.lane.b32.xlu2 %v1585_v20, %s1864_s19 }
  0x55   : > { %1691 = vrot.lane.b32.xlu1 %v1986_v10, %s1864_s19  ;;  %1686 = vrot.lane.b32.xlu0 %v1585_v20, %s1867_s24 }
  0x5b   : > { %1711 = vrot.lane.b32.xlu2 %v1998_v15, %s1866_s22 }
  0x5d   : > { %1706 = vrot.lane.b32.xlu1 %v1705_v26, %s2669_s27  ;;  %1701 = vrot.lane.b32.xlu0 %v1700_v27, %s2669_s27 }
  0x63   : > { %1726 = vrot.lane.b32.xlu2 %v1725_v37, %s2670_s13 }
  0x65   : > { %1721 = vrot.lane.b32.xlu1 %v1720_v38, %s2670_s13  ;;  %1716 = vrot.lane.b32.xlu0 %v1595_v22, %s1866_s22 }
  0x6b   : > { %1741 = vrot.lane.b32.xlu2 %v1998_v15, %s1867_s24 }
  0x6d   : > { %1736 = vrot.lane.b32.xlu1 %v1585_v20, %s2671_s15  ;;  %1731 = vrot.lane.b32.xlu0 %v1986_v10, %s2671_s15 }
  0x73   : > { %1756 = vrot.lane.b32.xlu2 %v1725_v37, %s2672_s16 }
  0x75   : > { %1751 = vrot.lane.b32.xlu1 %v1720_v38, %s2672_s16  ;;  %1746 = vrot.lane.b32.xlu0 %v1595_v22, %s1867_s24  ;;  %v2104_v39 = vpop.permute.xlu2 %1581 }
  0x76   : > { %v1584_v4 = vunpack.i.h.bf16 %v2104_v39  ;;  %v1583_v5 = vunpack.i.l.bf16 %v2104_v39 }
  0x7b   : > { %1771 = vrot.lane.b32.xlu2 %v1720_v38, %s1866_s22 }
  0x7d   : > { %1766 = vrot.lane.b32.xlu1 %v1725_v37, %s1865_s20  ;;  %1761 = vrot.lane.b32.xlu0 %v1720_v38, %s1865_s20  ;;  %v2109_v40 = vpop.permute.xlu2 %1586 }
  0x7e   : > { %v1589_v8 = vunpack.i.h.bf16 %v2109_v40  ;;  %v1588_v10 = vunpack.i.l.bf16 %v2109_v40  ;;  %v1528_v40 = vld [vmem:[%s2648_s3 + $0x14] sm:$0xf] }
  0x80   : > { %v860_v21 = vsel %vm663_vm4, %v1583_v5, %v1588_v10  ;;  %v861_v22 = vsel %vm663_vm4, %v1584_v4, %v1589_v8 }
  0x81   : > { %v890_v36 = vpack.c.bf16 %v861_v22, %v860_v21 }
  0x83   : > { %1786 = vrot.lane.b32.xlu2 %v1725_v37, %s1864_s19 }
  0x85   : > { %1781 = vrot.lane.b32.xlu1 %v1720_v38, %s1864_s19  ;;  %1776 = vrot.lane.b32.xlu0 %v1725_v37, %s1866_s22  ;;  %v2114_v41 = vpop.permute.xlu2 %1621 }
  0x86   : > { %v1624_v45 = vunpack.i.h.bf16 %v2114_v41 }
  0x8b   : > { %1801 = vrot.lane.b32.xlu2 %v1720_v38, %s2669_s27 }
  0x8d   : > { %1791 = vrot.lane.b32.xlu0 %v1720_v38, %s1867_s24  ;;  %1796 = vrot.lane.b32.xlu1 %v1725_v37, %s1867_s24  ;;  %v2121_v44 = vpop.permute.xlu2 %1636  ;;  %s533_s24 = scalar_lea.vmem %s2652_s7, %s1964_s23 }
  0x8f   : > { %v2119_v42 = vpop.permute.xlu1 %1601  ;;  %v1592_v43 = vpop.permute.xlu0 %1591 }
  0x90   : > { %v1603_v47 = vunpack.i.l.bf16 %v2119_v42  ;;  %v1594_v48 = vunpack.i.h.bf16 %v1592_v43  ;;  %v1593_v51 = vunpack.i.l.bf16 %v1592_v43  ;;  %v1638_v43 = vunpack.i.l.bf16 %v2121_v44 }
  0x93   : > { %1816 = vrot.lane.b32.xlu2 %v1725_v37, %s2671_s15 }
  0x95   : > { %1806 = vrot.lane.b32.xlu0 %v1725_v37, %s2669_s27  ;;  %1811 = vrot.lane.b32.xlu1 %v1720_v38, %s2671_s15  ;;  %v2134_v55 = vpop.permute.xlu2 %1651  ;;  %v1639_v38 = vunpack.i.h.bf16 %v2121_v44  ;;  %s515_s15 = scalar_lea.vmem %s2650_s5, %s1964_s23  ;;  %s1473_s23 = sshll.u32 %s1955_s14, 1 }
  0x96   : > { %s540_s26 = sadd.s32 %s1474_s25, %s1473_s23 }
  0x97   : > { %v2129_v49 = vpop.permute.xlu1 %1606  ;;  %v1597_v50 = vpop.permute.xlu0 %1596  ;;  %s1475_s12 = sshll.u32 %s540_s26, 3 }
  0x98   : > { %v1608_v52 = vunpack.i.l.bf16 %v2129_v49  ;;  %v1599_v53 = vunpack.i.h.bf16 %v1597_v50  ;;  %v1598_v54 = vunpack.i.l.bf16 %v1597_v50 }
  0x9a   : > { %v2138_v56 = vsel %vm598_vm2, %v1608_v52, %v1603_v47  ;;  %v2142_v57 = vsel %vm598_vm2, %v1603_v47, %v1608_v52  ;;  %v2146_v58 = vsel %vm585_vm3, %v1598_v54, %v1593_v51  ;;  %v2150_v59 = vsel %vm585_vm3, %v1599_v53, %v1594_v48 }
  0x9b   : > { %v681_v60 = vpack.c.bf16 %v2150_v59, %v2146_v58  ;;  %v2156_v61 = vsel %vm585_vm3, %v1593_v51, %v1598_v54  ;;  %v2160_v62 = vsel %vm585_vm3, %v1594_v48, %v1599_v53  ;;  %v1623_v47 = vunpack.i.l.bf16 %v2114_v41 }
  0x9c   : > { %v682_v63 = vpack.c.bf16 %v2160_v62, %v2156_v61  ;;  %v1530_v62 = vld [vmem:[%s2648_s3 + $0x24] sm:$0xf] }
  0x9d   : > { %v2190_v37 = vpop.permute.xlu2 %1666 }
  0x9f   : > { %v1617_v13 = vpop.permute.xlu1 %1616  ;;  %v1612_v14 = vpop.permute.xlu0 %1611 }
  0xa0   : > { %v1619_v15 = vunpack.i.h.bf16 %v1617_v13  ;;  %v1618_v18 = vunpack.i.l.bf16 %v1617_v13  ;;  %v1614_v19 = vunpack.i.h.bf16 %v1612_v14  ;;  %v1613_v20 = vunpack.i.l.bf16 %v1612_v14 }
  0xa2   : > { %v677_v25 = vsel %vm676_vm5, %v1613_v20, %v1618_v18  ;;  %v678_v26 = vsel %vm676_vm5, %v1614_v19, %v1619_v15  ;;  %v679_v27 = vsel %vm676_vm5, %v1618_v18, %v1613_v20  ;;  %v680_v33 = vsel %vm676_vm5, %v1619_v15, %v1614_v19  ;;  %v1526_v19 = vld [vmem:[%s2648_s3 + $0x4] sm:$0xf]  ;;  %v1480_v20 = vld [vmem:[%s2648_s3 + $0x8] sm:$0xf0] }
  0xa3   : > { %v697_v34 = vpack.c.bf16 %v678_v26, %v677_v25  ;;  %v698_v35 = vpack.c.bf16 %v680_v33, %v679_v27  ;;  %v1483_v22 = vor.u32 %v1526_v19, %v1480_v20 }
  0xa5   : > { %735 = vmatpush.bf16.msra.mxu1 %v697_v34  ;;  %763 = vmatpush.bf16.msra.mxu3 %v698_v35  ;;  %v2237_v26 = vpop.permute.xlu2 %1681 }
  0xa7   : > { %v2196_v48 = vpop.permute.xlu1 %1631  ;;  %v2198_v50 = vpop.permute.xlu0 %1626 }
  0xa8   : > { %v1634_v51 = vunpack.i.h.bf16 %v2196_v48  ;;  %v1633_v52 = vunpack.i.l.bf16 %v2196_v48  ;;  %v1629_v53 = vunpack.i.h.bf16 %v2198_v50  ;;  %v1628_v54 = vunpack.i.l.bf16 %v2198_v50  ;;  %1491 = vmatmul.msk.bf16.vlgmr.msra.gmra.mxu3 %vm710_vm8, %v1483_v22  ;;  %1487 = vmatmul.msk.bf16.vlgmr.msra.gmra.mxu1 %vm710_vm8, %v1483_v22 }
  0xa9   : > { %909 = vmatpush.bf16.msrb.mxu1 %v890_v36  ;;  %v1654_v22 = vunpack.i.h.bf16 %v2134_v55 }
  0xaa   : > { %v848_v13 = vsel %vm650_vm6, %v1623_v47, %v1628_v54  ;;  %v849_v14 = vsel %vm650_vm6, %v1624_v45, %v1629_v53  ;;  %v836_v15 = vsel %vm637_vm7, %v1633_v52, %v1638_v43  ;;  %v837_v18 = vsel %vm637_vm7, %v1634_v51, %v1639_v38 }
  0xab   : > { %v888_v21 = vpack.c.bf16 %v849_v14, %v848_v13  ;;  %v886_v25 = vpack.c.bf16 %v837_v18, %v836_v15  ;;  %v884_v13 = vpack.c.bf16 %v1978_v7, %v1976_v6  ;;  %v1653_v6 = vunpack.i.l.bf16 %v2134_v55 }
  0xac   : > { %v1669_v7 = vunpack.i.h.bf16 %v2190_v37 }
  0xad   : > { %910 = vmatpush.bf16.msrb.mxu1 %v888_v21 }
  0xaf   : > { %v1647_v27 = vpop.permute.xlu1 %1646  ;;  %v1642_v33 = vpop.permute.xlu0 %1641 }
  0xb0   : > { %v1649_v34 = vunpack.i.h.bf16 %v1647_v27  ;;  %v1648_v35 = vunpack.i.l.bf16 %v1647_v27  ;;  %v1644_v36 = vunpack.i.h.bf16 %v1642_v33  ;;  %v1643_v31 = vunpack.i.l.bf16 %v1642_v33 }
  0xb1   : > { %911 = vmatpush.bf16.msrb.mxu1 %v886_v25  ;;  %v1668_v25 = vunpack.i.l.bf16 %v2190_v37 }
  0xb2   : > { %v664_v14 = vsel %vm663_vm4, %v1643_v31, %v1648_v35  ;;  %v665_v15 = vsel %vm663_vm4, %v1644_v36, %v1649_v34  ;;  %v666_v18 = vsel %vm663_vm4, %v1648_v35, %v1643_v31  ;;  %v667_v19 = vsel %vm663_vm4, %v1649_v34, %v1644_v36 }
  0xb3   : > { %v695_v20 = vpack.c.bf16 %v665_v15, %v664_v14  ;;  %v696_v21 = vpack.c.bf16 %v667_v19, %v666_v18  ;;  %v2259_v14 = vpop.permute.xlu2 %1696 }
  0xb5   : > { %714 = vmatpush.bf16.msra.mxu0 %v695_v20  ;;  %742 = vmatpush.bf16.msra.mxu2 %v696_v21 }
  0xb6   : > { %912 = vmatpush.bf16.msrb.mxu1 %v884_v13 }
  0xb7   : > { %v2254_v27 = vpop.permute.xlu1 %1661  ;;  %v1657_v33 = vpop.permute.xlu0 %1656 }
  0xb8   : > { %v1664_v31 = vunpack.i.h.bf16 %v2254_v27  ;;  %v1663_v34 = vunpack.i.l.bf16 %v2254_v27  ;;  %v1659_v35 = vunpack.i.h.bf16 %v1657_v33  ;;  %v1658_v36 = vunpack.i.l.bf16 %v1657_v33 }
  0xba   : > { %v651_v55 = vsel %vm650_vm6, %v1653_v6, %v1658_v36  ;;  %v652_v13 = vsel %vm650_vm6, %v1654_v22, %v1659_v35  ;;  %v653_v15 = vsel %vm650_vm6, %v1658_v36, %v1653_v6  ;;  %v654_v18 = vsel %vm650_vm6, %v1659_v35, %v1654_v22 }
  0xbb   : > { %v693_v19 = vpack.c.bf16 %v652_v13, %v651_v55  ;;  %v694_v20 = vpack.c.bf16 %v654_v18, %v653_v15  ;;  %v826_v21 = vsel %vm624_vm9, %v1668_v25, %v1663_v34  ;;  %v827_v33 = vsel %vm624_vm9, %v1669_v7, %v1664_v31  ;;  %v2281_v18 = vpop.permute.xlu2 %1711 }
  0xbc   : > { %v882_v6 = vpack.c.bf16 %v827_v33, %v826_v21 }
  0xbd   : > { %715 = vmatpush.bf16.msra.mxu0 %v693_v19  ;;  %743 = vmatpush.bf16.msra.mxu2 %v694_v20 }
  0xbe   : > { %913 = vmatpush.bf16.msrb.mxu1 %v882_v6  ;;  %v1485_v6 = vpack.c.bf16 %v566_v3, %v564_v2 }
  0xbf   : > { %v1677_v22 = vpop.permute.xlu1 %1676  ;;  %v1672_v35 = vpop.permute.xlu0 %1671 }
  0xc0   : > { %v1679_v36 = vunpack.i.h.bf16 %v1677_v22  ;;  %v1678_v55 = vunpack.i.l.bf16 %v1677_v22  ;;  %v1674_v13 = vunpack.i.h.bf16 %v1672_v35  ;;  %v1673_v15 = vunpack.i.l.bf16 %v1672_v35 }
  0xc1   : > { %v1489_v22 = vpack.c.bf16 %v567_v12, %v565_v11  ;;  %v1684_v35 = vunpack.i.h.bf16 %v2237_v26  ;;  %v862_v11 = vsel %vm663_vm4, %v1588_v10, %v1583_v5  ;;  %v863_v12 = vsel %vm663_vm4, %v1589_v8, %v1584_v4  ;;  %v1498_v4 = vld [vmem:[%s2648_s3 + $0x18] sm:$0xf0] }
  0xc2   : > { %v638_v30 = vsel %vm637_vm7, %v1673_v15, %v1678_v55  ;;  %v639_v29 = vsel %vm637_vm7, %v1674_v13, %v1679_v36  ;;  %v640_v21 = vsel %vm637_vm7, %v1678_v55, %v1673_v15  ;;  %v641_v19 = vsel %vm637_vm7, %v1679_v36, %v1674_v13 }
  0xc3   : > { %v691_v20 = vpack.c.bf16 %v639_v29, %v638_v30  ;;  %v692_v33 = vpack.c.bf16 %v641_v19, %v640_v21  ;;  %v1683_v29 = vunpack.i.l.bf16 %v2237_v26  ;;  %v1699_v30 = vunpack.i.h.bf16 %v2259_v14  ;;  %v2339_v39 = vpop.permute.xlu2 %1726 }
  0xc4   : > { %v1698_v36 = vunpack.i.l.bf16 %v2259_v14  ;;  %v891_v19 = vpack.c.bf16 %v863_v12, %v862_v11 }
  0xc5   : > { %716 = vmatpush.bf16.msra.mxu0 %v691_v20  ;;  %744 = vmatpush.bf16.msra.mxu2 %v692_v33  ;;  %v2359_v20 = vor.u32 %v1528_v40, %v1498_v4  ;;  %v850_v33 = vsel %vm650_vm6, %v1628_v54, %v1623_v47 }
  0xc7   : > { %v2306_v55 = vpop.permute.xlu1 %1691  ;;  %v2308_v2 = vpop.permute.xlu0 %1686 }
  0xc8   : > { %v1694_v0 = vunpack.i.h.bf16 %v2306_v55  ;;  %v1693_v1 = vunpack.i.l.bf16 %v2306_v55  ;;  %v1689_v3 = vunpack.i.h.bf16 %v2308_v2  ;;  %v1688_v9 = vunpack.i.l.bf16 %v2308_v2 }
  0xc9   : > { %1486 = vmatpush.bf16.msk.msra.mxu0 %vm1484_vm10, %v1485_v6  ;;  %1490 = vmatpush.bf16.msk.msra.mxu2 %vm1484_vm10, %v1489_v22  ;;  %v851_v6 = vsel %vm650_vm6, %v1629_v53, %v1624_v45  ;;  %v1609_v22 = vunpack.i.h.bf16 %v2129_v49  ;;  %v838_v49 = vsel %vm637_vm7, %v1638_v43, %v1633_v52  ;;  %v885_v52 = vpack.c.bf16 %v2004_v17, %v2002_v16 }
  0xca   : > { %v814_v13 = vsel %vm611_vm11, %v1688_v9, %v1683_v29  ;;  %v815_v5 = vsel %vm611_vm11, %v1689_v3, %v1684_v35  ;;  %v872_v10 = vsel %vm676_vm5, %v1693_v1, %v1698_v36  ;;  %v873_v15 = vsel %vm676_vm5, %v1694_v0, %v1699_v30 }
  0xcb   : > { %v880_v8 = vpack.c.bf16 %v815_v5, %v814_v13  ;;  %v892_v21 = vpack.c.bf16 %v873_v15, %v872_v10  ;;  %v889_v10 = vpack.c.bf16 %v851_v6, %v850_v33  ;;  %v2401_v54 = vpop.permute.xlu2 %1741  ;;  %v1714_v15 = vunpack.i.h.bf16 %v2281_v18 }
  0xcc   : > { %v824_v6 = vsel %vm624_vm9, %v1663_v34, %v1668_v25  ;;  %v825_v16 = vsel %vm624_vm9, %v1664_v31, %v1669_v7  ;;  %v812_v7 = vsel %vm611_vm11, %v1683_v29, %v1688_v9  ;;  %v813_v31 = vsel %vm611_vm11, %v1684_v35, %v1689_v3  ;;  %v1496_v9 = vld [vmem:[%s2648_s3 + $0x10] sm:$0xf] }
  0xcd   : > { %914 = vmatpush.bf16.msrb.mxu1 %v880_v8  ;;  %930 = vmatpush.bf16.msrb.mxu3 %v892_v21  ;;  %v1604_v8 = vunpack.i.h.bf16 %v2119_v42  ;;  %v839_v42 = vsel %vm637_vm7, %v1639_v38, %v1634_v51  ;;  %v1713_v21 = vunpack.i.l.bf16 %v2281_v18  ;;  %v883_v27 = vpack.c.bf16 %v825_v16, %v824_v6 }
  0xce   : > { %v887_v38 = vpack.c.bf16 %v839_v42, %v838_v49  ;;  %v881_v42 = vpack.c.bf16 %v813_v31, %v812_v7 }
  0xcf   : > { %v1707_v11 = vpop.permute.xlu1 %1706  ;;  %v1702_v12 = vpop.permute.xlu0 %1701 }
  0xd0   : > { %v1709_v13 = vunpack.i.h.bf16 %v1707_v11  ;;  %v1708_v5 = vunpack.i.l.bf16 %v1707_v11  ;;  %v1704_v40 = vunpack.i.h.bf16 %v1702_v12  ;;  %v1703_v4 = vunpack.i.l.bf16 %v1702_v12  ;;  %1502 = vmatmul.msk.bf16.vlgmr.msrb.gmra.mxu3 %vm710_vm8, %v2359_v20 }
  0xd1   : > { %937 = vmatpush.bf16.msra.mxu3 %v891_v19 }
  0xd2   : > { %v802_v41 = vsel %vm598_vm2, %v1704_v40, %v1609_v22  ;;  %v803_v45 = vsel %vm598_vm2, %v1708_v5, %v1703_v4  ;;  %v2395_v50 = vsel %vm598_vm2, %v1709_v13, %v1604_v8  ;;  %v2399_v53 = vsel %vm598_vm2, %v1604_v8, %v1709_v13 }
  0xd3   : > { %v878_v47 = vpack.c.bf16 %v803_v45, %v802_v41  ;;  %v683_v43 = vpack.c.bf16 %v2395_v50, %v2138_v56  ;;  %v684_v44 = vpack.c.bf16 %v2399_v53, %v2142_v57  ;;  %v2445_v34 = vpop.permute.xlu2 %1756  ;;  %v800_v26 = vsel %vm598_vm2, %v1609_v22, %v1704_v40 }
  0xd4   : > { %v801_v35 = vsel %vm598_vm2, %v1703_v4, %v1708_v5  ;;  %v875_v22 = vsel %vm676_vm5, %v1699_v30, %v1694_v0  ;;  %v874_v5 = vsel %vm676_vm5, %v1698_v36, %v1693_v1  ;;  %v1744_v30 = vunpack.i.h.bf16 %v2401_v54 }
  0xd5   : > { %938 = vmatpush.bf16.msra.mxu3 %v889_v10  ;;  %915 = vmatpush.bf16.msrb.mxu1 %v878_v47  ;;  %v1529_v47 = vld [vmem:[%s2648_s3 + $0x14] sm:$0xf0]  ;;  %v879_v40 = vpack.c.bf16 %v801_v35, %v800_v26  ;;  %v1743_v0 = vunpack.i.l.bf16 %v2401_v54  ;;  %v893_v36 = vpack.c.bf16 %v875_v22, %v874_v5  ;;  %v1729_v1 = vunpack.i.h.bf16 %v2339_v39 }
  0xd7   : > { %v2407_v48 = vpop.permute.xlu1 %1721  ;;  %v1717_v51 = vpop.permute.xlu0 %1716 }
  0xd8   : > { %v1719_v19 = vunpack.i.h.bf16 %v1717_v51  ;;  %v1718_v33 = vunpack.i.l.bf16 %v1717_v51  ;;  %v1497_v51 = vor.u32 %v1529_v47, %v1496_v9 }
  0xd9   : > { %939 = vmatpush.bf16.msra.mxu3 %v887_v38 }
  0xda   : > { %v627_v17 = vsel %vm624_vm9, %v1718_v33, %v1713_v21  ;;  %v628_v18 = vsel %vm624_vm9, %v1719_v19, %v1714_v15  ;;  %v625_v11 = vsel %vm624_vm9, %v1713_v21, %v1718_v33  ;;  %v626_v12 = vsel %vm624_vm9, %v1714_v15, %v1719_v19 }
  0xdb   : > { %v687_v25 = vpack.c.bf16 %v628_v18, %v627_v17  ;;  %v688_v37 = vpack.c.bf16 %v626_v12, %v625_v11  ;;  %v2479_v14 = vpop.permute.xlu2 %1771  ;;  %v1728_v19 = vunpack.i.l.bf16 %v2339_v39  ;;  %v1724_v18 = vunpack.i.h.bf16 %v2407_v48 }
  0xdc   : > { %v1723_v11 = vunpack.i.l.bf16 %v2407_v48 }
  0xdd   : > { %940 = vmatpush.bf16.msra.mxu3 %v885_v52  ;;  %718 = vmatpush.bf16.msra.mxu0 %v687_v25  ;;  %v1759_v25 = vunpack.i.h.bf16 %v2445_v34 }
  0xde   : > { %746 = vmatpush.bf16.msra.mxu2 %v688_v37  ;;  %v1758_v37 = vunpack.i.l.bf16 %v2445_v34  ;;  %v1062_v31 = vsel %vm663_vm4, %v1723_v11, %v1728_v19  ;;  %v1478_v34 = vld [vmem:[%s2648_s3] sm:$0xf] }
  0xdf   : > { %v1737_v13 = vpop.permute.xlu1 %1736  ;;  %v1732_v8 = vpop.permute.xlu0 %1731 }
  0xe0   : > { %v1739_v10 = vunpack.i.h.bf16 %v1737_v13  ;;  %v1738_v41 = vunpack.i.l.bf16 %v1737_v13  ;;  %v1734_v45 = vunpack.i.h.bf16 %v1732_v8  ;;  %v1733_v49 = vunpack.i.l.bf16 %v1732_v8 }
  0xe1   : > { %941 = vmatpush.bf16.msra.mxu3 %v883_v27  ;;  %v1063_v13 = vsel %vm663_vm4, %v1724_v18, %v1729_v1 }
  0xe2   : > { %v790_v29 = vsel %vm585_vm3, %v1738_v41, %v1733_v49  ;;  %v791_v2 = vsel %vm585_vm3, %v1739_v10, %v1734_v45  ;;  %v788_v4 = vsel %vm585_vm3, %v1733_v49, %v1738_v41  ;;  %v789_v38 = vsel %vm585_vm3, %v1734_v45, %v1739_v10  ;;  %v1527_v45 = vld [vmem:[%s2648_s3 + $0x4] sm:$0xf0] }
  0xe3   : > { %v876_v3 = vpack.c.bf16 %v791_v2, %v790_v29  ;;  %v877_v33 = vpack.c.bf16 %v789_v38, %v788_v4  ;;  %v1064_v10 = vsel %vm663_vm4, %v1728_v19, %v1723_v11  ;;  %v1065_v41 = vsel %vm663_vm4, %v1729_v1, %v1724_v18  ;;  %v1787_v49 = vpop.permute.xlu2 %1786 }
  0xe4   : > { %v1093_v29 = vpack.c.bf16 %v1065_v41, %v1064_v10  ;;  %v1479_v2 = vor.u32 %v1527_v45, %v1478_v34  ;;  %v1788_v9 = vunpack.i.l.bf16 %v1787_v49  ;;  %v1773_v18 = vunpack.i.l.bf16 %v2479_v14 }
  0xe5   : > { %942 = vmatpush.bf16.msra.mxu3 %v881_v42  ;;  %916 = vmatpush.bf16.msrb.mxu1 %v876_v3  ;;  %v1092_v42 = vpack.c.bf16 %v1063_v13, %v1062_v31 }
  0xe7   : > { %v1752_v52 = vpop.permute.xlu1 %1751  ;;  %v1747_v15 = vpop.permute.xlu0 %1746 }
  0xe8   : > { %v1749_v55 = vunpack.i.h.bf16 %v1747_v15  ;;  %v1748_v21 = vunpack.i.l.bf16 %v1747_v15  ;;  %917 = vmatmul.bf16.vlgmr.msrb.gmra.mxu1 %v1497_v51  ;;  %v1754_v48 = vunpack.i.h.bf16 %v1752_v52  ;;  %v1753_v8 = vunpack.i.l.bf16 %v1752_v52 }
  0xe9   : > { %943 = vmatpush.bf16.msra.mxu3 %v879_v40 }
  0xea   : > { %v614_v6 = vsel %vm611_vm11, %v1748_v21, %v1743_v0  ;;  %v615_v16 = vsel %vm611_vm11, %v1749_v55, %v1744_v30  ;;  %v612_v54 = vsel %vm611_vm11, %v1743_v0, %v1748_v21  ;;  %v613_v17 = vsel %vm611_vm11, %v1744_v30, %v1749_v55 }
  0xeb   : > { %v685_v12 = vpack.c.bf16 %v615_v16, %v614_v6  ;;  %v686_v39 = vpack.c.bf16 %v613_v17, %v612_v54  ;;  %v1050_v26 = vsel %vm650_vm6, %v1753_v8, %v1758_v37  ;;  %v1051_v35 = vsel %vm650_vm6, %v1754_v48, %v1759_v25  ;;  %v1802_v0 = vpop.permute.xlu2 %1801 }
  0xec   : > { %v1052_v3 = vsel %vm650_vm6, %v1758_v37, %v1753_v8  ;;  %v1053_v56 = vsel %vm650_vm6, %v1759_v25, %v1754_v48  ;;  %v1090_v4 = vpack.c.bf16 %v1051_v35, %v1050_v26  ;;  %v2673_v16 = vunpack.c.l.bf16 %v2060_v24 }
  0xed   : > { %944 = vmatpush.bf16.msra.mxu3 %v877_v33  ;;  %719 = vmatpush.bf16.msra.mxu0 %v685_v12  ;;  %v1091_v38 = vpack.c.bf16 %v1053_v56, %v1052_v3  ;;  %v1774_v17 = vunpack.i.h.bf16 %v2479_v14  ;;  %v1804_v41 = vunpack.i.h.bf16 %v1802_v0 }
  0xee   : > { %747 = vmatpush.bf16.msra.mxu2 %v686_v39  ;;  %v1515_v54 = vpack.c.bf16 %v2673_v16, %v971_v28  ;;  %v2675_v39 = vunpack.c.h.bf16 %v2060_v24 }
  0xef   : > { %v1767_v27 = vpop.permute.xlu1 %1766  ;;  %v1762_v7 = vpop.permute.xlu0 %1761 }
  0xf0   : > { %945 = vmatmul.bf16.vlgmr.msra.gmra.mxu3 %v1497_v51  ;;  %v1769_v50 = vunpack.i.h.bf16 %v1767_v27  ;;  %v1764_v57 = vunpack.i.h.bf16 %v1762_v7  ;;  %v1763_v53 = vunpack.i.l.bf16 %v1762_v7 }
  0xf1   : > { %958 = vmatpush.bf16.msrb.mxu3 %v893_v36  ;;  %720 = vmatpush.bf16.msra.mxu0 %v683_v43  ;;  %v1768_v43 = vunpack.i.l.bf16 %v1767_v27 }
  0xf2   : > { %748 = vmatpush.bf16.msra.mxu2 %v684_v44  ;;  %v1789_v44 = vunpack.i.h.bf16 %v1787_v49  ;;  %v1039_v59 = vsel %vm637_vm7, %v1764_v57, %v1769_v50  ;;  %v1041_v61 = vsel %vm637_vm7, %v1769_v50, %v1764_v57  ;;  %v1803_v49 = vunpack.i.l.bf16 %v1802_v0 }
  0xf3   : > { %v1038_v58 = vsel %vm637_vm7, %v1763_v53, %v1768_v43  ;;  %v1817_v8 = vpop.permute.xlu2 %1816 }
  0xf4   : > { %v1088_v36 = vpack.c.bf16 %v1039_v59, %v1038_v58  ;;  %v1818_v26 = vunpack.i.l.bf16 %v1817_v8 }
  0xf5   : > { %721 = vmatpush.bf16.msra.mxu0 %v681_v60  ;;  %v1040_v60 = vsel %vm637_vm7, %v1768_v43, %v1763_v53 }
  0xf6   : > { %749 = vmatpush.bf16.msra.mxu2 %v682_v63  ;;  %v1510_v63 = vld [vmem:[%s2648_s3 + $0x28] sm:$0xf0]  ;;  %v1089_v6 = vpack.c.bf16 %v1041_v61, %v1040_v60  ;;  %v1508_v60 = vld [vmem:[%s2648_s3 + $0x20] sm:$0xf]  ;;  %v1531_v61 = vld [vmem:[%s2648_s3 + $0x24] sm:$0xf0] }
  0xf7   : > { %v1782_v47 = vpop.permute.xlu1 %1781  ;;  %v1777_v22 = vpop.permute.xlu0 %1776  ;;  %v2551_v1 = vor.u32 %v1530_v62, %v1510_v63  ;;  %v1509_v63 = vor.u32 %v1531_v61, %v1508_v60 }
  0xf8   : > { %v1784_v40 = vunpack.i.h.bf16 %v1782_v47  ;;  %v1783_v5 = vunpack.i.l.bf16 %v1782_v47  ;;  %722 = vmatmul.bf16.vlgmr.msra.gmra.mxu0 %v1479_v2  ;;  %v1779_v19 = vunpack.i.h.bf16 %v1777_v22  ;;  %v1778_v33 = vunpack.i.l.bf16 %v1777_v22 }
  0xf9   : > { %1139 = vmatpush.bf16.msrb.mxu0 %v1093_v29  ;;  %750 = vmatmul.bf16.vlgmr.msra.gmra.mxu2 %v1479_v2  ;;  %v1819_v2 = vunpack.i.h.bf16 %v1817_v8 }
  0xfa   : > { %1111 = vmatpush.bf16.msrb.mxu2 %v1092_v42  ;;  %v1075_v51 = vsel %vm676_vm5, %v1784_v40, %v1789_v44  ;;  %v1077_v52 = vsel %vm676_vm5, %v1789_v44, %v1784_v40  ;;  %v1074_v15 = vsel %vm676_vm5, %v1783_v5, %v1788_v9  ;;  %v1076_v30 = vsel %vm676_vm5, %v1788_v9, %v1783_v5 }
  0xfb   : > { %v1094_v55 = vpack.c.bf16 %v1075_v51, %v1074_v15  ;;  %v1095_v21 = vpack.c.bf16 %v1077_v52, %v1076_v30  ;;  %v1028_v14 = vsel %vm624_vm9, %v1778_v33, %v1773_v18  ;;  %v1029_v32 = vsel %vm624_vm9, %v1779_v19, %v1774_v17 }
  0xfc   : > { %v1027_v24 = vsel %vm624_vm9, %v1774_v17, %v1779_v19  ;;  %v1084_v31 = vpack.c.bf16 %v1029_v32, %v1028_v14  ;;  %v550_v17 = vld [vmem:[%s524_s18] sm:$0xff]  ;;  %v545_v14 = vld [vmem:[%s515_s15 + $0x8] sm:$0xff] }
  0xfd   : > { %1140 = vmatpush.bf16.msrb.mxu0 %v1091_v38  ;;  %1132 = vmatpush.bf16.msra.mxu1 %v1094_v55  ;;  %v551_v32 = vld [vmem:[%s524_s18 + $0x8] sm:$0xff] }
  0xfe   : > { %1112 = vmatpush.bf16.msrb.mxu2 %v1090_v4  ;;  %v554_v8 = vunpack.c.l.bf16 %v551_v32 }
  0xff   : > { %v1792_v11 = vpop.permute.xlu0 %1791  ;;  %v1797_v12 = vpop.permute.xlu1 %1796 }
 0x100   : > { %1503 = vmatmul.msk.bf16.vlgmr.msrb.gmra.mxu3 %vm710_vm8, %v2359_v20  ;;  %v2674_v20 = vunpack.c.h.bf16 %v2058_v23  ;;  %v1794_v37 = vunpack.i.h.bf16 %v1792_v11  ;;  %v1793_v27 = vunpack.i.l.bf16 %v1792_v11  ;;  %v1799_v28 = vunpack.i.h.bf16 %v1797_v12  ;;  %1517 = vmatmul.msk.bf16.vlgmr.msra.gmra.mxu1 %vm710_vm8, %v2551_v1 }
 0x101   : > { %1141 = vmatpush.bf16.msrb.mxu0 %v1089_v6  ;;  %1160 = vmatpush.bf16.msrb.mxu1 %v1095_v21  ;;  %v1798_v7 = vunpack.i.l.bf16 %v1797_v12  ;;  %v1026_v23 = vsel %vm624_vm9, %v1773_v18, %v1778_v33  ;;  %v553_v11 = vunpack.c.h.bf16 %v550_v17 }
 0x102   : > { %1113 = vmatpush.bf16.msrb.mxu2 %v1088_v36  ;;  %v1519_v25 = vpack.c.bf16 %v2675_v39, %v2674_v20  ;;  %v1017_v48 = vsel %vm611_vm11, %v1799_v28, %v1794_v37  ;;  %v1085_v10 = vpack.c.bf16 %v1027_v24, %v1026_v23  ;;  %v1015_v45 = vsel %vm611_vm11, %v1794_v37, %v1799_v28 }
 0x103   : > { %v1016_v13 = vsel %vm611_vm11, %v1798_v7, %v1793_v27  ;;  %v1014_v34 = vsel %vm611_vm11, %v1793_v27, %v1798_v7  ;;  %v552_v39 = vunpack.c.l.bf16 %v550_v17 }
 0x104   : > { %v1082_v29 = vpack.c.bf16 %v1017_v48, %v1016_v13  ;;  %v1083_v57 = vpack.c.bf16 %v1015_v45, %v1014_v34  ;;  %v548_v48 = vunpack.c.l.bf16 %v545_v14  ;;  %v1171_v45 = vld [vmem:[%s2649_s4] sm:$0x3] }
 0x105   : > { %1520 = vmatpush.bf16.msk.msrb.mxu0 %vm1514_vm12, %v1519_v25 }
 0x106   : > { %1516 = vmatpush.bf16.msk.msrb.mxu2 %vm1514_vm12, %v1515_v54  ;;  %v544_v54 = vld [vmem:[%s515_s15] sm:$0xff]  ;;  %s542_s15 = scalar_lea.vmem %s2653_s8, %s1475_s12 }
 0x107   : > { %v1807_v42 = vpop.permute.xlu0 %1806  ;;  %v1812_v35 = vpop.permute.xlu1 %1811  ;;  %v547_v18 = vunpack.c.h.bf16 %v544_v54  ;;  %v546_v20 = vunpack.c.l.bf16 %v544_v54 }
 0x108   : > { %v1809_v3 = vunpack.i.h.bf16 %v1807_v42  ;;  %v1808_v56 = vunpack.i.l.bf16 %v1807_v42  ;;  %v1814_v50 = vunpack.i.h.bf16 %v1812_v35  ;;  %v1813_v43 = vunpack.i.l.bf16 %v1812_v35 }
 0x109   : > { %1143 = vmatpush.bf16.msrb.mxu0 %v1085_v10  ;;  %v557_v37 = vadd.f32 %v553_v11, %v547_v18  ;;  %v556_v28 = vadd.f32 %v552_v39, %v546_v20  ;;  %v549_v10 = vunpack.c.h.bf16 %v545_v14 }
 0x10a   : > { %1115 = vmatpush.bf16.msrb.mxu2 %v1084_v31  ;;  %v1004_v53 = vsel %vm598_vm2, %v1808_v56, %v1803_v49  ;;  %v1005_v44 = vsel %vm598_vm2, %v1809_v3, %v1804_v41  ;;  %v1002_v9 = vsel %vm598_vm2, %v1803_v49, %v1808_v56  ;;  %v1003_v47 = vsel %vm598_vm2, %v1804_v41, %v1809_v3 }
 0x10b   : > { %v1080_v22 = vpack.c.bf16 %v1005_v44, %v1004_v53  ;;  %v1081_v40 = vpack.c.bf16 %v1003_v47, %v1002_v9  ;;  %v992_v5 = vsel %vm585_vm3, %v1818_v26, %v1813_v43  ;;  %v993_v4 = vsel %vm585_vm3, %v1819_v2, %v1814_v50 }
 0x10c   : > { %v990_v38 = vsel %vm585_vm3, %v1813_v43, %v1818_v26  ;;  %v991_v58 = vsel %vm585_vm3, %v1814_v50, %v1819_v2  ;;  %v1078_v59 = vpack.c.bf16 %v993_v4, %v992_v5  ;;  %v555_v41 = vunpack.c.h.bf16 %v551_v32 }
 0x10d   : > { %1144 = vmatpush.bf16.msrb.mxu0 %v1083_v57  ;;  %v1079_v62 = vpack.c.bf16 %v991_v58, %v990_v38  ;;  %v1174_v3 = vperm.slane %v1171_v45, 1  ;;  %v558_v43 = vadd.f32 %v554_v8, %v548_v48 }
 0x10e   : > { %1116 = vmatpush.bf16.msrb.mxu2 %v1082_v29  ;;  %v559_v56 = vadd.f32 %v555_v41, %v549_v10 }
 0x110   : > { %1521 = vmatmul.msk.bf16.vlgmr.msrb.gmra.mxu1 %vm710_vm8, %v2551_v1 }
 0x111   : > { %1145 = vmatpush.bf16.msrb.mxu0 %v1081_v40 }
 0x112   : > { %1117 = vmatpush.bf16.msrb.mxu2 %v1080_v22  ;;  %v1173_v22 = vperm.slane %v1171_v45, 0 }
 0x115   : > { %1146 = vmatpush.bf16.msrb.mxu0 %v1079_v62 }
 0x116   : > { %1118 = vmatpush.bf16.msrb.mxu2 %v1078_v59 }
 0x118   : > { %1147 = vmatmul.bf16.vlgmr.msrb.gmra.mxu0 %v1509_v63 }
 0x119   : > { %1119 = vmatmul.bf16.vlgmr.msrb.gmra.mxu2 %v1509_v63 }
 0x125   : > { %v737_v51 = vpop.f32.mrf.mxu1 }
 0x12b   : > { %v765_v46 = vpop.f32.mrf.mxu3 }
 0x12d   : > { %v739_v15 = vpop.f32.mrf.mxu1 }
 0x133   : > { %v767_v52 = vpop.f32.mrf.mxu3 }
 0x153   : > { %v932_v30 = vpop.f32.mrf.mxu3 }
 0x15b   : > { %v934_v55 = vpop.f32.mrf.mxu3 }
 0x165   : > { %v918_v0 = vpop.f32.mrf.mxu1 }
 0x166   : > { %v933_v49 = vadd.f32 %v932_v30, %v918_v0 }
 0x16d   : > { %v920_v21 = vpop.f32.mrf.mxu1 }
 0x16e   : > { %v935_v63 = vadd.f32 %v934_v55, %v920_v21 }
 0x173   : > { %v946_v36 = vpop.f32.mrf.mxu3 }
 0x175   : > { %v723_v33 = vpop.f32.mrf.mxu0 }
 0x176   : > { %v738_v7 = vadd.f32 %v737_v51, %v723_v33 }
 0x178   : > { %v770_v42 = vadd.f32 %v738_v7, %v556_v28 }
 0x17a   : > { %v965_v57 = vadd.f32 %v933_v49, %v770_v42 }
 0x17b   : > { %v948_v6 = vpop.f32.mrf.mxu3 }
 0x17c   : > { %v751_v1 = vpop.f32.mrf.mxu2 }
 0x17d   : > { %v1134_v19 = vpop.f32.mrf.mxu1  ;;  %v725_v12 = vpop.f32.mrf.mxu0  ;;  %v766_v27 = vadd.f32 %v765_v46, %v751_v1 }
 0x17e   : > { %v740_v44 = vadd.f32 %v739_v15, %v725_v12 }
 0x17f   : > { %v771_v13 = vadd.f32 %v766_v27, %v557_v37 }
 0x180   : > { %v772_v60 = vadd.f32 %v740_v44, %v558_v43 }
 0x183   : > { %v960_v25 = vpop.f32.mrf.mxu3 }
 0x184   : > { %v961_v23 = vadd.f32 %v960_v25, %v946_v36  ;;  %v753_v24 = vpop.f32.mrf.mxu2  ;;  %v967_v36 = vadd.f32 %v935_v63, %v772_v60 }
 0x185   : > { %v1136_v16 = vpop.f32.mrf.mxu1  ;;  %v768_v50 = vadd.f32 %v767_v52, %v753_v24 }
 0x186   : > { %v966_v29 = vadd.f32 %v961_v23, %v771_v13 }
 0x187   : > { %v773_v5 = vadd.f32 %v768_v50, %v559_v56 }
 0x18b   : > { %v962_v26 = vpop.f32.mrf.mxu3 }
 0x18c   : > { %v963_v9 = vadd.f32 %v962_v26, %v948_v6 }
 0x18d   : > { %v1162_v31 = vpop.f32.mrf.mxu1 }
 0x18e   : > { %v968_v61 = vadd.f32 %v963_v9, %v773_v5 }
 0x195   : > { %v1148_v34 = vpop.f32.mrf.mxu0  ;;  %v1164_v58 = vpop.f32.mrf.mxu1 }
 0x196   : > { %v1163_v2 = vadd.f32 %v1162_v31, %v1148_v34 }
 0x198   : > { %v1168_v35 = vadd.f32 %v1163_v2, %v966_v29 }
 0x19a   : > { %v1178_v40 = vmul.f32 %v1174_v3, %v1168_v35 }
 0x19c   : > { %v1120_v53 = vpop.f32.mrf.mxu2  ;;  %v1192_v46 = vmul.f32 %v1178_v40, %v1178_v40 }
 0x19d   : > { %v1135_v47 = vadd.f32 %v1134_v19, %v1120_v53  ;;  %v1150_v38 = vpop.f32.mrf.mxu0 }
 0x19e   : > { %v1165_v59 = vadd.f32 %v1164_v58, %v1150_v38 }
 0x19f   : > { %v1167_v4 = vadd.f32 %v1135_v47, %v965_v57 }
 0x1a0   : > { %v1170_v52 = vadd.f32 %v1165_v59, %v968_v61 }
 0x1a1   : > { %v1177_v62 = vmul.f32 %v1173_v22, %v1167_v4 }
 0x1a2   : > { %v1180_v6 = vmul.f32 %v1174_v3, %v1170_v52 }
 0x1a3   : > { %v1181_v51 = vpack.c.bf16 %v1178_v40, %v1177_v62  ;;  %v1185_v15 = vadd.f32 %v1178_v40, %v1177_v62  ;;  %v1191_v30 = vmul.f32 %v1177_v62, %v1177_v62 }
 0x1a4   : > { %v1122_v0 = vpop.f32.mrf.mxu2  ;;  %v1194_v18 = vmul.f32 %v1180_v6, %v1180_v6 }
 0x1a5   : > { %1183 = vst [vmem:[%s533_s24] sm:$0xff] %v1181_v51  ;;  %v1137_v19 = vadd.f32 %v1136_v16, %v1122_v0  ;;  %1186 = vadd.xlane.f32.xlu0 %v1185_v15  ;;  %v1195_v33 = vadd.f32 %v1192_v46, %v1191_v30 }
 0x1a7   : > { %v1169_v1 = vadd.f32 %v1137_v19, %v967_v36  ;;  %1196 = vadd.xlane.f32.xlu2 %v1195_v33 }
 0x1a9   : > { %v1179_v55 = vmul.f32 %v1173_v22, %v1169_v1 }
 0x1ab   : > { %v1182_v21 = vpack.c.bf16 %v1180_v6, %v1179_v55  ;;  %v1188_v54 = vadd.f32 %v1180_v6, %v1179_v55  ;;  %v1193_v17 = vmul.f32 %v1179_v55, %v1179_v55 }
 0x1ad   : > { %1184 = vst [vmem:[%s533_s24 + $0x8] sm:$0xff] %v1182_v21  ;;  %1189 = vadd.xlane.f32.xlu1 %v1188_v54  ;;  %v1198_v11 = vadd.f32 %v1194_v18, %v1193_v17 }
 0x1af   : > { %1199 = vadd.xlane.f32.xlu2 %v1198_v11 }
 0x218   : > { %v1187_v16 = vpop.xlane.xlu0 %1186 }
 0x21a   : > { %v1197_v12 = vpop.xlane.xlu2 %1196 }
 0x21b   : > { %v1202_v20 = vsel %vm1201_vm13, %v1187_v16, %v1197_v12 }
 0x21c   : > { %1205 = vst.msk [vmem:[%s542_s15] sm:$0xff] %vm1204_vm14, %v1202_v20 }
 0x220   : > { %v1190_v39 = vpop.xlane.xlu1 %1189 }
 0x222   : > { %v1200_v25 = vpop.xlane.xlu2 %1199 }
 0x223   : > { %v1203_v37 = vsel %vm1201_vm13, %v1190_v39, %v1200_v25 }
 0x224   : > { %1206 = vst.msk [vmem:[%s542_s15 + $0x8] sm:$0xff] %vm1204_vm14, %v1203_v37 }
 0x225 PF: > { %s19_s9 = sadd.s32 1, %s1858_s9   ;;  %s2676_s27 = smov %s1850_s29 }
 0x226   : > { %p16_p11 = scmp.ge.s32.totalorder %s19_s9, 10   ;;  %s2677_s28 = smov %s1854_s30 }
 0x227   : > { %s2678_s29 = smov %s2681_s10  ;;  %s2679_s30 = smov %s2685_s11 }
 0x228   :  { %18 = sbr.rel (!%p16_p11) target bundleno = 3 (0x3), region = 104 }

// kernel: iconvmod_forward.29
= control target key start
LH: loop header
LB: loop body
LE: loop exit
PB: predicated region body
PF: predicated region fallthrough
CT: control target
= control target key end

     0   :  { %s1483_s21 = smov 0   ;;  %s1485_s22 = smov 0   ;;  %s1667_s0 = inlined_call_operand.vmem [shape: bf16[2,4,16,256], index: 0, kind: input, shape index: {}]   ;;  %s1668_s1 = inlined_call_operand.vmem [shape: bf16[2,4,16,256], index: 1, kind: input, shape index: {}]   ;;  %s1669_s2 = inlined_call_operand.vmem [shape: bf16[2,4,16,256], index: 2, kind: input, shape index: {}]   ;;  %s1670_s3 = inlined_call_operand.vmem [shape: bf16[2,4,16,256], index: 3, kind: input, shape index: {}]   ;;  %s1671_s4 = inlined_call_operand.vmem [shape: f32[1,16,1], index: 4, kind: input, shape index: {}]   ;;  %s1672_s5 = inlined_call_operand.vmem [shape: f32[1,16,1], index: 5, kind: input, shape index: {}]   ;;  %s1673_s6 = inlined_call_operand.vmem [shape: f32[1,16,1], index: 6, kind: input, shape index: {}]   ;;  %s1674_s7 = inlined_call_operand.vmem [shape: f32[1,16,1], index: 7, kind: input, shape index: {}]   ;;  %s1675_s8 = inlined_call_operand.vmem [shape: f32[1,16,1], index: 8, kind: input, shape index: {}]   ;;  %s1676_s9 = inlined_call_operand.vmem [shape: f32[1,16,1], index: 9, kind: input, shape index: {}]   ;;  %s1677_s10 = inlined_call_operand.vmem [shape: f32[1,16,1], index: 10, kind: input, shape index: {}]   ;;  %s1678_s11 = inlined_call_operand.vmem [shape: f32[1,16,1], index: 11, kind: input, shape index: {}]   ;;  %s1679_s12 = inlined_call_operand.vmem [shape: f32[1,256], index: 12, kind: input, shape index: {}]   ;;  %s1680_s13 = inlined_call_operand.vmem [shape: f32[2,4,16,256], index: 13, kind: output, shape index: {0}]   ;;  %s1681_s14 = inlined_call_operand.vmem [shape: f32[2,4,16,256], index: 14, kind: output, shape index: {1}]   ;;  %s1682_s15 = inlined_call_operand.vmem [shape: f32[2,4,16,256], index: 15, kind: output, shape index: {2}]   ;;  %s1683_s16 = inlined_call_operand.vmem [shape: f32[2,4,16,256], index: 16, kind: output, shape index: {3}]  }
   0x1   :  { %1684 = sst [smem:[#allocation4_spill]] %s1667_s0  ;;  %s1487_s23 = smov 0  }
   0x2   :  { %s1489_s24 = smov 0   ;;  %s1491_s25 = smov 0  }
   0x3 LB: > { %s36_s26 = sadd.s32 1, %s1387_s23  ;;  %s39_s27 = sadd.s32 1, %s1391_s24  ;;  %s1395_s25 = sphi %s1491_s25, %s27_s25   ;;  %s1391_s24 = sphi %s1489_s24, %s1693_s24   ;;  %s1387_s23 = sphi %s1487_s23, %s1692_s23   ;;  %s1383_s22 = sphi %s1485_s22, %s1691_s22   ;;  %s1379_s21 = sphi %s1483_s21, %s1690_s21  }
   0x4   : > { %p37_p0 = scmp.ge.s32.totalorder %s36_s26, 4  ;;  %p1286_p1 = scmp.ge.s32.totalorder %s1395_s25, 1 }
   0x5   : > { %p543_p2 = scmp.lt.s32.totalorder %s1395_s25, 9 }
   0x6   : > { %s1695_s26 = smov (%p37_p0, %s36_s26), 0  ;;  %s1697_s27 = smov (!%p37_p0, %s39_s27), %s1391_s24 }
   0x7   : > { %1685 = sst [smem:[#allocation2_spill]] %s1695_s26  ;;  %p544_p3 = pnand %p1286_p1, %p543_p2 }
   0x8   : > { %p41_p4 = scmp.ge.s32.totalorder %s1697_s27, 2  ;;  %p655_p5 = scmp.lt.s32.totalorder (!%p544_p3), %s1383_s22, 1 }
   0x9   : > { %547 = sbr.rel (%p544_p3) target bundleno = 181 (0xb5), region = 72  ;;  %p657_p6 = scmp.lt.s32.totalorder (!%p544_p3), %s1379_s21, 3 }
   0xa   : > { %s1699_s27 = smov (%p41_p4, %s1697_s27), 0  ;;  %s1687_s28 = sld [smem:[#allocation4_spill]] (!%p544_p3) }
   0xb   : > { %1686 = sst [smem:[#allocation3_spill]] %s1699_s27 }
   0xe   : > { %v797_v0 = vld [vmem:[%s1673_s6] sm:$0xff]  ;;  %v1397_v3 = vmov 0   ;;  %v798_v4 = vld [vmem:[%s1673_s6 + $0x8] sm:$0xff]  ;;  %s1701_s22 = smov (!%p655_p5, %s1383_s22), 1  ;;  %s1703_s21 = smov (!%p657_p6, %s1379_s21), 3 }
   0xf   : > { %v736_v1 = vld [vmem:[%s1672_s5] sm:$0xff]  ;;  %1356 = vset.pattern.permute.xlu2 %v1397_v3  ;;  %1355 = vset.pattern.permute.xlu1 %v1397_v3  ;;  %v737_v5 = vld [vmem:[%s1672_s5 + $0x8] sm:$0xff]  ;;  %s1287_s26 = sshll.u32 %s1703_s21, 2  ;;  %s1288_s27 = sshll.u32 %s1701_s22, 4 }
  0x10   : > { %v734_v2 = vld [vmem:[%s1671_s4] sm:$0xff]  ;;  %1354 = vset.pattern.permute.xlu0 %v1397_v3  ;;  %803 = vperm.xlu2 %1356, %v797_v0   ;;  %v735_v6 = vld [vmem:[%s1671_s4 + $0x8] sm:$0xff]  ;;  %s661_s17 = sadd.s32 %s1288_s27, %s1287_s26 }
  0x11   : > { %754 = vperm.xlu1 %1355, %v736_v1   ;;  %740 = vperm.xlu0 %1354, %v734_v2   ;;  %v855_v7 = vld [vmem:[%s1675_s8] sm:$0xff]  ;;  %v800_v8 = vld [vmem:[%s1674_s7 + $0x8] sm:$0xff]  ;;  %s1569_s18 = sshll.u32 %s661_s17, 2  ;;  %s1582_s27 = sshll.u32 %s661_s17, 3 }
  0x12   : > { %v799_v9 = vld [vmem:[%s1674_s7] sm:$0xff]  ;;  %v914_v10 = vld [vmem:[%s1677_s10 + $0x8] sm:$0xff]  ;;  %s663_s29 = scalar_lea.vmem %s1687_s28, %s1569_s18  ;;  %s672_s26 = scalar_lea.vmem %s1668_s1, %s1569_s18 }
  0x13   : > { %v913_v11 = vld [vmem:[%s1677_s10] sm:$0xff]  ;;  %v856_v12 = vld [vmem:[%s1675_s8 + $0x8] sm:$0xff]  ;;  %s1594_s28 = scalar_lea.vmem %s1680_s13, %s1582_s27  ;;  %s1608_s30 = scalar_lea.vmem %s1670_s3, %s1569_s18 }
  0x14   : > { %v915_v13 = vld [vmem:[%s1678_s11] sm:$0xff]  ;;  %v858_v14 = vld [vmem:[%s1676_s9 + $0x8] sm:$0xff]  ;;  %s681_s22 = scalar_lea.vmem %s1669_s2, %s1569_s18  ;;  %s708_s20 = scalar_lea.vmem %s1681_s14, %s1582_s27 }
  0x15   : > { %v857_v15 = vld [vmem:[%s1676_s9] sm:$0xff]  ;;  %v916_v16 = vld [vmem:[%s1678_s11 + $0x8] sm:$0xff]  ;;  %s1632_s17 = scalar_lea.vmem %s1683_s16, %s1582_s27  ;;  %s717_s0 = scalar_lea.vmem %s1682_s15, %s1582_s27 }
  0x16   : > { %v728_v18 = vld [vmem:[%s663_s29] sm:$0xff]  ;;  %v729_v27 = vld [vmem:[%s663_s29 + $0x8] sm:$0xff] }
  0x17   : > { %v730_v20 = vunpack.c.l.bf16 %v728_v18  ;;  %v731_v21 = vunpack.c.h.bf16 %v728_v18  ;;  %v727_v24 = vld [vmem:[%s1679_s12] sm:$0x3]  ;;  %v732_v32 = vunpack.c.l.bf16 %v729_v27  ;;  %v733_v33 = vunpack.c.h.bf16 %v729_v27  ;;  %v792_v40 = vld [vmem:[%s672_s26 + $0x8] sm:$0xff] }
  0x18   : > { %808 = vperm.xlu2 %1356, %v798_v4   ;;  %v1584_v30 = vperm.slane %v727_v24, 0  ;;  %v1586_v31 = vperm.slane %v727_v24, 1  ;;  %v791_v37 = vld [vmem:[%s672_s26] sm:$0xff]  ;;  %v795_v49 = vunpack.c.l.bf16 %v792_v40  ;;  %v796_v50 = vunpack.c.h.bf16 %v792_v40  ;;  %v850_v24 = vld [vmem:[%s681_s22 + $0x8] sm:$0xff] }
  0x19   : > { %759 = vperm.xlu1 %1355, %v737_v5   ;;  %745 = vperm.xlu0 %1354, %v735_v6   ;;  %v793_v47 = vunpack.c.l.bf16 %v791_v37  ;;  %v794_v48 = vunpack.c.h.bf16 %v791_v37  ;;  %v907_v6 = vld [vmem:[%s1608_s30] sm:$0xff] }
  0x20   : > { %861 = vperm.xlu2 %1356, %v855_v7  }
  0x21   : > { %822 = vperm.xlu1 %1355, %v800_v8   ;;  %817 = vperm.xlu0 %1354, %v799_v9  }
  0x28   : > { %924 = vperm.xlu2 %1356, %v914_v10  }
  0x29   : > { %919 = vperm.xlu1 %1355, %v913_v11   ;;  %866 = vperm.xlu0 %1354, %v856_v12   ;;  %v909_v12 = vunpack.c.l.bf16 %v907_v6 }
  0x30   : > { %933 = vperm.xlu2 %1356, %v915_v13   ;;  %v910_v13 = vunpack.c.h.bf16 %v907_v6 }
  0x31   : > { %880 = vperm.xlu1 %1355, %v858_v14   ;;  %875 = vperm.xlu0 %1354, %v857_v15  }
  0x39   : > { %938 = vperm.xlu0 %1354, %v916_v16  }
  0x6a   : > { %v804_v17 = vpop.permute.xlu2 %803 }
  0x6b   : > { %v811_v55 = vmul.f32 %v804_v17, %v793_v47  ;;  %v812_v56 = vmul.f32 %v804_v17, %v794_v48  ;;  %v849_v17 = vld [vmem:[%s681_s22] sm:$0xff] }
  0x6c   : > { %v851_v27 = vunpack.c.l.bf16 %v849_v17 }
  0x72   : > { %v809_v19 = vpop.permute.xlu2 %808 }
  0x73   : > { %v813_v57 = vmul.f32 %v809_v19, %v795_v49  ;;  %v814_v58 = vmul.f32 %v809_v19, %v796_v50 }
  0x7a   : > { %v1588_v34 = vpop.permute.xlu2 %861 }
  0x82   : > { %v1600_v59 = vpop.permute.xlu2 %924 }
  0x83   : > { %v755_v22 = vpop.permute.xlu1 %754  ;;  %v741_v23 = vpop.permute.xlu0 %740 }
  0x84   : > { %v748_v25 = vmul.f32 %v741_v23, %v730_v20  ;;  %v749_v26 = vmul.f32 %v741_v23, %v731_v21 }
  0x86   : > { %v762_v28 = vadd.f32 %v755_v22, %v748_v25  ;;  %v763_v29 = vadd.f32 %v755_v22, %v749_v26 }
  0x88   : > { %vm766_vm0 = vcmp.ge.f32.partialorder %v762_v28, 0.0  ;;  %vm767_vm1 = vcmp.ge.f32.partialorder %v763_v29, 0.0  ;;  %v770_v35 = vmul.f32 0.01, %v762_v28  ;;  %v771_v36 = vmul.f32 0.01, %v763_v29 }
  0x8a   : > { %v774_v38 = vsel %vm766_vm0, %v762_v28, %v770_v35  ;;  %v775_v39 = vsel %vm767_vm1, %v763_v29, %v771_v36  ;;  %v852_v28 = vunpack.c.h.bf16 %v849_v17  ;;  %v934_v29 = vpop.permute.xlu2 %933  ;;  %v853_v35 = vunpack.c.l.bf16 %v850_v24 }
  0x8b   : > { %v783_v41 = vmul.f32 %v1584_v30, %v774_v38  ;;  %v784_v42 = vmul.f32 %v1586_v31, %v775_v39  ;;  %v760_v43 = vpop.permute.xlu1 %759  ;;  %v746_v44 = vpop.permute.xlu0 %745  ;;  %v854_v36 = vunpack.c.h.bf16 %v850_v24  ;;  %v869_v39 = vmul.f32 %v1588_v34, %v851_v27 }
  0x8c   : > { %v750_v45 = vmul.f32 %v746_v44, %v732_v32  ;;  %v751_v46 = vmul.f32 %v746_v44, %v733_v33  ;;  %v870_v40 = vmul.f32 %v1588_v34, %v852_v28 }
  0x8d   : > { %787 = vst [vmem:[%s1594_s28] sm:$0xff] %v783_v41  ;;  %v908_v41 = vld [vmem:[%s1608_s30 + $0x8] sm:$0xff] }
  0x8e   : > { %788 = vst [vmem:[%s1594_s28 + $0x8] sm:$0xff] %v784_v42  ;;  %v764_v51 = vadd.f32 %v760_v43, %v750_v45  ;;  %v765_v52 = vadd.f32 %v760_v43, %v751_v46 }
  0x90   : > { %vm768_vm2 = vcmp.ge.f32.partialorder %v764_v51, 0.0  ;;  %vm769_vm3 = vcmp.ge.f32.partialorder %v765_v52, 0.0  ;;  %v772_v53 = vmul.f32 0.01, %v764_v51  ;;  %v773_v54 = vmul.f32 0.01, %v765_v52 }
  0x92   : > { %v776_v60 = vsel %vm768_vm2, %v764_v51, %v772_v53  ;;  %v777_v61 = vsel %vm769_vm3, %v765_v52, %v773_v54  ;;  %v911_v53 = vunpack.c.l.bf16 %v908_v41  ;;  %v912_v54 = vunpack.c.h.bf16 %v908_v41 }
  0x93   : > { %v785_v62 = vmul.f32 %v1584_v30, %v776_v60  ;;  %v786_v63 = vmul.f32 %v1586_v31, %v777_v61  ;;  %v823_v0 = vpop.permute.xlu1 %822  ;;  %v818_v1 = vpop.permute.xlu0 %817 }
  0x94   : > { %v827_v2 = vadd.f32 %v823_v0, %v813_v57  ;;  %v828_v3 = vadd.f32 %v823_v0, %v814_v58  ;;  %v825_v4 = vadd.f32 %v818_v1, %v811_v55  ;;  %v826_v5 = vadd.f32 %v818_v1, %v812_v56 }
  0x95   : > { %789 = vst [vmem:[%s1594_s28 + $0x10] sm:$0xff] %v785_v62  ;;  %v929_v61 = vmul.f32 %v1600_v59, %v911_v53  ;;  %v930_v1 = vmul.f32 %v1600_v59, %v912_v54 }
  0x96   : > { %790 = vst [vmem:[%s1594_s28 + $0x18] sm:$0xff] %v786_v63  ;;  %vm831_vm4 = vcmp.ge.f32.partialorder %v827_v2, 0.0  ;;  %vm832_vm5 = vcmp.ge.f32.partialorder %v828_v3, 0.0  ;;  %v835_v7 = vmul.f32 0.01, %v827_v2  ;;  %vm829_vm6 = vcmp.ge.f32.partialorder %v825_v4, 0.0 }
  0x97   : > { %v836_v8 = vmul.f32 0.01, %v828_v3  ;;  %vm830_vm7 = vcmp.ge.f32.partialorder %v826_v5, 0.0  ;;  %v833_v9 = vmul.f32 0.01, %v825_v4 }
  0x98   : > { %v839_v10 = vsel %vm831_vm4, %v827_v2, %v835_v7  ;;  %v834_v11 = vmul.f32 0.01, %v826_v5 }
  0x99   : > { %v840_v14 = vsel %vm832_vm5, %v828_v3, %v836_v8  ;;  %v843_v15 = vmul.f32 %v839_v10, %v1584_v30  ;;  %v837_v16 = vsel %vm829_vm6, %v825_v4, %v833_v9 }
  0x9a   : > { %v844_v18 = vmul.f32 %v840_v14, %v1586_v31  ;;  %v838_v19 = vsel %vm830_vm7, %v826_v5, %v834_v11  ;;  %v841_v20 = vmul.f32 %v837_v16, %v1584_v30 }
  0x9b   : > { %847 = vst [vmem:[%s708_s20 + $0x10] sm:$0xff] %v843_v15  ;;  %v842_v21 = vmul.f32 %v838_v19, %v1586_v31  ;;  %v920_v22 = vpop.permute.xlu1 %919  ;;  %v867_v23 = vpop.permute.xlu0 %866 }
  0x9c   : > { %848 = vst [vmem:[%s708_s20 + $0x18] sm:$0xff] %v844_v18  ;;  %v927_v25 = vmul.f32 %v920_v22, %v909_v12  ;;  %v928_v26 = vmul.f32 %v920_v22, %v910_v13  ;;  %v871_v44 = vmul.f32 %v867_v23, %v853_v35  ;;  %v872_v45 = vmul.f32 %v867_v23, %v854_v36 }
  0x9d   : > { %845 = vst [vmem:[%s708_s20] sm:$0xff] %v841_v20 }
  0x9e   : > { %846 = vst [vmem:[%s708_s20 + $0x8] sm:$0xff] %v842_v21  ;;  %v941_v32 = vadd.f32 %v934_v29, %v927_v25  ;;  %v942_v33 = vadd.f32 %v934_v29, %v928_v26 }
  0xa0   : > { %vm945_vm8 = vcmp.ge.f32.partialorder %v941_v32, 0.0  ;;  %vm946_vm9 = vcmp.ge.f32.partialorder %v942_v33, 0.0  ;;  %v949_v37 = vmul.f32 0.01, %v941_v32  ;;  %v950_v38 = vmul.f32 0.01, %v942_v33 }
  0xa2   : > { %v953_v42 = vsel %vm945_vm8, %v941_v32, %v949_v37  ;;  %v954_v43 = vsel %vm946_vm9, %v942_v33, %v950_v38 }
  0xa3   : > { %v957_v46 = vmul.f32 %v953_v42, %v1584_v30  ;;  %v958_v47 = vmul.f32 %v954_v43, %v1586_v31  ;;  %v881_v48 = vpop.permute.xlu1 %880  ;;  %v876_v49 = vpop.permute.xlu0 %875 }
  0xa4   : > { %v885_v34 = vadd.f32 %v881_v48, %v871_v44  ;;  %v886_v50 = vadd.f32 %v881_v48, %v872_v45  ;;  %v883_v51 = vadd.f32 %v876_v49, %v869_v39  ;;  %v884_v52 = vadd.f32 %v876_v49, %v870_v40 }
  0xa5   : > { %961 = vst [vmem:[%s1632_s17] sm:$0xff] %v957_v46 }
  0xa6   : > { %962 = vst [vmem:[%s1632_s17 + $0x8] sm:$0xff] %v958_v47  ;;  %vm889_vm10 = vcmp.ge.f32.partialorder %v885_v34, 0.0  ;;  %vm890_vm11 = vcmp.ge.f32.partialorder %v886_v50, 0.0  ;;  %v893_v55 = vmul.f32 0.01, %v885_v34  ;;  %vm887_vm12 = vcmp.ge.f32.partialorder %v883_v51, 0.0 }
  0xa7   : > { %v894_v56 = vmul.f32 0.01, %v886_v50  ;;  %vm888_vm13 = vcmp.ge.f32.partialorder %v884_v52, 0.0  ;;  %v891_v57 = vmul.f32 0.01, %v883_v51 }
  0xa8   : > { %v897_v58 = vsel %vm889_vm10, %v885_v34, %v893_v55  ;;  %v892_v60 = vmul.f32 0.01, %v884_v52 }
  0xa9   : > { %v898_v62 = vsel %vm890_vm11, %v886_v50, %v894_v56  ;;  %v901_v63 = vmul.f32 %v897_v58, %v1584_v30  ;;  %v895_v0 = vsel %vm887_vm12, %v883_v51, %v891_v57 }
  0xaa   : > { %v902_v2 = vmul.f32 %v898_v62, %v1586_v31  ;;  %v896_v3 = vsel %vm888_vm13, %v884_v52, %v892_v60  ;;  %v899_v4 = vmul.f32 %v895_v0, %v1584_v30 }
  0xab   : > { %905 = vst [vmem:[%s717_s0 + $0x10] sm:$0xff] %v901_v63  ;;  %v900_v5 = vmul.f32 %v896_v3, %v1586_v31  ;;  %v939_v6 = vpop.permute.xlu0 %938 }
  0xac   : > { %906 = vst [vmem:[%s717_s0 + $0x18] sm:$0xff] %v902_v2  ;;  %v943_v7 = vadd.f32 %v939_v6, %v929_v61  ;;  %v944_v8 = vadd.f32 %v939_v6, %v930_v1 }
  0xad   : > { %903 = vst [vmem:[%s717_s0] sm:$0xff] %v899_v4 }
  0xae   : > { %904 = vst [vmem:[%s717_s0 + $0x8] sm:$0xff] %v900_v5  ;;  %vm947_vm14 = vcmp.ge.f32.partialorder %v943_v7, 0.0  ;;  %vm948_vm15 = vcmp.ge.f32.partialorder %v944_v8, 0.0  ;;  %v951_v9 = vmul.f32 0.01, %v943_v7 }
  0xaf   : > { %v952_v59 = vmul.f32 0.01, %v944_v8 }
  0xb0   : > { %v955_v10 = vsel %vm947_vm14, %v943_v7, %v951_v9 }
  0xb1   : > { %v956_v11 = vsel %vm948_vm15, %v944_v8, %v952_v59  ;;  %v959_v12 = vmul.f32 %v955_v10, %v1584_v30 }
  0xb2   : > { %v960_v13 = vmul.f32 %v956_v11, %v1586_v31 }
  0xb3   : > { %963 = vst [vmem:[%s1632_s17 + $0x10] sm:$0xff] %v959_v12 }
  0xb4   : > { %964 = vst [vmem:[%s1632_s17 + $0x18] sm:$0xff] %v960_v13 }
  0xb5 PF: > { %s27_s25 = sadd.s32 1, %s1395_s25   ;;  %s1688_s27 = sld [smem:[#allocation2_spill]] }
  0xb6   : > { %p24_p7 = scmp.ge.s32.totalorder %s27_s25, 10   ;;  %s1689_s26 = sld [smem:[#allocation3_spill]] }
  0xb7   : > { %s1690_s21 = smov %s1387_s23  ;;  %s1691_s22 = smov %s1391_s24 }
  0xb8   :  { %26 = sbr.rel (!%p24_p7) target bundleno = 3 (0x3), region = 147 }
  0xbb   : > { %s1692_s23 = smov %s1688_s27 }
  0xbc   : > { %s1693_s24 = smov %s1689_s26 }

</bundles_post_ra>
